<compile_context>
chip_gen: v6e
topology: v6e:2x2x1
jax: 0.10.0
libtpu: 0.0.40
codegen_flags: <defaults>
</compile_context>

<pallas_src>
import functools

import jax
import jax.numpy as jnp
from jax.experimental import pallas as pl
from jax.experimental.pallas import tpu as pltpu


# ----------------------------- in-kernel helpers -----------------------------
def _sigmoid(x):
    return 1.0 / (1.0 + jnp.exp(-x))


def _silu(x):
    return x * _sigmoid(x)


_VMEM = pl.BlockSpec(memory_space=pltpu.MemorySpace.VMEM)

# fixed flattening order of the per-layer (stacked) E_GCL weights
_LAYER_KEYS = ("ew1_src", "ew1_dst", "ew1_rad", "eb1", "ew2", "eb2", "wa", "ba",
               "cw1", "cb1", "cw2", "nw1_h", "nw1_agg", "nb1", "nw2", "nb2")
_BLOCK_NAMES = ("egnn_1", "egnn_2", "egnn_4")


# --------------------------- fully fused forward kernel -----------------------
def _fused_forward_kernel(*refs, n_layers, n_blocks):
    f32 = jnp.float32
    idx = 0

    def take(n):
        nonlocal idx
        r = refs[idx:idx + n]
        idx += n
        return r

    (x_ref, c_ref, grow_ref, gcol_ref, ssum_ref, smean_ref, pool_ref) = take(7)
    (ew1s_ref, ew1d_ref, ew1r_ref, eb1_ref, ew2_ref, eb2_ref, wa_ref, ba_ref,
     cw1_ref, cb1_ref, cw2_ref, nw1h_ref, nw1a_ref, nb1_ref, nw2_ref,
     nb2_ref) = take(16)
    emb = [take(4) for _ in range(n_blocks)]        # (wi, bi, wo, bo) per block
    (s1_ref, t1_ref, s2_ref, t2_ref, s4_ref, t4_ref,
     wfc1_ref, wfc2_ref, wfc4_ref, bfc_ref, wfin_ref, bfin_ref) = take(12)
    (out_ref,) = take(1)

    # graph structure (shared by every layer of every block)
    g_row = grow_ref[...]          # [E, N] gather matrix for index row
    g_col = gcol_ref[...]          # [E, N] gather matrix for index col
    g_diff = g_row - g_col         # [E, N] -> coord_diff in one matmul
    s_sum = ssum_ref[...]          # [N, E] segment-sum (by row)
    s_mean = smean_ref[...]        # [N, E] segment-mean (pre-scaled by 1/count)

    def egnn_block(block_idx, h, coord, wi_ref, bi_ref, wo_ref, bo_ref):
        # embedding_in
        h = jnp.dot(h, wi_ref[...], preferred_element_type=f32) + bi_ref[...]
        for l in range(n_layers):                     # static unroll over E_GCL
            li = block_idx * n_layers + l
            # coord2radial (normalize=False)
            coord_diff = jnp.dot(g_diff, coord, preferred_element_type=f32)  # [E,3]
            radial = jnp.sum(coord_diff * coord_diff, axis=1, keepdims=True)

            # gather node features for source / target
            h_row = jnp.dot(g_row, h, preferred_element_type=f32)            # [E,H]
            h_col = jnp.dot(g_col, h, preferred_element_type=f32)            # [E,H]

            # edge MLP (concat-free split first layer) + attention gate
            m = (jnp.dot(h_row, ew1s_ref[li], preferred_element_type=f32)
                 + jnp.dot(h_col, ew1d_ref[li], preferred_element_type=f32)
                 + radial * ew1r_ref[li]
                 + eb1_ref[li])
            m = _silu(m)
            m = _silu(jnp.dot(m, ew2_ref[li], preferred_element_type=f32)
                      + eb2_ref[li])
            att = _sigmoid(jnp.sum(m * wa_ref[li], axis=1, keepdims=True)
                           + ba_ref[li])
            edge_feat = m * att                                               # [E,H]

            # coord MLP (tanh=True), coords_agg='mean'
            t = _silu(jnp.dot(edge_feat, cw1_ref[li], preferred_element_type=f32)
                      + cb1_ref[li])
            scal = jnp.tanh(jnp.sum(t * cw2_ref[li], axis=1, keepdims=True))
            coord = coord + jnp.dot(s_mean, coord_diff * scal,
                                    preferred_element_type=f32)

            # node MLP (concat-free split) with residual
            agg = jnp.dot(s_sum, edge_feat, preferred_element_type=f32)       # [N,H]
            t = _silu(jnp.dot(h, nw1h_ref[li], preferred_element_type=f32)
                      + jnp.dot(agg, nw1a_ref[li], preferred_element_type=f32)
                      + nb1_ref[li])
            h = h + jnp.dot(t, nw2_ref[li], preferred_element_type=f32) + nb2_ref[li]
        # embedding_out
        h_out = jnp.dot(h, wo_ref[...], preferred_element_type=f32) + bo_ref[...]
        return h_out, coord

    h = x_ref[...]
    coord = c_ref[...]
    o1, coord = egnn_block(0, h, coord, *emb[0])
    o2, coord = egnn_block(1, o1, coord, *emb[1])
    o4, _ = egnn_block(2, o2, coord, *emb[2])

    # head: mean-pool per graph + folded BatchNorm + ReLU (bnrelu1/2/3)
    pool = pool_ref[...]
    g1 = jnp.maximum(jnp.dot(pool, o1, preferred_element_type=f32)
                     * s1_ref[...] + t1_ref[...], 0.0)
    g2 = jnp.maximum(jnp.dot(pool, o2, preferred_element_type=f32)
                     * s2_ref[...] + t2_ref[...], 0.0)
    g4 = jnp.maximum(jnp.dot(pool, o4, preferred_element_type=f32)
                     * s4_ref[...] + t4_ref[...], 0.0)
    # fc1 (BN + num_layers pass-duplication folded into the split weights)
    x = (jnp.dot(g1, wfc1_ref[...], preferred_element_type=f32)
         + jnp.dot(g2, wfc2_ref[...], preferred_element_type=f32)
         + jnp.dot(g4, wfc4_ref[...], preferred_element_type=f32)
         + bfc_ref[...])
    # final linear (no bnorm, no relu); self.sig is unused in the reference.
    out_ref[...] = (jnp.dot(x, wfin_ref[...], preferred_element_type=f32)
                    + bfin_ref[...])


def model_forward(fused, head, x_feat, coords, g_row, g_col, s_sum, s_mean,
                  pool_mat, *, n_layers, n_graphs, out_dim):
    stacked, emb = fused
    inputs = [x_feat.astype(jnp.float32), coords.astype(jnp.float32),
              g_row, g_col, s_sum, s_mean, pool_mat]
    inputs += [stacked[k] for k in _LAYER_KEYS]
    inputs += emb
    inputs += [head["s1"], head["t1"], head["s2"], head["t2"],
               head["s4"], head["t4"],
               head["wfc1"], head["wfc2"], head["wfc4"], head["b_fc"],
               head["w_final"], head["b_final"]]
    return pl.pallas_call(
        functools.partial(_fused_forward_kernel, n_layers=n_layers,
                          n_blocks=len(_BLOCK_NAMES)),
        in_specs=[_VMEM] * len(inputs),
        out_specs=_VMEM,
        out_shape=jax.ShapeDtypeStruct((n_graphs, out_dim), jnp.float32),
    )(*inputs)


# ----------------------------- parameter init --------------------------------
def _dense(key, din, dout, scale=0.1, bias=True):
    kw, kb = jax.random.split(key)
    w = jax.random.normal(kw, (din, dout), jnp.float32) * scale
    if bias:
        b = jax.random.normal(kb, (dout,), jnp.float32) * scale
    else:
        b = jnp.zeros((dout,), jnp.float32)
    return w, b


def _init_gcl(key, hidden):
    ks = jax.random.split(key, 16)
    s = 0.1

    def nrm(k, shape, scale=s):
        return jax.random.normal(k, shape, jnp.float32) * scale

    return dict(
        # edge_mlp: Linear(2H+1, H) split into src/dst/radial pieces
        ew1_src=nrm(ks[0], (hidden, hidden)),
        ew1_dst=nrm(ks[1], (hidden, hidden)),
        ew1_rad=nrm(ks[2], (1, hidden)),
        eb1=nrm(ks[3], (1, hidden)),
        ew2=nrm(ks[4], (hidden, hidden)),
        eb2=nrm(ks[5], (1, hidden)),
        # attention: Linear(H, 1) stored as a (1, H) row -> VPU/XLU reduction
        wa=nrm(ks[6], (1, hidden)),
        ba=nrm(ks[7], (1, 1)),
        # coord_mlp: Linear(H, H) -> SiLU -> Linear(H, 1, no bias, gain=1e-3) -> Tanh
        cw1=nrm(ks[8], (hidden, hidden)),
        cb1=nrm(ks[9], (1, hidden)),
        cw2=nrm(ks[10], (1, hidden), scale=0.001),
        # node_mlp: Linear(2H, H) split into h/agg pieces -> SiLU -> Linear(H, H)
        nw1_h=nrm(ks[11], (hidden, hidden)),
        nw1_agg=nrm(ks[12], (hidden, hidden)),
        nb1=nrm(ks[13], (1, hidden)),
        nw2=nrm(ks[14], (hidden, hidden)),
        nb2=nrm(ks[15], (1, hidden)),
    )


def _init_egnn(key, in_nf, hidden, out_nf, n_layers):
    ks = jax.random.split(key, n_layers + 2)
    wi, bi = _dense(ks[0], in_nf, hidden)
    wo, bo = _dense(ks[1], hidden, out_nf)
    layers = [_init_gcl(ks[2 + i], hidden) for i in range(n_layers)]
    stacked = {k: jnp.stack([lp[k] for lp in layers]) for k in _LAYER_KEYS}
    return dict(emb_in_w=wi, emb_in_b=bi.reshape(1, -1),
                emb_out_w=wo, emb_out_b=bo.reshape(1, -1),
                layers=stacked)


def _init_bn(c):
    return dict(gamma=jnp.ones((c,), jnp.float32), beta=jnp.zeros((c,), jnp.float32),
                mean=jnp.zeros((c,), jnp.float32), var=jnp.ones((c,), jnp.float32))


def init_model_params(key, in_feat, hidden, out_dim, egnn_layers, num_layers):
    ks = jax.random.split(key, 5)
    c1, c2, c4 = out_dim, out_dim // 2, out_dim // 4
    d_fc = out_dim + 50
    fc1_in = (c1 + c2 + c4) * num_layers
    return dict(
        egnn_1=_init_egnn(ks[0], in_feat, hidden, c1, egnn_layers),
        egnn_2=_init_egnn(ks[1], c1, hidden, c2, egnn_layers),
        egnn_4=_init_egnn(ks[2], c2, hidden, c4, egnn_layers),
        fc1=_dense(ks[3], fc1_in, d_fc),
        fc1_bn=_init_bn(d_fc),
        final=_dense(ks[4], d_fc, out_dim),
        bnrelu1=_init_bn(c1), bnrelu2=_init_bn(c2), bnrelu3=_init_bn(c4),
    )


def _fold_bn(bn, eps=1e-5):
    scale = bn["gamma"] / jnp.sqrt(bn["var"] + eps)
    shift = bn["beta"] - bn["mean"] * scale
    return scale.reshape(1, -1), shift.reshape(1, -1)


def prepare_head_params(params, num_layers, c1, c2, c4):
    """Fold eval-mode BatchNorms and the num_layers pass duplication into the
    head weights (done once on the host, outside the kernel)."""
    s1, t1 = _fold_bn(params["bnrelu1"])
    s2, t2 = _fold_bn(params["bnrelu2"])
    s4, t4 = _fold_bn(params["bnrelu3"])

    wfc, bfc = params["fc1"]
    ctot = c1 + c2 + c4
    # The reference calls forward_once() num_layers times; in eval mode the
    # passes are identical, so x @ W_fc1 == g @ (sum of per-pass row blocks).
    w_eff = wfc[0:ctot]
    for p in range(1, num_layers):
        w_eff = w_eff + wfc[p * ctot:(p + 1) * ctot]
    sfc, tfc = _fold_bn(params["fc1_bn"])          # fc1: Linear -> BatchNorm
    w_eff = w_eff * sfc
    b_eff = bfc.reshape(1, -1) * sfc + tfc

    w_final, b_final = params["final"]
    return dict(s1=s1, t1=t1, s2=s2, t2=t2, s4=s4, t4=t4,
                wfc1=w_eff[:c1], wfc2=w_eff[c1:c1 + c2], wfc4=w_eff[c1 + c2:],
                b_fc=b_eff, w_final=w_final, b_final=b_final.reshape(1, -1))


def prepare_fused_params(params):
    """Stack the 16 per-E_GCL-layer weight tensors across the three EGNN blocks
    (same hidden width) and collect the per-block embedding linears."""
    stacked = {k: jnp.concatenate([params[b]["layers"][k] for b in _BLOCK_NAMES],
                                  axis=0)
               for k in _LAYER_KEYS}
    emb = []
    for b in _BLOCK_NAMES:
        p = params[b]
        emb.extend([p["emb_in_w"], p["emb_in_b"], p["emb_out_w"], p["emb_out_b"]])
    return stacked, emb


# -------------------------------- graph glue -----------------------------------
def build_graph_mats(row, col, batch, n_nodes, n_graphs):
    g_row = jax.nn.one_hot(row, n_nodes, dtype=jnp.float32)          # [E, N]
    g_col = jax.nn.one_hot(col, n_nodes, dtype=jnp.float32)          # [E, N]
    s_sum = g_row.T                                                  # [N, E]
    cnt = jnp.maximum(jnp.sum(s_sum, axis=1, keepdims=True), 1.0)
    s_mean = s_sum / cnt                                             # [N, E]
    pool = jax.nn.one_hot(batch, n_graphs, dtype=jnp.float32).T      # [B, N]
    pool = pool / jnp.maximum(jnp.sum(pool, axis=1, keepdims=True), 1.0)
    return g_row, g_col, s_sum, s_mean, pool


# ----------------------------------- main --------------------------------------
if __name__ == "__main__":
    IN_FEAT = 16        # input_features_size
    HIDDEN = 32         # hidden_channels
    OUT_DIM = 16        # out_dim
    EGNN_LAYERS = 2     # num_egnn_layers
    NUM_LAYERS = 2      # num_layers
    N_NODES = 24
    N_EDGES = 48
    N_GRAPHS = 2

    key = jax.random.PRNGKey(0)
    k_x, k_c, k_r, k_cl, k_p = jax.random.split(key, 5)

    x_feat = jax.random.normal(k_x, (N_NODES, IN_FEAT), jnp.float32)
    coords = jax.random.normal(k_c, (N_NODES, 3), jnp.float32)
    row = jax.random.randint(k_r, (N_EDGES,), 0, N_NODES)
    col = jax.random.randint(k_cl, (N_EDGES,), 0, N_NODES)
    batch = jnp.repeat(jnp.arange(N_GRAPHS), N_NODES // N_GRAPHS)

    params = init_model_params(k_p, IN_FEAT, HIDDEN, OUT_DIM, EGNN_LAYERS, NUM_LAYERS)
    head = prepare_head_params(params, NUM_LAYERS, OUT_DIM, OUT_DIM // 2, OUT_DIM // 4)
    fused = prepare_fused_params(params)
    g_row, g_col, s_sum, s_mean, pool_mat = build_graph_mats(
        row, col, batch, N_NODES, N_GRAPHS)

    fwd = jax.jit(functools.partial(model_forward, n_layers=EGNN_LAYERS,
                                    n_graphs=N_GRAPHS, out_dim=OUT_DIM))
    out = fwd(fused, head, x_feat, coords, g_row, g_col, s_sum, s_mean, pool_mat)
    out = jax.block_until_ready(out)

    assert out.shape == (N_GRAPHS, OUT_DIM), out.shape
    assert out.dtype == jnp.float32
    assert bool(jnp.all(jnp.isfinite(out)))
    print("KERNEL_OK")
</pallas_src>

<mosaic_0001>
module attributes {stable_mosaic.version = 11 : i64} {
  func.func @_fused_forward_kernel(%arg0: memref<24x16xf32, #tpu.memory_space<vmem>>, %arg1: memref<24x3xf32, #tpu.memory_space<vmem>>, %arg2: memref<48x24xf32, #tpu.memory_space<vmem>>, %arg3: memref<48x24xf32, #tpu.memory_space<vmem>>, %arg4: memref<24x48xf32, #tpu.memory_space<vmem>>, %arg5: memref<24x48xf32, #tpu.memory_space<vmem>>, %arg6: memref<2x24xf32, #tpu.memory_space<vmem>>, %arg7: memref<6x32x32xf32, #tpu.memory_space<vmem>>, %arg8: memref<6x32x32xf32, #tpu.memory_space<vmem>>, %arg9: memref<6x1x32xf32, #tpu.memory_space<vmem>>, %arg10: memref<6x1x32xf32, #tpu.memory_space<vmem>>, %arg11: memref<6x32x32xf32, #tpu.memory_space<vmem>>, %arg12: memref<6x1x32xf32, #tpu.memory_space<vmem>>, %arg13: memref<6x1x32xf32, #tpu.memory_space<vmem>>, %arg14: memref<6x1x1xf32, #tpu.memory_space<vmem>>, %arg15: memref<6x32x32xf32, #tpu.memory_space<vmem>>, %arg16: memref<6x1x32xf32, #tpu.memory_space<vmem>>, %arg17: memref<6x1x32xf32, #tpu.memory_space<vmem>>, %arg18: memref<6x32x32xf32, #tpu.memory_space<vmem>>, %arg19: memref<6x32x32xf32, #tpu.memory_space<vmem>>, %arg20: memref<6x1x32xf32, #tpu.memory_space<vmem>>, %arg21: memref<6x32x32xf32, #tpu.memory_space<vmem>>, %arg22: memref<6x1x32xf32, #tpu.memory_space<vmem>>, %arg23: memref<16x32xf32, #tpu.memory_space<vmem>>, %arg24: memref<1x32xf32, #tpu.memory_space<vmem>>, %arg25: memref<32x16xf32, #tpu.memory_space<vmem>>, %arg26: memref<1x16xf32, #tpu.memory_space<vmem>>, %arg27: memref<16x32xf32, #tpu.memory_space<vmem>>, %arg28: memref<1x32xf32, #tpu.memory_space<vmem>>, %arg29: memref<32x8xf32, #tpu.memory_space<vmem>>, %arg30: memref<1x8xf32, #tpu.memory_space<vmem>>, %arg31: memref<8x32xf32, #tpu.memory_space<vmem>>, %arg32: memref<1x32xf32, #tpu.memory_space<vmem>>, %arg33: memref<32x4xf32, #tpu.memory_space<vmem>>, %arg34: memref<1x4xf32, #tpu.memory_space<vmem>>, %arg35: memref<1x16xf32, #tpu.memory_space<vmem>>, %arg36: memref<1x16xf32, #tpu.memory_space<vmem>>, %arg37: memref<1x8xf32, #tpu.memory_space<vmem>>, %arg38: memref<1x8xf32, #tpu.memory_space<vmem>>, %arg39: memref<1x4xf32, #tpu.memory_space<vmem>>, %arg40: memref<1x4xf32, #tpu.memory_space<vmem>>, %arg41: memref<16x66xf32, #tpu.memory_space<vmem>>, %arg42: memref<8x66xf32, #tpu.memory_space<vmem>>, %arg43: memref<4x66xf32, #tpu.memory_space<vmem>>, %arg44: memref<1x66xf32, #tpu.memory_space<vmem>>, %arg45: memref<66x16xf32, #tpu.memory_space<vmem>>, %arg46: memref<1x16xf32, #tpu.memory_space<vmem>>, %arg47: memref<2x16xf32, #tpu.memory_space<vmem>>) attributes {dimension_semantics = [], scalar_prefetch = 0 : i64, scratch_operands = 0 : i64, tpu.core_type = #tpu.core_type<tc>} {
    %c0 = arith.constant 0 : index
    %c0_0 = arith.constant 0 : index
    %0 = vector.load %arg2[%c0, %c0_0] : memref<48x24xf32, #tpu.memory_space<vmem>>, vector<48x24xf32>
    %c0_1 = arith.constant 0 : index
    %c0_2 = arith.constant 0 : index
    %1 = vector.load %arg3[%c0_1, %c0_2] : memref<48x24xf32, #tpu.memory_space<vmem>>, vector<48x24xf32>
    %2 = arith.subf %0, %1 : vector<48x24xf32>
    %c0_3 = arith.constant 0 : index
    %c0_4 = arith.constant 0 : index
    %3 = vector.load %arg4[%c0_3, %c0_4] : memref<24x48xf32, #tpu.memory_space<vmem>>, vector<24x48xf32>
    %c0_5 = arith.constant 0 : index
    %c0_6 = arith.constant 0 : index
    %4 = vector.load %arg5[%c0_5, %c0_6] : memref<24x48xf32, #tpu.memory_space<vmem>>, vector<24x48xf32>
    %c0_7 = arith.constant 0 : index
    %c0_8 = arith.constant 0 : index
    %5 = vector.load %arg0[%c0_7, %c0_8] : memref<24x16xf32, #tpu.memory_space<vmem>>, vector<24x16xf32>
    %c0_9 = arith.constant 0 : index
    %c0_10 = arith.constant 0 : index
    %6 = vector.load %arg1[%c0_9, %c0_10] : memref<24x3xf32, #tpu.memory_space<vmem>>, vector<24x3xf32>
    %c0_11 = arith.constant 0 : index
    %c0_12 = arith.constant 0 : index
    %7 = vector.load %arg23[%c0_11, %c0_12] : memref<16x32xf32, #tpu.memory_space<vmem>>, vector<16x32xf32>
    %cst = arith.constant dense<0.000000e+00> : vector<24x32xf32>
    %8 = tpu.matmul %5, %7, %cst {dimension_numbers = #tpu.dot_dimension_numbers<[1], [0], [0], [1], [0, 0, 1, 1], [], []>} : vector<24x16xf32>, vector<16x32xf32>, vector<24x32xf32> -> vector<24x32xf32>
    %c0_13 = arith.constant 0 : index
    %c0_14 = arith.constant 0 : index
    %9 = vector.load %arg24[%c0_13, %c0_14] : memref<1x32xf32, #tpu.memory_space<vmem>>, vector<1x32xf32>
    %10 = vector.broadcast %9 : vector<1x32xf32> to vector<24x32xf32>
    %11 = arith.addf %8, %10 : vector<24x32xf32>
    %cst_15 = arith.constant dense<0.000000e+00> : vector<48x3xf32>
    %12 = tpu.matmul %2, %6, %cst_15 {dimension_numbers = #tpu.dot_dimension_numbers<[1], [0], [0], [1], [0, 0, 1, 1], [], []>} : vector<48x24xf32>, vector<24x3xf32>, vector<48x3xf32> -> vector<48x3xf32>
    %13 = arith.mulf %12, %12 : vector<48x3xf32>
    %cst_16 = arith.constant dense<0.000000e+00> : vector<48xf32>
    %14 = vector.multi_reduction <add>, %13, %cst_16 [1] : vector<48x3xf32> to vector<48xf32>
    %15 = vector.shape_cast %14 : vector<48xf32> to vector<48x1xf32>
    %cst_17 = arith.constant dense<0.000000e+00> : vector<48x32xf32>
    %16 = tpu.matmul %0, %11, %cst_17 {dimension_numbers = #tpu.dot_dimension_numbers<[1], [0], [0], [1], [0, 0, 1, 1], [], []>} : vector<48x24xf32>, vector<24x32xf32>, vector<48x32xf32> -> vector<48x32xf32>
    %cst_18 = arith.constant dense<0.000000e+00> : vector<48x32xf32>
    %17 = tpu.matmul %1, %11, %cst_18 {dimension_numbers = #tpu.dot_dimension_numbers<[1], [0], [0], [1], [0, 0, 1, 1], [], []>} : vector<48x24xf32>, vector<24x32xf32>, vector<48x32xf32> -> vector<48x32xf32>
    %c0_19 = arith.constant 0 : index
    %c0_20 = arith.constant 0 : index
    %c0_21 = arith.constant 0 : index
    %18 = vector.load %arg7[%c0_19, %c0_20, %c0_21] : memref<6x32x32xf32, #tpu.memory_space<vmem>>, vector<1x32x32xf32>
    %19 = vector.shape_cast %18 : vector<1x32x32xf32> to vector<32x32xf32>
    %cst_22 = arith.constant dense<0.000000e+00> : vector<48x32xf32>
    %20 = tpu.matmul %16, %19, %cst_22 {dimension_numbers = #tpu.dot_dimension_numbers<[1], [0], [0], [1], [0, 0, 1, 1], [], []>} : vector<48x32xf32>, vector<32x32xf32>, vector<48x32xf32> -> vector<48x32xf32>
    %c0_23 = arith.constant 0 : index
    %c0_24 = arith.constant 0 : index
    %c0_25 = arith.constant 0 : index
    %21 = vector.load %arg8[%c0_23, %c0_24, %c0_25] : memref<6x32x32xf32, #tpu.memory_space<vmem>>, vector<1x32x32xf32>
    %22 = vector.shape_cast %21 : vector<1x32x32xf32> to vector<32x32xf32>
    %cst_26 = arith.constant dense<0.000000e+00> : vector<48x32xf32>
    %23 = tpu.matmul %17, %22, %cst_26 {dimension_numbers = #tpu.dot_dimension_numbers<[1], [0], [0], [1], [0, 0, 1, 1], [], []>} : vector<48x32xf32>, vector<32x32xf32>, vector<48x32xf32> -> vector<48x32xf32>
    %24 = arith.addf %20, %23 : vector<48x32xf32>
    %c0_27 = arith.constant 0 : index
    %c0_28 = arith.constant 0 : index
    %c0_29 = arith.constant 0 : index
    %25 = vector.load %arg9[%c0_27, %c0_28, %c0_29] : memref<6x1x32xf32, #tpu.memory_space<vmem>>, vector<1x1x32xf32>
    %26 = vector.shape_cast %25 : vector<1x1x32xf32> to vector<1x32xf32>
    %27 = vector.broadcast %15 : vector<48x1xf32> to vector<48x32xf32>
    %28 = vector.broadcast %26 : vector<1x32xf32> to vector<48x32xf32>
    %29 = arith.mulf %27, %28 : vector<48x32xf32>
    %30 = arith.addf %24, %29 : vector<48x32xf32>
    %c0_30 = arith.constant 0 : index
    %c0_31 = arith.constant 0 : index
    %c0_32 = arith.constant 0 : index
    %31 = vector.load %arg10[%c0_30, %c0_31, %c0_32] : memref<6x1x32xf32, #tpu.memory_space<vmem>>, vector<1x1x32xf32>
    %32 = vector.shape_cast %31 : vector<1x1x32xf32> to vector<1x32xf32>
    %33 = vector.broadcast %32 : vector<1x32xf32> to vector<48x32xf32>
    %34 = arith.addf %30, %33 : vector<48x32xf32>
    %cst_33 = arith.constant 0.000000e+00 : f32
    %35 = vector.broadcast %cst_33 : f32 to vector<48x32xf32>
    %36 = arith.subf %35, %34 : vector<48x32xf32>
    %37 = math.exp %36 : vector<48x32xf32>
    %cst_34 = arith.constant 1.000000e+00 : f32
    %38 = vector.broadcast %cst_34 : f32 to vector<48x32xf32>
    %39 = arith.addf %38, %37 : vector<48x32xf32>
    %cst_35 = arith.constant 1.000000e+00 : f32
    %40 = vector.broadcast %cst_35 : f32 to vector<48x32xf32>
    %41 = arith.divf %40, %39 : vector<48x32xf32>
    %42 = arith.mulf %34, %41 : vector<48x32xf32>
    %c0_36 = arith.constant 0 : index
    %c0_37 = arith.constant 0 : index
    %c0_38 = arith.constant 0 : index
    %43 = vector.load %arg11[%c0_36, %c0_37, %c0_38] : memref<6x32x32xf32, #tpu.memory_space<vmem>>, vector<1x32x32xf32>
    %44 = vector.shape_cast %43 : vector<1x32x32xf32> to vector<32x32xf32>
    %cst_39 = arith.constant dense<0.000000e+00> : vector<48x32xf32>
    %45 = tpu.matmul %42, %44, %cst_39 {dimension_numbers = #tpu.dot_dimension_numbers<[1], [0], [0], [1], [0, 0, 1, 1], [], []>} : vector<48x32xf32>, vector<32x32xf32>, vector<48x32xf32> -> vector<48x32xf32>
    %c0_40 = arith.constant 0 : index
    %c0_41 = arith.constant 0 : index
    %c0_42 = arith.constant 0 : index
    %46 = vector.load %arg12[%c0_40, %c0_41, %c0_42] : memref<6x1x32xf32, #tpu.memory_space<vmem>>, vector<1x1x32xf32>
    %47 = vector.shape_cast %46 : vector<1x1x32xf32> to vector<1x32xf32>
    %48 = vector.broadcast %47 : vector<1x32xf32> to vector<48x32xf32>
    %49 = arith.addf %45, %48 : vector<48x32xf32>
    %cst_43 = arith.constant 0.000000e+00 : f32
    %50 = vector.broadcast %cst_43 : f32 to vector<48x32xf32>
    %51 = arith.subf %50, %49 : vector<48x32xf32>
    %52 = math.exp %51 : vector<48x32xf32>
    %cst_44 = arith.constant 1.000000e+00 : f32
    %53 = vector.broadcast %cst_44 : f32 to vector<48x32xf32>
    %54 = arith.addf %53, %52 : vector<48x32xf32>
    %cst_45 = arith.constant 1.000000e+00 : f32
    %55 = vector.broadcast %cst_45 : f32 to vector<48x32xf32>
    %56 = arith.divf %55, %54 : vector<48x32xf32>
    %57 = arith.mulf %49, %56 : vector<48x32xf32>
    %c0_46 = arith.constant 0 : index
    %c0_47 = arith.constant 0 : index
    %c0_48 = arith.constant 0 : index
    %58 = vector.load %arg13[%c0_46, %c0_47, %c0_48] : memref<6x1x32xf32, #tpu.memory_space<vmem>>, vector<1x1x32xf32>
    %59 = vector.shape_cast %58 : vector<1x1x32xf32> to vector<1x32xf32>
    %60 = vector.broadcast %59 : vector<1x32xf32> to vector<48x32xf32>
    %61 = arith.mulf %57, %60 : vector<48x32xf32>
    %cst_49 = arith.constant dense<0.000000e+00> : vector<48xf32>
    %62 = vector.multi_reduction <add>, %61, %cst_49 [1] : vector<48x32xf32> to vector<48xf32>
    %63 = vector.shape_cast %62 : vector<48xf32> to vector<48x1xf32>
    %c0_50 = arith.constant 0 : index
    %c0_51 = arith.constant 0 : index
    %c0_52 = arith.constant 0 : index
    %64 = vector.load %arg14[%c0_50, %c0_51, %c0_52] : memref<6x1x1xf32, #tpu.memory_space<vmem>>, vector<1x1x1xf32>
    %65 = vector.shape_cast %64 : vector<1x1x1xf32> to vector<1x1xf32>
    %66 = vector.broadcast %65 : vector<1x1xf32> to vector<48x1xf32>
    %67 = arith.addf %63, %66 : vector<48x1xf32>
    %cst_53 = arith.constant 0.000000e+00 : f32
    %68 = vector.broadcast %cst_53 : f32 to vector<48x1xf32>
    %69 = arith.subf %68, %67 : vector<48x1xf32>
    %70 = math.exp %69 : vector<48x1xf32>
    %cst_54 = arith.constant 1.000000e+00 : f32
    %71 = vector.broadcast %cst_54 : f32 to vector<48x1xf32>
    %72 = arith.addf %71, %70 : vector<48x1xf32>
    %cst_55 = arith.constant 1.000000e+00 : f32
    %73 = vector.broadcast %cst_55 : f32 to vector<48x1xf32>
    %74 = arith.divf %73, %72 : vector<48x1xf32>
    %75 = vector.broadcast %74 : vector<48x1xf32> to vector<48x32xf32>
    %76 = arith.mulf %57, %75 : vector<48x32xf32>
    %c0_56 = arith.constant 0 : index
    %c0_57 = arith.constant 0 : index
    %c0_58 = arith.constant 0 : index
    %77 = vector.load %arg15[%c0_56, %c0_57, %c0_58] : memref<6x32x32xf32, #tpu.memory_space<vmem>>, vector<1x32x32xf32>
    %78 = vector.shape_cast %77 : vector<1x32x32xf32> to vector<32x32xf32>
    %cst_59 = arith.constant dense<0.000000e+00> : vector<48x32xf32>
    %79 = tpu.matmul %76, %78, %cst_59 {dimension_numbers = #tpu.dot_dimension_numbers<[1], [0], [0], [1], [0, 0, 1, 1], [], []>} : vector<48x32xf32>, vector<32x32xf32>, vector<48x32xf32> -> vector<48x32xf32>
    %c0_60 = arith.constant 0 : index
    %c0_61 = arith.constant 0 : index
    %c0_62 = arith.constant 0 : index
    %80 = vector.load %arg16[%c0_60, %c0_61, %c0_62] : memref<6x1x32xf32, #tpu.memory_space<vmem>>, vector<1x1x32xf32>
    %81 = vector.shape_cast %80 : vector<1x1x32xf32> to vector<1x32xf32>
    %82 = vector.broadcast %81 : vector<1x32xf32> to vector<48x32xf32>
    %83 = arith.addf %79, %82 : vector<48x32xf32>
    %cst_63 = arith.constant 0.000000e+00 : f32
    %84 = vector.broadcast %cst_63 : f32 to vector<48x32xf32>
    %85 = arith.subf %84, %83 : vector<48x32xf32>
    %86 = math.exp %85 : vector<48x32xf32>
    %cst_64 = arith.constant 1.000000e+00 : f32
    %87 = vector.broadcast %cst_64 : f32 to vector<48x32xf32>
    %88 = arith.addf %87, %86 : vector<48x32xf32>
    %cst_65 = arith.constant 1.000000e+00 : f32
    %89 = vector.broadcast %cst_65 : f32 to vector<48x32xf32>
    %90 = arith.divf %89, %88 : vector<48x32xf32>
    %91 = arith.mulf %83, %90 : vector<48x32xf32>
    %c0_66 = arith.constant 0 : index
    %c0_67 = arith.constant 0 : index
    %c0_68 = arith.constant 0 : index
    %92 = vector.load %arg17[%c0_66, %c0_67, %c0_68] : memref<6x1x32xf32, #tpu.memory_space<vmem>>, vector<1x1x32xf32>
    %93 = vector.shape_cast %92 : vector<1x1x32xf32> to vector<1x32xf32>
    %94 = vector.broadcast %93 : vector<1x32xf32> to vector<48x32xf32>
    %95 = arith.mulf %91, %94 : vector<48x32xf32>
    %cst_69 = arith.constant dense<0.000000e+00> : vector<48xf32>
    %96 = vector.multi_reduction <add>, %95, %cst_69 [1] : vector<48x32xf32> to vector<48xf32>
    %97 = vector.shape_cast %96 : vector<48xf32> to vector<48x1xf32>
    %98 = math.tanh %97 : vector<48x1xf32>
    %99 = vector.broadcast %98 : vector<48x1xf32> to vector<48x3xf32>
    %100 = arith.mulf %12, %99 : vector<48x3xf32>
    %cst_70 = arith.constant dense<0.000000e+00> : vector<24x3xf32>
    %101 = tpu.matmul %4, %100, %cst_70 {dimension_numbers = #tpu.dot_dimension_numbers<[1], [0], [0], [1], [0, 0, 1, 1], [], []>} : vector<24x48xf32>, vector<48x3xf32>, vector<24x3xf32> -> vector<24x3xf32>
    %102 = arith.addf %6, %101 : vector<24x3xf32>
    %cst_71 = arith.constant dense<0.000000e+00> : vector<24x32xf32>
    %103 = tpu.matmul %3, %76, %cst_71 {dimension_numbers = #tpu.dot_dimension_numbers<[1], [0], [0], [1], [0, 0, 1, 1], [], []>} : vector<24x48xf32>, vector<48x32xf32>, vector<24x32xf32> -> vector<24x32xf32>
    %c0_72 = arith.constant 0 : index
    %c0_73 = arith.constant 0 : index
    %c0_74 = arith.constant 0 : index
    %104 = vector.load %arg18[%c0_72, %c0_73, %c0_74] : memref<6x32x32xf32, #tpu.memory_space<vmem>>, vector<1x32x32xf32>
    %105 = vector.shape_cast %104 : vector<1x32x32xf32> to vector<32x32xf32>
    %cst_75 = arith.constant dense<0.000000e+00> : vector<24x32xf32>
    %106 = tpu.matmul %11, %105, %cst_75 {dimension_numbers = #tpu.dot_dimension_numbers<[1], [0], [0], [1], [0, 0, 1, 1], [], []>} : vector<24x32xf32>, vector<32x32xf32>, vector<24x32xf32> -> vector<24x32xf32>
    %c0_76 = arith.constant 0 : index
    %c0_77 = arith.constant 0 : index
    %c0_78 = arith.constant 0 : index
    %107 = vector.load %arg19[%c0_76, %c0_77, %c0_78] : memref<6x32x32xf32, #tpu.memory_space<vmem>>, vector<1x32x32xf32>
    %108 = vector.shape_cast %107 : vector<1x32x32xf32> to vector<32x32xf32>
    %cst_79 = arith.constant dense<0.000000e+00> : vector<24x32xf32>
    %109 = tpu.matmul %103, %108, %cst_79 {dimension_numbers = #tpu.dot_dimension_numbers<[1], [0], [0], [1], [0, 0, 1, 1], [], []>} : vector<24x32xf32>, vector<32x32xf32>, vector<24x32xf32> -> vector<24x32xf32>
    %110 = arith.addf %106, %109 : vector<24x32xf32>
    %c0_80 = arith.constant 0 : index
    %c0_81 = arith.constant 0 : index
    %c0_82 = arith.constant 0 : index
    %111 = vector.load %arg20[%c0_80, %c0_81, %c0_82] : memref<6x1x32xf32, #tpu.memory_space<vmem>>, vector<1x1x32xf32>
    %112 = vector.shape_cast %111 : vector<1x1x32xf32> to vector<1x32xf32>
    %113 = vector.broadcast %112 : vector<1x32xf32> to vector<24x32xf32>
    %114 = arith.addf %110, %113 : vector<24x32xf32>
    %cst_83 = arith.constant 0.000000e+00 : f32
    %115 = vector.broadcast %cst_83 : f32 to vector<24x32xf32>
    %116 = arith.subf %115, %114 : vector<24x32xf32>
    %117 = math.exp %116 : vector<24x32xf32>
    %cst_84 = arith.constant 1.000000e+00 : f32
    %118 = vector.broadcast %cst_84 : f32 to vector<24x32xf32>
    %119 = arith.addf %118, %117 : vector<24x32xf32>
    %cst_85 = arith.constant 1.000000e+00 : f32
    %120 = vector.broadcast %cst_85 : f32 to vector<24x32xf32>
    %121 = arith.divf %120, %119 : vector<24x32xf32>
    %122 = arith.mulf %114, %121 : vector<24x32xf32>
    %c0_86 = arith.constant 0 : index
    %c0_87 = arith.constant 0 : index
    %c0_88 = arith.constant 0 : index
    %123 = vector.load %arg21[%c0_86, %c0_87, %c0_88] : memref<6x32x32xf32, #tpu.memory_space<vmem>>, vector<1x32x32xf32>
    %124 = vector.shape_cast %123 : vector<1x32x32xf32> to vector<32x32xf32>
    %cst_89 = arith.constant dense<0.000000e+00> : vector<24x32xf32>
    %125 = tpu.matmul %122, %124, %cst_89 {dimension_numbers = #tpu.dot_dimension_numbers<[1], [0], [0], [1], [0, 0, 1, 1], [], []>} : vector<24x32xf32>, vector<32x32xf32>, vector<24x32xf32> -> vector<24x32xf32>
    %126 = arith.addf %11, %125 : vector<24x32xf32>
    %c0_90 = arith.constant 0 : index
    %c0_91 = arith.constant 0 : index
    %c0_92 = arith.constant 0 : index
    %127 = vector.load %arg22[%c0_90, %c0_91, %c0_92] : memref<6x1x32xf32, #tpu.memory_space<vmem>>, vector<1x1x32xf32>
    %128 = vector.shape_cast %127 : vector<1x1x32xf32> to vector<1x32xf32>
    %129 = vector.broadcast %128 : vector<1x32xf32> to vector<24x32xf32>
    %130 = arith.addf %126, %129 : vector<24x32xf32>
    %cst_93 = arith.constant dense<0.000000e+00> : vector<48x3xf32>
    %131 = tpu.matmul %2, %102, %cst_93 {dimension_numbers = #tpu.dot_dimension_numbers<[1], [0], [0], [1], [0, 0, 1, 1], [], []>} : vector<48x24xf32>, vector<24x3xf32>, vector<48x3xf32> -> vector<48x3xf32>
    %132 = arith.mulf %131, %131 : vector<48x3xf32>
    %cst_94 = arith.constant dense<0.000000e+00> : vector<48xf32>
    %133 = vector.multi_reduction <add>, %132, %cst_94 [1] : vector<48x3xf32> to vector<48xf32>
    %134 = vector.shape_cast %133 : vector<48xf32> to vector<48x1xf32>
    %cst_95 = arith.constant dense<0.000000e+00> : vector<48x32xf32>
    %135 = tpu.matmul %0, %130, %cst_95 {dimension_numbers = #tpu.dot_dimension_numbers<[1], [0], [0], [1], [0, 0, 1, 1], [], []>} : vector<48x24xf32>, vector<24x32xf32>, vector<48x32xf32> -> vector<48x32xf32>
    %cst_96 = arith.constant dense<0.000000e+00> : vector<48x32xf32>
    %136 = tpu.matmul %1, %130, %cst_96 {dimension_numbers = #tpu.dot_dimension_numbers<[1], [0], [0], [1], [0, 0, 1, 1], [], []>} : vector<48x24xf32>, vector<24x32xf32>, vector<48x32xf32> -> vector<48x32xf32>
    %c1 = arith.constant 1 : index
    %c0_97 = arith.constant 0 : index
    %c0_98 = arith.constant 0 : index
    %137 = vector.load %arg7[%c1, %c0_97, %c0_98] : memref<6x32x32xf32, #tpu.memory_space<vmem>>, vector<1x32x32xf32>
    %138 = vector.shape_cast %137 : vector<1x32x32xf32> to vector<32x32xf32>
    %cst_99 = arith.constant dense<0.000000e+00> : vector<48x32xf32>
    %139 = tpu.matmul %135, %138, %cst_99 {dimension_numbers = #tpu.dot_dimension_numbers<[1], [0], [0], [1], [0, 0, 1, 1], [], []>} : vector<48x32xf32>, vector<32x32xf32>, vector<48x32xf32> -> vector<48x32xf32>
    %c1_100 = arith.constant 1 : index
    %c0_101 = arith.constant 0 : index
    %c0_102 = arith.constant 0 : index
    %140 = vector.load %arg8[%c1_100, %c0_101, %c0_102] : memref<6x32x32xf32, #tpu.memory_space<vmem>>, vector<1x32x32xf32>
    %141 = vector.shape_cast %140 : vector<1x32x32xf32> to vector<32x32xf32>
    %cst_103 = arith.constant dense<0.000000e+00> : vector<48x32xf32>
    %142 = tpu.matmul %136, %141, %cst_103 {dimension_numbers = #tpu.dot_dimension_numbers<[1], [0], [0], [1], [0, 0, 1, 1], [], []>} : vector<48x32xf32>, vector<32x32xf32>, vector<48x32xf32> -> vector<48x32xf32>
    %143 = arith.addf %139, %142 : vector<48x32xf32>
    %c1_104 = arith.constant 1 : index
    %c0_105 = arith.constant 0 : index
    %c0_106 = arith.constant 0 : index
    %144 = vector.load %arg9[%c1_104, %c0_105, %c0_106] : memref<6x1x32xf32, #tpu.memory_space<vmem>>, vector<1x1x32xf32>
    %145 = vector.shape_cast %144 : vector<1x1x32xf32> to vector<1x32xf32>
    %146 = vector.broadcast %134 : vector<48x1xf32> to vector<48x32xf32>
    %147 = vector.broadcast %145 : vector<1x32xf32> to vector<48x32xf32>
    %148 = arith.mulf %146, %147 : vector<48x32xf32>
    %149 = arith.addf %143, %148 : vector<48x32xf32>
    %c1_107 = arith.constant 1 : index
    %c0_108 = arith.constant 0 : index
    %c0_109 = arith.constant 0 : index
    %150 = vector.load %arg10[%c1_107, %c0_108, %c0_109] : memref<6x1x32xf32, #tpu.memory_space<vmem>>, vector<1x1x32xf32>
    %151 = vector.shape_cast %150 : vector<1x1x32xf32> to vector<1x32xf32>
    %152 = vector.broadcast %151 : vector<1x32xf32> to vector<48x32xf32>
    %153 = arith.addf %149, %152 : vector<48x32xf32>
    %cst_110 = arith.constant 0.000000e+00 : f32
    %154 = vector.broadcast %cst_110 : f32 to vector<48x32xf32>
    %155 = arith.subf %154, %153 : vector<48x32xf32>
    %156 = math.exp %155 : vector<48x32xf32>
    %cst_111 = arith.constant 1.000000e+00 : f32
    %157 = vector.broadcast %cst_111 : f32 to vector<48x32xf32>
    %158 = arith.addf %157, %156 : vector<48x32xf32>
    %cst_112 = arith.constant 1.000000e+00 : f32
    %159 = vector.broadcast %cst_112 : f32 to vector<48x32xf32>
    %160 = arith.divf %159, %158 : vector<48x32xf32>
    %161 = arith.mulf %153, %160 : vector<48x32xf32>
    %c1_113 = arith.constant 1 : index
    %c0_114 = arith.constant 0 : index
    %c0_115 = arith.constant 0 : index
    %162 = vector.load %arg11[%c1_113, %c0_114, %c0_115] : memref<6x32x32xf32, #tpu.memory_space<vmem>>, vector<1x32x32xf32>
    %163 = vector.shape_cast %162 : vector<1x32x32xf32> to vector<32x32xf32>
    %cst_116 = arith.constant dense<0.000000e+00> : vector<48x32xf32>
    %164 = tpu.matmul %161, %163, %cst_116 {dimension_numbers = #tpu.dot_dimension_numbers<[1], [0], [0], [1], [0, 0, 1, 1], [], []>} : vector<48x32xf32>, vector<32x32xf32>, vector<48x32xf32> -> vector<48x32xf32>
    %c1_117 = arith.constant 1 : index
    %c0_118 = arith.constant 0 : index
    %c0_119 = arith.constant 0 : index
    %165 = vector.load %arg12[%c1_117, %c0_118, %c0_119] : memref<6x1x32xf32, #tpu.memory_space<vmem>>, vector<1x1x32xf32>
    %166 = vector.shape_cast %165 : vector<1x1x32xf32> to vector<1x32xf32>
    %167 = vector.broadcast %166 : vector<1x32xf32> to vector<48x32xf32>
    %168 = arith.addf %164, %167 : vector<48x32xf32>
    %cst_120 = arith.constant 0.000000e+00 : f32
    %169 = vector.broadcast %cst_120 : f32 to vector<48x32xf32>
    %170 = arith.subf %169, %168 : vector<48x32xf32>
    %171 = math.exp %170 : vector<48x32xf32>
    %cst_121 = arith.constant 1.000000e+00 : f32
    %172 = vector.broadcast %cst_121 : f32 to vector<48x32xf32>
    %173 = arith.addf %172, %171 : vector<48x32xf32>
    %cst_122 = arith.constant 1.000000e+00 : f32
    %174 = vector.broadcast %cst_122 : f32 to vector<48x32xf32>
    %175 = arith.divf %174, %173 : vector<48x32xf32>
    %176 = arith.mulf %168, %175 : vector<48x32xf32>
    %c1_123 = arith.constant 1 : index
    %c0_124 = arith.constant 0 : index
    %c0_125 = arith.constant 0 : index
    %177 = vector.load %arg13[%c1_123, %c0_124, %c0_125] : memref<6x1x32xf32, #tpu.memory_space<vmem>>, vector<1x1x32xf32>
    %178 = vector.shape_cast %177 : vector<1x1x32xf32> to vector<1x32xf32>
    %179 = vector.broadcast %178 : vector<1x32xf32> to vector<48x32xf32>
    %180 = arith.mulf %176, %179 : vector<48x32xf32>
    %cst_126 = arith.constant dense<0.000000e+00> : vector<48xf32>
    %181 = vector.multi_reduction <add>, %180, %cst_126 [1] : vector<48x32xf32> to vector<48xf32>
    %182 = vector.shape_cast %181 : vector<48xf32> to vector<48x1xf32>
    %c1_127 = arith.constant 1 : index
    %c0_128 = arith.constant 0 : index
    %c0_129 = arith.constant 0 : index
    %183 = vector.load %arg14[%c1_127, %c0_128, %c0_129] : memref<6x1x1xf32, #tpu.memory_space<vmem>>, vector<1x1x1xf32>
    %184 = vector.shape_cast %183 : vector<1x1x1xf32> to vector<1x1xf32>
    %185 = vector.broadcast %184 : vector<1x1xf32> to vector<48x1xf32>
    %186 = arith.addf %182, %185 : vector<48x1xf32>
    %cst_130 = arith.constant 0.000000e+00 : f32
    %187 = vector.broadcast %cst_130 : f32 to vector<48x1xf32>
    %188 = arith.subf %187, %186 : vector<48x1xf32>
    %189 = math.exp %188 : vector<48x1xf32>
    %cst_131 = arith.constant 1.000000e+00 : f32
    %190 = vector.broadcast %cst_131 : f32 to vector<48x1xf32>
    %191 = arith.addf %190, %189 : vector<48x1xf32>
    %cst_132 = arith.constant 1.000000e+00 : f32
    %192 = vector.broadcast %cst_132 : f32 to vector<48x1xf32>
    %193 = arith.divf %192, %191 : vector<48x1xf32>
    %194 = vector.broadcast %193 : vector<48x1xf32> to vector<48x32xf32>
    %195 = arith.mulf %176, %194 : vector<48x32xf32>
    %c1_133 = arith.constant 1 : index
    %c0_134 = arith.constant 0 : index
    %c0_135 = arith.constant 0 : index
    %196 = vector.load %arg15[%c1_133, %c0_134, %c0_135] : memref<6x32x32xf32, #tpu.memory_space<vmem>>, vector<1x32x32xf32>
    %197 = vector.shape_cast %196 : vector<1x32x32xf32> to vector<32x32xf32>
    %cst_136 = arith.constant dense<0.000000e+00> : vector<48x32xf32>
    %198 = tpu.matmul %195, %197, %cst_136 {dimension_numbers = #tpu.dot_dimension_numbers<[1], [0], [0], [1], [0, 0, 1, 1], [], []>} : vector<48x32xf32>, vector<32x32xf32>, vector<48x32xf32> -> vector<48x32xf32>
    %c1_137 = arith.constant 1 : index
    %c0_138 = arith.constant 0 : index
    %c0_139 = arith.constant 0 : index
    %199 = vector.load %arg16[%c1_137, %c0_138, %c0_139] : memref<6x1x32xf32, #tpu.memory_space<vmem>>, vector<1x1x32xf32>
    %200 = vector.shape_cast %199 : vector<1x1x32xf32> to vector<1x32xf32>
    %201 = vector.broadcast %200 : vector<1x32xf32> to vector<48x32xf32>
    %202 = arith.addf %198, %201 : vector<48x32xf32>
    %cst_140 = arith.constant 0.000000e+00 : f32
    %203 = vector.broadcast %cst_140 : f32 to vector<48x32xf32>
    %204 = arith.subf %203, %202 : vector<48x32xf32>
    %205 = math.exp %204 : vector<48x32xf32>
    %cst_141 = arith.constant 1.000000e+00 : f32
    %206 = vector.broadcast %cst_141 : f32 to vector<48x32xf32>
    %207 = arith.addf %206, %205 : vector<48x32xf32>
    %cst_142 = arith.constant 1.000000e+00 : f32
    %208 = vector.broadcast %cst_142 : f32 to vector<48x32xf32>
    %209 = arith.divf %208, %207 : vector<48x32xf32>
    %210 = arith.mulf %202, %209 : vector<48x32xf32>
    %c1_143 = arith.constant 1 : index
    %c0_144 = arith.constant 0 : index
    %c0_145 = arith.constant 0 : index
    %211 = vector.load %arg17[%c1_143, %c0_144, %c0_145] : memref<6x1x32xf32, #tpu.memory_space<vmem>>, vector<1x1x32xf32>
    %212 = vector.shape_cast %211 : vector<1x1x32xf32> to vector<1x32xf32>
    %213 = vector.broadcast %212 : vector<1x32xf32> to vector<48x32xf32>
    %214 = arith.mulf %210, %213 : vector<48x32xf32>
    %cst_146 = arith.constant dense<0.000000e+00> : vector<48xf32>
    %215 = vector.multi_reduction <add>, %214, %cst_146 [1] : vector<48x32xf32> to vector<48xf32>
    %216 = vector.shape_cast %215 : vector<48xf32> to vector<48x1xf32>
    %217 = math.tanh %216 : vector<48x1xf32>
    %218 = vector.broadcast %217 : vector<48x1xf32> to vector<48x3xf32>
    %219 = arith.mulf %131, %218 : vector<48x3xf32>
    %cst_147 = arith.constant dense<0.000000e+00> : vector<24x3xf32>
    %220 = tpu.matmul %4, %219, %cst_147 {dimension_numbers = #tpu.dot_dimension_numbers<[1], [0], [0], [1], [0, 0, 1, 1], [], []>} : vector<24x48xf32>, vector<48x3xf32>, vector<24x3xf32> -> vector<24x3xf32>
    %221 = arith.addf %102, %220 : vector<24x3xf32>
    %cst_148 = arith.constant dense<0.000000e+00> : vector<24x32xf32>
    %222 = tpu.matmul %3, %195, %cst_148 {dimension_numbers = #tpu.dot_dimension_numbers<[1], [0], [0], [1], [0, 0, 1, 1], [], []>} : vector<24x48xf32>, vector<48x32xf32>, vector<24x32xf32> -> vector<24x32xf32>
    %c1_149 = arith.constant 1 : index
    %c0_150 = arith.constant 0 : index
    %c0_151 = arith.constant 0 : index
    %223 = vector.load %arg18[%c1_149, %c0_150, %c0_151] : memref<6x32x32xf32, #tpu.memory_space<vmem>>, vector<1x32x32xf32>
    %224 = vector.shape_cast %223 : vector<1x32x32xf32> to vector<32x32xf32>
    %cst_152 = arith.constant dense<0.000000e+00> : vector<24x32xf32>
    %225 = tpu.matmul %130, %224, %cst_152 {dimension_numbers = #tpu.dot_dimension_numbers<[1], [0], [0], [1], [0, 0, 1, 1], [], []>} : vector<24x32xf32>, vector<32x32xf32>, vector<24x32xf32> -> vector<24x32xf32>
    %c1_153 = arith.constant 1 : index
    %c0_154 = arith.constant 0 : index
    %c0_155 = arith.constant 0 : index
    %226 = vector.load %arg19[%c1_153, %c0_154, %c0_155] : memref<6x32x32xf32, #tpu.memory_space<vmem>>, vector<1x32x32xf32>
    %227 = vector.shape_cast %226 : vector<1x32x32xf32> to vector<32x32xf32>
    %cst_156 = arith.constant dense<0.000000e+00> : vector<24x32xf32>
    %228 = tpu.matmul %222, %227, %cst_156 {dimension_numbers = #tpu.dot_dimension_numbers<[1], [0], [0], [1], [0, 0, 1, 1], [], []>} : vector<24x32xf32>, vector<32x32xf32>, vector<24x32xf32> -> vector<24x32xf32>
    %229 = arith.addf %225, %228 : vector<24x32xf32>
    %c1_157 = arith.constant 1 : index
    %c0_158 = arith.constant 0 : index
    %c0_159 = arith.constant 0 : index
    %230 = vector.load %arg20[%c1_157, %c0_158, %c0_159] : memref<6x1x32xf32, #tpu.memory_space<vmem>>, vector<1x1x32xf32>
    %231 = vector.shape_cast %230 : vector<1x1x32xf32> to vector<1x32xf32>
    %232 = vector.broadcast %231 : vector<1x32xf32> to vector<24x32xf32>
    %233 = arith.addf %229, %232 : vector<24x32xf32>
    %cst_160 = arith.constant 0.000000e+00 : f32
    %234 = vector.broadcast %cst_160 : f32 to vector<24x32xf32>
    %235 = arith.subf %234, %233 : vector<24x32xf32>
    %236 = math.exp %235 : vector<24x32xf32>
    %cst_161 = arith.constant 1.000000e+00 : f32
    %237 = vector.broadcast %cst_161 : f32 to vector<24x32xf32>
    %238 = arith.addf %237, %236 : vector<24x32xf32>
    %cst_162 = arith.constant 1.000000e+00 : f32
    %239 = vector.broadcast %cst_162 : f32 to vector<24x32xf32>
    %240 = arith.divf %239, %238 : vector<24x32xf32>
    %241 = arith.mulf %233, %240 : vector<24x32xf32>
    %c1_163 = arith.constant 1 : index
    %c0_164 = arith.constant 0 : index
    %c0_165 = arith.constant 0 : index
    %242 = vector.load %arg21[%c1_163, %c0_164, %c0_165] : memref<6x32x32xf32, #tpu.memory_space<vmem>>, vector<1x32x32xf32>
    %243 = vector.shape_cast %242 : vector<1x32x32xf32> to vector<32x32xf32>
    %cst_166 = arith.constant dense<0.000000e+00> : vector<24x32xf32>
    %244 = tpu.matmul %241, %243, %cst_166 {dimension_numbers = #tpu.dot_dimension_numbers<[1], [0], [0], [1], [0, 0, 1, 1], [], []>} : vector<24x32xf32>, vector<32x32xf32>, vector<24x32xf32> -> vector<24x32xf32>
    %245 = arith.addf %130, %244 : vector<24x32xf32>
    %c1_167 = arith.constant 1 : index
    %c0_168 = arith.constant 0 : index
    %c0_169 = arith.constant 0 : index
    %246 = vector.load %arg22[%c1_167, %c0_168, %c0_169] : memref<6x1x32xf32, #tpu.memory_space<vmem>>, vector<1x1x32xf32>
    %247 = vector.shape_cast %246 : vector<1x1x32xf32> to vector<1x32xf32>
    %248 = vector.broadcast %247 : vector<1x32xf32> to vector<24x32xf32>
    %249 = arith.addf %245, %248 : vector<24x32xf32>
    %c0_170 = arith.constant 0 : index
    %c0_171 = arith.constant 0 : index
    %250 = vector.load %arg25[%c0_170, %c0_171] : memref<32x16xf32, #tpu.memory_space<vmem>>, vector<32x16xf32>
    %cst_172 = arith.constant dense<0.000000e+00> : vector<24x16xf32>
    %251 = tpu.matmul %249, %250, %cst_172 {dimension_numbers = #tpu.dot_dimension_numbers<[1], [0], [0], [1], [0, 0, 1, 1], [], []>} : vector<24x32xf32>, vector<32x16xf32>, vector<24x16xf32> -> vector<24x16xf32>
    %c0_173 = arith.constant 0 : index
    %c0_174 = arith.constant 0 : index
    %252 = vector.load %arg26[%c0_173, %c0_174] : memref<1x16xf32, #tpu.memory_space<vmem>>, vector<1x16xf32>
    %253 = vector.broadcast %252 : vector<1x16xf32> to vector<24x16xf32>
    %254 = arith.addf %251, %253 : vector<24x16xf32>
    %c0_175 = arith.constant 0 : index
    %c0_176 = arith.constant 0 : index
    %255 = vector.load %arg27[%c0_175, %c0_176] : memref<16x32xf32, #tpu.memory_space<vmem>>, vector<16x32xf32>
    %cst_177 = arith.constant dense<0.000000e+00> : vector<24x32xf32>
    %256 = tpu.matmul %254, %255, %cst_177 {dimension_numbers = #tpu.dot_dimension_numbers<[1], [0], [0], [1], [0, 0, 1, 1], [], []>} : vector<24x16xf32>, vector<16x32xf32>, vector<24x32xf32> -> vector<24x32xf32>
    %c0_178 = arith.constant 0 : index
    %c0_179 = arith.constant 0 : index
    %257 = vector.load %arg28[%c0_178, %c0_179] : memref<1x32xf32, #tpu.memory_space<vmem>>, vector<1x32xf32>
    %258 = vector.broadcast %257 : vector<1x32xf32> to vector<24x32xf32>
    %259 = arith.addf %256, %258 : vector<24x32xf32>
    %cst_180 = arith.constant dense<0.000000e+00> : vector<48x3xf32>
    %260 = tpu.matmul %2, %221, %cst_180 {dimension_numbers = #tpu.dot_dimension_numbers<[1], [0], [0], [1], [0, 0, 1, 1], [], []>} : vector<48x24xf32>, vector<24x3xf32>, vector<48x3xf32> -> vector<48x3xf32>
    %261 = arith.mulf %260, %260 : vector<48x3xf32>
    %cst_181 = arith.constant dense<0.000000e+00> : vector<48xf32>
    %262 = vector.multi_reduction <add>, %261, %cst_181 [1] : vector<48x3xf32> to vector<48xf32>
    %263 = vector.shape_cast %262 : vector<48xf32> to vector<48x1xf32>
    %cst_182 = arith.constant dense<0.000000e+00> : vector<48x32xf32>
    %264 = tpu.matmul %0, %259, %cst_182 {dimension_numbers = #tpu.dot_dimension_numbers<[1], [0], [0], [1], [0, 0, 1, 1], [], []>} : vector<48x24xf32>, vector<24x32xf32>, vector<48x32xf32> -> vector<48x32xf32>
    %cst_183 = arith.constant dense<0.000000e+00> : vector<48x32xf32>
    %265 = tpu.matmul %1, %259, %cst_183 {dimension_numbers = #tpu.dot_dimension_numbers<[1], [0], [0], [1], [0, 0, 1, 1], [], []>} : vector<48x24xf32>, vector<24x32xf32>, vector<48x32xf32> -> vector<48x32xf32>
    %c2 = arith.constant 2 : index
    %c0_184 = arith.constant 0 : index
    %c0_185 = arith.constant 0 : index
    %266 = vector.load %arg7[%c2, %c0_184, %c0_185] : memref<6x32x32xf32, #tpu.memory_space<vmem>>, vector<1x32x32xf32>
    %267 = vector.shape_cast %266 : vector<1x32x32xf32> to vector<32x32xf32>
    %cst_186 = arith.constant dense<0.000000e+00> : vector<48x32xf32>
    %268 = tpu.matmul %264, %267, %cst_186 {dimension_numbers = #tpu.dot_dimension_numbers<[1], [0], [0], [1], [0, 0, 1, 1], [], []>} : vector<48x32xf32>, vector<32x32xf32>, vector<48x32xf32> -> vector<48x32xf32>
    %c2_187 = arith.constant 2 : index
    %c0_188 = arith.constant 0 : index
    %c0_189 = arith.constant 0 : index
    %269 = vector.load %arg8[%c2_187, %c0_188, %c0_189] : memref<6x32x32xf32, #tpu.memory_space<vmem>>, vector<1x32x32xf32>
    %270 = vector.shape_cast %269 : vector<1x32x32xf32> to vector<32x32xf32>
    %cst_190 = arith.constant dense<0.000000e+00> : vector<48x32xf32>
    %271 = tpu.matmul %265, %270, %cst_190 {dimension_numbers = #tpu.dot_dimension_numbers<[1], [0], [0], [1], [0, 0, 1, 1], [], []>} : vector<48x32xf32>, vector<32x32xf32>, vector<48x32xf32> -> vector<48x32xf32>
    %272 = arith.addf %268, %271 : vector<48x32xf32>
    %c2_191 = arith.constant 2 : index
    %c0_192 = arith.constant 0 : index
    %c0_193 = arith.constant 0 : index
    %273 = vector.load %arg9[%c2_191, %c0_192, %c0_193] : memref<6x1x32xf32, #tpu.memory_space<vmem>>, vector<1x1x32xf32>
    %274 = vector.shape_cast %273 : vector<1x1x32xf32> to vector<1x32xf32>
    %275 = vector.broadcast %263 : vector<48x1xf32> to vector<48x32xf32>
    %276 = vector.broadcast %274 : vector<1x32xf32> to vector<48x32xf32>
    %277 = arith.mulf %275, %276 : vector<48x32xf32>
    %278 = arith.addf %272, %277 : vector<48x32xf32>
    %c2_194 = arith.constant 2 : index
    %c0_195 = arith.constant 0 : index
    %c0_196 = arith.constant 0 : index
    %279 = vector.load %arg10[%c2_194, %c0_195, %c0_196] : memref<6x1x32xf32, #tpu.memory_space<vmem>>, vector<1x1x32xf32>
    %280 = vector.shape_cast %279 : vector<1x1x32xf32> to vector<1x32xf32>
    %281 = vector.broadcast %280 : vector<1x32xf32> to vector<48x32xf32>
    %282 = arith.addf %278, %281 : vector<48x32xf32>
    %cst_197 = arith.constant 0.000000e+00 : f32
    %283 = vector.broadcast %cst_197 : f32 to vector<48x32xf32>
    %284 = arith.subf %283, %282 : vector<48x32xf32>
    %285 = math.exp %284 : vector<48x32xf32>
    %cst_198 = arith.constant 1.000000e+00 : f32
    %286 = vector.broadcast %cst_198 : f32 to vector<48x32xf32>
    %287 = arith.addf %286, %285 : vector<48x32xf32>
    %cst_199 = arith.constant 1.000000e+00 : f32
    %288 = vector.broadcast %cst_199 : f32 to vector<48x32xf32>
    %289 = arith.divf %288, %287 : vector<48x32xf32>
    %290 = arith.mulf %282, %289 : vector<48x32xf32>
    %c2_200 = arith.constant 2 : index
    %c0_201 = arith.constant 0 : index
    %c0_202 = arith.constant 0 : index
    %291 = vector.load %arg11[%c2_200, %c0_201, %c0_202] : memref<6x32x32xf32, #tpu.memory_space<vmem>>, vector<1x32x32xf32>
    %292 = vector.shape_cast %291 : vector<1x32x32xf32> to vector<32x32xf32>
    %cst_203 = arith.constant dense<0.000000e+00> : vector<48x32xf32>
    %293 = tpu.matmul %290, %292, %cst_203 {dimension_numbers = #tpu.dot_dimension_numbers<[1], [0], [0], [1], [0, 0, 1, 1], [], []>} : vector<48x32xf32>, vector<32x32xf32>, vector<48x32xf32> -> vector<48x32xf32>
    %c2_204 = arith.constant 2 : index
    %c0_205 = arith.constant 0 : index
    %c0_206 = arith.constant 0 : index
    %294 = vector.load %arg12[%c2_204, %c0_205, %c0_206] : memref<6x1x32xf32, #tpu.memory_space<vmem>>, vector<1x1x32xf32>
    %295 = vector.shape_cast %294 : vector<1x1x32xf32> to vector<1x32xf32>
    %296 = vector.broadcast %295 : vector<1x32xf32> to vector<48x32xf32>
    %297 = arith.addf %293, %296 : vector<48x32xf32>
    %cst_207 = arith.constant 0.000000e+00 : f32
    %298 = vector.broadcast %cst_207 : f32 to vector<48x32xf32>
    %299 = arith.subf %298, %297 : vector<48x32xf32>
    %300 = math.exp %299 : vector<48x32xf32>
    %cst_208 = arith.constant 1.000000e+00 : f32
    %301 = vector.broadcast %cst_208 : f32 to vector<48x32xf32>
    %302 = arith.addf %301, %300 : vector<48x32xf32>
    %cst_209 = arith.constant 1.000000e+00 : f32
    %303 = vector.broadcast %cst_209 : f32 to vector<48x32xf32>
    %304 = arith.divf %303, %302 : vector<48x32xf32>
    %305 = arith.mulf %297, %304 : vector<48x32xf32>
    %c2_210 = arith.constant 2 : index
    %c0_211 = arith.constant 0 : index
    %c0_212 = arith.constant 0 : index
    %306 = vector.load %arg13[%c2_210, %c0_211, %c0_212] : memref<6x1x32xf32, #tpu.memory_space<vmem>>, vector<1x1x32xf32>
    %307 = vector.shape_cast %306 : vector<1x1x32xf32> to vector<1x32xf32>
    %308 = vector.broadcast %307 : vector<1x32xf32> to vector<48x32xf32>
    %309 = arith.mulf %305, %308 : vector<48x32xf32>
    %cst_213 = arith.constant dense<0.000000e+00> : vector<48xf32>
    %310 = vector.multi_reduction <add>, %309, %cst_213 [1] : vector<48x32xf32> to vector<48xf32>
    %311 = vector.shape_cast %310 : vector<48xf32> to vector<48x1xf32>
    %c2_214 = arith.constant 2 : index
    %c0_215 = arith.constant 0 : index
    %c0_216 = arith.constant 0 : index
    %312 = vector.load %arg14[%c2_214, %c0_215, %c0_216] : memref<6x1x1xf32, #tpu.memory_space<vmem>>, vector<1x1x1xf32>
    %313 = vector.shape_cast %312 : vector<1x1x1xf32> to vector<1x1xf32>
    %314 = vector.broadcast %313 : vector<1x1xf32> to vector<48x1xf32>
    %315 = arith.addf %311, %314 : vector<48x1xf32>
    %cst_217 = arith.constant 0.000000e+00 : f32
    %316 = vector.broadcast %cst_217 : f32 to vector<48x1xf32>
    %317 = arith.subf %316, %315 : vector<48x1xf32>
    %318 = math.exp %317 : vector<48x1xf32>
    %cst_218 = arith.constant 1.000000e+00 : f32
    %319 = vector.broadcast %cst_218 : f32 to vector<48x1xf32>
    %320 = arith.addf %319, %318 : vector<48x1xf32>
    %cst_219 = arith.constant 1.000000e+00 : f32
    %321 = vector.broadcast %cst_219 : f32 to vector<48x1xf32>
    %322 = arith.divf %321, %320 : vector<48x1xf32>
    %323 = vector.broadcast %322 : vector<48x1xf32> to vector<48x32xf32>
    %324 = arith.mulf %305, %323 : vector<48x32xf32>
    %c2_220 = arith.constant 2 : index
    %c0_221 = arith.constant 0 : index
    %c0_222 = arith.constant 0 : index
    %325 = vector.load %arg15[%c2_220, %c0_221, %c0_222] : memref<6x32x32xf32, #tpu.memory_space<vmem>>, vector<1x32x32xf32>
    %326 = vector.shape_cast %325 : vector<1x32x32xf32> to vector<32x32xf32>
    %cst_223 = arith.constant dense<0.000000e+00> : vector<48x32xf32>
    %327 = tpu.matmul %324, %326, %cst_223 {dimension_numbers = #tpu.dot_dimension_numbers<[1], [0], [0], [1], [0, 0, 1, 1], [], []>} : vector<48x32xf32>, vector<32x32xf32>, vector<48x32xf32> -> vector<48x32xf32>
    %c2_224 = arith.constant 2 : index
    %c0_225 = arith.constant 0 : index
    %c0_226 = arith.constant 0 : index
    %328 = vector.load %arg16[%c2_224, %c0_225, %c0_226] : memref<6x1x32xf32, #tpu.memory_space<vmem>>, vector<1x1x32xf32>
    %329 = vector.shape_cast %328 : vector<1x1x32xf32> to vector<1x32xf32>
    %330 = vector.broadcast %329 : vector<1x32xf32> to vector<48x32xf32>
    %331 = arith.addf %327, %330 : vector<48x32xf32>
    %cst_227 = arith.constant 0.000000e+00 : f32
    %332 = vector.broadcast %cst_227 : f32 to vector<48x32xf32>
    %333 = arith.subf %332, %331 : vector<48x32xf32>
    %334 = math.exp %333 : vector<48x32xf32>
    %cst_228 = arith.constant 1.000000e+00 : f32
    %335 = vector.broadcast %cst_228 : f32 to vector<48x32xf32>
    %336 = arith.addf %335, %334 : vector<48x32xf32>
    %cst_229 = arith.constant 1.000000e+00 : f32
    %337 = vector.broadcast %cst_229 : f32 to vector<48x32xf32>
    %338 = arith.divf %337, %336 : vector<48x32xf32>
    %339 = arith.mulf %331, %338 : vector<48x32xf32>
    %c2_230 = arith.constant 2 : index
    %c0_231 = arith.constant 0 : index
    %c0_232 = arith.constant 0 : index
    %340 = vector.load %arg17[%c2_230, %c0_231, %c0_232] : memref<6x1x32xf32, #tpu.memory_space<vmem>>, vector<1x1x32xf32>
    %341 = vector.shape_cast %340 : vector<1x1x32xf32> to vector<1x32xf32>
    %342 = vector.broadcast %341 : vector<1x32xf32> to vector<48x32xf32>
    %343 = arith.mulf %339, %342 : vector<48x32xf32>
    %cst_233 = arith.constant dense<0.000000e+00> : vector<48xf32>
    %344 = vector.multi_reduction <add>, %343, %cst_233 [1] : vector<48x32xf32> to vector<48xf32>
    %345 = vector.shape_cast %344 : vector<48xf32> to vector<48x1xf32>
    %346 = math.tanh %345 : vector<48x1xf32>
    %347 = vector.broadcast %346 : vector<48x1xf32> to vector<48x3xf32>
    %348 = arith.mulf %260, %347 : vector<48x3xf32>
    %cst_234 = arith.constant dense<0.000000e+00> : vector<24x3xf32>
    %349 = tpu.matmul %4, %348, %cst_234 {dimension_numbers = #tpu.dot_dimension_numbers<[1], [0], [0], [1], [0, 0, 1, 1], [], []>} : vector<24x48xf32>, vector<48x3xf32>, vector<24x3xf32> -> vector<24x3xf32>
    %350 = arith.addf %221, %349 : vector<24x3xf32>
    %cst_235 = arith.constant dense<0.000000e+00> : vector<24x32xf32>
    %351 = tpu.matmul %3, %324, %cst_235 {dimension_numbers = #tpu.dot_dimension_numbers<[1], [0], [0], [1], [0, 0, 1, 1], [], []>} : vector<24x48xf32>, vector<48x32xf32>, vector<24x32xf32> -> vector<24x32xf32>
    %c2_236 = arith.constant 2 : index
    %c0_237 = arith.constant 0 : index
    %c0_238 = arith.constant 0 : index
    %352 = vector.load %arg18[%c2_236, %c0_237, %c0_238] : memref<6x32x32xf32, #tpu.memory_space<vmem>>, vector<1x32x32xf32>
    %353 = vector.shape_cast %352 : vector<1x32x32xf32> to vector<32x32xf32>
    %cst_239 = arith.constant dense<0.000000e+00> : vector<24x32xf32>
    %354 = tpu.matmul %259, %353, %cst_239 {dimension_numbers = #tpu.dot_dimension_numbers<[1], [0], [0], [1], [0, 0, 1, 1], [], []>} : vector<24x32xf32>, vector<32x32xf32>, vector<24x32xf32> -> vector<24x32xf32>
    %c2_240 = arith.constant 2 : index
    %c0_241 = arith.constant 0 : index
    %c0_242 = arith.constant 0 : index
    %355 = vector.load %arg19[%c2_240, %c0_241, %c0_242] : memref<6x32x32xf32, #tpu.memory_space<vmem>>, vector<1x32x32xf32>
    %356 = vector.shape_cast %355 : vector<1x32x32xf32> to vector<32x32xf32>
    %cst_243 = arith.constant dense<0.000000e+00> : vector<24x32xf32>
    %357 = tpu.matmul %351, %356, %cst_243 {dimension_numbers = #tpu.dot_dimension_numbers<[1], [0], [0], [1], [0, 0, 1, 1], [], []>} : vector<24x32xf32>, vector<32x32xf32>, vector<24x32xf32> -> vector<24x32xf32>
    %358 = arith.addf %354, %357 : vector<24x32xf32>
    %c2_244 = arith.constant 2 : index
    %c0_245 = arith.constant 0 : index
    %c0_246 = arith.constant 0 : index
    %359 = vector.load %arg20[%c2_244, %c0_245, %c0_246] : memref<6x1x32xf32, #tpu.memory_space<vmem>>, vector<1x1x32xf32>
    %360 = vector.shape_cast %359 : vector<1x1x32xf32> to vector<1x32xf32>
    %361 = vector.broadcast %360 : vector<1x32xf32> to vector<24x32xf32>
    %362 = arith.addf %358, %361 : vector<24x32xf32>
    %cst_247 = arith.constant 0.000000e+00 : f32
    %363 = vector.broadcast %cst_247 : f32 to vector<24x32xf32>
    %364 = arith.subf %363, %362 : vector<24x32xf32>
    %365 = math.exp %364 : vector<24x32xf32>
    %cst_248 = arith.constant 1.000000e+00 : f32
    %366 = vector.broadcast %cst_248 : f32 to vector<24x32xf32>
    %367 = arith.addf %366, %365 : vector<24x32xf32>
    %cst_249 = arith.constant 1.000000e+00 : f32
    %368 = vector.broadcast %cst_249 : f32 to vector<24x32xf32>
    %369 = arith.divf %368, %367 : vector<24x32xf32>
    %370 = arith.mulf %362, %369 : vector<24x32xf32>
    %c2_250 = arith.constant 2 : index
    %c0_251 = arith.constant 0 : index
    %c0_252 = arith.constant 0 : index
    %371 = vector.load %arg21[%c2_250, %c0_251, %c0_252] : memref<6x32x32xf32, #tpu.memory_space<vmem>>, vector<1x32x32xf32>
    %372 = vector.shape_cast %371 : vector<1x32x32xf32> to vector<32x32xf32>
    %cst_253 = arith.constant dense<0.000000e+00> : vector<24x32xf32>
    %373 = tpu.matmul %370, %372, %cst_253 {dimension_numbers = #tpu.dot_dimension_numbers<[1], [0], [0], [1], [0, 0, 1, 1], [], []>} : vector<24x32xf32>, vector<32x32xf32>, vector<24x32xf32> -> vector<24x32xf32>
    %374 = arith.addf %259, %373 : vector<24x32xf32>
    %c2_254 = arith.constant 2 : index
    %c0_255 = arith.constant 0 : index
    %c0_256 = arith.constant 0 : index
    %375 = vector.load %arg22[%c2_254, %c0_255, %c0_256] : memref<6x1x32xf32, #tpu.memory_space<vmem>>, vector<1x1x32xf32>
    %376 = vector.shape_cast %375 : vector<1x1x32xf32> to vector<1x32xf32>
    %377 = vector.broadcast %376 : vector<1x32xf32> to vector<24x32xf32>
    %378 = arith.addf %374, %377 : vector<24x32xf32>
    %cst_257 = arith.constant dense<0.000000e+00> : vector<48x3xf32>
    %379 = tpu.matmul %2, %350, %cst_257 {dimension_numbers = #tpu.dot_dimension_numbers<[1], [0], [0], [1], [0, 0, 1, 1], [], []>} : vector<48x24xf32>, vector<24x3xf32>, vector<48x3xf32> -> vector<48x3xf32>
    %380 = arith.mulf %379, %379 : vector<48x3xf32>
    %cst_258 = arith.constant dense<0.000000e+00> : vector<48xf32>
    %381 = vector.multi_reduction <add>, %380, %cst_258 [1] : vector<48x3xf32> to vector<48xf32>
    %382 = vector.shape_cast %381 : vector<48xf32> to vector<48x1xf32>
    %cst_259 = arith.constant dense<0.000000e+00> : vector<48x32xf32>
    %383 = tpu.matmul %0, %378, %cst_259 {dimension_numbers = #tpu.dot_dimension_numbers<[1], [0], [0], [1], [0, 0, 1, 1], [], []>} : vector<48x24xf32>, vector<24x32xf32>, vector<48x32xf32> -> vector<48x32xf32>
    %cst_260 = arith.constant dense<0.000000e+00> : vector<48x32xf32>
    %384 = tpu.matmul %1, %378, %cst_260 {dimension_numbers = #tpu.dot_dimension_numbers<[1], [0], [0], [1], [0, 0, 1, 1], [], []>} : vector<48x24xf32>, vector<24x32xf32>, vector<48x32xf32> -> vector<48x32xf32>
    %c3 = arith.constant 3 : index
    %c0_261 = arith.constant 0 : index
    %c0_262 = arith.constant 0 : index
    %385 = vector.load %arg7[%c3, %c0_261, %c0_262] : memref<6x32x32xf32, #tpu.memory_space<vmem>>, vector<1x32x32xf32>
    %386 = vector.shape_cast %385 : vector<1x32x32xf32> to vector<32x32xf32>
    %cst_263 = arith.constant dense<0.000000e+00> : vector<48x32xf32>
    %387 = tpu.matmul %383, %386, %cst_263 {dimension_numbers = #tpu.dot_dimension_numbers<[1], [0], [0], [1], [0, 0, 1, 1], [], []>} : vector<48x32xf32>, vector<32x32xf32>, vector<48x32xf32> -> vector<48x32xf32>
    %c3_264 = arith.constant 3 : index
    %c0_265 = arith.constant 0 : index
    %c0_266 = arith.constant 0 : index
    %388 = vector.load %arg8[%c3_264, %c0_265, %c0_266] : memref<6x32x32xf32, #tpu.memory_space<vmem>>, vector<1x32x32xf32>
    %389 = vector.shape_cast %388 : vector<1x32x32xf32> to vector<32x32xf32>
    %cst_267 = arith.constant dense<0.000000e+00> : vector<48x32xf32>
    %390 = tpu.matmul %384, %389, %cst_267 {dimension_numbers = #tpu.dot_dimension_numbers<[1], [0], [0], [1], [0, 0, 1, 1], [], []>} : vector<48x32xf32>, vector<32x32xf32>, vector<48x32xf32> -> vector<48x32xf32>
    %391 = arith.addf %387, %390 : vector<48x32xf32>
    %c3_268 = arith.constant 3 : index
    %c0_269 = arith.constant 0 : index
    %c0_270 = arith.constant 0 : index
    %392 = vector.load %arg9[%c3_268, %c0_269, %c0_270] : memref<6x1x32xf32, #tpu.memory_space<vmem>>, vector<1x1x32xf32>
    %393 = vector.shape_cast %392 : vector<1x1x32xf32> to vector<1x32xf32>
    %394 = vector.broadcast %382 : vector<48x1xf32> to vector<48x32xf32>
    %395 = vector.broadcast %393 : vector<1x32xf32> to vector<48x32xf32>
    %396 = arith.mulf %394, %395 : vector<48x32xf32>
    %397 = arith.addf %391, %396 : vector<48x32xf32>
    %c3_271 = arith.constant 3 : index
    %c0_272 = arith.constant 0 : index
    %c0_273 = arith.constant 0 : index
    %398 = vector.load %arg10[%c3_271, %c0_272, %c0_273] : memref<6x1x32xf32, #tpu.memory_space<vmem>>, vector<1x1x32xf32>
    %399 = vector.shape_cast %398 : vector<1x1x32xf32> to vector<1x32xf32>
    %400 = vector.broadcast %399 : vector<1x32xf32> to vector<48x32xf32>
    %401 = arith.addf %397, %400 : vector<48x32xf32>
    %cst_274 = arith.constant 0.000000e+00 : f32
    %402 = vector.broadcast %cst_274 : f32 to vector<48x32xf32>
    %403 = arith.subf %402, %401 : vector<48x32xf32>
    %404 = math.exp %403 : vector<48x32xf32>
    %cst_275 = arith.constant 1.000000e+00 : f32
    %405 = vector.broadcast %cst_275 : f32 to vector<48x32xf32>
    %406 = arith.addf %405, %404 : vector<48x32xf32>
    %cst_276 = arith.constant 1.000000e+00 : f32
    %407 = vector.broadcast %cst_276 : f32 to vector<48x32xf32>
    %408 = arith.divf %407, %406 : vector<48x32xf32>
    %409 = arith.mulf %401, %408 : vector<48x32xf32>
    %c3_277 = arith.constant 3 : index
    %c0_278 = arith.constant 0 : index
    %c0_279 = arith.constant 0 : index
    %410 = vector.load %arg11[%c3_277, %c0_278, %c0_279] : memref<6x32x32xf32, #tpu.memory_space<vmem>>, vector<1x32x32xf32>
    %411 = vector.shape_cast %410 : vector<1x32x32xf32> to vector<32x32xf32>
    %cst_280 = arith.constant dense<0.000000e+00> : vector<48x32xf32>
    %412 = tpu.matmul %409, %411, %cst_280 {dimension_numbers = #tpu.dot_dimension_numbers<[1], [0], [0], [1], [0, 0, 1, 1], [], []>} : vector<48x32xf32>, vector<32x32xf32>, vector<48x32xf32> -> vector<48x32xf32>
    %c3_281 = arith.constant 3 : index
    %c0_282 = arith.constant 0 : index
    %c0_283 = arith.constant 0 : index
    %413 = vector.load %arg12[%c3_281, %c0_282, %c0_283] : memref<6x1x32xf32, #tpu.memory_space<vmem>>, vector<1x1x32xf32>
    %414 = vector.shape_cast %413 : vector<1x1x32xf32> to vector<1x32xf32>
    %415 = vector.broadcast %414 : vector<1x32xf32> to vector<48x32xf32>
    %416 = arith.addf %412, %415 : vector<48x32xf32>
    %cst_284 = arith.constant 0.000000e+00 : f32
    %417 = vector.broadcast %cst_284 : f32 to vector<48x32xf32>
    %418 = arith.subf %417, %416 : vector<48x32xf32>
    %419 = math.exp %418 : vector<48x32xf32>
    %cst_285 = arith.constant 1.000000e+00 : f32
    %420 = vector.broadcast %cst_285 : f32 to vector<48x32xf32>
    %421 = arith.addf %420, %419 : vector<48x32xf32>
    %cst_286 = arith.constant 1.000000e+00 : f32
    %422 = vector.broadcast %cst_286 : f32 to vector<48x32xf32>
    %423 = arith.divf %422, %421 : vector<48x32xf32>
    %424 = arith.mulf %416, %423 : vector<48x32xf32>
    %c3_287 = arith.constant 3 : index
    %c0_288 = arith.constant 0 : index
    %c0_289 = arith.constant 0 : index
    %425 = vector.load %arg13[%c3_287, %c0_288, %c0_289] : memref<6x1x32xf32, #tpu.memory_space<vmem>>, vector<1x1x32xf32>
    %426 = vector.shape_cast %425 : vector<1x1x32xf32> to vector<1x32xf32>
    %427 = vector.broadcast %426 : vector<1x32xf32> to vector<48x32xf32>
    %428 = arith.mulf %424, %427 : vector<48x32xf32>
    %cst_290 = arith.constant dense<0.000000e+00> : vector<48xf32>
    %429 = vector.multi_reduction <add>, %428, %cst_290 [1] : vector<48x32xf32> to vector<48xf32>
    %430 = vector.shape_cast %429 : vector<48xf32> to vector<48x1xf32>
    %c3_291 = arith.constant 3 : index
    %c0_292 = arith.constant 0 : index
    %c0_293 = arith.constant 0 : index
    %431 = vector.load %arg14[%c3_291, %c0_292, %c0_293] : memref<6x1x1xf32, #tpu.memory_space<vmem>>, vector<1x1x1xf32>
    %432 = vector.shape_cast %431 : vector<1x1x1xf32> to vector<1x1xf32>
    %433 = vector.broadcast %432 : vector<1x1xf32> to vector<48x1xf32>
    %434 = arith.addf %430, %433 : vector<48x1xf32>
    %cst_294 = arith.constant 0.000000e+00 : f32
    %435 = vector.broadcast %cst_294 : f32 to vector<48x1xf32>
    %436 = arith.subf %435, %434 : vector<48x1xf32>
    %437 = math.exp %436 : vector<48x1xf32>
    %cst_295 = arith.constant 1.000000e+00 : f32
    %438 = vector.broadcast %cst_295 : f32 to vector<48x1xf32>
    %439 = arith.addf %438, %437 : vector<48x1xf32>
    %cst_296 = arith.constant 1.000000e+00 : f32
    %440 = vector.broadcast %cst_296 : f32 to vector<48x1xf32>
    %441 = arith.divf %440, %439 : vector<48x1xf32>
    %442 = vector.broadcast %441 : vector<48x1xf32> to vector<48x32xf32>
    %443 = arith.mulf %424, %442 : vector<48x32xf32>
    %c3_297 = arith.constant 3 : index
    %c0_298 = arith.constant 0 : index
    %c0_299 = arith.constant 0 : index
    %444 = vector.load %arg15[%c3_297, %c0_298, %c0_299] : memref<6x32x32xf32, #tpu.memory_space<vmem>>, vector<1x32x32xf32>
    %445 = vector.shape_cast %444 : vector<1x32x32xf32> to vector<32x32xf32>
    %cst_300 = arith.constant dense<0.000000e+00> : vector<48x32xf32>
    %446 = tpu.matmul %443, %445, %cst_300 {dimension_numbers = #tpu.dot_dimension_numbers<[1], [0], [0], [1], [0, 0, 1, 1], [], []>} : vector<48x32xf32>, vector<32x32xf32>, vector<48x32xf32> -> vector<48x32xf32>
    %c3_301 = arith.constant 3 : index
    %c0_302 = arith.constant 0 : index
    %c0_303 = arith.constant 0 : index
    %447 = vector.load %arg16[%c3_301, %c0_302, %c0_303] : memref<6x1x32xf32, #tpu.memory_space<vmem>>, vector<1x1x32xf32>
    %448 = vector.shape_cast %447 : vector<1x1x32xf32> to vector<1x32xf32>
    %449 = vector.broadcast %448 : vector<1x32xf32> to vector<48x32xf32>
    %450 = arith.addf %446, %449 : vector<48x32xf32>
    %cst_304 = arith.constant 0.000000e+00 : f32
    %451 = vector.broadcast %cst_304 : f32 to vector<48x32xf32>
    %452 = arith.subf %451, %450 : vector<48x32xf32>
    %453 = math.exp %452 : vector<48x32xf32>
    %cst_305 = arith.constant 1.000000e+00 : f32
    %454 = vector.broadcast %cst_305 : f32 to vector<48x32xf32>
    %455 = arith.addf %454, %453 : vector<48x32xf32>
    %cst_306 = arith.constant 1.000000e+00 : f32
    %456 = vector.broadcast %cst_306 : f32 to vector<48x32xf32>
    %457 = arith.divf %456, %455 : vector<48x32xf32>
    %458 = arith.mulf %450, %457 : vector<48x32xf32>
    %c3_307 = arith.constant 3 : index
    %c0_308 = arith.constant 0 : index
    %c0_309 = arith.constant 0 : index
    %459 = vector.load %arg17[%c3_307, %c0_308, %c0_309] : memref<6x1x32xf32, #tpu.memory_space<vmem>>, vector<1x1x32xf32>
    %460 = vector.shape_cast %459 : vector<1x1x32xf32> to vector<1x32xf32>
    %461 = vector.broadcast %460 : vector<1x32xf32> to vector<48x32xf32>
    %462 = arith.mulf %458, %461 : vector<48x32xf32>
    %cst_310 = arith.constant dense<0.000000e+00> : vector<48xf32>
    %463 = vector.multi_reduction <add>, %462, %cst_310 [1] : vector<48x32xf32> to vector<48xf32>
    %464 = vector.shape_cast %463 : vector<48xf32> to vector<48x1xf32>
    %465 = math.tanh %464 : vector<48x1xf32>
    %466 = vector.broadcast %465 : vector<48x1xf32> to vector<48x3xf32>
    %467 = arith.mulf %379, %466 : vector<48x3xf32>
    %cst_311 = arith.constant dense<0.000000e+00> : vector<24x3xf32>
    %468 = tpu.matmul %4, %467, %cst_311 {dimension_numbers = #tpu.dot_dimension_numbers<[1], [0], [0], [1], [0, 0, 1, 1], [], []>} : vector<24x48xf32>, vector<48x3xf32>, vector<24x3xf32> -> vector<24x3xf32>
    %469 = arith.addf %350, %468 : vector<24x3xf32>
    %cst_312 = arith.constant dense<0.000000e+00> : vector<24x32xf32>
    %470 = tpu.matmul %3, %443, %cst_312 {dimension_numbers = #tpu.dot_dimension_numbers<[1], [0], [0], [1], [0, 0, 1, 1], [], []>} : vector<24x48xf32>, vector<48x32xf32>, vector<24x32xf32> -> vector<24x32xf32>
    %c3_313 = arith.constant 3 : index
    %c0_314 = arith.constant 0 : index
    %c0_315 = arith.constant 0 : index
    %471 = vector.load %arg18[%c3_313, %c0_314, %c0_315] : memref<6x32x32xf32, #tpu.memory_space<vmem>>, vector<1x32x32xf32>
    %472 = vector.shape_cast %471 : vector<1x32x32xf32> to vector<32x32xf32>
    %cst_316 = arith.constant dense<0.000000e+00> : vector<24x32xf32>
    %473 = tpu.matmul %378, %472, %cst_316 {dimension_numbers = #tpu.dot_dimension_numbers<[1], [0], [0], [1], [0, 0, 1, 1], [], []>} : vector<24x32xf32>, vector<32x32xf32>, vector<24x32xf32> -> vector<24x32xf32>
    %c3_317 = arith.constant 3 : index
    %c0_318 = arith.constant 0 : index
    %c0_319 = arith.constant 0 : index
    %474 = vector.load %arg19[%c3_317, %c0_318, %c0_319] : memref<6x32x32xf32, #tpu.memory_space<vmem>>, vector<1x32x32xf32>
    %475 = vector.shape_cast %474 : vector<1x32x32xf32> to vector<32x32xf32>
    %cst_320 = arith.constant dense<0.000000e+00> : vector<24x32xf32>
    %476 = tpu.matmul %470, %475, %cst_320 {dimension_numbers = #tpu.dot_dimension_numbers<[1], [0], [0], [1], [0, 0, 1, 1], [], []>} : vector<24x32xf32>, vector<32x32xf32>, vector<24x32xf32> -> vector<24x32xf32>
    %477 = arith.addf %473, %476 : vector<24x32xf32>
    %c3_321 = arith.constant 3 : index
    %c0_322 = arith.constant 0 : index
    %c0_323 = arith.constant 0 : index
    %478 = vector.load %arg20[%c3_321, %c0_322, %c0_323] : memref<6x1x32xf32, #tpu.memory_space<vmem>>, vector<1x1x32xf32>
    %479 = vector.shape_cast %478 : vector<1x1x32xf32> to vector<1x32xf32>
    %480 = vector.broadcast %479 : vector<1x32xf32> to vector<24x32xf32>
    %481 = arith.addf %477, %480 : vector<24x32xf32>
    %cst_324 = arith.constant 0.000000e+00 : f32
    %482 = vector.broadcast %cst_324 : f32 to vector<24x32xf32>
    %483 = arith.subf %482, %481 : vector<24x32xf32>
    %484 = math.exp %483 : vector<24x32xf32>
    %cst_325 = arith.constant 1.000000e+00 : f32
    %485 = vector.broadcast %cst_325 : f32 to vector<24x32xf32>
    %486 = arith.addf %485, %484 : vector<24x32xf32>
    %cst_326 = arith.constant 1.000000e+00 : f32
    %487 = vector.broadcast %cst_326 : f32 to vector<24x32xf32>
    %488 = arith.divf %487, %486 : vector<24x32xf32>
    %489 = arith.mulf %481, %488 : vector<24x32xf32>
    %c3_327 = arith.constant 3 : index
    %c0_328 = arith.constant 0 : index
    %c0_329 = arith.constant 0 : index
    %490 = vector.load %arg21[%c3_327, %c0_328, %c0_329] : memref<6x32x32xf32, #tpu.memory_space<vmem>>, vector<1x32x32xf32>
    %491 = vector.shape_cast %490 : vector<1x32x32xf32> to vector<32x32xf32>
    %cst_330 = arith.constant dense<0.000000e+00> : vector<24x32xf32>
    %492 = tpu.matmul %489, %491, %cst_330 {dimension_numbers = #tpu.dot_dimension_numbers<[1], [0], [0], [1], [0, 0, 1, 1], [], []>} : vector<24x32xf32>, vector<32x32xf32>, vector<24x32xf32> -> vector<24x32xf32>
    %493 = arith.addf %378, %492 : vector<24x32xf32>
    %c3_331 = arith.constant 3 : index
    %c0_332 = arith.constant 0 : index
    %c0_333 = arith.constant 0 : index
    %494 = vector.load %arg22[%c3_331, %c0_332, %c0_333] : memref<6x1x32xf32, #tpu.memory_space<vmem>>, vector<1x1x32xf32>
    %495 = vector.shape_cast %494 : vector<1x1x32xf32> to vector<1x32xf32>
    %496 = vector.broadcast %495 : vector<1x32xf32> to vector<24x32xf32>
    %497 = arith.addf %493, %496 : vector<24x32xf32>
    %c0_334 = arith.constant 0 : index
    %c0_335 = arith.constant 0 : index
    %498 = vector.load %arg29[%c0_334, %c0_335] : memref<32x8xf32, #tpu.memory_space<vmem>>, vector<32x8xf32>
    %cst_336 = arith.constant dense<0.000000e+00> : vector<24x8xf32>
    %499 = tpu.matmul %497, %498, %cst_336 {dimension_numbers = #tpu.dot_dimension_numbers<[1], [0], [0], [1], [0, 0, 1, 1], [], []>} : vector<24x32xf32>, vector<32x8xf32>, vector<24x8xf32> -> vector<24x8xf32>
    %c0_337 = arith.constant 0 : index
    %c0_338 = arith.constant 0 : index
    %500 = vector.load %arg30[%c0_337, %c0_338] : memref<1x8xf32, #tpu.memory_space<vmem>>, vector<1x8xf32>
    %501 = vector.broadcast %500 : vector<1x8xf32> to vector<24x8xf32>
    %502 = arith.addf %499, %501 : vector<24x8xf32>
    %c0_339 = arith.constant 0 : index
    %c0_340 = arith.constant 0 : index
    %503 = vector.load %arg31[%c0_339, %c0_340] : memref<8x32xf32, #tpu.memory_space<vmem>>, vector<8x32xf32>
    %cst_341 = arith.constant dense<0.000000e+00> : vector<24x32xf32>
    %504 = tpu.matmul %502, %503, %cst_341 {dimension_numbers = #tpu.dot_dimension_numbers<[1], [0], [0], [1], [0, 0, 1, 1], [], []>} : vector<24x8xf32>, vector<8x32xf32>, vector<24x32xf32> -> vector<24x32xf32>
    %c0_342 = arith.constant 0 : index
    %c0_343 = arith.constant 0 : index
    %505 = vector.load %arg32[%c0_342, %c0_343] : memref<1x32xf32, #tpu.memory_space<vmem>>, vector<1x32xf32>
    %506 = vector.broadcast %505 : vector<1x32xf32> to vector<24x32xf32>
    %507 = arith.addf %504, %506 : vector<24x32xf32>
    %cst_344 = arith.constant dense<0.000000e+00> : vector<48x3xf32>
    %508 = tpu.matmul %2, %469, %cst_344 {dimension_numbers = #tpu.dot_dimension_numbers<[1], [0], [0], [1], [0, 0, 1, 1], [], []>} : vector<48x24xf32>, vector<24x3xf32>, vector<48x3xf32> -> vector<48x3xf32>
    %509 = arith.mulf %508, %508 : vector<48x3xf32>
    %cst_345 = arith.constant dense<0.000000e+00> : vector<48xf32>
    %510 = vector.multi_reduction <add>, %509, %cst_345 [1] : vector<48x3xf32> to vector<48xf32>
    %511 = vector.shape_cast %510 : vector<48xf32> to vector<48x1xf32>
    %cst_346 = arith.constant dense<0.000000e+00> : vector<48x32xf32>
    %512 = tpu.matmul %0, %507, %cst_346 {dimension_numbers = #tpu.dot_dimension_numbers<[1], [0], [0], [1], [0, 0, 1, 1], [], []>} : vector<48x24xf32>, vector<24x32xf32>, vector<48x32xf32> -> vector<48x32xf32>
    %cst_347 = arith.constant dense<0.000000e+00> : vector<48x32xf32>
    %513 = tpu.matmul %1, %507, %cst_347 {dimension_numbers = #tpu.dot_dimension_numbers<[1], [0], [0], [1], [0, 0, 1, 1], [], []>} : vector<48x24xf32>, vector<24x32xf32>, vector<48x32xf32> -> vector<48x32xf32>
    %c4 = arith.constant 4 : index
    %c0_348 = arith.constant 0 : index
    %c0_349 = arith.constant 0 : index
    %514 = vector.load %arg7[%c4, %c0_348, %c0_349] : memref<6x32x32xf32, #tpu.memory_space<vmem>>, vector<1x32x32xf32>
    %515 = vector.shape_cast %514 : vector<1x32x32xf32> to vector<32x32xf32>
    %cst_350 = arith.constant dense<0.000000e+00> : vector<48x32xf32>
    %516 = tpu.matmul %512, %515, %cst_350 {dimension_numbers = #tpu.dot_dimension_numbers<[1], [0], [0], [1], [0, 0, 1, 1], [], []>} : vector<48x32xf32>, vector<32x32xf32>, vector<48x32xf32> -> vector<48x32xf32>
    %c4_351 = arith.constant 4 : index
    %c0_352 = arith.constant 0 : index
    %c0_353 = arith.constant 0 : index
    %517 = vector.load %arg8[%c4_351, %c0_352, %c0_353] : memref<6x32x32xf32, #tpu.memory_space<vmem>>, vector<1x32x32xf32>
    %518 = vector.shape_cast %517 : vector<1x32x32xf32> to vector<32x32xf32>
    %cst_354 = arith.constant dense<0.000000e+00> : vector<48x32xf32>
    %519 = tpu.matmul %513, %518, %cst_354 {dimension_numbers = #tpu.dot_dimension_numbers<[1], [0], [0], [1], [0, 0, 1, 1], [], []>} : vector<48x32xf32>, vector<32x32xf32>, vector<48x32xf32> -> vector<48x32xf32>
    %520 = arith.addf %516, %519 : vector<48x32xf32>
    %c4_355 = arith.constant 4 : index
    %c0_356 = arith.constant 0 : index
    %c0_357 = arith.constant 0 : index
    %521 = vector.load %arg9[%c4_355, %c0_356, %c0_357] : memref<6x1x32xf32, #tpu.memory_space<vmem>>, vector<1x1x32xf32>
    %522 = vector.shape_cast %521 : vector<1x1x32xf32> to vector<1x32xf32>
    %523 = vector.broadcast %511 : vector<48x1xf32> to vector<48x32xf32>
    %524 = vector.broadcast %522 : vector<1x32xf32> to vector<48x32xf32>
    %525 = arith.mulf %523, %524 : vector<48x32xf32>
    %526 = arith.addf %520, %525 : vector<48x32xf32>
    %c4_358 = arith.constant 4 : index
    %c0_359 = arith.constant 0 : index
    %c0_360 = arith.constant 0 : index
    %527 = vector.load %arg10[%c4_358, %c0_359, %c0_360] : memref<6x1x32xf32, #tpu.memory_space<vmem>>, vector<1x1x32xf32>
    %528 = vector.shape_cast %527 : vector<1x1x32xf32> to vector<1x32xf32>
    %529 = vector.broadcast %528 : vector<1x32xf32> to vector<48x32xf32>
    %530 = arith.addf %526, %529 : vector<48x32xf32>
    %cst_361 = arith.constant 0.000000e+00 : f32
    %531 = vector.broadcast %cst_361 : f32 to vector<48x32xf32>
    %532 = arith.subf %531, %530 : vector<48x32xf32>
    %533 = math.exp %532 : vector<48x32xf32>
    %cst_362 = arith.constant 1.000000e+00 : f32
    %534 = vector.broadcast %cst_362 : f32 to vector<48x32xf32>
    %535 = arith.addf %534, %533 : vector<48x32xf32>
    %cst_363 = arith.constant 1.000000e+00 : f32
    %536 = vector.broadcast %cst_363 : f32 to vector<48x32xf32>
    %537 = arith.divf %536, %535 : vector<48x32xf32>
    %538 = arith.mulf %530, %537 : vector<48x32xf32>
    %c4_364 = arith.constant 4 : index
    %c0_365 = arith.constant 0 : index
    %c0_366 = arith.constant 0 : index
    %539 = vector.load %arg11[%c4_364, %c0_365, %c0_366] : memref<6x32x32xf32, #tpu.memory_space<vmem>>, vector<1x32x32xf32>
    %540 = vector.shape_cast %539 : vector<1x32x32xf32> to vector<32x32xf32>
    %cst_367 = arith.constant dense<0.000000e+00> : vector<48x32xf32>
    %541 = tpu.matmul %538, %540, %cst_367 {dimension_numbers = #tpu.dot_dimension_numbers<[1], [0], [0], [1], [0, 0, 1, 1], [], []>} : vector<48x32xf32>, vector<32x32xf32>, vector<48x32xf32> -> vector<48x32xf32>
    %c4_368 = arith.constant 4 : index
    %c0_369 = arith.constant 0 : index
    %c0_370 = arith.constant 0 : index
    %542 = vector.load %arg12[%c4_368, %c0_369, %c0_370] : memref<6x1x32xf32, #tpu.memory_space<vmem>>, vector<1x1x32xf32>
    %543 = vector.shape_cast %542 : vector<1x1x32xf32> to vector<1x32xf32>
    %544 = vector.broadcast %543 : vector<1x32xf32> to vector<48x32xf32>
    %545 = arith.addf %541, %544 : vector<48x32xf32>
    %cst_371 = arith.constant 0.000000e+00 : f32
    %546 = vector.broadcast %cst_371 : f32 to vector<48x32xf32>
    %547 = arith.subf %546, %545 : vector<48x32xf32>
    %548 = math.exp %547 : vector<48x32xf32>
    %cst_372 = arith.constant 1.000000e+00 : f32
    %549 = vector.broadcast %cst_372 : f32 to vector<48x32xf32>
    %550 = arith.addf %549, %548 : vector<48x32xf32>
    %cst_373 = arith.constant 1.000000e+00 : f32
    %551 = vector.broadcast %cst_373 : f32 to vector<48x32xf32>
    %552 = arith.divf %551, %550 : vector<48x32xf32>
    %553 = arith.mulf %545, %552 : vector<48x32xf32>
    %c4_374 = arith.constant 4 : index
    %c0_375 = arith.constant 0 : index
    %c0_376 = arith.constant 0 : index
    %554 = vector.load %arg13[%c4_374, %c0_375, %c0_376] : memref<6x1x32xf32, #tpu.memory_space<vmem>>, vector<1x1x32xf32>
    %555 = vector.shape_cast %554 : vector<1x1x32xf32> to vector<1x32xf32>
    %556 = vector.broadcast %555 : vector<1x32xf32> to vector<48x32xf32>
    %557 = arith.mulf %553, %556 : vector<48x32xf32>
    %cst_377 = arith.constant dense<0.000000e+00> : vector<48xf32>
    %558 = vector.multi_reduction <add>, %557, %cst_377 [1] : vector<48x32xf32> to vector<48xf32>
    %559 = vector.shape_cast %558 : vector<48xf32> to vector<48x1xf32>
    %c4_378 = arith.constant 4 : index
    %c0_379 = arith.constant 0 : index
    %c0_380 = arith.constant 0 : index
    %560 = vector.load %arg14[%c4_378, %c0_379, %c0_380] : memref<6x1x1xf32, #tpu.memory_space<vmem>>, vector<1x1x1xf32>
    %561 = vector.shape_cast %560 : vector<1x1x1xf32> to vector<1x1xf32>
    %562 = vector.broadcast %561 : vector<1x1xf32> to vector<48x1xf32>
    %563 = arith.addf %559, %562 : vector<48x1xf32>
    %cst_381 = arith.constant 0.000000e+00 : f32
    %564 = vector.broadcast %cst_381 : f32 to vector<48x1xf32>
    %565 = arith.subf %564, %563 : vector<48x1xf32>
    %566 = math.exp %565 : vector<48x1xf32>
    %cst_382 = arith.constant 1.000000e+00 : f32
    %567 = vector.broadcast %cst_382 : f32 to vector<48x1xf32>
    %568 = arith.addf %567, %566 : vector<48x1xf32>
    %cst_383 = arith.constant 1.000000e+00 : f32
    %569 = vector.broadcast %cst_383 : f32 to vector<48x1xf32>
    %570 = arith.divf %569, %568 : vector<48x1xf32>
    %571 = vector.broadcast %570 : vector<48x1xf32> to vector<48x32xf32>
    %572 = arith.mulf %553, %571 : vector<48x32xf32>
    %c4_384 = arith.constant 4 : index
    %c0_385 = arith.constant 0 : index
    %c0_386 = arith.constant 0 : index
    %573 = vector.load %arg15[%c4_384, %c0_385, %c0_386] : memref<6x32x32xf32, #tpu.memory_space<vmem>>, vector<1x32x32xf32>
    %574 = vector.shape_cast %573 : vector<1x32x32xf32> to vector<32x32xf32>
    %cst_387 = arith.constant dense<0.000000e+00> : vector<48x32xf32>
    %575 = tpu.matmul %572, %574, %cst_387 {dimension_numbers = #tpu.dot_dimension_numbers<[1], [0], [0], [1], [0, 0, 1, 1], [], []>} : vector<48x32xf32>, vector<32x32xf32>, vector<48x32xf32> -> vector<48x32xf32>
    %c4_388 = arith.constant 4 : index
    %c0_389 = arith.constant 0 : index
    %c0_390 = arith.constant 0 : index
    %576 = vector.load %arg16[%c4_388, %c0_389, %c0_390] : memref<6x1x32xf32, #tpu.memory_space<vmem>>, vector<1x1x32xf32>
    %577 = vector.shape_cast %576 : vector<1x1x32xf32> to vector<1x32xf32>
    %578 = vector.broadcast %577 : vector<1x32xf32> to vector<48x32xf32>
    %579 = arith.addf %575, %578 : vector<48x32xf32>
    %cst_391 = arith.constant 0.000000e+00 : f32
    %580 = vector.broadcast %cst_391 : f32 to vector<48x32xf32>
    %581 = arith.subf %580, %579 : vector<48x32xf32>
    %582 = math.exp %581 : vector<48x32xf32>
    %cst_392 = arith.constant 1.000000e+00 : f32
    %583 = vector.broadcast %cst_392 : f32 to vector<48x32xf32>
    %584 = arith.addf %583, %582 : vector<48x32xf32>
    %cst_393 = arith.constant 1.000000e+00 : f32
    %585 = vector.broadcast %cst_393 : f32 to vector<48x32xf32>
    %586 = arith.divf %585, %584 : vector<48x32xf32>
    %587 = arith.mulf %579, %586 : vector<48x32xf32>
    %c4_394 = arith.constant 4 : index
    %c0_395 = arith.constant 0 : index
    %c0_396 = arith.constant 0 : index
    %588 = vector.load %arg17[%c4_394, %c0_395, %c0_396] : memref<6x1x32xf32, #tpu.memory_space<vmem>>, vector<1x1x32xf32>
    %589 = vector.shape_cast %588 : vector<1x1x32xf32> to vector<1x32xf32>
    %590 = vector.broadcast %589 : vector<1x32xf32> to vector<48x32xf32>
    %591 = arith.mulf %587, %590 : vector<48x32xf32>
    %cst_397 = arith.constant dense<0.000000e+00> : vector<48xf32>
    %592 = vector.multi_reduction <add>, %591, %cst_397 [1] : vector<48x32xf32> to vector<48xf32>
    %593 = vector.shape_cast %592 : vector<48xf32> to vector<48x1xf32>
    %594 = math.tanh %593 : vector<48x1xf32>
    %595 = vector.broadcast %594 : vector<48x1xf32> to vector<48x3xf32>
    %596 = arith.mulf %508, %595 : vector<48x3xf32>
    %cst_398 = arith.constant dense<0.000000e+00> : vector<24x3xf32>
    %597 = tpu.matmul %4, %596, %cst_398 {dimension_numbers = #tpu.dot_dimension_numbers<[1], [0], [0], [1], [0, 0, 1, 1], [], []>} : vector<24x48xf32>, vector<48x3xf32>, vector<24x3xf32> -> vector<24x3xf32>
    %598 = arith.addf %469, %597 : vector<24x3xf32>
    %cst_399 = arith.constant dense<0.000000e+00> : vector<24x32xf32>
    %599 = tpu.matmul %3, %572, %cst_399 {dimension_numbers = #tpu.dot_dimension_numbers<[1], [0], [0], [1], [0, 0, 1, 1], [], []>} : vector<24x48xf32>, vector<48x32xf32>, vector<24x32xf32> -> vector<24x32xf32>
    %c4_400 = arith.constant 4 : index
    %c0_401 = arith.constant 0 : index
    %c0_402 = arith.constant 0 : index
    %600 = vector.load %arg18[%c4_400, %c0_401, %c0_402] : memref<6x32x32xf32, #tpu.memory_space<vmem>>, vector<1x32x32xf32>
    %601 = vector.shape_cast %600 : vector<1x32x32xf32> to vector<32x32xf32>
    %cst_403 = arith.constant dense<0.000000e+00> : vector<24x32xf32>
    %602 = tpu.matmul %507, %601, %cst_403 {dimension_numbers = #tpu.dot_dimension_numbers<[1], [0], [0], [1], [0, 0, 1, 1], [], []>} : vector<24x32xf32>, vector<32x32xf32>, vector<24x32xf32> -> vector<24x32xf32>
    %c4_404 = arith.constant 4 : index
    %c0_405 = arith.constant 0 : index
    %c0_406 = arith.constant 0 : index
    %603 = vector.load %arg19[%c4_404, %c0_405, %c0_406] : memref<6x32x32xf32, #tpu.memory_space<vmem>>, vector<1x32x32xf32>
    %604 = vector.shape_cast %603 : vector<1x32x32xf32> to vector<32x32xf32>
    %cst_407 = arith.constant dense<0.000000e+00> : vector<24x32xf32>
    %605 = tpu.matmul %599, %604, %cst_407 {dimension_numbers = #tpu.dot_dimension_numbers<[1], [0], [0], [1], [0, 0, 1, 1], [], []>} : vector<24x32xf32>, vector<32x32xf32>, vector<24x32xf32> -> vector<24x32xf32>
    %606 = arith.addf %602, %605 : vector<24x32xf32>
    %c4_408 = arith.constant 4 : index
    %c0_409 = arith.constant 0 : index
    %c0_410 = arith.constant 0 : index
    %607 = vector.load %arg20[%c4_408, %c0_409, %c0_410] : memref<6x1x32xf32, #tpu.memory_space<vmem>>, vector<1x1x32xf32>
    %608 = vector.shape_cast %607 : vector<1x1x32xf32> to vector<1x32xf32>
    %609 = vector.broadcast %608 : vector<1x32xf32> to vector<24x32xf32>
    %610 = arith.addf %606, %609 : vector<24x32xf32>
    %cst_411 = arith.constant 0.000000e+00 : f32
    %611 = vector.broadcast %cst_411 : f32 to vector<24x32xf32>
    %612 = arith.subf %611, %610 : vector<24x32xf32>
    %613 = math.exp %612 : vector<24x32xf32>
    %cst_412 = arith.constant 1.000000e+00 : f32
    %614 = vector.broadcast %cst_412 : f32 to vector<24x32xf32>
    %615 = arith.addf %614, %613 : vector<24x32xf32>
    %cst_413 = arith.constant 1.000000e+00 : f32
    %616 = vector.broadcast %cst_413 : f32 to vector<24x32xf32>
    %617 = arith.divf %616, %615 : vector<24x32xf32>
    %618 = arith.mulf %610, %617 : vector<24x32xf32>
    %c4_414 = arith.constant 4 : index
    %c0_415 = arith.constant 0 : index
    %c0_416 = arith.constant 0 : index
    %619 = vector.load %arg21[%c4_414, %c0_415, %c0_416] : memref<6x32x32xf32, #tpu.memory_space<vmem>>, vector<1x32x32xf32>
    %620 = vector.shape_cast %619 : vector<1x32x32xf32> to vector<32x32xf32>
    %cst_417 = arith.constant dense<0.000000e+00> : vector<24x32xf32>
    %621 = tpu.matmul %618, %620, %cst_417 {dimension_numbers = #tpu.dot_dimension_numbers<[1], [0], [0], [1], [0, 0, 1, 1], [], []>} : vector<24x32xf32>, vector<32x32xf32>, vector<24x32xf32> -> vector<24x32xf32>
    %622 = arith.addf %507, %621 : vector<24x32xf32>
    %c4_418 = arith.constant 4 : index
    %c0_419 = arith.constant 0 : index
    %c0_420 = arith.constant 0 : index
    %623 = vector.load %arg22[%c4_418, %c0_419, %c0_420] : memref<6x1x32xf32, #tpu.memory_space<vmem>>, vector<1x1x32xf32>
    %624 = vector.shape_cast %623 : vector<1x1x32xf32> to vector<1x32xf32>
    %625 = vector.broadcast %624 : vector<1x32xf32> to vector<24x32xf32>
    %626 = arith.addf %622, %625 : vector<24x32xf32>
    %cst_421 = arith.constant dense<0.000000e+00> : vector<48x3xf32>
    %627 = tpu.matmul %2, %598, %cst_421 {dimension_numbers = #tpu.dot_dimension_numbers<[1], [0], [0], [1], [0, 0, 1, 1], [], []>} : vector<48x24xf32>, vector<24x3xf32>, vector<48x3xf32> -> vector<48x3xf32>
    %628 = arith.mulf %627, %627 : vector<48x3xf32>
    %cst_422 = arith.constant dense<0.000000e+00> : vector<48xf32>
    %629 = vector.multi_reduction <add>, %628, %cst_422 [1] : vector<48x3xf32> to vector<48xf32>
    %630 = vector.shape_cast %629 : vector<48xf32> to vector<48x1xf32>
    %cst_423 = arith.constant dense<0.000000e+00> : vector<48x32xf32>
    %631 = tpu.matmul %0, %626, %cst_423 {dimension_numbers = #tpu.dot_dimension_numbers<[1], [0], [0], [1], [0, 0, 1, 1], [], []>} : vector<48x24xf32>, vector<24x32xf32>, vector<48x32xf32> -> vector<48x32xf32>
    %cst_424 = arith.constant dense<0.000000e+00> : vector<48x32xf32>
    %632 = tpu.matmul %1, %626, %cst_424 {dimension_numbers = #tpu.dot_dimension_numbers<[1], [0], [0], [1], [0, 0, 1, 1], [], []>} : vector<48x24xf32>, vector<24x32xf32>, vector<48x32xf32> -> vector<48x32xf32>
    %c5 = arith.constant 5 : index
    %c0_425 = arith.constant 0 : index
    %c0_426 = arith.constant 0 : index
    %633 = vector.load %arg7[%c5, %c0_425, %c0_426] : memref<6x32x32xf32, #tpu.memory_space<vmem>>, vector<1x32x32xf32>
    %634 = vector.shape_cast %633 : vector<1x32x32xf32> to vector<32x32xf32>
    %cst_427 = arith.constant dense<0.000000e+00> : vector<48x32xf32>
    %635 = tpu.matmul %631, %634, %cst_427 {dimension_numbers = #tpu.dot_dimension_numbers<[1], [0], [0], [1], [0, 0, 1, 1], [], []>} : vector<48x32xf32>, vector<32x32xf32>, vector<48x32xf32> -> vector<48x32xf32>
    %c5_428 = arith.constant 5 : index
    %c0_429 = arith.constant 0 : index
    %c0_430 = arith.constant 0 : index
    %636 = vector.load %arg8[%c5_428, %c0_429, %c0_430] : memref<6x32x32xf32, #tpu.memory_space<vmem>>, vector<1x32x32xf32>
    %637 = vector.shape_cast %636 : vector<1x32x32xf32> to vector<32x32xf32>
    %cst_431 = arith.constant dense<0.000000e+00> : vector<48x32xf32>
    %638 = tpu.matmul %632, %637, %cst_431 {dimension_numbers = #tpu.dot_dimension_numbers<[1], [0], [0], [1], [0, 0, 1, 1], [], []>} : vector<48x32xf32>, vector<32x32xf32>, vector<48x32xf32> -> vector<48x32xf32>
    %639 = arith.addf %635, %638 : vector<48x32xf32>
    %c5_432 = arith.constant 5 : index
    %c0_433 = arith.constant 0 : index
    %c0_434 = arith.constant 0 : index
    %640 = vector.load %arg9[%c5_432, %c0_433, %c0_434] : memref<6x1x32xf32, #tpu.memory_space<vmem>>, vector<1x1x32xf32>
    %641 = vector.shape_cast %640 : vector<1x1x32xf32> to vector<1x32xf32>
    %642 = vector.broadcast %630 : vector<48x1xf32> to vector<48x32xf32>
    %643 = vector.broadcast %641 : vector<1x32xf32> to vector<48x32xf32>
    %644 = arith.mulf %642, %643 : vector<48x32xf32>
    %645 = arith.addf %639, %644 : vector<48x32xf32>
    %c5_435 = arith.constant 5 : index
    %c0_436 = arith.constant 0 : index
    %c0_437 = arith.constant 0 : index
    %646 = vector.load %arg10[%c5_435, %c0_436, %c0_437] : memref<6x1x32xf32, #tpu.memory_space<vmem>>, vector<1x1x32xf32>
    %647 = vector.shape_cast %646 : vector<1x1x32xf32> to vector<1x32xf32>
    %648 = vector.broadcast %647 : vector<1x32xf32> to vector<48x32xf32>
    %649 = arith.addf %645, %648 : vector<48x32xf32>
    %cst_438 = arith.constant 0.000000e+00 : f32
    %650 = vector.broadcast %cst_438 : f32 to vector<48x32xf32>
    %651 = arith.subf %650, %649 : vector<48x32xf32>
    %652 = math.exp %651 : vector<48x32xf32>
    %cst_439 = arith.constant 1.000000e+00 : f32
    %653 = vector.broadcast %cst_439 : f32 to vector<48x32xf32>
    %654 = arith.addf %653, %652 : vector<48x32xf32>
    %cst_440 = arith.constant 1.000000e+00 : f32
    %655 = vector.broadcast %cst_440 : f32 to vector<48x32xf32>
    %656 = arith.divf %655, %654 : vector<48x32xf32>
    %657 = arith.mulf %649, %656 : vector<48x32xf32>
    %c5_441 = arith.constant 5 : index
    %c0_442 = arith.constant 0 : index
    %c0_443 = arith.constant 0 : index
    %658 = vector.load %arg11[%c5_441, %c0_442, %c0_443] : memref<6x32x32xf32, #tpu.memory_space<vmem>>, vector<1x32x32xf32>
    %659 = vector.shape_cast %658 : vector<1x32x32xf32> to vector<32x32xf32>
    %cst_444 = arith.constant dense<0.000000e+00> : vector<48x32xf32>
    %660 = tpu.matmul %657, %659, %cst_444 {dimension_numbers = #tpu.dot_dimension_numbers<[1], [0], [0], [1], [0, 0, 1, 1], [], []>} : vector<48x32xf32>, vector<32x32xf32>, vector<48x32xf32> -> vector<48x32xf32>
    %c5_445 = arith.constant 5 : index
    %c0_446 = arith.constant 0 : index
    %c0_447 = arith.constant 0 : index
    %661 = vector.load %arg12[%c5_445, %c0_446, %c0_447] : memref<6x1x32xf32, #tpu.memory_space<vmem>>, vector<1x1x32xf32>
    %662 = vector.shape_cast %661 : vector<1x1x32xf32> to vector<1x32xf32>
    %663 = vector.broadcast %662 : vector<1x32xf32> to vector<48x32xf32>
    %664 = arith.addf %660, %663 : vector<48x32xf32>
    %cst_448 = arith.constant 0.000000e+00 : f32
    %665 = vector.broadcast %cst_448 : f32 to vector<48x32xf32>
    %666 = arith.subf %665, %664 : vector<48x32xf32>
    %667 = math.exp %666 : vector<48x32xf32>
    %cst_449 = arith.constant 1.000000e+00 : f32
    %668 = vector.broadcast %cst_449 : f32 to vector<48x32xf32>
    %669 = arith.addf %668, %667 : vector<48x32xf32>
    %cst_450 = arith.constant 1.000000e+00 : f32
    %670 = vector.broadcast %cst_450 : f32 to vector<48x32xf32>
    %671 = arith.divf %670, %669 : vector<48x32xf32>
    %672 = arith.mulf %664, %671 : vector<48x32xf32>
    %c5_451 = arith.constant 5 : index
    %c0_452 = arith.constant 0 : index
    %c0_453 = arith.constant 0 : index
    %673 = vector.load %arg13[%c5_451, %c0_452, %c0_453] : memref<6x1x32xf32, #tpu.memory_space<vmem>>, vector<1x1x32xf32>
    %674 = vector.shape_cast %673 : vector<1x1x32xf32> to vector<1x32xf32>
    %675 = vector.broadcast %674 : vector<1x32xf32> to vector<48x32xf32>
    %676 = arith.mulf %672, %675 : vector<48x32xf32>
    %cst_454 = arith.constant dense<0.000000e+00> : vector<48xf32>
    %677 = vector.multi_reduction <add>, %676, %cst_454 [1] : vector<48x32xf32> to vector<48xf32>
    %678 = vector.shape_cast %677 : vector<48xf32> to vector<48x1xf32>
    %c5_455 = arith.constant 5 : index
    %c0_456 = arith.constant 0 : index
    %c0_457 = arith.constant 0 : index
    %679 = vector.load %arg14[%c5_455, %c0_456, %c0_457] : memref<6x1x1xf32, #tpu.memory_space<vmem>>, vector<1x1x1xf32>
    %680 = vector.shape_cast %679 : vector<1x1x1xf32> to vector<1x1xf32>
    %681 = vector.broadcast %680 : vector<1x1xf32> to vector<48x1xf32>
    %682 = arith.addf %678, %681 : vector<48x1xf32>
    %cst_458 = arith.constant 0.000000e+00 : f32
    %683 = vector.broadcast %cst_458 : f32 to vector<48x1xf32>
    %684 = arith.subf %683, %682 : vector<48x1xf32>
    %685 = math.exp %684 : vector<48x1xf32>
    %cst_459 = arith.constant 1.000000e+00 : f32
    %686 = vector.broadcast %cst_459 : f32 to vector<48x1xf32>
    %687 = arith.addf %686, %685 : vector<48x1xf32>
    %cst_460 = arith.constant 1.000000e+00 : f32
    %688 = vector.broadcast %cst_460 : f32 to vector<48x1xf32>
    %689 = arith.divf %688, %687 : vector<48x1xf32>
    %690 = vector.broadcast %689 : vector<48x1xf32> to vector<48x32xf32>
    %691 = arith.mulf %672, %690 : vector<48x32xf32>
    %cst_461 = arith.constant dense<0.000000e+00> : vector<24x32xf32>
    %692 = tpu.matmul %3, %691, %cst_461 {dimension_numbers = #tpu.dot_dimension_numbers<[1], [0], [0], [1], [0, 0, 1, 1], [], []>} : vector<24x48xf32>, vector<48x32xf32>, vector<24x32xf32> -> vector<24x32xf32>
    %c5_462 = arith.constant 5 : index
    %c0_463 = arith.constant 0 : index
    %c0_464 = arith.constant 0 : index
    %693 = vector.load %arg18[%c5_462, %c0_463, %c0_464] : memref<6x32x32xf32, #tpu.memory_space<vmem>>, vector<1x32x32xf32>
    %694 = vector.shape_cast %693 : vector<1x32x32xf32> to vector<32x32xf32>
    %cst_465 = arith.constant dense<0.000000e+00> : vector<24x32xf32>
    %695 = tpu.matmul %626, %694, %cst_465 {dimension_numbers = #tpu.dot_dimension_numbers<[1], [0], [0], [1], [0, 0, 1, 1], [], []>} : vector<24x32xf32>, vector<32x32xf32>, vector<24x32xf32> -> vector<24x32xf32>
    %c5_466 = arith.constant 5 : index
    %c0_467 = arith.constant 0 : index
    %c0_468 = arith.constant 0 : index
    %696 = vector.load %arg19[%c5_466, %c0_467, %c0_468] : memref<6x32x32xf32, #tpu.memory_space<vmem>>, vector<1x32x32xf32>
    %697 = vector.shape_cast %696 : vector<1x32x32xf32> to vector<32x32xf32>
    %cst_469 = arith.constant dense<0.000000e+00> : vector<24x32xf32>
    %698 = tpu.matmul %692, %697, %cst_469 {dimension_numbers = #tpu.dot_dimension_numbers<[1], [0], [0], [1], [0, 0, 1, 1], [], []>} : vector<24x32xf32>, vector<32x32xf32>, vector<24x32xf32> -> vector<24x32xf32>
    %699 = arith.addf %695, %698 : vector<24x32xf32>
    %c5_470 = arith.constant 5 : index
    %c0_471 = arith.constant 0 : index
    %c0_472 = arith.constant 0 : index
    %700 = vector.load %arg20[%c5_470, %c0_471, %c0_472] : memref<6x1x32xf32, #tpu.memory_space<vmem>>, vector<1x1x32xf32>
    %701 = vector.shape_cast %700 : vector<1x1x32xf32> to vector<1x32xf32>
    %702 = vector.broadcast %701 : vector<1x32xf32> to vector<24x32xf32>
    %703 = arith.addf %699, %702 : vector<24x32xf32>
    %cst_473 = arith.constant 0.000000e+00 : f32
    %704 = vector.broadcast %cst_473 : f32 to vector<24x32xf32>
    %705 = arith.subf %704, %703 : vector<24x32xf32>
    %706 = math.exp %705 : vector<24x32xf32>
    %cst_474 = arith.constant 1.000000e+00 : f32
    %707 = vector.broadcast %cst_474 : f32 to vector<24x32xf32>
    %708 = arith.addf %707, %706 : vector<24x32xf32>
    %cst_475 = arith.constant 1.000000e+00 : f32
    %709 = vector.broadcast %cst_475 : f32 to vector<24x32xf32>
    %710 = arith.divf %709, %708 : vector<24x32xf32>
    %711 = arith.mulf %703, %710 : vector<24x32xf32>
    %c5_476 = arith.constant 5 : index
    %c0_477 = arith.constant 0 : index
    %c0_478 = arith.constant 0 : index
    %712 = vector.load %arg21[%c5_476, %c0_477, %c0_478] : memref<6x32x32xf32, #tpu.memory_space<vmem>>, vector<1x32x32xf32>
    %713 = vector.shape_cast %712 : vector<1x32x32xf32> to vector<32x32xf32>
    %cst_479 = arith.constant dense<0.000000e+00> : vector<24x32xf32>
    %714 = tpu.matmul %711, %713, %cst_479 {dimension_numbers = #tpu.dot_dimension_numbers<[1], [0], [0], [1], [0, 0, 1, 1], [], []>} : vector<24x32xf32>, vector<32x32xf32>, vector<24x32xf32> -> vector<24x32xf32>
    %715 = arith.addf %626, %714 : vector<24x32xf32>
    %c5_480 = arith.constant 5 : index
    %c0_481 = arith.constant 0 : index
    %c0_482 = arith.constant 0 : index
    %716 = vector.load %arg22[%c5_480, %c0_481, %c0_482] : memref<6x1x32xf32, #tpu.memory_space<vmem>>, vector<1x1x32xf32>
    %717 = vector.shape_cast %716 : vector<1x1x32xf32> to vector<1x32xf32>
    %718 = vector.broadcast %717 : vector<1x32xf32> to vector<24x32xf32>
    %719 = arith.addf %715, %718 : vector<24x32xf32>
    %c0_483 = arith.constant 0 : index
    %c0_484 = arith.constant 0 : index
    %720 = vector.load %arg33[%c0_483, %c0_484] : memref<32x4xf32, #tpu.memory_space<vmem>>, vector<32x4xf32>
    %cst_485 = arith.constant dense<0.000000e+00> : vector<24x4xf32>
    %721 = tpu.matmul %719, %720, %cst_485 {dimension_numbers = #tpu.dot_dimension_numbers<[1], [0], [0], [1], [0, 0, 1, 1], [], []>} : vector<24x32xf32>, vector<32x4xf32>, vector<24x4xf32> -> vector<24x4xf32>
    %c0_486 = arith.constant 0 : index
    %c0_487 = arith.constant 0 : index
    %722 = vector.load %arg34[%c0_486, %c0_487] : memref<1x4xf32, #tpu.memory_space<vmem>>, vector<1x4xf32>
    %723 = vector.broadcast %722 : vector<1x4xf32> to vector<24x4xf32>
    %724 = arith.addf %721, %723 : vector<24x4xf32>
    %c0_488 = arith.constant 0 : index
    %c0_489 = arith.constant 0 : index
    %725 = vector.load %arg6[%c0_488, %c0_489] : memref<2x24xf32, #tpu.memory_space<vmem>>, vector<2x24xf32>
    %cst_490 = arith.constant dense<0.000000e+00> : vector<2x16xf32>
    %726 = tpu.matmul %725, %254, %cst_490 {dimension_numbers = #tpu.dot_dimension_numbers<[1], [0], [0], [1], [0, 0, 1, 1], [], []>} : vector<2x24xf32>, vector<24x16xf32>, vector<2x16xf32> -> vector<2x16xf32>
    %c0_491 = arith.constant 0 : index
    %c0_492 = arith.constant 0 : index
    %727 = vector.load %arg35[%c0_491, %c0_492] : memref<1x16xf32, #tpu.memory_space<vmem>>, vector<1x16xf32>
    %728 = vector.broadcast %727 : vector<1x16xf32> to vector<2x16xf32>
    %729 = arith.mulf %726, %728 : vector<2x16xf32>
    %c0_493 = arith.constant 0 : index
    %c0_494 = arith.constant 0 : index
    %730 = vector.load %arg36[%c0_493, %c0_494] : memref<1x16xf32, #tpu.memory_space<vmem>>, vector<1x16xf32>
    %731 = vector.broadcast %730 : vector<1x16xf32> to vector<2x16xf32>
    %732 = arith.addf %729, %731 : vector<2x16xf32>
    %cst_495 = arith.constant 0.000000e+00 : f32
    %733 = vector.broadcast %cst_495 : f32 to vector<2x16xf32>
    %734 = arith.maximumf %732, %733 : vector<2x16xf32>
    %cst_496 = arith.constant dense<0.000000e+00> : vector<2x8xf32>
    %735 = tpu.matmul %725, %502, %cst_496 {dimension_numbers = #tpu.dot_dimension_numbers<[1], [0], [0], [1], [0, 0, 1, 1], [], []>} : vector<2x24xf32>, vector<24x8xf32>, vector<2x8xf32> -> vector<2x8xf32>
    %c0_497 = arith.constant 0 : index
    %c0_498 = arith.constant 0 : index
    %736 = vector.load %arg37[%c0_497, %c0_498] : memref<1x8xf32, #tpu.memory_space<vmem>>, vector<1x8xf32>
    %737 = vector.broadcast %736 : vector<1x8xf32> to vector<2x8xf32>
    %738 = arith.mulf %735, %737 : vector<2x8xf32>
    %c0_499 = arith.constant 0 : index
    %c0_500 = arith.constant 0 : index
    %739 = vector.load %arg38[%c0_499, %c0_500] : memref<1x8xf32, #tpu.memory_space<vmem>>, vector<1x8xf32>
    %740 = vector.broadcast %739 : vector<1x8xf32> to vector<2x8xf32>
    %741 = arith.addf %738, %740 : vector<2x8xf32>
    %cst_501 = arith.constant 0.000000e+00 : f32
    %742 = vector.broadcast %cst_501 : f32 to vector<2x8xf32>
    %743 = arith.maximumf %741, %742 : vector<2x8xf32>
    %cst_502 = arith.constant dense<0.000000e+00> : vector<2x4xf32>
    %744 = tpu.matmul %725, %724, %cst_502 {dimension_numbers = #tpu.dot_dimension_numbers<[1], [0], [0], [1], [0, 0, 1, 1], [], []>} : vector<2x24xf32>, vector<24x4xf32>, vector<2x4xf32> -> vector<2x4xf32>
    %c0_503 = arith.constant 0 : index
    %c0_504 = arith.constant 0 : index
    %745 = vector.load %arg39[%c0_503, %c0_504] : memref<1x4xf32, #tpu.memory_space<vmem>>, vector<1x4xf32>
    %746 = vector.broadcast %745 : vector<1x4xf32> to vector<2x4xf32>
    %747 = arith.mulf %744, %746 : vector<2x4xf32>
    %c0_505 = arith.constant 0 : index
    %c0_506 = arith.constant 0 : index
    %748 = vector.load %arg40[%c0_505, %c0_506] : memref<1x4xf32, #tpu.memory_space<vmem>>, vector<1x4xf32>
    %749 = vector.broadcast %748 : vector<1x4xf32> to vector<2x4xf32>
    %750 = arith.addf %747, %749 : vector<2x4xf32>
    %cst_507 = arith.constant 0.000000e+00 : f32
    %751 = vector.broadcast %cst_507 : f32 to vector<2x4xf32>
    %752 = arith.maximumf %750, %751 : vector<2x4xf32>
    %c0_508 = arith.constant 0 : index
    %c0_509 = arith.constant 0 : index
    %753 = vector.load %arg41[%c0_508, %c0_509] : memref<16x66xf32, #tpu.memory_space<vmem>>, vector<16x66xf32>
    %cst_510 = arith.constant dense<0.000000e+00> : vector<2x66xf32>
    %754 = tpu.matmul %734, %753, %cst_510 {dimension_numbers = #tpu.dot_dimension_numbers<[1], [0], [0], [1], [0, 0, 1, 1], [], []>} : vector<2x16xf32>, vector<16x66xf32>, vector<2x66xf32> -> vector<2x66xf32>
    %c0_511 = arith.constant 0 : index
    %c0_512 = arith.constant 0 : index
    %755 = vector.load %arg42[%c0_511, %c0_512] : memref<8x66xf32, #tpu.memory_space<vmem>>, vector<8x66xf32>
    %cst_513 = arith.constant dense<0.000000e+00> : vector<2x66xf32>
    %756 = tpu.matmul %743, %755, %cst_513 {dimension_numbers = #tpu.dot_dimension_numbers<[1], [0], [0], [1], [0, 0, 1, 1], [], []>} : vector<2x8xf32>, vector<8x66xf32>, vector<2x66xf32> -> vector<2x66xf32>
    %757 = arith.addf %754, %756 : vector<2x66xf32>
    %c0_514 = arith.constant 0 : index
    %c0_515 = arith.constant 0 : index
    %758 = vector.load %arg43[%c0_514, %c0_515] : memref<4x66xf32, #tpu.memory_space<vmem>>, vector<4x66xf32>
    %cst_516 = arith.constant dense<0.000000e+00> : vector<2x66xf32>
    %759 = tpu.matmul %752, %758, %cst_516 {dimension_numbers = #tpu.dot_dimension_numbers<[1], [0], [0], [1], [0, 0, 1, 1], [], []>} : vector<2x4xf32>, vector<4x66xf32>, vector<2x66xf32> -> vector<2x66xf32>
    %760 = arith.addf %757, %759 : vector<2x66xf32>
    %c0_517 = arith.constant 0 : index
    %c0_518 = arith.constant 0 : index
    %761 = vector.load %arg44[%c0_517, %c0_518] : memref<1x66xf32, #tpu.memory_space<vmem>>, vector<1x66xf32>
    %762 = vector.broadcast %761 : vector<1x66xf32> to vector<2x66xf32>
    %763 = arith.addf %760, %762 : vector<2x66xf32>
    %c0_519 = arith.constant 0 : index
    %c0_520 = arith.constant 0 : index
    %764 = vector.load %arg45[%c0_519, %c0_520] : memref<66x16xf32, #tpu.memory_space<vmem>>, vector<66x16xf32>
    %cst_521 = arith.constant dense<0.000000e+00> : vector<2x16xf32>
    %765 = tpu.matmul %763, %764, %cst_521 {dimension_numbers = #tpu.dot_dimension_numbers<[1], [0], [0], [1], [0, 0, 1, 1], [], []>} : vector<2x66xf32>, vector<66x16xf32>, vector<2x16xf32> -> vector<2x16xf32>
    %c0_522 = arith.constant 0 : index
    %c0_523 = arith.constant 0 : index
    %766 = vector.load %arg46[%c0_522, %c0_523] : memref<1x16xf32, #tpu.memory_space<vmem>>, vector<1x16xf32>
    %767 = vector.broadcast %766 : vector<1x16xf32> to vector<2x16xf32>
    %768 = arith.addf %765, %767 : vector<2x16xf32>
    %c0_524 = arith.constant 0 : index
    %c0_525 = arith.constant 0 : index
    %769 = vector.load %arg47[%c0_524, %c0_525] : memref<2x16xf32, #tpu.memory_space<vmem>>, vector<2x16xf32>
    tpu.vector_store %arg47[%c0_524, %c0_525], %768 {strides = array<i32>} : memref<2x16xf32, #tpu.memory_space<vmem>>, vector<2x16xf32>,
    return
  }
}

</mosaic_0001>

<bundles_post_ra>
// kernel: model_forward.1
= control target key start
LH: loop header
LB: loop body
LE: loop exit
PB: predicated region body
PF: predicated region fallthrough
CT: control target
= control target key end

     0   :  { %s15346_s6 = smov 1   ;;  %s15347_s10 = smov 2   ;;  %s17536_s0 = inlined_call_operand.smem [shape: u32[48], index: -1, kind: input, shape index: {}] }
   0x1   :  { %s15440_s5 = sld [smem:[%s17536_s0]]   ;;  %s15348_s14 = smov 3  }
   0x2   :  { %s15445_s9 = sld [smem:[%s17536_s0 + %s15346_s6]]   ;;  %s15349_s18 = smov 4  }
   0x3   :  { %s15450_s13 = sld [smem:[%s17536_s0 + %s15347_s10]]   ;;  %s15350_s22 = smov 5  }
   0x4   :  { %s15455_s17 = sld [smem:[%s17536_s0 + %s15348_s14]]   ;;  %s15351_s26 = smov 6  }
   0x5   :  { %s15460_s21 = sld [smem:[%s17536_s0 + %s15349_s18]]   ;;  %s15352_s30 = smov 7  }
   0x6   :  { %s15465_s25 = sld [smem:[%s17536_s0 + %s15350_s22]]   ;;  %s15353_s4 = smov 8  }
   0x7   :  { %17550 = sst [smem:[#allocation68_spill]] %s15440_s5  ;;  %s15354_s10 = smov 9  }
   0x8   :  { %17551 = sst [smem:[#allocation69_spill]] %s15445_s9  ;;  %s15355_s15 = smov 10  }
   0x9   :  { %17552 = sst [smem:[#allocation70_spill]] %s15450_s13  ;;  %s15356_s20 = smov 11  }
   0xa   :  { %17553 = sst [smem:[#allocation71_spill]] %s15455_s17  ;;  %s15358_s1 = smov 13  }
   0xb   :  { %17554 = sst [smem:[#allocation72_spill]] %s15460_s21  ;;  %s15359_s7 = smov 14  }
   0xc   :  { %17555 = sst [smem:[#allocation73_spill]] %s15465_s25  ;;  %s15361_s22 = smov 16  }
   0xd   :  { %s15470_s29 = sld [smem:[%s17536_s0 + %s15351_s26]]   ;;  %s15357_s26 = smov 12  }
   0xe   :  { %s15475_s3 = sld [smem:[%s17536_s0 + %s15352_s30]]   ;;  %s15362_s28 = smov 17  }
   0xf   :  { %s15480_s8 = sld [smem:[%s17536_s0 + %s15353_s4]]  }
  0x10   :  { %s15485_s14 = sld [smem:[%s17536_s0 + %s15354_s10]]  }
  0x11   :  { %s15490_s19 = sld [smem:[%s17536_s0 + %s15355_s15]]   ;;  %s15360_s15 = smov 15  }
  0x12   :  { %s15495_s24 = sld [smem:[%s17536_s0 + %s15356_s20]]  }
  0x13   :  { %17556 = sst [smem:[#allocation74_spill]] %s15470_s29 }
  0x14   :  { %17557 = sst [smem:[#allocation75_spill]] %s15475_s3 }
  0x15   :  { %17558 = sst [smem:[#allocation76_spill]] %s15480_s8 }
  0x16   :  { %17559 = sst [smem:[#allocation77_spill]] %s15485_s14 }
  0x17   :  { %s15500_s30 = sld [smem:[%s17536_s0 + %s15357_s26]]  }
  0x18   :  { %17560 = sst [smem:[#allocation78_spill]] %s15495_s24 }
  0x19   :  { %s15505_s6 = sld [smem:[%s17536_s0 + %s15358_s1]]  }
  0x1a   :  { %s15510_s12 = sld [smem:[%s17536_s0 + %s15359_s7]]   ;;  %s15363_s7 = smov 18  }
  0x1b   :  { %s15515_s20 = sld [smem:[%s17536_s0 + %s15360_s15]]   ;;  %s15364_s15 = smov 19  }
  0x1c   :  { %s15520_s27 = sld [smem:[%s17536_s0 + %s15361_s22]]   ;;  %s15365_s22 = smov 20  }
  0x1d   :  { %s15525_s4 = sld [smem:[%s17536_s0 + %s15362_s28]]   ;;  %s15366_s28 = smov 21  }
  0x1e   :  { %s15530_s29 = sld [smem:[%s17536_s0 + %s15363_s7]]   ;;  %s15367_s7 = smov 22  }
  0x1f   :  { %17561 = sst [smem:[#allocation79_spill]] %s15505_s6 }
  0x20   :  { %17562 = sst [smem:[#allocation80_spill]] %s15510_s12 }
  0x21   :  { %s15535_s25 = sld [smem:[%s17536_s0 + %s15364_s15]]   ;;  %s15368_s15 = smov 23  }
  0x22   :  { %17563 = sst [smem:[#allocation81_spill]] %s15520_s27 }
  0x23   :  { %s15540_s21 = sld [smem:[%s17536_s0 + %s15365_s22]]   ;;  %s15369_s22 = smov 24  }
  0x24   :  { %17564 = sst [smem:[#allocation82_spill]] %s15530_s29 }
  0x25   :  { %s15545_s12 = sld [smem:[%s17536_s0 + %s15366_s28]]   ;;  %s15370_s28 = smov 25  }
  0x26   :  { %s15550_s3 = sld [smem:[%s17536_s0 + %s15367_s7]]   ;;  %s15371_s7 = smov 26  }
  0x27   :  { %s15555_s8 = sld [smem:[%s17536_s0 + %s15368_s15]]   ;;  %s15372_s15 = smov 27  }
  0x28   :  { %s15560_s17 = sld [smem:[%s17536_s0 + %s15369_s22]]   ;;  %s15373_s22 = smov 28  }
  0x29   :  { %17565 = sst [smem:[#allocation83_spill]] %s15540_s21 }
  0x2a   :  { %s15565_s13 = sld [smem:[%s17536_s0 + %s15370_s28]]   ;;  %s15374_s28 = smov 29  }
  0x2b   :  { %s15570_s9 = sld [smem:[%s17536_s0 + %s15371_s7]]   ;;  %s15375_s7 = smov 30  }
  0x2c   :  { %17566 = sst [smem:[#allocation84_spill]] %s15550_s3 }
  0x2d   :  { %s15575_s5 = sld [smem:[%s17536_s0 + %s15372_s15]]   ;;  %s15376_s15 = smov 31  }
  0x2e   :  { %17567 = sst [smem:[#allocation85_spill]] %s15560_s17 }
  0x2f   :  { %s15580_s17 = sld [smem:[%s17536_s0 + %s15373_s22]]   ;;  %s15377_s22 = smov 32  }
  0x30   :  { %17568 = sst [smem:[#allocation86_spill]] %s15565_s13 }
  0x31   :  { %s15585_s13 = sld [smem:[%s17536_s0 + %s15374_s28]]   ;;  %s15378_s28 = smov 33  }
  0x32   :  { %s15590_s3 = sld [smem:[%s17536_s0 + %s15375_s7]]   ;;  %s15379_s7 = smov 34  }
  0x33   :  { %17569 = sst [smem:[#allocation87_spill]] %s15575_s5 }
  0x34   :  { %s15595_s5 = sld [smem:[%s17536_s0 + %s15376_s15]]   ;;  %s15380_s15 = smov 35  }
  0x35   :  { %s15600_s21 = sld [smem:[%s17536_s0 + %s15377_s22]]   ;;  %s15381_s22 = smov 36  }
  0x36   :  { %s15615_s29 = sld [smem:[%s17536_s0 + %s15380_s15]]   ;;  %s15384_s15 = smov 39  }
  0x37   :  { %17570 = sst [smem:[#allocation88_spill]] %s15585_s13 }
  0x38   :  { %17571 = sst [smem:[#allocation89_spill]] %s15590_s3 }
  0x39   :  { %s15605_s13 = sld [smem:[%s17536_s0 + %s15378_s28]]   ;;  %s15382_s28 = smov 37  }
  0x3a   :  { %s15610_s3 = sld [smem:[%s17536_s0 + %s15379_s7]]   ;;  %s15383_s7 = smov 38  }
  0x3b   :  { %17572 = sst [smem:[#allocation90_spill]] %s15600_s21 }
  0x3c   :  { %17574 = sst [smem:[#allocation92_spill]] %s15615_s29 }
  0x3d   :  { %s15620_s21 = sld [smem:[%s17536_s0 + %s15381_s22]]   ;;  %s15385_s22 = smov 40  }
  0x3e   :  { %s15630_s27 = sld [smem:[%s17536_s0 + %s15383_s7]]   ;;  %s15387_s7 = smov 42  }
  0x3f   :  { %17573 = sst [smem:[#allocation91_spill]] %s15605_s13 }
  0x40   :  { %s15625_s13 = sld [smem:[%s17536_s0 + %s15382_s28]]   ;;  %s15386_s28 = smov 41  }
  0x41   :  { %s15635_s29 = sld [smem:[%s17536_s0 + %s15384_s15]]   ;;  %s15388_s15 = smov 43  }
  0x42   :  { %s15640_s6 = sld [smem:[%s17536_s0 + %s15385_s22]]   ;;  %s15389_s22 = smov 44  }
  0x43   :  { %s15650_s24 = sld [smem:[%s17536_s0 + %s15387_s7]]   ;;  %s15391_s7 = smov 46  }
  0x44   :  { %s15660_s14 = sld [smem:[%s17536_s0 + %s15389_s22]]  }
  0x46   :  { %17575 = sst [smem:[#allocation93_spill]] %s15625_s13 }
  0x47   :  { %17576 = sst [smem:[#allocation94_spill]] %s15635_s29 }
  0x48   :  { %s15645_s13 = sld [smem:[%s17536_s0 + %s15386_s28]]   ;;  %s15390_s28 = smov 45  }
  0x49   :  { %17578 = sst [smem:[#allocation96_spill]] %s15650_s24 }
  0x4a   :  { %s15655_s29 = sld [smem:[%s17536_s0 + %s15388_s15]]   ;;  %s15392_s15 = smov 47  }
  0x4b   :  { %s15670_s24 = sld [smem:[%s17536_s0 + %s15391_s7]]  }
  0x4e   :  { %17577 = sst [smem:[#allocation95_spill]] %s15645_s13 }
  0x4f   :  { %s15665_s13 = sld [smem:[%s17536_s0 + %s15390_s28]]  }
  0x50   :  { %17579 = sst [smem:[#allocation97_spill]] %s15655_s29 }
  0x51   :  { %s15675_s29 = sld [smem:[%s17536_s0 + %s15392_s15]]  }
  0x52   :  { %100 = vsyncpa [#allocation3], 0 }
  0x53   :  { %101 = vsyncpa [#allocation6], 0 }
  0x54   :  { %102 = vsyncpa [#allocation9], 0 }
  0x55   :  { %103 = vsyncpa [#allocation12], 0 }
  0x56   :  { %104 = vsyncpa [#allocation15], 0 }
  0x57   :  { %105 = vsyncpa [#allocation18], 0 }
  0x58   :  { %106 = vsyncpa [#allocation21], 0 }
  0x59   :  { %107 = vsyncpa [#allocation24], 0 }
  0x5a   :  { %108 = vsyncpa [#allocation27], 0 }
  0x5b   :  { %109 = vsyncpa [#allocation30], 0 }
  0x5c   :  { %110 = vsyncpa [#allocation33], 0 }
  0x5d   :  { %111 = vsyncpa [#allocation36], 0 }
  0x5e   :  { %112 = vsyncpa [#allocation39], 0 }
  0x5f   :  { %113 = vsyncpa [#allocation42], 0 }
  0x60   :  { %114 = vsyncpa [#allocation45], 0 }
  0x61   :  { %115 = vsyncpa [#allocation48], 0 }
  0x62   :  { %116 = vsyncpa [#allocation4], 0  ;;  %s15393_s22 = smov [#allocation5]   ;;  %s15394_s23 = smov [#allocation8]  }
  0x63   :  { %s152_s0 = sshll.u32 %s15393_s22, 4  ;;  %s176_s26 = sshll.u32 %s15394_s23, 4  ;;  %s153_s0 = int_to_ptr.vmem [resolvable:$true] %s152_s0  ;;  %s177_s26 = int_to_ptr.vmem [resolvable:$true] %s176_s26 }
  0x64   :  { %s14680_s28 = scalar_lea.vmem %s153_s0, 96  ;;  %p14685_p1 = scmp.lt.s32.totalorder %s153_s0, %s153_s0 }
  0x65   :  { %p14681_p0 = scmp.ne.s32.totalorder %s153_s0, %s14680_s28  ;;  %p14686_p2 = scmp.lt.s32.totalorder %s14680_s28, %s14680_s28 }
  0x67   :  { %p14687_p3 = por %p14686_p2, %p14685_p1 }
  0x69   :  { %p14688_p4 = pnand %p14687_p3, %p14681_p0 }
  0x6b   :  { %14691 = shalt.err (!%p14688_p4)
}
  0x6c   :  { %s15395_s1 = smov 16   ;;  %s15396_s2 = smov 1  }
  0x6d   :  { %158 = dma.hbm_to_vmem [thread:$0]  %s15490_s19, 96, %s153_s0, [#allocation6], %s15395_s1, %s15395_s1, %s15396_s2  }
  0x6e   :  { %s14700_s7 = scalar_lea.vmem %s177_s26, 96  ;;  %p14705_p6 = scmp.lt.s32.totalorder %s177_s26, %s177_s26 }
  0x6f   :  { %p14701_p5 = scmp.ne.s32.totalorder %s177_s26, %s14700_s7  ;;  %p14706_p7 = scmp.lt.s32.totalorder %s14700_s7, %s14700_s7 }
  0x71   :  { %p14707_p8 = por %p14706_p7, %p14705_p6 }
  0x73   :  { %p14708_p9 = pnand %p14707_p8, %p14701_p5 }
  0x75   :  { %14711 = shalt.err (!%p14708_p9)
}
  0x76   :  { %182 = dma.hbm_to_vmem [thread:$0]  %s15500_s30, 96, %s177_s26, [#allocation9], %s15395_s1, %s15395_s1, %s15396_s2  }
  0x77   :  { %s15397_s10 = smov [#allocation11]   ;;  %s15398_s15 = smov [#allocation14]  }
  0x78   :  { %s202_s11 = sshll.u32 %s15397_s10, 4  ;;  %s226_s16 = sshll.u32 %s15398_s15, 4  ;;  %s203_s11 = int_to_ptr.vmem [resolvable:$true] %s202_s11  ;;  %s227_s16 = int_to_ptr.vmem [resolvable:$true] %s226_s16 }
  0x79   :  { %s14720_s18 = scalar_lea.vmem %s203_s11, 3072  ;;  %p14725_p11 = scmp.lt.s32.totalorder %s203_s11, %s203_s11 }
  0x7a   :  { %p14721_p10 = scmp.ne.s32.totalorder %s203_s11, %s14720_s18  ;;  %p14726_p12 = scmp.lt.s32.totalorder %s14720_s18, %s14720_s18 }
  0x7c   :  { %p14727_p13 = por %p14726_p12, %p14725_p11 }
  0x7e   :  { %p14728_p0 = pnand %p14727_p13, %p14721_p10 }
  0x80   :  { %14731 = shalt.err (!%p14728_p0)
}
  0x81   :  { %s15399_s19 = smov 128   ;;  %s15400_s22 = smov 8  }
  0x82   :  { %208 = dma.hbm_to_vmem [thread:$0]  %s15515_s20, 3072, %s203_s11, [#allocation12], %s15399_s19, %s15399_s19, %s15400_s22  }
  0x83   :  { %s14740_s30 = scalar_lea.vmem %s227_s16, 96  ;;  %p14745_p2 = scmp.lt.s32.totalorder %s227_s16, %s227_s16 }
  0x84   :  { %p14741_p1 = scmp.ne.s32.totalorder %s227_s16, %s14740_s30  ;;  %p14746_p3 = scmp.lt.s32.totalorder %s14740_s30, %s14740_s30 }
  0x86   :  { %p14747_p4 = por %p14746_p3, %p14745_p2 }
  0x88   :  { %p14748_p5 = pnand %p14747_p4, %p14741_p1 }
  0x8a   :  { %14751 = shalt.err (!%p14748_p5)
}
  0x8b   :  { %232 = dma.hbm_to_vmem [thread:$0]  %s15525_s4, 96, %s227_s16, [#allocation15], %s15395_s1, %s15395_s1, %s15396_s2  }
  0x8c   :  { %s15401_s0 = smov [#allocation17]   ;;  %s15402_s26 = smov [#allocation20]  }
  0x8d   :  { %s250_s23 = sshll.u32 %s15401_s0, 4  ;;  %s274_s28 = sshll.u32 %s15402_s26, 4  ;;  %s251_s23 = int_to_ptr.vmem [resolvable:$true] %s250_s23  ;;  %s275_s28 = int_to_ptr.vmem [resolvable:$true] %s274_s28 }
  0x8e   :  { %s14760_s7 = scalar_lea.vmem %s251_s23, 3072  ;;  %p14765_p7 = scmp.lt.s32.totalorder %s251_s23, %s251_s23 }
  0x8f   :  { %p14761_p6 = scmp.ne.s32.totalorder %s251_s23, %s14760_s7  ;;  %p14766_p8 = scmp.lt.s32.totalorder %s14760_s7, %s14760_s7 }
  0x91   :  { %p14767_p9 = por %p14766_p8, %p14765_p7 }
  0x93   :  { %p14768_p10 = pnand %p14767_p9, %p14761_p6 }
  0x95   :  { %14771 = shalt.err (!%p14768_p10)
}
  0x96   :  { %256 = dma.hbm_to_vmem [thread:$0]  %s15535_s25, 3072, %s251_s23, [#allocation18], %s15399_s19, %s15399_s19, %s15400_s22  }
  0x97   :  { %s14780_s20 = scalar_lea.vmem %s275_s28, 3072  ;;  %p14785_p12 = scmp.lt.s32.totalorder %s275_s28, %s275_s28 }
  0x98   :  { %p14781_p11 = scmp.ne.s32.totalorder %s275_s28, %s14780_s20  ;;  %p14786_p13 = scmp.lt.s32.totalorder %s14780_s20, %s14780_s20 }
  0x9a   :  { %p14787_p0 = por %p14786_p13, %p14785_p12 }
  0x9c   :  { %p14788_p1 = pnand %p14787_p0, %p14781_p11 }
  0x9e   :  { %14791 = shalt.err (!%p14788_p1)
}
  0x9f   :  { %280 = dma.hbm_to_vmem [thread:$0]  %s15545_s12, 3072, %s275_s28, [#allocation21], %s15399_s19, %s15399_s19, %s15400_s22  }
  0xa0   :  { %s15403_s4 = smov [#allocation23]   ;;  %s15404_s11 = smov [#allocation26]  }
  0xa1   :  { %s298_s10 = sshll.u32 %s15403_s4, 4  ;;  %s323_s15 = sshll.u32 %s15404_s11, 4  ;;  %s299_s10 = int_to_ptr.vmem [resolvable:$true] %s298_s10  ;;  %s324_s15 = int_to_ptr.vmem [resolvable:$true] %s323_s15 }
  0xa2   :  { %s14800_s16 = scalar_lea.vmem %s299_s10, 256  ;;  %p14805_p3 = scmp.lt.s32.totalorder %s299_s10, %s299_s10 }
  0xa3   :  { %p14801_p2 = scmp.ne.s32.totalorder %s299_s10, %s14800_s16  ;;  %p14806_p4 = scmp.lt.s32.totalorder %s14800_s16, %s14800_s16 }
  0xa5   :  { %p14807_p5 = por %p14806_p4, %p14805_p3 }
  0xa7   :  { %p14808_p6 = pnand %p14807_p5, %p14801_p2 }
  0xa9   :  { %14811 = shalt.err (!%p14808_p6)
}
  0xaa   :  { %304 = dma.hbm_to_vmem [thread:$0]  %s15555_s8, 256, %s299_s10, [#allocation24], %s15399_s19, %s15399_s19, %s15400_s22  }
  0xab   :  { %s14820_s25 = scalar_lea.vmem %s324_s15, 16  ;;  %s14824_s12 = scalar_lea.vmem %s324_s15, 32 }
  0xac   :  { %p14821_p7 = scmp.ne.s32.totalorder %s324_s15, %s14820_s25  ;;  %p14825_p8 = scmp.lt.s32.totalorder %s324_s15, %s324_s15 }
  0xad   :  { %p14826_p9 = scmp.lt.s32.totalorder %s14824_s12, %s14820_s25 }
  0xaf   :  { %p14827_p10 = por %p14826_p9, %p14825_p8 }
  0xb1   :  { %p14828_p11 = pnand %p14827_p10, %p14821_p7 }
  0xb3   :  { %14831 = shalt.err (!%p14828_p11)
}
  0xb4   :  { %326 = dma.hbm_to_vmem [thread:$0]  %s15570_s9, 16, %s324_s15, [#allocation27]  }
  0xb5   :  { %s15405_s18 = smov [#allocation29]   ;;  %s15406_s0 = smov [#allocation32]  }
  0xb6   :  { %s345_s30 = sshll.u32 %s15405_s18, 4  ;;  %s367_s23 = sshll.u32 %s15406_s0, 4  ;;  %s346_s30 = int_to_ptr.vmem [resolvable:$true] %s345_s30  ;;  %s368_s23 = int_to_ptr.vmem [resolvable:$true] %s367_s23 }
  0xb7   :  { %s14840_s26 = scalar_lea.vmem %s346_s30, 16  ;;  %s14844_s28 = scalar_lea.vmem %s346_s30, 32 }
  0xb8   :  { %p14841_p12 = scmp.ne.s32.totalorder %s346_s30, %s14840_s26  ;;  %p14845_p13 = scmp.lt.s32.totalorder %s346_s30, %s346_s30 }
  0xb9   :  { %p14846_p0 = scmp.lt.s32.totalorder %s14844_s28, %s14840_s26 }
  0xbb   :  { %p14847_p1 = por %p14846_p0, %p14845_p13 }
  0xbd   :  { %p14848_p2 = pnand %p14847_p1, %p14841_p12 }
  0xbf   :  { %14851 = shalt.err (!%p14848_p2)
}
  0xc0   :  { %348 = dma.hbm_to_vmem [thread:$0]  %s15580_s17, 16, %s346_s30, [#allocation30]  }
  0xc1   :  { %s14860_s8 = scalar_lea.vmem %s368_s23, 128  ;;  %p14865_p4 = scmp.lt.s32.totalorder %s368_s23, %s368_s23 }
  0xc2   :  { %p14861_p3 = scmp.ne.s32.totalorder %s368_s23, %s14860_s8  ;;  %p14866_p5 = scmp.lt.s32.totalorder %s14860_s8, %s14860_s8 }
  0xc4   :  { %p14867_p6 = por %p14866_p5, %p14865_p4 }
  0xc6   :  { %p14868_p7 = pnand %p14867_p6, %p14861_p3 }
  0xc8   :  { %14871 = shalt.err (!%p14868_p7)
}
  0xc9   :  { %370 = dma.hbm_to_vmem [thread:$0]  %s15595_s5, 128, %s368_s23, [#allocation33]  }
  0xca   :  { %s15407_s9 = smov [#allocation35]   ;;  %s15408_s20 = smov [#allocation38]  }
  0xcb   :  { %s389_s7 = sshll.u32 %s15407_s9, 4  ;;  %s409_s4 = sshll.u32 %s15408_s20, 4  ;;  %s390_s7 = int_to_ptr.vmem [resolvable:$true] %s389_s7  ;;  %s410_s4 = int_to_ptr.vmem [resolvable:$true] %s409_s4 }
  0xcc   :  { %s14880_s10 = scalar_lea.vmem %s390_s7, 16  ;;  %s14884_s11 = scalar_lea.vmem %s390_s7, 32 }
  0xcd   :  { %p14881_p8 = scmp.ne.s32.totalorder %s390_s7, %s14880_s10  ;;  %p14885_p9 = scmp.lt.s32.totalorder %s390_s7, %s390_s7 }
  0xce   :  { %p14886_p10 = scmp.lt.s32.totalorder %s14884_s11, %s14880_s10 }
  0xd0   :  { %p14887_p11 = por %p14886_p10, %p14885_p9 }
  0xd2   :  { %p14888_p12 = pnand %p14887_p11, %p14881_p8 }
  0xd4   :  { %14891 = shalt.err (!%p14888_p12)
}
  0xd5   :  { %392 = dma.hbm_to_vmem [thread:$0]  %s15610_s3, 16, %s390_s7, [#allocation36]  }
  0xd6   :  { %s14900_s17 = scalar_lea.vmem %s410_s4, 16  ;;  %s14904_s15 = scalar_lea.vmem %s410_s4, 32 }
  0xd7   :  { %p14901_p13 = scmp.ne.s32.totalorder %s410_s4, %s14900_s17  ;;  %p14905_p0 = scmp.lt.s32.totalorder %s410_s4, %s410_s4 }
  0xd8   :  { %p14906_p1 = scmp.lt.s32.totalorder %s14904_s15, %s14900_s17 }
  0xda   :  { %p14907_p2 = por %p14906_p1, %p14905_p0 }
  0xdc   :  { %p14908_p3 = pnand %p14907_p2, %p14901_p13 }
  0xde   :  { %14911 = shalt.err (!%p14908_p3)
}
  0xdf   :  { %412 = dma.hbm_to_vmem [thread:$0]  %s15620_s21, 16, %s410_s4, [#allocation39]  }
  0xe0   :  { %s15409_s5 = smov [#allocation41]   ;;  %s15410_s25 = smov [#allocation44]  }
  0xe1   :  { %s429_s16 = sshll.u32 %s15409_s5, 4  ;;  %s449_s12 = sshll.u32 %s15410_s25, 4  ;;  %s430_s16 = int_to_ptr.vmem [resolvable:$true] %s429_s16  ;;  %s450_s12 = int_to_ptr.vmem [resolvable:$true] %s449_s12 }
  0xe2   :  { %s14920_s18 = scalar_lea.vmem %s430_s16, 16  ;;  %s14924_s30 = scalar_lea.vmem %s430_s16, 32 }
  0xe3   :  { %p14921_p4 = scmp.ne.s32.totalorder %s430_s16, %s14920_s18  ;;  %p14925_p5 = scmp.lt.s32.totalorder %s430_s16, %s430_s16 }
  0xe4   :  { %p14926_p6 = scmp.lt.s32.totalorder %s14924_s30, %s14920_s18 }
  0xe6   :  { %p14927_p7 = por %p14926_p6, %p14925_p5 }
  0xe8   :  { %p14928_p8 = pnand %p14927_p7, %p14921_p4 }
  0xea   :  { %14931 = shalt.err (!%p14928_p8)
}
  0xeb   :  { %432 = dma.hbm_to_vmem [thread:$0]  %s15630_s27, 16, %s430_s16, [#allocation42]  }
  0xec   :  { %s14940_s3 = scalar_lea.vmem %s450_s12, 16  ;;  %s14944_s0 = scalar_lea.vmem %s450_s12, 32 }
  0xed   :  { %p14941_p9 = scmp.ne.s32.totalorder %s450_s12, %s14940_s3  ;;  %p14945_p10 = scmp.lt.s32.totalorder %s450_s12, %s450_s12 }
  0xee   :  { %p14946_p11 = scmp.lt.s32.totalorder %s14944_s0, %s14940_s3 }
  0xf0   :  { %p14947_p12 = por %p14946_p11, %p14945_p10 }
  0xf2   :  { %p14948_p13 = pnand %p14947_p12, %p14941_p9 }
  0xf4   :  { %14951 = shalt.err (!%p14948_p13)
}
  0xf5   :  { %452 = dma.hbm_to_vmem [thread:$0]  %s15640_s6, 16, %s450_s12, [#allocation45]  }
  0xf6   :  { %s15411_s21 = smov [#allocation47]   ;;  %s15412_s26 = smov [#allocation2]  }
  0xf7   :  { %s473_s23 = sshll.u32 %s15411_s21, 4  ;;  %s140_s28 = sshll.u32 %s15412_s26, 4  ;;  %s474_s23 = int_to_ptr.vmem [resolvable:$true] %s473_s23  ;;  %s141_s28 = int_to_ptr.vmem [resolvable:$true] %s140_s28 }
  0xf8   :  { %s14960_s8 = scalar_lea.vmem %s474_s23, 16  ;;  %s14964_s9 = scalar_lea.vmem %s474_s23, 32 }
  0xf9   :  { %p14961_p0 = scmp.ne.s32.totalorder %s474_s23, %s14960_s8  ;;  %p14965_p1 = scmp.lt.s32.totalorder %s474_s23, %s474_s23 }
  0xfa   :  { %p14966_p2 = scmp.lt.s32.totalorder %s14964_s9, %s14960_s8 }
  0xfc   :  { %p14967_p3 = por %p14966_p2, %p14965_p1 }
  0xfe   :  { %p14968_p4 = pnand %p14967_p3, %p14961_p0 }
 0x100   :  { %14971 = shalt.err (!%p14968_p4)
}
 0x101   :  { %476 = dma.hbm_to_vmem [thread:$0]  %s15660_s14, 16, %s474_s23, [#allocation48]  }
 0x102   :  { %s14980_s27 = scalar_lea.vmem %s141_s28, 96  ;;  %p14985_p6 = scmp.lt.s32.totalorder %s141_s28, %s141_s28 }
 0x103   :  { %p14981_p5 = scmp.ne.s32.totalorder %s141_s28, %s14980_s27  ;;  %p14986_p7 = scmp.lt.s32.totalorder %s14980_s27, %s14980_s27 }
 0x105   :  { %p14987_p8 = por %p14986_p7, %p14985_p6 }
 0x107   :  { %p14988_p9 = pnand %p14987_p8, %p14981_p5 }
 0x109   :  { %14991 = shalt.err (!%p14988_p9)
}
 0x10a   :  { %s17580_s6 = sld [smem:[#allocation77_spill]]  ;;  %s15413_s7 = smov [#allocation7]  }
 0x10b   :  { %s164_s20 = sshll.u32 %s15413_s7, 4  ;;  %s15414_s4 = smov [#allocation10]   ;;  %s165_s20 = int_to_ptr.vmem [resolvable:$true] %s164_s20 }
 0x10c   :  { %s188_s10 = sshll.u32 %s15414_s4, 4  ;;  %s15000_s11 = scalar_lea.vmem %s165_s20, 3072  ;;  %s189_s10 = int_to_ptr.vmem [resolvable:$true] %s188_s10 }
 0x10d   :  { %p15001_p10 = scmp.ne.s32.totalorder %s165_s20, %s15000_s11  ;;  %p15005_p11 = scmp.lt.s32.totalorder %s165_s20, %s165_s20 }
 0x10e   :  { %p15006_p12 = scmp.lt.s32.totalorder %s15000_s11, %s15000_s11 }
 0x110   :  { %146 = dma.hbm_to_vmem [thread:$0]  %s17580_s6, 96, %s141_s28, [#allocation3], %s15395_s1, %s15395_s1, %s15396_s2  }
 0x111   :  { %p15007_p13 = por %p15006_p12, %p15005_p11 }
 0x113   :  { %p15008_p0 = pnand %p15007_p13, %p15001_p10 }
 0x115   :  { %15011 = shalt.err (!%p15008_p0)
}
 0x116   :  { %s17581_s14 = sld [smem:[#allocation78_spill]]  ;;  %s15020_s17 = scalar_lea.vmem %s189_s10, 96 }
 0x117   :  { %p15021_p1 = scmp.ne.s32.totalorder %s189_s10, %s15020_s17  ;;  %p15025_p2 = scmp.lt.s32.totalorder %s189_s10, %s189_s10 }
 0x118   :  { %p15026_p3 = scmp.lt.s32.totalorder %s15020_s17, %s15020_s17 }
 0x11a   :  { %p15027_p4 = por %p15026_p3, %p15025_p2 }
 0x11c   :  { %170 = dma.hbm_to_vmem [thread:$0]  %s17581_s14, 3072, %s165_s20, [#allocation6], %s15399_s19, %s15399_s19, %s15400_s22  }
 0x11d   :  { %p15028_p5 = pnand %p15027_p4, %p15021_p1 }
 0x11f   :  { %15031 = shalt.err (!%p15028_p5)
}
 0x120   :  { %s17582_s15 = sld [smem:[#allocation79_spill]]  ;;  %s15415_s5 = smov [#allocation13]  }
 0x121   :  { %s214_s16 = sshll.u32 %s15415_s5, 4  ;;  %s15416_s25 = smov [#allocation16]   ;;  %s215_s16 = int_to_ptr.vmem [resolvable:$true] %s214_s16 }
 0x122   :  { %s238_s12 = sshll.u32 %s15416_s25, 4  ;;  %s15040_s18 = scalar_lea.vmem %s215_s16, 96  ;;  %s239_s12 = int_to_ptr.vmem [resolvable:$true] %s238_s12 }
 0x123   :  { %p15041_p6 = scmp.ne.s32.totalorder %s215_s16, %s15040_s18  ;;  %p15045_p7 = scmp.lt.s32.totalorder %s215_s16, %s215_s16 }
 0x124   :  { %p15046_p8 = scmp.lt.s32.totalorder %s15040_s18, %s15040_s18 }
 0x126   :  { %194 = dma.hbm_to_vmem [thread:$0]  %s17582_s15, 96, %s189_s10, [#allocation9], %s15395_s1, %s15395_s1, %s15396_s2  }
 0x127   :  { %p15047_p9 = por %p15046_p8, %p15045_p7 }
 0x129   :  { %p15048_p10 = pnand %p15047_p9, %p15041_p6 }
 0x12b   :  { %15051 = shalt.err (!%p15048_p10)
}
 0x12c   :  { %s17583_s30 = sld [smem:[#allocation81_spill]]  ;;  %s15060_s3 = scalar_lea.vmem %s239_s12, 3072 }
 0x12d   :  { %p15061_p11 = scmp.ne.s32.totalorder %s239_s12, %s15060_s3  ;;  %p15065_p12 = scmp.lt.s32.totalorder %s239_s12, %s239_s12 }
 0x12e   :  { %p15066_p13 = scmp.lt.s32.totalorder %s15060_s3, %s15060_s3 }
 0x130   :  { %p15067_p0 = por %p15066_p13, %p15065_p12 }
 0x132   :  { %220 = dma.hbm_to_vmem [thread:$0]  %s17583_s30, 96, %s215_s16, [#allocation12], %s15395_s1, %s15395_s1, %s15396_s2  }
 0x133   :  { %p15068_p1 = pnand %p15067_p0, %p15061_p11 }
 0x135   :  { %15071 = shalt.err (!%p15068_p1)
}
 0x136   :  { %s17584_s0 = sld [smem:[#allocation82_spill]]  ;;  %s15417_s21 = smov [#allocation19]  }
 0x137   :  { %s262_s23 = sshll.u32 %s15417_s21, 4  ;;  %s15418_s26 = smov [#allocation22]   ;;  %s263_s23 = int_to_ptr.vmem [resolvable:$true] %s262_s23 }
 0x138   :  { %s286_s28 = sshll.u32 %s15418_s26, 4  ;;  %s15080_s8 = scalar_lea.vmem %s263_s23, 96  ;;  %s287_s28 = int_to_ptr.vmem [resolvable:$true] %s286_s28 }
 0x139   :  { %p15081_p2 = scmp.ne.s32.totalorder %s263_s23, %s15080_s8  ;;  %p15085_p3 = scmp.lt.s32.totalorder %s263_s23, %s263_s23 }
 0x13a   :  { %p15086_p4 = scmp.lt.s32.totalorder %s15080_s8, %s15080_s8 }
 0x13c   :  { %244 = dma.hbm_to_vmem [thread:$0]  %s17584_s0, 3072, %s239_s12, [#allocation15], %s15399_s19, %s15399_s19, %s15400_s22  }
 0x13d   :  { %p15087_p5 = por %p15086_p4, %p15085_p3 }
 0x13f   :  { %p15088_p6 = pnand %p15087_p5, %p15081_p2 }
 0x141   :  { %15091 = shalt.err (!%p15088_p6)
}
 0x142   :  { %s17585_s9 = sld [smem:[#allocation83_spill]]  ;;  %s15100_s27 = scalar_lea.vmem %s287_s28, 96 }
 0x143   :  { %p15101_p7 = scmp.ne.s32.totalorder %s287_s28, %s15100_s27  ;;  %p15105_p8 = scmp.lt.s32.totalorder %s287_s28, %s287_s28 }
 0x144   :  { %p15106_p9 = scmp.lt.s32.totalorder %s15100_s27, %s15100_s27 }
 0x146   :  { %p15107_p10 = por %p15106_p9, %p15105_p8 }
 0x148   :  { %268 = dma.hbm_to_vmem [thread:$0]  %s17585_s9, 96, %s263_s23, [#allocation18], %s15395_s1, %s15395_s1, %s15396_s2  }
 0x149   :  { %p15108_p11 = pnand %p15107_p10, %p15101_p7 }
 0x14b   :  { %15111 = shalt.err (!%p15108_p11)
}
 0x14c   :  { %s17586_s6 = sld [smem:[#allocation84_spill]]  ;;  %s15419_s7 = smov [#allocation25]  }
 0x14d   :  { %s311_s20 = sshll.u32 %s15419_s7, 4  ;;  %s15420_s4 = smov [#allocation28]   ;;  %s312_s20 = int_to_ptr.vmem [resolvable:$true] %s311_s20 }
 0x14e   :  { %s332_s10 = sshll.u32 %s15420_s4, 4  ;;  %s15120_s11 = scalar_lea.vmem %s312_s20, 16  ;;  %s333_s10 = int_to_ptr.vmem [resolvable:$true] %s332_s10 }
 0x14f   :  { %p15121_p12 = scmp.ne.s32.totalorder %s312_s20, %s15120_s11  ;;  %s15124_s14 = scalar_lea.vmem %s312_s20, 32 }
 0x150   :  { %p15125_p13 = scmp.lt.s32.totalorder %s312_s20, %s312_s20  ;;  %p15126_p0 = scmp.lt.s32.totalorder %s15124_s14, %s15120_s11 }
 0x152   :  { %292 = dma.hbm_to_vmem [thread:$0]  %s17586_s6, 96, %s287_s28, [#allocation21], %s15395_s1, %s15395_s1, %s15396_s2  }
 0x153   :  { %p15127_p1 = por %p15126_p0, %p15125_p13 }
 0x155   :  { %p15128_p2 = pnand %p15127_p1, %p15121_p12 }
 0x157   :  { %15131 = shalt.err (!%p15128_p2)
}
 0x158   :  { %s17587_s17 = sld [smem:[#allocation85_spill]]  ;;  %s15140_s15 = scalar_lea.vmem %s333_s10, 256 }
 0x159   :  { %p15141_p3 = scmp.ne.s32.totalorder %s333_s10, %s15140_s15  ;;  %p15145_p4 = scmp.lt.s32.totalorder %s333_s10, %s333_s10 }
 0x15a   :  { %p15146_p5 = scmp.lt.s32.totalorder %s15140_s15, %s15140_s15 }
 0x15c   :  { %p15147_p6 = por %p15146_p5, %p15145_p4 }
 0x15e   :  { %314 = dma.hbm_to_vmem [thread:$0]  %s17587_s17, 16, %s312_s20, [#allocation24]  }
 0x15f   :  { %p15148_p7 = pnand %p15147_p6, %p15141_p3 }
 0x161   :  { %15151 = shalt.err (!%p15148_p7)
}
 0x162   :  { %s17588_s1 = sld [smem:[#allocation87_spill]]  ;;  %s15421_s2 = smov [#allocation31]  }
 0x163   :  { %s357_s5 = sshll.u32 %s15421_s2, 4  ;;  %s15422_s16 = smov [#allocation34]   ;;  %s358_s5 = int_to_ptr.vmem [resolvable:$true] %s357_s5 }
 0x164   :  { %s377_s25 = sshll.u32 %s15422_s16, 4  ;;  %s15160_s12 = scalar_lea.vmem %s358_s5, 16  ;;  %s378_s25 = int_to_ptr.vmem [resolvable:$true] %s377_s25 }
 0x165   :  { %p15161_p8 = scmp.ne.s32.totalorder %s358_s5, %s15160_s12  ;;  %s15164_s18 = scalar_lea.vmem %s358_s5, 32 }
 0x166   :  { %p15165_p9 = scmp.lt.s32.totalorder %s358_s5, %s358_s5  ;;  %p15166_p10 = scmp.lt.s32.totalorder %s15164_s18, %s15160_s12 }
 0x168   :  { %338 = dma.hbm_to_vmem [thread:$0]  %s17588_s1, 256, %s333_s10, [#allocation27], %s15399_s19, %s15399_s19, %s15400_s22  }
 0x169   :  { %p15167_p11 = por %p15166_p10, %p15165_p9 }
 0x16b   :  { %p15168_p12 = pnand %p15167_p11, %p15161_p8 }
 0x16d   :  { %15171 = shalt.err (!%p15168_p12)
}
 0x16e   :  { %s17589_s30 = sld [smem:[#allocation89_spill]]  ;;  %s15180_s3 = scalar_lea.vmem %s378_s25, 16 }
 0x16f   :  { %p15181_p13 = scmp.ne.s32.totalorder %s378_s25, %s15180_s3  ;;  %s15184_s0 = scalar_lea.vmem %s378_s25, 32 }
 0x170   :  { %p15185_p0 = scmp.lt.s32.totalorder %s378_s25, %s378_s25  ;;  %p15186_p1 = scmp.lt.s32.totalorder %s15184_s0, %s15180_s3 }
 0x172   :  { %p15187_p2 = por %p15186_p1, %p15185_p0 }
 0x174   :  { %360 = dma.hbm_to_vmem [thread:$0]  %s17589_s30, 16, %s358_s5, [#allocation30]  }
 0x175   :  { %p15188_p3 = pnand %p15187_p2, %p15181_p13 }
 0x177   :  { %15191 = shalt.err (!%p15188_p3)
}
 0x178   :  { %s17590_s19 = sld [smem:[#allocation90_spill]]  ;;  %s15423_s22 = smov [#allocation37]  }
 0x179   :  { %s399_s21 = sshll.u32 %s15423_s22, 4  ;;  %s15424_s23 = smov [#allocation40]   ;;  %s400_s21 = int_to_ptr.vmem [resolvable:$true] %s399_s21 }
 0x17a   :  { %s419_s26 = sshll.u32 %s15424_s23, 4  ;;  %s15200_s28 = scalar_lea.vmem %s400_s21, 16  ;;  %s420_s26 = int_to_ptr.vmem [resolvable:$true] %s419_s26 }
 0x17b   :  { %p15201_p4 = scmp.ne.s32.totalorder %s400_s21, %s15200_s28  ;;  %s15204_s8 = scalar_lea.vmem %s400_s21, 32 }
 0x17c   :  { %p15205_p5 = scmp.lt.s32.totalorder %s400_s21, %s400_s21  ;;  %p15206_p6 = scmp.lt.s32.totalorder %s15204_s8, %s15200_s28 }
 0x17e   :  { %380 = dma.hbm_to_vmem [thread:$0]  %s17590_s19, 16, %s378_s25, [#allocation33]  }
 0x17f   :  { %p15207_p7 = por %p15206_p6, %p15205_p5 }
 0x181   :  { %p15208_p8 = pnand %p15207_p7, %p15201_p4 }
 0x183   :  { %15211 = shalt.err (!%p15208_p8)
}
 0x184   :  { %s17591_s9 = sld [smem:[#allocation92_spill]]  ;;  %s15220_s27 = scalar_lea.vmem %s420_s26, 16 }
 0x185   :  { %p15221_p9 = scmp.ne.s32.totalorder %s420_s26, %s15220_s27  ;;  %s15224_s6 = scalar_lea.vmem %s420_s26, 32 }
 0x186   :  { %p15225_p10 = scmp.lt.s32.totalorder %s420_s26, %s420_s26  ;;  %p15226_p11 = scmp.lt.s32.totalorder %s15224_s6, %s15220_s27 }
 0x188   :  { %p15227_p12 = por %p15226_p11, %p15225_p10 }
 0x18a   :  { %402 = dma.hbm_to_vmem [thread:$0]  %s17591_s9, 16, %s400_s21, [#allocation36]  }
 0x18b   :  { %p15228_p13 = pnand %p15227_p12, %p15221_p9 }
 0x18d   :  { %15231 = shalt.err (!%p15228_p13)
}
 0x18e   :  { %s17592_s7 = sld [smem:[#allocation93_spill]]  ;;  %s15425_s20 = smov [#allocation43]  }
 0x18f   :  { %s439_s4 = sshll.u32 %s15425_s20, 4  ;;  %s15426_s10 = smov [#allocation46]   ;;  %s440_s4 = int_to_ptr.vmem [resolvable:$true] %s439_s4 }
 0x190   :  { %s461_s11 = sshll.u32 %s15426_s10, 4  ;;  %s15240_s14 = scalar_lea.vmem %s440_s4, 16  ;;  %s462_s11 = int_to_ptr.vmem [resolvable:$true] %s461_s11 }
 0x191   :  { %p15241_p0 = scmp.ne.s32.totalorder %s440_s4, %s15240_s14  ;;  %s15244_s17 = scalar_lea.vmem %s440_s4, 32 }
 0x192   :  { %p15245_p1 = scmp.lt.s32.totalorder %s440_s4, %s440_s4  ;;  %p15246_p2 = scmp.lt.s32.totalorder %s15244_s17, %s15240_s14 }
 0x194   :  { %422 = dma.hbm_to_vmem [thread:$0]  %s17592_s7, 16, %s420_s26, [#allocation39]  }
 0x195   :  { %p15247_p3 = por %p15246_p2, %p15245_p1 }
 0x197   :  { %p15248_p4 = pnand %p15247_p3, %p15241_p0 }
 0x199   :  { %15251 = shalt.err (!%p15248_p4)
}
 0x19a   :  { %s17593_s15 = sld [smem:[#allocation94_spill]]  ;;  %s15260_s1 = scalar_lea.vmem %s462_s11, 128 }
 0x19b   :  { %p15261_p5 = scmp.ne.s32.totalorder %s462_s11, %s15260_s1  ;;  %p15265_p6 = scmp.lt.s32.totalorder %s462_s11, %s462_s11 }
 0x19c   :  { %p15266_p7 = scmp.lt.s32.totalorder %s15260_s1, %s15260_s1 }
 0x19e   :  { %p15267_p8 = por %p15266_p7, %p15265_p6 }
 0x1a0   :  { %442 = dma.hbm_to_vmem [thread:$0]  %s17593_s15, 16, %s440_s4, [#allocation42]  }
 0x1a1   :  { %p15268_p9 = pnand %p15267_p8, %p15261_p5 }
 0x1a3   :  { %15271 = shalt.err (!%p15268_p9)
}
 0x1a4   :  { %s17594_s2 = sld [smem:[#allocation96_spill]]  ;;  %s15427_s5 = smov [#allocation49]  }
 0x1a5   :  { %s485_s16 = sshll.u32 %s15427_s5, 4  ;;  %s486_s16 = int_to_ptr.vmem [resolvable:$true] %s485_s16 }
 0x1a6   :  { %s15280_s25 = scalar_lea.vmem %s486_s16, 16  ;;  %s15284_s12 = scalar_lea.vmem %s486_s16, 32 }
 0x1a7   :  { %p15281_p10 = scmp.ne.s32.totalorder %s486_s16, %s15280_s25  ;;  %p15285_p11 = scmp.lt.s32.totalorder %s486_s16, %s486_s16 }
 0x1a8   :  { %p15286_p12 = scmp.lt.s32.totalorder %s15284_s12, %s15280_s25 }
 0x1aa   :  { %464 = dma.hbm_to_vmem [thread:$0]  %s17594_s2, 128, %s462_s11, [#allocation45]  }
 0x1ab   :  { %p15287_p13 = por %p15286_p12, %p15285_p11 }
 0x1ad   :  { %p15288_p0 = pnand %p15287_p13, %p15281_p10 }
 0x1af   :  { %15291 = shalt.err (!%p15288_p0)
}
 0x1b0   :  { %488 = dma.hbm_to_vmem [thread:$0]  %s15670_s24, 16, %s486_s16, [#allocation48]  }
 0x1b1   :  { %15312 = dma.done.wait [#allocation3], 96  }
 0x1b2   :  { %15313 = vsyncadd [#allocation3], 4294967200 }
 0x1b3   :  { %15314 = dma.done.wait [#allocation6], 3168  }
 0x1b4   :  { %15315 = vsyncadd [#allocation6], 4294964128 }
 0x1b5   :  { %15316 = dma.done.wait [#allocation9], 192  }
 0x1b6   :  { %15317 = vsyncadd [#allocation9], 4294967104 }
 0x1b7   :  { %15318 = dma.done.wait [#allocation12], 3168  }
 0x1b8   :  { %15319 = vsyncadd [#allocation12], 4294964128 }
 0x1b9   :  { %15320 = dma.done.wait [#allocation15], 3168  }
 0x1ba   :  { %15321 = vsyncadd [#allocation15], 4294964128 }
 0x1bb   :  { %15322 = dma.done.wait [#allocation18], 3168  }
 0x1bc   :  { %15323 = vsyncadd [#allocation18], 4294964128 }
 0x1bd   :  { %15324 = dma.done.wait [#allocation21], 3168  }
 0x1be   :  { %15325 = vsyncadd [#allocation21], 4294964128 }
 0x1bf   :  { %15326 = dma.done.wait [#allocation24], 272  }
 0x1c0   :  { %15327 = vsyncadd [#allocation24], 4294967024 }
 0x1c1   :  { %15328 = dma.done.wait [#allocation27], 272  }
 0x1c2   :  { %15329 = vsyncadd [#allocation27], 4294967024 }
 0x1c3   :  { %15330 = dma.done.wait [#allocation30], 32  }
 0x1c4   :  { %15331 = vsyncadd [#allocation30], 4294967264 }
 0x1c5   :  { %15332 = dma.done.wait [#allocation33], 144  }
 0x1c6   :  { %15333 = vsyncadd [#allocation33], 4294967152 }
 0x1c7   :  { %15334 = dma.done.wait [#allocation36], 32  }
 0x1c8   :  { %15335 = vsyncadd [#allocation36], 4294967264 }
 0x1c9   :  { %15336 = dma.done.wait [#allocation39], 32  }
 0x1ca   :  { %15337 = vsyncadd [#allocation39], 4294967264 }
 0x1cb   :  { %15338 = dma.done.wait [#allocation42], 32  }
 0x1cc   :  { %15339 = vsyncadd [#allocation42], 4294967264 }
 0x1cd   :  { %15340 = dma.done.wait [#allocation45], 144  }
 0x1ce   :  { %15341 = vsyncadd [#allocation45], 4294967152 }
 0x1cf   :  { %15342 = dma.done.wait [#allocation48], 32  }
 0x1d0   :  { %15343 = vsyncadd [#allocation48], 4294967264  ;;  %s17595_s24 = sld [smem:[#allocation68_spill]]  ;;  %v15428_v0 = vmov 0.0   ;;  %vm15429_vm0 = vmmov 0   ;;  %v613_v1 = vld [vmem:[#allocation23 + $0x8] sm:$0xff] }
 0x1d1   :  { %s17596_s18 = sld [smem:[#allocation69_spill]]  ;;  %12459 = vmatprep.subr.mxu1 %v15428_v0  ;;  %12463 = vmatprep.mubr.msk.f32.mxu1 %vm15429_vm0, %v15428_v0  ;;  %v612_v2 = vld [vmem:[#allocation23] sm:$0xff]  ;;  %vm621_vm1 = vcmask 130048   ;;  %vm711_vm2 = vcmask 195584   ;;  %v11307_v31 = vld [vmem:[#allocation25] ss:$0 sm:$0xff] }
 0x1d2   :  { %s17597_s30 = sld [smem:[#allocation70_spill]]  ;;  %12460 = vmatpush3.msra.mxu1 %v613_v1  ;;  %vm831_vm3 = vcmask 23552   ;;  %vm1084_vm4 = vcmask 261120   ;;  %vm1876_vm5 = vcmask 392192   ;;  %vm7517_vm6 = vcmask 64512   ;;  %s15431_s7 = smov [#allocation50]  }
 0x1d3   :  { %s17598_s3 = sld [smem:[#allocation71_spill]]  ;;  %12461 = vmatprep.subr.mxu1 %v15428_v0  ;;  %vm11051_vm7 = vcmask 1043456   ;;  %vm11154_vm8 = vcmask 1041408   ;;  %vm11047_vm9 = vcmask 31744   ;;  %vm11150_vm10 = vcmask 539648   ;;  %s11236_s20 = sshll.u32 %s15431_s7, 4  ;;  %s11237_s20 = int_to_ptr.vmem [resolvable:$true] %s11236_s20 }
 0x1d4   :  { %12462 = vmatpush3.msra.mxu1 %v612_v2  ;;  %s17599_s0 = sld [smem:[#allocation76_spill]]  ;;  %vm11228_vm11 = vcmask 123904   ;;  %p15297_p2 = scmp.lt.s32.totalorder %s11237_s20, %s11237_s20 }
 0x1d5   :  { %s17600_s19 = sld [smem:[#allocation75_spill]] }
 0x1d6   :  { %v606_v3 = vld [vmem:[%s17595_s24] sm:$0xff]  ;;  %v607_v7 = vld [vmem:[%s17595_s24 + $0x8] sm:$0xff]  ;;  %v608_v10 = vld [vmem:[%s17595_s24 + $0x10] sm:$0xff]  ;;  %s17601_s22 = sld [smem:[#allocation80_spill]] }
 0x1d7   :  { %v611_v4 = vld [vmem:[%s17596_s18 + $0x10] sm:$0xff]  ;;  %v610_v6 = vld [vmem:[%s17596_s18 + $0x8] sm:$0xff]  ;;  %12464 = vmatmul.mubr.msk.f32.vlgmr.msra.gmra.mxu1 %vm621_vm1, %v606_v3  ;;  %v609_v8 = vld [vmem:[%s17596_s18] sm:$0xff]  ;;  %s17602_s21 = sld [smem:[#allocation72_spill]] }
 0x1d8   :  { %v582_v5 = vld [vmem:[%s17597_s30] sm:$0xff]  ;;  %12472 = vmatprep.subr.mxu1 %v611_v4  ;;  %12466 = vmatprep.mubr.msk.f32.mxu1 %vm15429_vm0, %v15428_v0  ;;  %v583_v12 = vld [vmem:[%s17597_s30 + $0x8] sm:$0xff]  ;;  %v584_v15 = vld [vmem:[%s17597_s30 + $0x10] sm:$0xff]  ;;  %s17603_s23 = sld [smem:[#allocation73_spill]] }
 0x1d9   :  { %12493 = vmatprep.mubr.msk.f32.mxu0 %vm711_vm2, %v582_v5  ;;  %12473 = vmatpush3.msra.mxu1 %v611_v4  ;;  %v588_v9 = vld [vmem:[%s17598_s3] sm:$0xff]  ;;  %v589_v13 = vld [vmem:[%s17598_s3 + $0x8] sm:$0xff]  ;;  %v590_v16 = vld [vmem:[%s17598_s3 + $0x10] sm:$0xff]  ;;  %s17604_s26 = sld [smem:[#allocation86_spill]] }
 0x1da   :  { %12474 = vmatprep.subr.mxu1 %v610_v6  ;;  %v15772_v11 = vsub.f32 %v582_v5, %v588_v9  ;;  %v15777_v14 = vsub.f32 %v583_v12, %v589_v13  ;;  %v15785_v17 = vsub.f32 %v584_v15, %v590_v16  ;;  %v585_v18 = vld [vmem:[%s17597_s30 + $0x18] sm:$0xff]  ;;  %v586_v21 = vld [vmem:[%s17597_s30 + $0x20] sm:$0xff]  ;;  %v587_v24 = vld [vmem:[%s17597_s30 + $0x28] sm:$0xff]  ;;  %s17605_s28 = sld [smem:[#allocation88_spill]] }
 0x1db   :  { %12475 = vmatpush3.msra.mxu1 %v610_v6  ;;  %v591_v19 = vld [vmem:[%s17598_s3 + $0x18] sm:$0xff]  ;;  %v592_v22 = vld [vmem:[%s17598_s3 + $0x20] sm:$0xff]  ;;  %v593_v25 = vld [vmem:[%s17598_s3 + $0x28] sm:$0xff]  ;;  %s17606_s8 = sld [smem:[#allocation91_spill]] }
 0x1dc   :  { %12467 = vmatmul.mubr.msk.f32.gmra.mxu1 %vm621_vm1, %v607_v7  ;;  %12476 = vmatprep.subr.mxu1 %v609_v8  ;;  %v15789_v20 = vsub.f32 %v585_v18, %v591_v19  ;;  %v15797_v23 = vsub.f32 %v586_v21, %v592_v22  ;;  %v15801_v26 = vsub.f32 %v587_v24, %v593_v25  ;;  %v1083_v41 = vld [vmem:[%s17599_s0 + $0x18] sm:$0xff]  ;;  %v1082_v45 = vld [vmem:[%s17599_s0 + $0x10] sm:$0xff]  ;;  %v1081_v57 = vld [vmem:[%s17599_s0 + $0x8] sm:$0xff]  ;;  %s17607_s9 = sld [smem:[#allocation74_spill]] }
 0x1dd   :  { %12469 = vmatprep.mubr.msk.f32.mxu1 %vm15429_vm0, %v15428_v0  ;;  %12477 = vmatpush3.msra.mxu1 %v609_v8  ;;  %v1079_v43 = vld [vmem:[%s17600_s19 + $0x18] sm:$0xff]  ;;  %v1078_v46 = vld [vmem:[%s17600_s19 + $0x10] sm:$0xff]  ;;  %v1077_v58 = vld [vmem:[%s17600_s19 + $0x8] sm:$0xff]  ;;  %s17608_s27 = sld [smem:[#allocation95_spill]] }
 0x1de   :  { %v1080_v61 = vld [vmem:[%s17599_s0] sm:$0xff]  ;;  %s17609_s6 = sld [smem:[#allocation97_spill]] }
 0x1df   :  { %v1076_v62 = vld [vmem:[%s17600_s19] sm:$0xff] }
 0x1e0   :  { %12470 = vmatmul.mubr.msk.f32.gmra.mxu1 %vm621_vm1, %v608_v10 }
 0x1e1   :  { %12478 = vmatprep.mubr.msk.f32.mxu1 %vm711_vm2, %v15772_v11 }
 0x1e4   :  { %12479 = vmatmul.mubr.msk.f32.vlgmr.msra.gmra.mxu1 %vm711_vm2, %v15777_v14 }
 0x1e5   :  { %12481 = vmatprep.mubr.msk.f32.mxu1 %vm711_vm2, %v15785_v17 }
 0x1e8   :  { %12482 = vmatmul.mubr.msk.f32.gmra.mxu1 %vm711_vm2, %v15789_v20 }
 0x1e9   :  { %12484 = vmatprep.mubr.msk.f32.mxu1 %vm711_vm2, %v15797_v23 }
 0x1ec   :  { %12485 = vmatmul.mubr.msk.f32.gmra.mxu1 %vm711_vm2, %v15801_v26 }
 0x1ed   :  { %12508 = vmatprep.mubr.msk.f32.mxu1 %vm711_vm2, %v588_v9 }
 0x297   :  { %v697_v27 = vpop.f32.mrf.mxu1 }
 0x298   :  { %v15818_v37 = vadd.f32 %v11307_v31, %v697_v27 }
 0x299   :  { %v12465_v28 = vpop.f32.mrf.mxu1 }
 0x29c   :  { %v702_v29 = vpop.f32.mrf.mxu1 }
 0x29d   :  { %v15810_v35 = vadd.f32 %v11307_v31, %v702_v29 }
 0x29e   :  { %v12468_v30 = vpop.f32.mrf.mxu1 }
 0x2a0   :  { %v707_v32 = vpop.f32.mrf.mxu1 }
 0x2a1   :  { %v15808_v33 = vadd.f32 %v11307_v31, %v707_v32  ;;  %v11342_v31 = vld [vmem:[#allocation5] ss:$0 sm:$0xff] }
 0x2a2   :  { %v12471_v34 = vpop.f32.mrf.mxu1 }
 0x2a3   :  { %12487 = vmatprep.subr.mxu0 %v15808_v33  ;;  %12502 = vmatprep.subr.mxu1 %v15808_v33 }
 0x2a4   :  { %12488 = vmatpush3.msra.mxu0 %v15808_v33  ;;  %12503 = vmatpush3.msra.mxu1 %v15808_v33  ;;  %v15816_v36 = vpop.f32.mrf.mxu1 }
 0x2a5   :  { %12489 = vmatprep.subr.mxu0 %v15810_v35  ;;  %12504 = vmatprep.subr.mxu1 %v15810_v35  ;;  %v826_v40 = vmul.f32 %v15816_v36, %v15816_v36 }
 0x2a6   :  { %12490 = vmatpush3.msra.mxu0 %v15810_v35  ;;  %12505 = vmatpush3.msra.mxu1 %v15810_v35  ;;  %v15824_v38 = vpop.f32.mrf.mxu1 }
 0x2a7   :  { %12491 = vmatprep.subr.mxu0 %v15818_v37  ;;  %12506 = vmatprep.subr.mxu1 %v15818_v37  ;;  %v825_v39 = vmul.f32 %v15824_v38, %v15824_v38  ;;  %v835_v44 = vsel %vm831_vm3, %v826_v40, 0.0 }
 0x2a8   :  { %12492 = vmatpush3.msra.mxu0 %v15818_v37  ;;  %12507 = vmatpush3.msra.mxu1 %v15818_v37  ;;  %v15850_v47 = vpop.f32.mrf.mxu1 }
 0x2a9   :  { %12494 = vmatmul.mubr.msk.f32.vlgmr.msra.gmra.mxu0 %vm711_vm2, %v583_v12  ;;  %12509 = vmatmul.mubr.msk.f32.vlgmr.msra.gmra.mxu1 %vm711_vm2, %v589_v13  ;;  %v832_v42 = vsel %vm831_vm3, %v825_v39, 0.0  ;;  %v828_v49 = vmul.f32 %v15850_v47, %v15850_v47  ;;  %v1388_v13 = vld [vmem:[#allocation7 + $0x18] sm:$0xff] }
 0x2aa   :  { %12496 = vmatprep.mubr.msk.f32.mxu0 %vm711_vm2, %v584_v15  ;;  %12511 = vmatprep.mubr.msk.f32.mxu1 %vm711_vm2, %v590_v16  ;;  %v15852_v48 = vpop.f32.mrf.mxu1  ;;  %v1387_v15 = vld [vmem:[#allocation7 + $0x10] sm:$0xff]  ;;  %v1386_v16 = vld [vmem:[#allocation7 + $0x8] sm:$0xff] }
 0x2ab   :  { %833 = vadd.xlane.f32.xlu0 %v832_v42  ;;  %12517 = vmatprep.subr.mxu0 %v1083_v41  ;;  %v827_v50 = vmul.f32 %v15852_v48, %v15852_v48  ;;  %v841_v52 = vsel %vm831_vm3, %v828_v49, 0.0 }
 0x2ac   :  { %12534 = vmatprep.subr.mxu1 %v1079_v43  ;;  %12518 = vmatpush3.msra.mxu0 %v1083_v41  ;;  %v15860_v53 = vpop.f32.mrf.mxu1 }
 0x2ad   :  { %12497 = vmatmul.mubr.msk.f32.gmra.mxu0 %vm711_vm2, %v585_v18  ;;  %12512 = vmatmul.mubr.msk.f32.gmra.mxu1 %vm711_vm2, %v591_v19  ;;  %v838_v51 = vsel %vm831_vm3, %v827_v50, 0.0  ;;  %v830_v54 = vmul.f32 %v15860_v53, %v15860_v53  ;;  %v1385_v18 = vld [vmem:[#allocation7] sm:$0xff] }
 0x2ae   :  { %12499 = vmatprep.mubr.msk.f32.mxu0 %vm711_vm2, %v586_v21  ;;  %12514 = vmatprep.mubr.msk.f32.mxu1 %vm711_vm2, %v592_v22  ;;  %v15864_v55 = vpop.f32.mrf.mxu1  ;;  %v11341_v22 = vld [vmem:[#allocation2] ss:$0 sm:$0xff] }
 0x2af   :  { %836 = vadd.xlane.f32.xlu0 %v835_v44  ;;  %12535 = vmatpush3.msra.mxu1 %v1079_v43  ;;  %v829_v56 = vmul.f32 %v15864_v55, %v15864_v55  ;;  %v847_v59 = vsel %vm831_vm3, %v830_v54, 0.0 }
 0x2b0   :  { %12519 = vmatprep.subr.mxu0 %v1082_v45  ;;  %12536 = vmatprep.subr.mxu1 %v1078_v46 }
 0x2b1   :  { %12500 = vmatmul.mubr.msk.f32.gmra.mxu0 %vm711_vm2, %v587_v24  ;;  %12515 = vmatmul.mubr.msk.f32.gmra.mxu1 %vm711_vm2, %v593_v25  ;;  %v844_v60 = vsel %vm831_vm3, %v829_v56, 0.0 }
 0x2b2   :  { %12520 = vmatpush3.msra.mxu0 %v1082_v45  ;;  %12537 = vmatpush3.msra.mxu1 %v1078_v46 }
 0x2b3   :  { %839 = vadd.xlane.f32.xlu1 %v838_v51  ;;  %12521 = vmatprep.subr.mxu0 %v1081_v57 }
 0x2b4   :  { %12538 = vmatprep.subr.mxu1 %v1077_v58  ;;  %845 = vadd.xlane.f32.xlu0 %v844_v60 }
 0x2b5   :  { %12522 = vmatpush3.msra.mxu0 %v1081_v57  ;;  %12539 = vmatpush3.msra.mxu1 %v1077_v58 }
 0x2b6   :  { %12523 = vmatprep.subr.mxu0 %v1080_v61  ;;  %12540 = vmatprep.subr.mxu1 %v1076_v62 }
 0x2b7   :  { %842 = vadd.xlane.f32.xlu1 %v841_v52  ;;  %12524 = vmatpush3.msra.mxu0 %v1080_v61 }
 0x2b8   :  { %12541 = vmatpush3.msra.mxu1 %v1076_v62  ;;  %12551 = vmatprep.subr.mxu0 %v1388_v13 }
 0x2bb   :  { %848 = vadd.xlane.f32.xlu1 %v847_v59 }
 0x334   :  { %v834_v19 = vpop.xlane.xlu0 %833 }
 0x335   :  { %v1318_v39 = vmul.f32 %v11341_v22, %v834_v19 }
 0x338   :  { %v837_v24 = vpop.xlane.xlu0 %836 }
 0x339   :  { %v1319_v28 = vmul.f32 %v11341_v22, %v837_v24 }
 0x33c   :  { %v840_v21 = vpop.xlane.xlu1 %839 }
 0x33d   :  { %v1320_v50 = vmul.f32 %v11341_v22, %v840_v21  ;;  %v846_v62 = vpop.xlane.xlu0 %845 }
 0x340   :  { %v843_v29 = vpop.xlane.xlu1 %842 }
 0x341   :  { %v1321_v44 = vmul.f32 %v11341_v22, %v843_v29 }
 0x344   :  { %v849_v54 = vpop.xlane.xlu1 %848 }
 0x369   :  { %v12495_v63 = vpop.f32.mrf.mxu0  ;;  %v12510_v1 = vpop.f32.mrf.mxu1 }
 0x36b   :  { %v934_v2 = vpop.f32.mrf.mxu0  ;;  %v1047_v3 = vpop.f32.mrf.mxu1 }
 0x36c   :  { %12525 = vmatprep.mubr.msk.f32.mxu0 %vm1084_vm4, %v1047_v3  ;;  %12542 = vmatprep.mubr.msk.f32.mxu1 %vm1084_vm4, %v934_v2 }
 0x36d   :  { %v12498_v4 = vpop.f32.mrf.mxu0  ;;  %v12513_v5 = vpop.f32.mrf.mxu1  ;;  %12526 = vmatmul.mubr.msk.f32.vlgmr.msra.gmra.mxu0 %vm1084_vm4, %v12510_v1  ;;  %12543 = vmatmul.mubr.msk.f32.vlgmr.msra.gmra.mxu1 %vm1084_vm4, %v12495_v63 }
 0x36e   :  { %12552 = vmatpush3.msra.mxu0 %v1388_v13 }
 0x36f   :  { %v944_v6 = vpop.f32.mrf.mxu0  ;;  %v1057_v7 = vpop.f32.mrf.mxu1  ;;  %12553 = vmatprep.subr.mxu0 %v1387_v15 }
 0x370   :  { %12528 = vmatprep.mubr.msk.f32.mxu0 %vm1084_vm4, %v1057_v7  ;;  %12545 = vmatprep.mubr.msk.f32.mxu1 %vm1084_vm4, %v944_v6 }
 0x371   :  { %v12501_v8 = vpop.f32.mrf.mxu0  ;;  %v12516_v9 = vpop.f32.mrf.mxu1  ;;  %12529 = vmatmul.mubr.msk.f32.gmra.mxu0 %vm1084_vm4, %v12513_v5  ;;  %12546 = vmatmul.mubr.msk.f32.gmra.mxu1 %vm1084_vm4, %v12498_v4  ;;  %v1323_v4 = vmul.f32 %v11341_v22, %v849_v54 }
 0x372   :  { %12554 = vmatpush3.msra.mxu0 %v1387_v15 }
 0x373   :  { %v954_v10 = vpop.f32.mrf.mxu0  ;;  %v1067_v12 = vpop.f32.mrf.mxu1  ;;  %12555 = vmatprep.subr.mxu0 %v1386_v16 }
 0x374   :  { %12531 = vmatprep.mubr.msk.f32.mxu0 %vm1084_vm4, %v1067_v12  ;;  %12548 = vmatprep.mubr.msk.f32.mxu1 %vm1084_vm4, %v954_v10  ;;  %v1322_v12 = vmul.f32 %v11341_v22, %v846_v62 }
 0x375   :  { %12532 = vmatmul.mubr.msk.f32.gmra.mxu0 %vm1084_vm4, %v12516_v9  ;;  %12549 = vmatmul.mubr.msk.f32.gmra.mxu1 %vm1084_vm4, %v12501_v8 }
 0x376   :  { %12556 = vmatpush3.msra.mxu0 %v1386_v16 }
 0x377   :  { %12557 = vmatprep.subr.mxu0 %v1385_v18 }
 0x378   :  { %12558 = vmatpush3.msra.mxu0 %v1385_v18 }
 0x379   :  { %12585 = vmatprep.subr.mxu0 %v15428_v0 }
 0x42d   :  { %v12527_v25 = vpop.f32.mrf.mxu0  ;;  %v12544_v27 = vpop.f32.mrf.mxu1 }
 0x42e   :  { %v1288_v30 = vadd.f32 %v12544_v27, %v12527_v25 }
 0x42f   :  { %v1169_v32 = vpop.f32.mrf.mxu0  ;;  %v1282_v34 = vpop.f32.mrf.mxu1 }
 0x430   :  { %v1325_v40 = vadd.f32 %v1319_v28, %v1288_v30  ;;  %v1283_v41 = vadd.f32 %v1282_v34, %v1169_v32 }
 0x431   :  { %v12530_v42 = vpop.f32.mrf.mxu0  ;;  %v12547_v43 = vpop.f32.mrf.mxu1 }
 0x432   :  { %v15887_v45 = vadd.f32 %v11342_v31, %v1325_v40  ;;  %v1324_v46 = vadd.f32 %v1318_v39, %v1283_v41  ;;  %v1298_v49 = vadd.f32 %v12547_v43, %v12530_v42 }
 0x433   :  { %v1179_v51 = vpop.f32.mrf.mxu0  ;;  %v1292_v52 = vpop.f32.mrf.mxu1 }
 0x434   :  { %v1344_v56 = vsub.f32 0.0, %v15887_v45  ;;  %v1337_v57 = vadd.f32 %v11342_v31, %v1324_v46  ;;  %v1327_v58 = vadd.f32 %v1321_v44, %v1298_v49  ;;  %v1293_v59 = vadd.f32 %v1292_v52, %v1179_v51 }
 0x435   :  { %v12533_v60 = vpop.f32.mrf.mxu0  ;;  %v12550_v61 = vpop.f32.mrf.mxu1 }
 0x436   :  { %v1351_v63 = vmul.f32 1.442695, %v1344_v56  ;;  %v1343_v1 = vsub.f32 0.0, %v1337_v57  ;;  %v1340_v2 = vadd.f32 %v11342_v31, %v1327_v58  ;;  %v1326_v3 = vadd.f32 %v1320_v50, %v1293_v59 }
 0x437   :  { %v1308_v5 = vadd.f32 %v12550_v61, %v12533_v60  ;;  %v1189_v6 = vpop.f32.mrf.mxu0  ;;  %v1302_v7 = vpop.f32.mrf.mxu1 }
 0x438   :  { %13898 = vpow2.f32 %v1351_v63  ;;  %v1349_v8 = vmul.f32 1.442695, %v1343_v1  ;;  %v1346_v9 = vsub.f32 0.0, %v1340_v2  ;;  %v1339_v10 = vadd.f32 %v11342_v31, %v1326_v3 }
 0x439   :  { %v1329_v13 = vadd.f32 %v1323_v4, %v1308_v5  ;;  %v1303_v15 = vadd.f32 %v1302_v7, %v1189_v6 }
 0x43a   :  { %13900 = vpow2.f32 %v1349_v8  ;;  %v1355_v16 = vmul.f32 1.442695, %v1346_v9  ;;  %v1345_v18 = vsub.f32 0.0, %v1339_v10 }
 0x43b   :  { %v1342_v19 = vadd.f32 %v11342_v31, %v1329_v13  ;;  %v1328_v21 = vadd.f32 %v1322_v12, %v1303_v15 }
 0x43c   :  { %13902 = vpow2.f32 %v1355_v16  ;;  %v1353_v24 = vmul.f32 1.442695, %v1345_v18 }
 0x43d   :  { %v1348_v25 = vsub.f32 0.0, %v1342_v19  ;;  %v1341_v27 = vadd.f32 %v11342_v31, %v1328_v21 }
 0x43e   :  { %13904 = vpow2.f32 %v1353_v24 }
 0x43f   :  { %v1359_v28 = vmul.f32 1.442695, %v1348_v25  ;;  %v1347_v29 = vsub.f32 0.0, %v1341_v27 }
 0x441   :  { %13906 = vpow2.f32 %v1359_v28  ;;  %v1357_v30 = vmul.f32 1.442695, %v1347_v29 }
 0x443   :  { %13908 = vpow2.f32 %v1357_v30 }
 0x445   :  { %v13899_v32 = vpop.eup %13898 }
 0x446   :  { %v1362_v34 = vadd.f32 1.0, %v13899_v32 }
 0x447   :  { %v13901_v22 = vpop.eup %13900 }
 0x448   :  { %v1361_v39 = vadd.f32 1.0, %v13901_v22  ;;  %13910 = vrcp.f32 %v1362_v34 }
 0x449   :  { %v13903_v40 = vpop.eup %13902 }
 0x44a   :  { %13912 = vrcp.f32 %v1361_v39  ;;  %v1364_v41 = vadd.f32 1.0, %v13903_v40 }
 0x44b   :  { %v13905_v42 = vpop.eup %13904 }
 0x44c   :  { %v1363_v43 = vadd.f32 1.0, %v13905_v42  ;;  %13914 = vrcp.f32 %v1364_v41 }
 0x44e   :  { %v13907_v44 = vpop.eup %13906  ;;  %13916 = vrcp.f32 %v1363_v43 }
 0x44f   :  { %v1366_v31 = vadd.f32 1.0, %v13907_v44 }
 0x450   :  { %v13909_v46 = vpop.eup %13908 }
 0x451   :  { %v1365_v49 = vadd.f32 1.0, %v13909_v46  ;;  %13918 = vrcp.f32 %v1366_v31 }
 0x453   :  { %13920 = vrcp.f32 %v1365_v49 }
 0x455   :  { %v13911_v50 = vpop.eup %13910 }
 0x456   :  { %v1380_v54 = vmul.f32 %v13911_v50, %v15887_v45  ;;  %v11343_v45 = vld [vmem:[#allocation8] ss:$0 sm:$0xff] }
 0x457   :  { %v13913_v51 = vpop.eup %13912 }
 0x458   :  { %v1379_v52 = vmul.f32 %v13913_v51, %v1337_v57 }
 0x459   :  { %v13915_v56 = vpop.eup %13914 }
 0x45a   :  { %12559 = vmatprep.mubr.msk.f32.mxu0 %vm1084_vm4, %v1379_v52  ;;  %v1382_v60 = vmul.f32 %v13915_v56, %v1340_v2  ;;  %v11350_v52 = vld [vmem:[#allocation10] ss:$0 sm:$0xff] }
 0x45b   :  { %v13917_v58 = vpop.eup %13916  ;;  %12560 = vmatmul.mubr.msk.f32.vlgmr.msra.gmra.mxu0 %vm1084_vm4, %v1380_v54 }
 0x45c   :  { %v1381_v59 = vmul.f32 %v13917_v58, %v1339_v10 }
 0x45e   :  { %12562 = vmatprep.mubr.msk.f32.mxu0 %vm1084_vm4, %v1381_v59  ;;  %v13919_v61 = vpop.eup %13918 }
 0x45f   :  { %12563 = vmatmul.mubr.msk.f32.gmra.mxu0 %vm1084_vm4, %v1382_v60  ;;  %v1384_v1 = vmul.f32 %v13919_v61, %v1342_v19 }
 0x460   :  { %v13921_v62 = vpop.eup %13920 }
 0x461   :  { %v1383_v63 = vmul.f32 %v13921_v62, %v1341_v27 }
 0x463   :  { %12565 = vmatprep.mubr.msk.f32.mxu0 %vm1084_vm4, %v1383_v63 }
 0x464   :  { %12566 = vmatmul.mubr.msk.f32.gmra.mxu0 %vm1084_vm4, %v1384_v1 }
 0x465   :  { %12597 = vmatprep.mubr.msk.f32.mxu0 %vm15429_vm0, %v15428_v0 }
 0x51b   :  { %v12561_v57 = vpop.f32.mrf.mxu0 }
 0x51c   :  { %v1486_v3 = vadd.f32 %v12561_v57, %v11343_v45 }
 0x51d   :  { %v1480_v4 = vpop.f32.mrf.mxu0 }
 0x51e   :  { %v1510_v2 = vsub.f32 0.0, %v1486_v3  ;;  %v1481_v5 = vadd.f32 %v11343_v45, %v1480_v4 }
 0x51f   :  { %v12564_v6 = vpop.f32.mrf.mxu0 }
 0x520   :  { %v1517_v7 = vmul.f32 1.442695, %v1510_v2  ;;  %v1509_v8 = vsub.f32 0.0, %v1481_v5  ;;  %v1496_v9 = vadd.f32 %v12564_v6, %v11343_v45 }
 0x521   :  { %v1490_v10 = vpop.f32.mrf.mxu0 }
 0x522   :  { %13922 = vpow2.f32 %v1517_v7  ;;  %v1515_v12 = vmul.f32 1.442695, %v1509_v8  ;;  %v1512_v13 = vsub.f32 0.0, %v1496_v9  ;;  %v1491_v15 = vadd.f32 %v11343_v45, %v1490_v10 }
 0x524   :  { %13924 = vpow2.f32 %v1515_v12  ;;  %v1521_v16 = vmul.f32 1.442695, %v1512_v13  ;;  %v1511_v18 = vsub.f32 0.0, %v1491_v15  ;;  %v12567_v19 = vpop.f32.mrf.mxu0 }
 0x525   :  { %v1506_v21 = vadd.f32 %v12567_v19, %v11343_v45  ;;  %v1669_v19 = vld [vmem:[#allocation11 + $0x10] sm:$0xff] }
 0x526   :  { %13926 = vpow2.f32 %v1521_v16  ;;  %v1519_v24 = vmul.f32 1.442695, %v1511_v18  ;;  %v1500_v25 = vpop.f32.mrf.mxu0  ;;  %v15430_v16 = vmov 0   ;;  %v1670_v18 = vld [vmem:[#allocation11 + $0x18] sm:$0xff] }
 0x527   :  { %v1514_v27 = vsub.f32 0.0, %v1506_v21  ;;  %v1501_v28 = vadd.f32 %v11343_v45, %v1500_v25  ;;  %13897 = vset.pattern.permute.xlu1 %v15430_v16  ;;  %13896 = vset.pattern.permute.xlu0 %v15430_v16 }
 0x528   :  { %13928 = vpow2.f32 %v1519_v24  ;;  %12568 = vmatprep.subr.mxu1 %v1670_v18 }
 0x529   :  { %v1525_v29 = vmul.f32 1.442695, %v1514_v27  ;;  %v1513_v30 = vsub.f32 0.0, %v1501_v28  ;;  %12569 = vmatpush3.msra.mxu1 %v1670_v18 }
 0x52a   :  { %12570 = vmatprep.subr.mxu1 %v1669_v19 }
 0x52b   :  { %13930 = vpow2.f32 %v1525_v29  ;;  %v1523_v32 = vmul.f32 1.442695, %v1513_v30  ;;  %12571 = vmatpush3.msra.mxu1 %v1669_v19 }
 0x52d   :  { %13932 = vpow2.f32 %v1523_v32 }
 0x52f   :  { %v13923_v34 = vpop.eup %13922 }
 0x530   :  { %v1528_v22 = vadd.f32 1.0, %v13923_v34 }
 0x531   :  { %v13925_v39 = vpop.eup %13924 }
 0x532   :  { %13934 = vrcp.f32 %v1528_v22  ;;  %v1527_v40 = vadd.f32 1.0, %v13925_v39 }
 0x533   :  { %v13927_v41 = vpop.eup %13926 }
 0x534   :  { %13936 = vrcp.f32 %v1527_v40  ;;  %v1530_v42 = vadd.f32 1.0, %v13927_v41 }
 0x535   :  { %v13929_v43 = vpop.eup %13928 }
 0x536   :  { %13938 = vrcp.f32 %v1530_v42  ;;  %v1529_v44 = vadd.f32 1.0, %v13929_v43 }
 0x538   :  { %v13931_v31 = vpop.eup %13930  ;;  %13940 = vrcp.f32 %v1529_v44 }
 0x539   :  { %v1532_v46 = vadd.f32 1.0, %v13931_v31 }
 0x53a   :  { %v13933_v49 = vpop.eup %13932 }
 0x53b   :  { %13942 = vrcp.f32 %v1532_v46  ;;  %v1531_v50 = vadd.f32 1.0, %v13933_v49 }
 0x53d   :  { %13944 = vrcp.f32 %v1531_v50 }
 0x53f   :  { %v13935_v51 = vpop.eup %13934 }
 0x540   :  { %v15899_v54 = vmul.f32 %v13935_v51, %v1486_v3 }
 0x541   :  { %v13937_v56 = vpop.eup %13936 }
 0x542   :  { %v15901_v58 = vmul.f32 %v13937_v56, %v1481_v5  ;;  %v1559_v59 = vmul.f32 %v11350_v52, %v15899_v54 }
 0x543   :  { %v13939_v60 = vpop.eup %13938 }
 0x544   :  { %v15904_v61 = vmul.f32 %v13939_v60, %v1496_v9  ;;  %v1567_v62 = vsel %vm1084_vm4, %v1559_v59, 0.0  ;;  %v1558_v63 = vmul.f32 %v11350_v52, %v15901_v58 }
 0x545   :  { %v13941_v1 = vpop.eup %13940  ;;  %1568 = vadd.xlane.f32.xlu1 %v1567_v62 }
 0x546   :  { %v15908_v45 = vmul.f32 %v13941_v1, %v1491_v15  ;;  %v1564_v57 = vsel %vm1084_vm4, %v1558_v63, 0.0  ;;  %v1561_v3 = vmul.f32 %v11350_v52, %v15904_v61 }
 0x547   :  { %1565 = vadd.xlane.f32.xlu0 %v1564_v57 }
 0x548   :  { %v13943_v4 = vpop.eup %13942  ;;  %v1573_v2 = vsel %vm1084_vm4, %v1561_v3, 0.0  ;;  %v1560_v5 = vmul.f32 %v11350_v52, %v15908_v45 }
 0x549   :  { %v15914_v6 = vmul.f32 %v13943_v4, %v1506_v21  ;;  %1574 = vadd.xlane.f32.xlu1 %v1573_v2  ;;  %v11351_v21 = vld [vmem:[%s17601_s22] ss:$0 sm:$0xff] }
 0x54a   :  { %v13945_v7 = vpop.eup %13944  ;;  %v1570_v8 = vsel %vm1084_vm4, %v1560_v5, 0.0 }
 0x54b   :  { %v15917_v9 = vmul.f32 %v13945_v7, %v1501_v28  ;;  %1571 = vadd.xlane.f32.xlu0 %v1570_v8  ;;  %v1563_v10 = vmul.f32 %v11350_v52, %v15914_v6 }
 0x54d   :  { %v1579_v12 = vsel %vm1084_vm4, %v1563_v10, 0.0  ;;  %v1562_v13 = vmul.f32 %v11350_v52, %v15917_v9 }
 0x54e   :  { %1580 = vadd.xlane.f32.xlu1 %v1579_v12  ;;  %v1668_v12 = vld [vmem:[#allocation11 + $0x8] sm:$0xff] }
 0x54f   :  { %v1576_v15 = vsel %vm1084_vm4, %v1562_v13, 0.0  ;;  %12572 = vmatprep.subr.mxu1 %v1668_v12 }
 0x550   :  { %1577 = vadd.xlane.f32.xlu0 %v1576_v15  ;;  %12573 = vmatpush3.msra.mxu1 %v1668_v12  ;;  %v1667_v15 = vld [vmem:[#allocation11] sm:$0xff] }
 0x551   :  { %12574 = vmatprep.subr.mxu1 %v1667_v15 }
 0x552   :  { %12575 = vmatpush3.msra.mxu1 %v1667_v15 }
 0x553   :  { %12606 = vmatprep.subr.mxu1 %v15428_v0 }
 0x5ce   :  { %v1569_v24 = vpop.xlane.xlu1 %1568 }
 0x5cf   :  { %v1590_v25 = vadd.f32 %v11351_v21, %v1569_v24 }
 0x5d0   :  { %v1566_v27 = vpop.xlane.xlu0 %1565 }
 0x5d1   :  { %v1596_v28 = vsub.f32 0.0, %v1590_v25  ;;  %v1589_v29 = vadd.f32 %v11351_v21, %v1566_v27 }
 0x5d2   :  { %v1575_v30 = vpop.xlane.xlu1 %1574 }
 0x5d3   :  { %v1603_v32 = vmul.f32 1.442695, %v1596_v28  ;;  %v1595_v34 = vsub.f32 0.0, %v1589_v29  ;;  %v1592_v22 = vadd.f32 %v11351_v21, %v1575_v30 }
 0x5d4   :  { %v1572_v39 = vpop.xlane.xlu0 %1571 }
 0x5d5   :  { %13946 = vpow2.f32 %v1603_v32  ;;  %v1601_v40 = vmul.f32 1.442695, %v1595_v34  ;;  %v1598_v41 = vsub.f32 0.0, %v1592_v22  ;;  %v1591_v42 = vadd.f32 %v11351_v21, %v1572_v39 }
 0x5d7   :  { %13948 = vpow2.f32 %v1601_v40  ;;  %v1607_v43 = vmul.f32 1.442695, %v1598_v41  ;;  %v1597_v44 = vsub.f32 0.0, %v1591_v42  ;;  %v1581_v31 = vpop.xlane.xlu1 %1580  ;;  %v2059_v42 = vld [vmem:[#allocation16 + $0x8] sm:$0xff] }
 0x5d8   :  { %v1594_v46 = vadd.f32 %v11351_v21, %v1581_v31 }
 0x5d9   :  { %13950 = vpow2.f32 %v1607_v43  ;;  %v1605_v49 = vmul.f32 1.442695, %v1597_v44  ;;  %v1578_v50 = vpop.xlane.xlu0 %1577  ;;  %v2058_v43 = vld [vmem:[#allocation16] sm:$0xff]  ;;  %v602_v44 = vld [vmem:[%s17602_s21 + $0x10] sm:$0xff] }
 0x5da   :  { %v1600_v51 = vsub.f32 0.0, %v1594_v46  ;;  %v1593_v52 = vadd.f32 %v11351_v21, %v1578_v50  ;;  %v11352_v46 = vld [vmem:[#allocation13] ss:$0 sm:$0xff] }
 0x5db   :  { %13952 = vpow2.f32 %v1605_v49 }
 0x5dc   :  { %v1599_v56 = vsub.f32 0.0, %v1593_v52  ;;  %v1611_v59 = vmul.f32 1.442695, %v1600_v51 }
 0x5de   :  { %v1609_v60 = vmul.f32 1.442695, %v1599_v56 }
 0x5e0   :  { %13954 = vpow2.f32 %v1609_v60 }
 0x5e1   :  { %13956 = vpow2.f32 %v1611_v59 }
 0x5e2   :  { %v13947_v62 = vpop.eup %13946 }
 0x5e3   :  { %v1614_v63 = vadd.f32 1.0, %v13947_v62 }
 0x5e4   :  { %v13949_v1 = vpop.eup %13948 }
 0x5e5   :  { %13958 = vrcp.f32 %v1614_v63  ;;  %v1613_v57 = vadd.f32 1.0, %v13949_v1 }
 0x5e6   :  { %v13951_v3 = vpop.eup %13950 }
 0x5e7   :  { %13960 = vrcp.f32 %v1613_v57  ;;  %v1616_v4 = vadd.f32 1.0, %v13951_v3 }
 0x5e8   :  { %v13953_v2 = vpop.eup %13952 }
 0x5e9   :  { %13962 = vrcp.f32 %v1616_v4  ;;  %v1615_v5 = vadd.f32 1.0, %v13953_v2 }
 0x5eb   :  { %13964 = vrcp.f32 %v1615_v5 }
 0x5ed   :  { %v13955_v7 = vpop.eup %13954 }
 0x5ee   :  { %v13957_v8 = vpop.eup %13956  ;;  %v1617_v10 = vadd.f32 1.0, %v13955_v7 }
 0x5ef   :  { %v1618_v13 = vadd.f32 1.0, %v13957_v8 }
 0x5f0   :  { %13966 = vrcp.f32 %v1617_v10 }
 0x5f1   :  { %13968 = vrcp.f32 %v1618_v13 }
 0x5f2   :  { %v13959_v16 = vpop.eup %13958 }
 0x5f3   :  { %1638 = vperm.xlu1 %13897, %v13959_v16  }
 0x5f4   :  { %v13961_v18 = vpop.eup %13960 }
 0x5f5   :  { %1633 = vperm.xlu0 %13896, %v13961_v18  }
 0x5f6   :  { %v13963_v19 = vpop.eup %13962 }
 0x5f7   :  { %1648 = vperm.xlu1 %13897, %v13963_v19  }
 0x5f8   :  { %v13965_v21 = vpop.eup %13964 }
 0x5fb   :  { %1643 = vperm.xlu1 %13897, %v13965_v21  }
 0x5fd   :  { %v13967_v24 = vpop.eup %13966 }
 0x5fe   :  { %v13969_v25 = vpop.eup %13968 }
 0x5ff   :  { %1653 = vperm.xlu1 %13897, %v13967_v24  }
 0x603   :  { %1658 = vperm.xlu1 %13897, %v13969_v25  }
 0x66e   :  { %v1639_v27 = vpop.permute.xlu1 %1638 }
 0x66f   :  { %v1662_v30 = vmul.f32 %v1639_v27, %v15899_v54 }
 0x670   :  { %v1634_v28 = vpop.permute.xlu0 %1633 }
 0x671   :  { %v1661_v29 = vmul.f32 %v1634_v28, %v15901_v58 }
 0x672   :  { %v1649_v32 = vpop.permute.xlu1 %1648 }
 0x673   :  { %12576 = vmatprep.mubr.msk.f32.mxu1 %vm1084_vm4, %v1661_v29  ;;  %v1664_v39 = vmul.f32 %v1649_v32, %v15904_v61  ;;  %v600_v61 = vld [vmem:[%s17602_s21] sm:$0xff] }
 0x674   :  { %12577 = vmatmul.mubr.msk.f32.vlgmr.msra.gmra.mxu1 %vm1084_vm4, %v1662_v30 }
 0x676   :  { %v1644_v34 = vpop.permute.xlu1 %1643 }
 0x677   :  { %v1663_v22 = vmul.f32 %v1644_v34, %v15908_v45  ;;  %v2061_v45 = vld [vmem:[#allocation16 + $0x18] sm:$0xff] }
 0x679   :  { %12579 = vmatprep.mubr.msk.f32.mxu1 %vm1084_vm4, %v1663_v22 }
 0x67a   :  { %v1654_v40 = vpop.permute.xlu1 %1653  ;;  %12580 = vmatmul.mubr.msk.f32.gmra.mxu1 %vm1084_vm4, %v1664_v39 }
 0x67b   :  { %v1665_v58 = vmul.f32 %v1654_v40, %v15917_v9  ;;  %v601_v9 = vld [vmem:[%s17602_s21 + $0x8] sm:$0xff] }
 0x67d   :  { %12582 = vmatprep.mubr.msk.f32.mxu1 %vm1084_vm4, %v1665_v58 }
 0x67e   :  { %v1659_v54 = vpop.permute.xlu1 %1658 }
 0x67f   :  { %v1666_v41 = vmul.f32 %v1659_v54, %v15914_v6  ;;  %v2060_v6 = vld [vmem:[#allocation16 + $0x10] sm:$0xff] }
 0x681   :  { %12583 = vmatmul.mubr.msk.f32.gmra.mxu1 %vm1084_vm4, %v1666_v41 }
 0x682   :  { %12607 = vmatpush3.msra.mxu1 %v1666_v41  ;;  %12618 = vmatprep.mubr.msk.f32.mxu1 %vm15429_vm0, %v15428_v0 }
 0x683   :  { %12608 = vmatprep.subr.mxu1 %v15428_v0 }
 0x684   :  { %12609 = vmatpush3.msra.mxu1 %v1665_v58 }
 0x685   :  { %12610 = vmatprep.subr.mxu1 %v15428_v0 }
 0x686   :  { %12611 = vmatpush3.msra.mxu1 %v1664_v39 }
 0x687   :  { %12612 = vmatprep.subr.mxu1 %v15428_v0 }
 0x688   :  { %12613 = vmatpush3.msra.mxu1 %v1663_v22 }
 0x689   :  { %12614 = vmatprep.subr.mxu1 %v15428_v0 }
 0x68a   :  { %12615 = vmatpush3.msra.mxu1 %v1662_v30 }
 0x68b   :  { %12616 = vmatprep.subr.mxu1 %v15428_v0 }
 0x68c   :  { %12617 = vmatpush3.msra.mxu1 %v1661_v29 }
 0x68d   :  { %12619 = vmatmul.mubr.msk.f32.vlgmr.msra.gmra.mxu1 %vm1876_vm5, %v600_v61  ;;  %12644 = vmatprep.subr.mxu1 %v15428_v0 }
 0x68e   :  { %12621 = vmatprep.mubr.msk.f32.mxu1 %vm15429_vm0, %v15428_v0  ;;  %12645 = vmatpush3.msra.mxu1 %v2061_v45 }
 0x68f   :  { %12646 = vmatprep.subr.mxu1 %v15428_v0 }
 0x690   :  { %12647 = vmatpush3.msra.mxu1 %v2060_v6 }
 0x691   :  { %12622 = vmatmul.mubr.msk.f32.gmra.mxu1 %vm1876_vm5, %v601_v9  ;;  %12648 = vmatprep.subr.mxu1 %v15428_v0 }
 0x692   :  { %12624 = vmatprep.mubr.msk.f32.mxu1 %vm15429_vm0, %v15428_v0  ;;  %12649 = vmatpush3.msra.mxu1 %v2059_v42 }
 0x693   :  { %12650 = vmatprep.subr.mxu1 %v15428_v0 }
 0x694   :  { %12651 = vmatpush3.msra.mxu1 %v2058_v43 }
 0x695   :  { %12625 = vmatmul.mubr.msk.f32.gmra.mxu1 %vm1876_vm5, %v602_v44 }
 0x696   :  { %12652 = vmatprep.mubr.msk.f32.mxu1 %vm15429_vm0, %v15428_v0 }
 0x699   :  { %12653 = vmatmul.mubr.msk.f32.vlgmr.msra.gmra.mxu1 %vm1084_vm4, %v15818_v37 }
 0x69a   :  { %12655 = vmatprep.mubr.msk.f32.mxu1 %vm15429_vm0, %v15428_v0 }
 0x69d   :  { %12656 = vmatmul.mubr.msk.f32.gmra.mxu1 %vm1084_vm4, %v15810_v35 }
 0x69e   :  { %12658 = vmatprep.mubr.msk.f32.mxu1 %vm15429_vm0, %v15428_v0 }
 0x6a1   :  { %12659 = vmatmul.mubr.msk.f32.gmra.mxu1 %vm1084_vm4, %v15808_v33 }
 0x6a2   :  { %12684 = vmatprep.mubr.msk.f32.mxu1 %vm711_vm2, %v15772_v11 }
 0x734   :  { %v12578_v31 = vpop.f32.mrf.mxu1 }
 0x735   :  { %v15972_v49 = vadd.f32 %v12578_v31, %v11352_v46 }
 0x736   :  { %v1762_v50 = vpop.f32.mrf.mxu1 }
 0x737   :  { %v1792_v52 = vsub.f32 0.0, %v15972_v49  ;;  %v15975_v60 = vadd.f32 %v11352_v46, %v1762_v50 }
 0x739   :  { %v1799_v1 = vmul.f32 1.442695, %v1792_v52  ;;  %v1791_v4 = vsub.f32 0.0, %v15975_v60 }
 0x73a   :  { %v12581_v51 = vpop.f32.mrf.mxu1 }
 0x73b   :  { %v1778_v56 = vadd.f32 %v12581_v51, %v11352_v46  ;;  %v1797_v13 = vmul.f32 1.442695, %v1791_v4 }
 0x73c   :  { %v1772_v59 = vpop.f32.mrf.mxu1 }
 0x73d   :  { %v1794_v62 = vsub.f32 0.0, %v1778_v56  ;;  %v1773_v63 = vadd.f32 %v11352_v46, %v1772_v59 }
 0x73f   :  { %v1803_v57 = vmul.f32 1.442695, %v1794_v62  ;;  %v1793_v3 = vsub.f32 0.0, %v1773_v63 }
 0x741   :  { %v1801_v2 = vmul.f32 1.442695, %v1793_v3  ;;  %v12584_v5 = vpop.f32.mrf.mxu1  ;;  %13970 = vpow2.f32 %v1803_v57  ;;  %v11359_v57 = vld [vmem:[#allocation14] ss:$0 sm:$0xff] }
 0x742   :  { %v1788_v7 = vadd.f32 %v12584_v5, %v11352_v46  ;;  %13972 = vpow2.f32 %v1799_v1 }
 0x743   :  { %v1782_v8 = vpop.f32.mrf.mxu1  ;;  %13974 = vpow2.f32 %v1801_v2 }
 0x744   :  { %v1796_v10 = vsub.f32 0.0, %v1788_v7  ;;  %v1783_v12 = vadd.f32 %v11352_v46, %v1782_v8 }
 0x746   :  { %v1807_v15 = vmul.f32 1.442695, %v1796_v10  ;;  %v1795_v16 = vsub.f32 0.0, %v1783_v12 }
 0x748   :  { %13976 = vpow2.f32 %v1807_v15  ;;  %v1805_v18 = vmul.f32 1.442695, %v1795_v16 }
 0x749   :  { %13978 = vpow2.f32 %v1797_v13 }
 0x74a   :  { %13980 = vpow2.f32 %v1805_v18 }
 0x74d   :  { %v15978_v19 = vpop.f32.mrf.mxu1 }
 0x74e   :  { %v13971_v21 = vpop.eup %13970 }
 0x74f   :  { %v12620_v24 = vpop.f32.mrf.mxu1  ;;  %v13973_v25 = vpop.eup %13972  ;;  %v1812_v29 = vadd.f32 1.0, %v13971_v21 }
 0x750   :  { %v13975_v28 = vpop.eup %13974  ;;  %v1810_v30 = vadd.f32 1.0, %v13973_v25 }
 0x751   :  { %v15980_v27 = vpop.f32.mrf.mxu1  ;;  %v1811_v22 = vadd.f32 1.0, %v13975_v28  ;;  %13982 = vrcp.f32 %v1812_v29 }
 0x752   :  { %13984 = vrcp.f32 %v1810_v30 }
 0x753   :  { %v12623_v32 = vpop.f32.mrf.mxu1 }
 0x755   :  { %v13977_v34 = vpop.eup %13976  ;;  %v15982_v39 = vpop.f32.mrf.mxu1 }
 0x756   :  { %v13979_v40 = vpop.eup %13978  ;;  %v1814_v58 = vadd.f32 1.0, %v13977_v34 }
 0x757   :  { %v13981_v54 = vpop.eup %13980  ;;  %v12626_v41 = vpop.f32.mrf.mxu1  ;;  %v1809_v6 = vadd.f32 1.0, %v13979_v40 }
 0x758   :  { %13986 = vrcp.f32 %v1814_v58  ;;  %v1813_v61 = vadd.f32 1.0, %v13981_v54 }
 0x759   :  { %13988 = vrcp.f32 %v1811_v22  ;;  %v15984_v45 = vpop.f32.mrf.mxu1 }
 0x75a   :  { %13990 = vrcp.f32 %v1813_v61 }
 0x75b   :  { %v12654_v9 = vpop.f32.mrf.mxu1  ;;  %13992 = vrcp.f32 %v1809_v6 }
 0x75d   :  { %v15986_v42 = vpop.f32.mrf.mxu1 }
 0x75e   :  { %v13983_v31 = vpop.eup %13982 }
 0x75f   :  { %v12657_v43 = vpop.f32.mrf.mxu1  ;;  %v13985_v50 = vpop.eup %13984  ;;  %v1830_v59 = vmul.f32 %v13983_v31, %v1778_v56  ;;  %v2065_v31 = vld [vmem:[#allocation17 + $0x18] sm:$0xff] }
 0x760   :  { %v1828_v3 = vmul.f32 %v13985_v50, %v15972_v49  ;;  %v605_v50 = vld [vmem:[%s17603_s23 + $0x10] sm:$0xff] }
 0x761   :  { %v15988_v44 = vpop.f32.mrf.mxu1  ;;  %v1843_v13 = vmul.f32 %v11359_v57, %v1830_v59 }
 0x762   :  { %v1841_v18 = vmul.f32 %v11359_v57, %v1828_v3  ;;  %v14582_v3 = vld [vmem:[%s17596_s18 + $0x10] sm:$0xff] }
 0x763   :  { %v12660_v46 = vpop.f32.mrf.mxu1 }
 0x764   :  { %v1849_v49 = vsel %vm1084_vm4, %v1841_v18, 0.0  ;;  %v2063_v46 = vld [vmem:[#allocation17 + $0x8] sm:$0xff] }
 0x765   :  { %v13987_v51 = vpop.eup %13986 }
 0x766   :  { %v13989_v52 = vpop.eup %13988  ;;  %v1832_v62 = vmul.f32 %v13987_v51, %v1788_v7  ;;  %v1855_v7 = vsel %vm1084_vm4, %v1843_v13, 0.0  ;;  %v2278_v51 = vld [vmem:[#allocation20 + $0x18] sm:$0xff] }
 0x767   :  { %v13991_v1 = vpop.eup %13990  ;;  %v1829_v5 = vmul.f32 %v13989_v52, %v1773_v63  ;;  %v2275_v52 = vld [vmem:[#allocation20] sm:$0xff]  ;;  %v11372_v13 = vld [vmem:[#allocation19] ss:$0 sm:$0xff] }
 0x768   :  { %v1831_v4 = vmul.f32 %v13991_v1, %v1783_v12  ;;  %v1845_v2 = vmul.f32 %v11359_v57, %v1832_v62  ;;  %v13993_v15 = vpop.eup %13992 }
 0x769   :  { %v1827_v56 = vmul.f32 %v13993_v15, %v15975_v60  ;;  %v1842_v21 = vmul.f32 %v11359_v57, %v1829_v5  ;;  %v14583_v5 = vld [vmem:[%s17596_s18 + $0x8] sm:$0xff]  ;;  %v14584_v15 = vld [vmem:[%s17596_s18] sm:$0xff] }
 0x76a   :  { %v1861_v8 = vsel %vm1084_vm4, %v1845_v2, 0.0  ;;  %v1844_v10 = vmul.f32 %v11359_v57, %v1831_v4 }
 0x76b   :  { %1862 = vadd.xlane.f32.xlu1 %v1861_v8  ;;  %v1852_v63 = vsel %vm1084_vm4, %v1842_v21, 0.0  ;;  %v1840_v12 = vmul.f32 %v11359_v57, %v1827_v56 }
 0x76c   :  { %v1858_v16 = vsel %vm1084_vm4, %v1844_v10, 0.0 }
 0x76d   :  { %1859 = vadd.xlane.f32.xlu0 %v1858_v16  ;;  %v1846_v24 = vsel %vm1084_vm4, %v1840_v12, 0.0 }
 0x76f   :  { %1856 = vadd.xlane.f32.xlu1 %v1855_v7 }
 0x771   :  { %1850 = vadd.xlane.f32.xlu0 %v1849_v49 }
 0x773   :  { %1853 = vadd.xlane.f32.xlu1 %v1852_v63 }
 0x777   :  { %1847 = vadd.xlane.f32.xlu1 %v1846_v24 }
 0x7f4   :  { %v1863_v25 = vpop.xlane.xlu1 %1862 }
 0x7f5   :  { %13994 = vtanh.f32 %v1863_v25 }
 0x7f6   :  { %v1860_v28 = vpop.xlane.xlu0 %1859 }
 0x7f7   :  { %13996 = vtanh.f32 %v1860_v28 }
 0x7f8   :  { %v1857_v29 = vpop.xlane.xlu1 %1856 }
 0x7f9   :  { %13998 = vtanh.f32 %v1857_v29 }
 0x7fa   :  { %v1851_v60 = vpop.xlane.xlu0 %1850 }
 0x7fb   :  { %14000 = vtanh.f32 %v1851_v60 }
 0x7fc   :  { %v1854_v30 = vpop.xlane.xlu1 %1853 }
 0x7fd   :  { %14002 = vtanh.f32 %v1854_v30 }
 0x800   :  { %v1848_v32 = vpop.xlane.xlu1 %1847 }
 0x801   :  { %14004 = vtanh.f32 %v1848_v32 }
 0x802   :  { %v13995_v34 = vpop.eup %13994 }
 0x803   :  { %v1875_v22 = vmul.f32 %v13995_v34, %v15860_v53  ;;  %v14585_v34 = vld [vmem:[%s17598_s3] sm:$0xff] }
 0x804   :  { %v13997_v40 = vpop.eup %13996 }
 0x805   :  { %12586 = vmatpush3.msra.mxu0 %v1875_v22  ;;  %v1874_v58 = vmul.f32 %v13997_v40, %v15864_v55 }
 0x806   :  { %v13999_v54 = vpop.eup %13998  ;;  %12587 = vmatprep.subr.mxu0 %v15428_v0 }
 0x807   :  { %12588 = vmatpush3.msra.mxu0 %v1874_v58  ;;  %v1873_v41 = vmul.f32 %v13999_v54, %v15850_v47  ;;  %v603_v47 = vld [vmem:[%s17603_s23] sm:$0xff] }
 0x808   :  { %12589 = vmatprep.subr.mxu0 %v15428_v0  ;;  %v14001_v61 = vpop.eup %14000 }
 0x809   :  { %12590 = vmatpush3.msra.mxu0 %v1873_v41  ;;  %v1871_v55 = vmul.f32 %v14001_v61, %v15816_v36  ;;  %v604_v36 = vld [vmem:[%s17603_s23 + $0x8] sm:$0xff] }
 0x80a   :  { %v14003_v6 = vpop.eup %14002  ;;  %12591 = vmatprep.subr.mxu0 %v15428_v0 }
 0x80b   :  { %v1872_v53 = vmul.f32 %v14003_v6, %v15852_v48  ;;  %v2064_v48 = vld [vmem:[#allocation17 + $0x10] sm:$0xff] }
 0x80d   :  { %12592 = vmatpush3.msra.mxu0 %v1872_v53 }
 0x80e   :  { %v14005_v9 = vpop.eup %14004  ;;  %12593 = vmatprep.subr.mxu0 %v15428_v0 }
 0x80f   :  { %12594 = vmatpush3.msra.mxu0 %v1871_v55  ;;  %v1870_v43 = vmul.f32 %v14005_v9, %v15824_v38  ;;  %v2062_v38 = vld [vmem:[#allocation17] sm:$0xff] }
 0x810   :  { %12595 = vmatprep.subr.mxu0 %v15428_v0 }
 0x811   :  { %12596 = vmatpush3.msra.mxu0 %v1870_v43 }
 0x812   :  { %12598 = vmatmul.mubr.msk.f32.vlgmr.msra.gmra.mxu0 %vm1876_vm5, %v603_v47  ;;  %12627 = vmatprep.subr.mxu0 %v15428_v0 }
 0x813   :  { %12600 = vmatprep.mubr.msk.f32.mxu0 %vm15429_vm0, %v15428_v0  ;;  %12628 = vmatpush3.msra.mxu0 %v2065_v31  ;;  %v14586_v31 = vld [vmem:[%s17597_s30] sm:$0xff] }
 0x814   :  { %12629 = vmatprep.subr.mxu0 %v15428_v0 }
 0x815   :  { %12630 = vmatpush3.msra.mxu0 %v2064_v48 }
 0x816   :  { %12601 = vmatmul.mubr.msk.f32.gmra.mxu0 %vm1876_vm5, %v604_v36  ;;  %12631 = vmatprep.subr.mxu0 %v15428_v0 }
 0x817   :  { %12603 = vmatprep.mubr.msk.f32.mxu0 %vm15429_vm0, %v15428_v0  ;;  %12632 = vmatpush3.msra.mxu0 %v2063_v46 }
 0x818   :  { %12633 = vmatprep.subr.mxu0 %v15428_v0 }
 0x819   :  { %12634 = vmatpush3.msra.mxu0 %v2062_v38 }
 0x81a   :  { %12604 = vmatmul.mubr.msk.f32.gmra.mxu0 %vm1876_vm5, %v605_v50  ;;  %12661 = vmatprep.subr.mxu0 %v15428_v0 }
 0x81b   :  { %12635 = vmatprep.mubr.msk.f32.mxu0 %vm15429_vm0, %v15428_v0 }
 0x81e   :  { %12636 = vmatmul.mubr.msk.f32.vlgmr.msra.gmra.mxu0 %vm1084_vm4, %v15978_v19  ;;  %v2277_v19 = vld [vmem:[#allocation20 + $0x10] sm:$0xff] }
 0x81f   :  { %12638 = vmatprep.mubr.msk.f32.mxu0 %vm15429_vm0, %v15428_v0  ;;  %12662 = vmatpush3.msra.mxu0 %v2278_v51 }
 0x820   :  { %12663 = vmatprep.subr.mxu0 %v15428_v0 }
 0x821   :  { %12664 = vmatpush3.msra.mxu0 %v2277_v19 }
 0x822   :  { %12639 = vmatmul.mubr.msk.f32.gmra.mxu0 %vm1084_vm4, %v15980_v27  ;;  %12665 = vmatprep.subr.mxu0 %v15428_v0  ;;  %v2276_v27 = vld [vmem:[#allocation20 + $0x8] sm:$0xff] }
 0x823   :  { %12641 = vmatprep.mubr.msk.f32.mxu0 %vm15429_vm0, %v15428_v0  ;;  %12666 = vmatpush3.msra.mxu0 %v2276_v27 }
 0x824   :  { %12667 = vmatprep.subr.mxu0 %v15428_v0 }
 0x825   :  { %12668 = vmatpush3.msra.mxu0 %v2275_v52 }
 0x826   :  { %12642 = vmatmul.mubr.msk.f32.gmra.mxu0 %vm1084_vm4, %v15982_v39 }
 0x827   :  { %12669 = vmatprep.mubr.msk.f32.mxu0 %vm15429_vm0, %v15428_v0 }
 0x8d2   :  { %v1952_v39 = vpop.f32.mrf.mxu0 }
 0x8d3   :  { %v16050_v16 = vadd.f32 %v14584_v15, %v1952_v39 }
 0x8d4   :  { %v12599_v59 = vpop.f32.mrf.mxu0 }
 0x8d6   :  { %v1957_v62 = vpop.f32.mrf.mxu0 }
 0x8d7   :  { %v16045_v8 = vadd.f32 %v14583_v5, %v1957_v62 }
 0x8d8   :  { %v12602_v1 = vpop.f32.mrf.mxu0 }
 0x8da   :  { %v1962_v57 = vpop.f32.mrf.mxu0 }
 0x8db   :  { %v16042_v4 = vadd.f32 %v14582_v3, %v1962_v57 }
 0x8dc   :  { %v12605_v2 = vpop.f32.mrf.mxu0 }
 0x8dd   :  { %12678 = vmatprep.subr.mxu1 %v16042_v4 }
 0x8de   :  { %v2141_v10 = vpop.f32.mrf.mxu0  ;;  %12679 = vmatpush3.msra.mxu1 %v16042_v4 }
 0x8df   :  { %v2231_v18 = vadd.f32 %v15984_v45, %v2141_v10  ;;  %12680 = vmatprep.subr.mxu1 %v16045_v8 }
 0x8e0   :  { %v12637_v56 = vpop.f32.mrf.mxu0  ;;  %12681 = vmatpush3.msra.mxu1 %v16045_v8 }
 0x8e1   :  { %v2251_v7 = vadd.f32 %v11372_v13, %v2231_v18  ;;  %12682 = vmatprep.subr.mxu1 %v16050_v16 }
 0x8e2   :  { %v2146_v21 = vpop.f32.mrf.mxu0  ;;  %12683 = vmatpush3.msra.mxu1 %v16050_v16 }
 0x8e3   :  { %v2254_v49 = vsub.f32 0.0, %v2251_v7  ;;  %v2236_v63 = vadd.f32 %v15986_v42, %v2146_v21  ;;  %12685 = vmatmul.mubr.msk.f32.vlgmr.msra.gmra.mxu1 %vm711_vm2, %v15777_v14 }
 0x8e4   :  { %v12640_v12 = vpop.f32.mrf.mxu0  ;;  %12687 = vmatprep.mubr.msk.f32.mxu1 %vm711_vm2, %v15785_v17 }
 0x8e5   :  { %v2257_v45 = vmul.f32 1.442695, %v2254_v49  ;;  %v2252_v24 = vadd.f32 %v11372_v13, %v2236_v63  ;;  %v11376_v63 = vld [vmem:[#allocation22] ss:$0 sm:$0xff] }
 0x8e6   :  { %v2151_v25 = vpop.f32.mrf.mxu0 }
 0x8e7   :  { %14006 = vpow2.f32 %v2257_v45  ;;  %v2255_v28 = vsub.f32 0.0, %v2252_v24  ;;  %v2241_v29 = vadd.f32 %v15988_v44, %v2151_v25  ;;  %12688 = vmatmul.mubr.msk.f32.gmra.mxu1 %vm711_vm2, %v15789_v20 }
 0x8e8   :  { %v12643_v60 = vpop.f32.mrf.mxu0  ;;  %12690 = vmatprep.mubr.msk.f32.mxu1 %vm711_vm2, %v15797_v23 }
 0x8e9   :  { %v2259_v42 = vmul.f32 1.442695, %v2255_v28  ;;  %v2253_v30 = vadd.f32 %v11372_v13, %v2241_v29  ;;  %v14587_v28 = vld [vmem:[%s17597_s30 + $0x8] sm:$0xff]  ;;  %v14589_v60 = vld [vmem:[%s17597_s30 + $0x10] sm:$0xff] }
 0x8ea   :  { %v14588_v29 = vld [vmem:[%s17598_s3 + $0x8] sm:$0xff] }
 0x8eb   :  { %14008 = vpow2.f32 %v2259_v42  ;;  %v2256_v32 = vsub.f32 0.0, %v2253_v30  ;;  %12691 = vmatmul.mubr.msk.f32.gmra.mxu1 %vm711_vm2, %v15801_v26  ;;  %v14590_v42 = vld [vmem:[%s17598_s3 + $0x10] sm:$0xff] }
 0x8ec   :  { %12714 = vmatprep.mubr.msk.f32.mxu1 %vm711_vm2, %v14585_v34  ;;  %v14591_v34 = vld [vmem:[%s17597_s30 + $0x18] sm:$0xff] }
 0x8ed   :  { %v2261_v22 = vmul.f32 1.442695, %v2256_v32  ;;  %v11397_v32 = vld [vmem:[%s17600_s19 + $0x30] sm:$0xff] }
 0x8ef   :  { %14010 = vpow2.f32 %v2261_v22  ;;  %v14592_v22 = vld [vmem:[%s17598_s3 + $0x18] sm:$0xff] }
 0x8f4   :  { %v14007_v44 = vpop.eup %14006 }
 0x8f5   :  { %v2263_v40 = vadd.f32 1.0, %v14007_v44  ;;  %v14593_v44 = vld [vmem:[%s17597_s30 + $0x20] sm:$0xff] }
 0x8f7   :  { %14012 = vrcp.f32 %v2263_v40  ;;  %v14594_v40 = vld [vmem:[%s17598_s3 + $0x20] sm:$0xff] }
 0x8f8   :  { %v14009_v58 = vpop.eup %14008 }
 0x8f9   :  { %v2264_v54 = vadd.f32 1.0, %v14009_v58  ;;  %v14595_v58 = vld [vmem:[%s17597_s30 + $0x28] sm:$0xff] }
 0x8fb   :  { %14014 = vrcp.f32 %v2264_v54  ;;  %v14596_v54 = vld [vmem:[%s17598_s3 + $0x28] sm:$0xff] }
 0x8fc   :  { %v14011_v41 = vpop.eup %14010 }
 0x8fd   :  { %v2265_v61 = vadd.f32 1.0, %v14011_v41  ;;  %v11400_v41 = vld [vmem:[%s17599_s0 + $0x28] sm:$0xff] }
 0x8ff   :  { %14016 = vrcp.f32 %v2265_v61  ;;  %v11396_v61 = vld [vmem:[%s17600_s19 + $0x28] sm:$0xff] }
 0x904   :  { %v14013_v6 = vpop.eup %14012 }
 0x905   :  { %v2272_v53 = vmul.f32 %v14013_v6, %v2251_v7  ;;  %v11399_v6 = vld [vmem:[%s17599_s0 + $0x20] sm:$0xff] }
 0x907   :  { %12670 = vmatmul.mubr.msk.f32.vlgmr.msra.gmra.mxu0 %vm1084_vm4, %v2272_v53  ;;  %v11395_v53 = vld [vmem:[%s17600_s19 + $0x20] sm:$0xff] }
 0x908   :  { %v14015_v55 = vpop.eup %14014  ;;  %12672 = vmatprep.mubr.msk.f32.mxu0 %vm15429_vm0, %v15428_v0 }
 0x909   :  { %v2273_v9 = vmul.f32 %v14015_v55, %v2252_v24 }
 0x90b   :  { %12673 = vmatmul.mubr.msk.f32.gmra.mxu0 %vm1084_vm4, %v2273_v9 }
 0x90c   :  { %v14017_v43 = vpop.eup %14016  ;;  %12675 = vmatprep.mubr.msk.f32.mxu0 %vm15429_vm0, %v15428_v0 }
 0x90d   :  { %v2274_v47 = vmul.f32 %v14017_v43, %v2253_v30  ;;  %v11401_v30 = vld [vmem:[%s17599_s0 + $0x30] sm:$0xff] }
 0x90f   :  { %12676 = vmatmul.mubr.msk.f32.gmra.mxu0 %vm1084_vm4, %v2274_v47 }
 0x910   :  { %12699 = vmatprep.mubr.msk.f32.mxu0 %vm711_vm2, %v14586_v31 }
 0x9a3   :  { %v16080_v48 = vpop.f32.mrf.mxu1 }
 0x9a4   :  { %v2477_v36 = vmul.f32 %v16080_v48, %v16080_v48 }
 0x9a5   :  { %v16084_v46 = vpop.f32.mrf.mxu1 }
 0x9a6   :  { %v2485_v38 = vsel %vm831_vm3, %v2477_v36, 0.0  ;;  %v2476_v50 = vmul.f32 %v16084_v46, %v16084_v46 }
 0x9a7   :  { %v16089_v51 = vpop.f32.mrf.mxu1  ;;  %2486 = vadd.xlane.f32.xlu1 %v2485_v38 }
 0x9a8   :  { %v2479_v19 = vmul.f32 %v16089_v51, %v16089_v51  ;;  %v2482_v27 = vsel %vm831_vm3, %v2476_v50, 0.0 }
 0x9a9   :  { %2483 = vadd.xlane.f32.xlu0 %v2482_v27  ;;  %v16094_v52 = vpop.f32.mrf.mxu1 }
 0x9aa   :  { %v2491_v39 = vsel %vm831_vm3, %v2479_v19, 0.0  ;;  %v2478_v59 = vmul.f32 %v16094_v52, %v16094_v52 }
 0x9ab   :  { %v16099_v62 = vpop.f32.mrf.mxu1  ;;  %2492 = vadd.xlane.f32.xlu1 %v2491_v39 }
 0x9ac   :  { %v2481_v1 = vmul.f32 %v16099_v62, %v16099_v62  ;;  %v2488_v57 = vsel %vm831_vm3, %v2478_v59, 0.0 }
 0x9ad   :  { %2489 = vadd.xlane.f32.xlu0 %v2488_v57  ;;  %v16104_v3 = vpop.f32.mrf.mxu1  ;;  %v3005_v57 = vld [vmem:[#allocation7 + $0x30] sm:$0xff] }
 0x9ae   :  { %v2497_v2 = vsel %vm831_vm3, %v2481_v1, 0.0  ;;  %v2480_v5 = vmul.f32 %v16104_v3, %v16104_v3  ;;  %v3006_v1 = vld [vmem:[#allocation7 + $0x38] sm:$0xff] }
 0x9af   :  { %2498 = vadd.xlane.f32.xlu1 %v2497_v2  ;;  %v3004_v2 = vld [vmem:[#allocation7 + $0x28] sm:$0xff] }
 0x9b0   :  { %v2494_v10 = vsel %vm831_vm3, %v2480_v5, 0.0  ;;  %v3003_v5 = vld [vmem:[#allocation7 + $0x20] sm:$0xff] }
 0x9b1   :  { %2495 = vadd.xlane.f32.xlu0 %v2494_v10 }
 0x9c7   :  { %v2354_v13 = vpop.f32.mrf.mxu0 }
 0x9c8   :  { %v2368_v45 = vadd.f32 %v2354_v13, %v15818_v37  ;;  %v11398_v37 = vld [vmem:[%s17600_s19 + $0x38] sm:$0xff] }
 0x9c9   :  { %v12671_v15 = vpop.f32.mrf.mxu0 }
 0x9ca   :  { %v11415_v15 = vld [vmem:[#allocation2 + $0x1] ss:$0 sm:$0xff] }
 0x9cb   :  { %v2359_v18 = vpop.f32.mrf.mxu0 }
 0x9cc   :  { %v2369_v21 = vadd.f32 %v2359_v18, %v15810_v35  ;;  %v11402_v35 = vld [vmem:[%s17599_s0 + $0x38] sm:$0xff] }
 0x9cd   :  { %v12674_v56 = vpop.f32.mrf.mxu0 }
 0x9ce   :  { %v16115_v25 = vadd.f32 %v11376_v63, %v2369_v21 }
 0x9cf   :  { %v2364_v7 = vpop.f32.mrf.mxu0 }
 0x9d0   :  { %v2370_v49 = vadd.f32 %v2364_v7, %v15808_v33  ;;  %v16121_v33 = vadd.f32 %v11376_v63, %v2368_v45 }
 0x9d1   :  { %v12677_v12 = vpop.f32.mrf.mxu0 }
 0x9d2   :  { %v16113_v24 = vadd.f32 %v11376_v63, %v2370_v49  ;;  %v11416_v63 = vld [vmem:[#allocation5 + $0x1] ss:$0 sm:$0xff] }
 0x9d4   :  { %12693 = vmatprep.subr.mxu0 %v16113_v24  ;;  %12708 = vmatprep.subr.mxu1 %v16113_v24 }
 0x9d5   :  { %12694 = vmatpush3.msra.mxu0 %v16113_v24  ;;  %12709 = vmatpush3.msra.mxu1 %v16113_v24 }
 0x9d6   :  { %12695 = vmatprep.subr.mxu0 %v16115_v25  ;;  %12710 = vmatprep.subr.mxu1 %v16115_v25 }
 0x9d7   :  { %12696 = vmatpush3.msra.mxu0 %v16115_v25  ;;  %12711 = vmatpush3.msra.mxu1 %v16115_v25 }
 0x9d8   :  { %12697 = vmatprep.subr.mxu0 %v16121_v33  ;;  %12712 = vmatprep.subr.mxu1 %v16121_v33 }
 0x9d9   :  { %12698 = vmatpush3.msra.mxu0 %v16121_v33  ;;  %12713 = vmatpush3.msra.mxu1 %v16121_v33 }
 0x9da   :  { %12700 = vmatmul.mubr.msk.f32.vlgmr.msra.gmra.mxu0 %vm711_vm2, %v14587_v28  ;;  %12715 = vmatmul.mubr.msk.f32.vlgmr.msra.gmra.mxu1 %vm711_vm2, %v14588_v29 }
 0x9db   :  { %12702 = vmatprep.mubr.msk.f32.mxu0 %vm711_vm2, %v14589_v60  ;;  %12717 = vmatprep.mubr.msk.f32.mxu1 %vm711_vm2, %v14590_v42 }
 0x9dc   :  { %12723 = vmatprep.subr.mxu0 %v11402_v35  ;;  %12740 = vmatprep.subr.mxu1 %v11398_v37 }
 0x9dd   :  { %12724 = vmatpush3.msra.mxu0 %v11402_v35  ;;  %12741 = vmatpush3.msra.mxu1 %v11398_v37 }
 0x9de   :  { %12703 = vmatmul.mubr.msk.f32.gmra.mxu0 %vm711_vm2, %v14591_v34  ;;  %12718 = vmatmul.mubr.msk.f32.gmra.mxu1 %vm711_vm2, %v14592_v22 }
 0x9df   :  { %12705 = vmatprep.mubr.msk.f32.mxu0 %vm711_vm2, %v14593_v44  ;;  %12720 = vmatprep.mubr.msk.f32.mxu1 %vm711_vm2, %v14594_v40 }
 0x9e0   :  { %12725 = vmatprep.subr.mxu0 %v11401_v30  ;;  %12742 = vmatprep.subr.mxu1 %v11397_v32 }
 0x9e1   :  { %12726 = vmatpush3.msra.mxu0 %v11401_v30  ;;  %12743 = vmatpush3.msra.mxu1 %v11397_v32 }
 0x9e2   :  { %12706 = vmatmul.mubr.msk.f32.gmra.mxu0 %vm711_vm2, %v14595_v58  ;;  %12721 = vmatmul.mubr.msk.f32.gmra.mxu1 %vm711_vm2, %v14596_v54 }
 0x9e3   :  { %12727 = vmatprep.subr.mxu0 %v11400_v41  ;;  %12744 = vmatprep.subr.mxu1 %v11396_v61 }
 0x9e4   :  { %12728 = vmatpush3.msra.mxu0 %v11400_v41  ;;  %12745 = vmatpush3.msra.mxu1 %v11396_v61 }
 0x9e5   :  { %12729 = vmatprep.subr.mxu0 %v11399_v6  ;;  %12746 = vmatprep.subr.mxu1 %v11395_v53 }
 0x9e6   :  { %12730 = vmatpush3.msra.mxu0 %v11399_v6  ;;  %12747 = vmatpush3.msra.mxu1 %v11395_v53 }
 0x9e7   :  { %12757 = vmatprep.subr.mxu0 %v3006_v1 }
 0xa30   :  { %v2487_v10 = vpop.xlane.xlu1 %2486 }
 0xa31   :  { %v2935_v7 = vmul.f32 %v11415_v15, %v2487_v10 }
 0xa32   :  { %v2484_v13 = vpop.xlane.xlu0 %2483 }
 0xa33   :  { %v2934_v35 = vmul.f32 %v11415_v15, %v2484_v13 }
 0xa34   :  { %v2493_v21 = vpop.xlane.xlu1 %2492 }
 0xa35   :  { %v2937_v30 = vmul.f32 %v11415_v15, %v2493_v21 }
 0xa36   :  { %v2490_v37 = vpop.xlane.xlu0 %2489 }
 0xa37   :  { %v2936_v44 = vmul.f32 %v11415_v15, %v2490_v37 }
 0xa38   :  { %v2499_v54 = vpop.xlane.xlu1 %2498 }
 0xa9a   :  { %v12701_v55 = vpop.f32.mrf.mxu0  ;;  %v12716_v9 = vpop.f32.mrf.mxu1 }
 0xa9c   :  { %v2566_v43 = vpop.f32.mrf.mxu0  ;;  %v2661_v47 = vpop.f32.mrf.mxu1 }
 0xa9d   :  { %12731 = vmatprep.mubr.msk.f32.mxu0 %vm1084_vm4, %v2661_v47  ;;  %12748 = vmatprep.mubr.msk.f32.mxu1 %vm1084_vm4, %v2566_v43  ;;  %v2496_v43 = vpop.xlane.xlu0 %2495 }
 0xa9e   :  { %v12704_v31 = vpop.f32.mrf.mxu0  ;;  %v12719_v36 = vpop.f32.mrf.mxu1  ;;  %12732 = vmatmul.mubr.msk.f32.vlgmr.msra.gmra.mxu0 %vm1084_vm4, %v12716_v9  ;;  %12749 = vmatmul.mubr.msk.f32.vlgmr.msra.gmra.mxu1 %vm1084_vm4, %v12701_v55 }
 0xa9f   :  { %12758 = vmatpush3.msra.mxu0 %v3006_v1 }
 0xaa0   :  { %v2576_v38 = vpop.f32.mrf.mxu0  ;;  %v2671_v50 = vpop.f32.mrf.mxu1  ;;  %12759 = vmatprep.subr.mxu0 %v3005_v57 }
 0xaa1   :  { %12734 = vmatprep.mubr.msk.f32.mxu0 %vm1084_vm4, %v2671_v50  ;;  %12751 = vmatprep.mubr.msk.f32.mxu1 %vm1084_vm4, %v2576_v38  ;;  %v2939_v50 = vmul.f32 %v11415_v15, %v2499_v54 }
 0xaa2   :  { %v12707_v19 = vpop.f32.mrf.mxu0  ;;  %v12722_v27 = vpop.f32.mrf.mxu1  ;;  %12735 = vmatmul.mubr.msk.f32.gmra.mxu0 %vm1084_vm4, %v12719_v36  ;;  %12752 = vmatmul.mubr.msk.f32.gmra.mxu1 %vm1084_vm4, %v12704_v31 }
 0xaa3   :  { %12760 = vmatpush3.msra.mxu0 %v3005_v57 }
 0xaa4   :  { %v2586_v39 = vpop.f32.mrf.mxu0  ;;  %v2681_v59 = vpop.f32.mrf.mxu1  ;;  %12761 = vmatprep.subr.mxu0 %v3004_v2 }
 0xaa5   :  { %12737 = vmatprep.mubr.msk.f32.mxu0 %vm1084_vm4, %v2681_v59  ;;  %12754 = vmatprep.mubr.msk.f32.mxu1 %vm1084_vm4, %v2586_v39 }
 0xaa6   :  { %12738 = vmatmul.mubr.msk.f32.gmra.mxu0 %vm1084_vm4, %v12722_v27  ;;  %12755 = vmatmul.mubr.msk.f32.gmra.mxu1 %vm1084_vm4, %v12707_v19 }
 0xaa7   :  { %12762 = vmatpush3.msra.mxu0 %v3004_v2  ;;  %v2938_v2 = vmul.f32 %v11415_v15, %v2496_v43 }
 0xaa8   :  { %12763 = vmatprep.subr.mxu0 %v3003_v5 }
 0xaa9   :  { %12764 = vmatpush3.msra.mxu0 %v3003_v5 }
 0xaaa   :  { %12791 = vmatprep.subr.mxu0 %v15428_v0 }
 0xb5e   :  { %v12733_v18 = vpop.f32.mrf.mxu0  ;;  %v12750_v56 = vpop.f32.mrf.mxu1 }
 0xb5f   :  { %v2903_v49 = vadd.f32 %v12750_v56, %v12733_v18 }
 0xb60   :  { %v2784_v12 = vpop.f32.mrf.mxu0  ;;  %v2897_v45 = vpop.f32.mrf.mxu1 }
 0xb61   :  { %v2941_v28 = vadd.f32 %v2935_v7, %v2903_v49  ;;  %v2898_v29 = vadd.f32 %v2897_v45, %v2784_v12 }
 0xb62   :  { %v12736_v60 = vpop.f32.mrf.mxu0  ;;  %v12753_v42 = vpop.f32.mrf.mxu1 }
 0xb63   :  { %v16172_v32 = vadd.f32 %v11416_v63, %v2941_v28  ;;  %v2940_v34 = vadd.f32 %v2934_v35, %v2898_v29  ;;  %v2913_v22 = vadd.f32 %v12753_v42, %v12736_v60 }
 0xb64   :  { %v2794_v40 = vpop.f32.mrf.mxu0  ;;  %v2907_v58 = vpop.f32.mrf.mxu1 }
 0xb65   :  { %v2961_v41 = vsub.f32 0.0, %v16172_v32  ;;  %v2954_v61 = vadd.f32 %v11416_v63, %v2940_v34  ;;  %v2943_v6 = vadd.f32 %v2937_v30, %v2913_v22  ;;  %v2908_v53 = vadd.f32 %v2907_v58, %v2794_v40 }
 0xb66   :  { %v12739_v55 = vpop.f32.mrf.mxu0  ;;  %v12756_v9 = vpop.f32.mrf.mxu1 }
 0xb67   :  { %v2968_v47 = vmul.f32 1.442695, %v2961_v41  ;;  %v2960_v31 = vsub.f32 0.0, %v2954_v61  ;;  %v2957_v36 = vadd.f32 %v11416_v63, %v2943_v6  ;;  %v2942_v38 = vadd.f32 %v2936_v44, %v2908_v53 }
 0xb68   :  { %v2923_v19 = vadd.f32 %v12756_v9, %v12739_v55  ;;  %v2804_v27 = vpop.f32.mrf.mxu0  ;;  %v2917_v39 = vpop.f32.mrf.mxu1 }
 0xb69   :  { %14018 = vpow2.f32 %v2968_v47  ;;  %v2966_v59 = vmul.f32 1.442695, %v2960_v31  ;;  %v2963_v1 = vsub.f32 0.0, %v2957_v36  ;;  %v2956_v57 = vadd.f32 %v11416_v63, %v2942_v38 }
 0xb6a   :  { %v2945_v5 = vadd.f32 %v2939_v50, %v2923_v19  ;;  %v2918_v10 = vadd.f32 %v2917_v39, %v2804_v27 }
 0xb6b   :  { %14020 = vpow2.f32 %v2966_v59  ;;  %v2972_v13 = vmul.f32 1.442695, %v2963_v1  ;;  %v2962_v18 = vsub.f32 0.0, %v2956_v57 }
 0xb6c   :  { %v2959_v56 = vadd.f32 %v11416_v63, %v2945_v5  ;;  %v2944_v7 = vadd.f32 %v2938_v2, %v2918_v10 }
 0xb6d   :  { %14022 = vpow2.f32 %v2972_v13  ;;  %v2970_v21 = vmul.f32 1.442695, %v2962_v18 }
 0xb6e   :  { %v2965_v49 = vsub.f32 0.0, %v2959_v56  ;;  %v2958_v12 = vadd.f32 %v11416_v63, %v2944_v7 }
 0xb6f   :  { %14024 = vpow2.f32 %v2970_v21 }
 0xb70   :  { %v2976_v45 = vmul.f32 1.442695, %v2965_v49  ;;  %v2964_v35 = vsub.f32 0.0, %v2958_v12 }
 0xb72   :  { %14026 = vpow2.f32 %v2976_v45  ;;  %v2974_v37 = vmul.f32 1.442695, %v2964_v35 }
 0xb74   :  { %14028 = vpow2.f32 %v2974_v37 }
 0xb76   :  { %v14019_v28 = vpop.eup %14018 }
 0xb77   :  { %v2979_v29 = vadd.f32 1.0, %v14019_v28 }
 0xb78   :  { %v14021_v15 = vpop.eup %14020 }
 0xb79   :  { %v2978_v60 = vadd.f32 1.0, %v14021_v15  ;;  %14030 = vrcp.f32 %v2979_v29 }
 0xb7a   :  { %v14023_v42 = vpop.eup %14022 }
 0xb7b   :  { %14032 = vrcp.f32 %v2978_v60  ;;  %v2981_v30 = vadd.f32 1.0, %v14023_v42 }
 0xb7c   :  { %v14025_v34 = vpop.eup %14024 }
 0xb7d   :  { %v2980_v22 = vadd.f32 1.0, %v14025_v34  ;;  %14034 = vrcp.f32 %v2981_v30 }
 0xb7f   :  { %v14027_v44 = vpop.eup %14026  ;;  %14036 = vrcp.f32 %v2980_v22 }
 0xb80   :  { %v2983_v63 = vadd.f32 1.0, %v14027_v44 }
 0xb81   :  { %v14029_v40 = vpop.eup %14028 }
 0xb82   :  { %v2982_v58 = vadd.f32 1.0, %v14029_v40  ;;  %14038 = vrcp.f32 %v2983_v63 }
 0xb84   :  { %14040 = vrcp.f32 %v2982_v58 }
 0xb86   :  { %v14031_v54 = vpop.eup %14030 }
 0xb87   :  { %v2997_v53 = vmul.f32 %v14031_v54, %v16172_v32  ;;  %v11417_v32 = vld [vmem:[#allocation8 + $0x1] ss:$0 sm:$0xff] }
 0xb88   :  { %v14033_v41 = vpop.eup %14032 }
 0xb89   :  { %v2996_v6 = vmul.f32 %v14033_v41, %v2954_v61 }
 0xb8a   :  { %v14035_v55 = vpop.eup %14034 }
 0xb8b   :  { %12765 = vmatprep.mubr.msk.f32.mxu0 %vm1084_vm4, %v2996_v6  ;;  %v2999_v47 = vmul.f32 %v14035_v55, %v2957_v36 }
 0xb8c   :  { %v14037_v9 = vpop.eup %14036  ;;  %12766 = vmatmul.mubr.msk.f32.vlgmr.msra.gmra.mxu0 %vm1084_vm4, %v2997_v53 }
 0xb8d   :  { %v2998_v43 = vmul.f32 %v14037_v9, %v2956_v57  ;;  %v11424_v9 = vld [vmem:[#allocation10 + $0x1] ss:$0 sm:$0xff] }
 0xb8f   :  { %12768 = vmatprep.mubr.msk.f32.mxu0 %vm1084_vm4, %v2998_v43  ;;  %v14039_v31 = vpop.eup %14038 }
 0xb90   :  { %12769 = vmatmul.mubr.msk.f32.gmra.mxu0 %vm1084_vm4, %v2999_v47  ;;  %v3001_v19 = vmul.f32 %v14039_v31, %v2959_v56 }
 0xb91   :  { %v14041_v38 = vpop.eup %14040 }
 0xb92   :  { %v3000_v50 = vmul.f32 %v14041_v38, %v2958_v12 }
 0xb94   :  { %12771 = vmatprep.mubr.msk.f32.mxu0 %vm1084_vm4, %v3000_v50 }
 0xb95   :  { %12772 = vmatmul.mubr.msk.f32.gmra.mxu0 %vm1084_vm4, %v3001_v19 }
 0xb96   :  { %12803 = vmatprep.mubr.msk.f32.mxu0 %vm15429_vm0, %v15428_v0 }
 0xc4c   :  { %v12767_v61 = vpop.f32.mrf.mxu0 }
 0xc4d   :  { %v3105_v27 = vadd.f32 %v12767_v61, %v11417_v32 }
 0xc4e   :  { %v3099_v39 = vpop.f32.mrf.mxu0 }
 0xc4f   :  { %v3129_v36 = vsub.f32 0.0, %v3105_v27  ;;  %v3100_v59 = vadd.f32 %v11417_v32, %v3099_v39 }
 0xc50   :  { %v12770_v1 = vpop.f32.mrf.mxu0 }
 0xc51   :  { %v3136_v57 = vmul.f32 1.442695, %v3129_v36  ;;  %v3128_v2 = vsub.f32 0.0, %v3100_v59  ;;  %v3115_v5 = vadd.f32 %v12770_v1, %v11417_v32 }
 0xc52   :  { %v3109_v10 = vpop.f32.mrf.mxu0 }
 0xc53   :  { %14042 = vpow2.f32 %v3136_v57  ;;  %v3134_v13 = vmul.f32 1.442695, %v3128_v2  ;;  %v3131_v18 = vsub.f32 0.0, %v3115_v5  ;;  %v3110_v56 = vadd.f32 %v11417_v32, %v3109_v10 }
 0xc55   :  { %14044 = vpow2.f32 %v3134_v13  ;;  %v3140_v7 = vmul.f32 1.442695, %v3131_v18  ;;  %v3130_v21 = vsub.f32 0.0, %v3110_v56  ;;  %v12773_v49 = vpop.f32.mrf.mxu0 }
 0xc56   :  { %v3125_v12 = vadd.f32 %v12773_v49, %v11417_v32 }
 0xc57   :  { %14046 = vpow2.f32 %v3140_v7  ;;  %v3138_v45 = vmul.f32 1.442695, %v3130_v21  ;;  %v3119_v35 = vpop.f32.mrf.mxu0 }
 0xc58   :  { %v3133_v37 = vsub.f32 0.0, %v3125_v12  ;;  %v3120_v28 = vadd.f32 %v11417_v32, %v3119_v35  ;;  %v11426_v35 = vld [vmem:[%s17601_s22 + $0x1] ss:$0 sm:$0xff] }
 0xc59   :  { %14048 = vpow2.f32 %v3138_v45  ;;  %v3291_v45 = vld [vmem:[#allocation11 + $0x30] sm:$0xff] }
 0xc5a   :  { %v3144_v29 = vmul.f32 1.442695, %v3133_v37  ;;  %v3132_v15 = vsub.f32 0.0, %v3120_v28 }
 0xc5c   :  { %14050 = vpow2.f32 %v3144_v29  ;;  %v3142_v60 = vmul.f32 1.442695, %v3132_v15 }
 0xc5e   :  { %14052 = vpow2.f32 %v3142_v60 }
 0xc60   :  { %v14043_v42 = vpop.eup %14042 }
 0xc61   :  { %v3147_v30 = vadd.f32 1.0, %v14043_v42 }
 0xc62   :  { %v14045_v34 = vpop.eup %14044 }
 0xc63   :  { %14054 = vrcp.f32 %v3147_v30  ;;  %v3146_v22 = vadd.f32 1.0, %v14045_v34 }
 0xc64   :  { %v14047_v44 = vpop.eup %14046 }
 0xc65   :  { %14056 = vrcp.f32 %v3146_v22  ;;  %v3149_v63 = vadd.f32 1.0, %v14047_v44 }
 0xc66   :  { %v14049_v40 = vpop.eup %14048 }
 0xc67   :  { %14058 = vrcp.f32 %v3149_v63  ;;  %v3148_v58 = vadd.f32 1.0, %v14049_v40 }
 0xc69   :  { %v14051_v54 = vpop.eup %14050  ;;  %14060 = vrcp.f32 %v3148_v58 }
 0xc6a   :  { %v3151_v41 = vadd.f32 1.0, %v14051_v54 }
 0xc6b   :  { %v14053_v6 = vpop.eup %14052 }
 0xc6c   :  { %14062 = vrcp.f32 %v3151_v41  ;;  %v3150_v53 = vadd.f32 1.0, %v14053_v6 }
 0xc6e   :  { %14064 = vrcp.f32 %v3150_v53 }
 0xc70   :  { %v14055_v55 = vpop.eup %14054 }
 0xc71   :  { %v16184_v43 = vmul.f32 %v14055_v55, %v3105_v27 }
 0xc72   :  { %v14057_v47 = vpop.eup %14056 }
 0xc73   :  { %v16186_v31 = vmul.f32 %v14057_v47, %v3100_v59  ;;  %v3179_v38 = vmul.f32 %v11424_v9, %v16184_v43 }
 0xc74   :  { %v14059_v50 = vpop.eup %14058 }
 0xc75   :  { %v16189_v19 = vmul.f32 %v14059_v50, %v3115_v5  ;;  %v3187_v32 = vsel %vm1084_vm4, %v3179_v38, 0.0  ;;  %v3178_v61 = vmul.f32 %v11424_v9, %v16186_v31 }
 0xc76   :  { %v14061_v39 = vpop.eup %14060  ;;  %3188 = vadd.xlane.f32.xlu1 %v3187_v32 }
 0xc77   :  { %v16193_v36 = vmul.f32 %v14061_v39, %v3110_v56  ;;  %v3184_v1 = vsel %vm1084_vm4, %v3178_v61, 0.0  ;;  %v3181_v27 = vmul.f32 %v11424_v9, %v16189_v19 }
 0xc78   :  { %3185 = vadd.xlane.f32.xlu0 %v3184_v1 }
 0xc79   :  { %v14063_v59 = vpop.eup %14062  ;;  %v3193_v57 = vsel %vm1084_vm4, %v3181_v27, 0.0  ;;  %v3180_v2 = vmul.f32 %v11424_v9, %v16193_v36 }
 0xc7a   :  { %v16199_v5 = vmul.f32 %v14063_v59, %v3125_v12  ;;  %3194 = vadd.xlane.f32.xlu1 %v3193_v57  ;;  %v3292_v12 = vld [vmem:[#allocation11 + $0x38] sm:$0xff] }
 0xc7b   :  { %v14065_v10 = vpop.eup %14064  ;;  %v3190_v13 = vsel %vm1084_vm4, %v3180_v2, 0.0  ;;  %12774 = vmatprep.subr.mxu1 %v3292_v12 }
 0xc7c   :  { %v16202_v18 = vmul.f32 %v14065_v10, %v3120_v28  ;;  %3191 = vadd.xlane.f32.xlu0 %v3190_v13  ;;  %v3183_v56 = vmul.f32 %v11424_v9, %v16199_v5  ;;  %12775 = vmatpush3.msra.mxu1 %v3292_v12  ;;  %v3290_v12 = vld [vmem:[#allocation11 + $0x28] sm:$0xff] }
 0xc7d   :  { %12776 = vmatprep.subr.mxu1 %v3291_v45 }
 0xc7e   :  { %v3199_v7 = vsel %vm1084_vm4, %v3183_v56, 0.0  ;;  %v3182_v21 = vmul.f32 %v11424_v9, %v16202_v18  ;;  %12777 = vmatpush3.msra.mxu1 %v3291_v45  ;;  %v3289_v45 = vld [vmem:[#allocation11 + $0x20] sm:$0xff] }
 0xc7f   :  { %3200 = vadd.xlane.f32.xlu1 %v3199_v7  ;;  %12778 = vmatprep.subr.mxu1 %v3290_v12 }
 0xc80   :  { %v3196_v49 = vsel %vm1084_vm4, %v3182_v21, 0.0  ;;  %12779 = vmatpush3.msra.mxu1 %v3290_v12 }
 0xc81   :  { %3197 = vadd.xlane.f32.xlu0 %v3196_v49  ;;  %12780 = vmatprep.subr.mxu1 %v3289_v45 }
 0xc82   :  { %12781 = vmatpush3.msra.mxu1 %v3289_v45 }
 0xc83   :  { %12812 = vmatprep.subr.mxu1 %v15428_v0 }
 0xcff   :  { %v3189_v37 = vpop.xlane.xlu1 %3188 }
 0xd00   :  { %v3211_v28 = vadd.f32 %v11426_v35, %v3189_v37 }
 0xd01   :  { %v3186_v29 = vpop.xlane.xlu0 %3185 }
 0xd02   :  { %v3217_v15 = vsub.f32 0.0, %v3211_v28  ;;  %v3210_v60 = vadd.f32 %v11426_v35, %v3186_v29 }
 0xd03   :  { %v3195_v42 = vpop.xlane.xlu1 %3194 }
 0xd04   :  { %v3224_v30 = vmul.f32 1.442695, %v3217_v15  ;;  %v3216_v34 = vsub.f32 0.0, %v3210_v60  ;;  %v3213_v22 = vadd.f32 %v11426_v35, %v3195_v42 }
 0xd05   :  { %v3192_v44 = vpop.xlane.xlu0 %3191 }
 0xd06   :  { %14066 = vpow2.f32 %v3224_v30  ;;  %v3222_v63 = vmul.f32 1.442695, %v3216_v34  ;;  %v3219_v40 = vsub.f32 0.0, %v3213_v22  ;;  %v3212_v58 = vadd.f32 %v11426_v35, %v3192_v44 }
 0xd08   :  { %14068 = vpow2.f32 %v3222_v63  ;;  %v3228_v54 = vmul.f32 1.442695, %v3219_v40  ;;  %v3218_v41 = vsub.f32 0.0, %v3212_v58  ;;  %v3201_v6 = vpop.xlane.xlu1 %3200 }
 0xd09   :  { %v3215_v53 = vadd.f32 %v11426_v35, %v3201_v6  ;;  %v14598_v6 = vld [vmem:[%s17602_s21 + $0x8] sm:$0xff] }
 0xd0a   :  { %14070 = vpow2.f32 %v3228_v54  ;;  %v3226_v55 = vmul.f32 1.442695, %v3218_v41  ;;  %v3198_v9 = vpop.xlane.xlu0 %3197 }
 0xd0b   :  { %v3221_v47 = vsub.f32 0.0, %v3215_v53  ;;  %v3214_v38 = vadd.f32 %v11426_v35, %v3198_v9  ;;  %v3664_v53 = vld [vmem:[#allocation16 + $0x20] sm:$0xff] }
 0xd0c   :  { %14072 = vpow2.f32 %v3226_v55  ;;  %v14599_v55 = vld [vmem:[%s17602_s21 + $0x10] sm:$0xff] }
 0xd0d   :  { %v3232_v50 = vmul.f32 1.442695, %v3221_v47  ;;  %v3220_v32 = vsub.f32 0.0, %v3214_v38  ;;  %v11427_v47 = vld [vmem:[#allocation13 + $0x1] ss:$0 sm:$0xff] }
 0xd0f   :  { %14074 = vpow2.f32 %v3232_v50  ;;  %v3230_v61 = vmul.f32 1.442695, %v3220_v32 }
 0xd11   :  { %14076 = vpow2.f32 %v3230_v61 }
 0xd13   :  { %v14067_v39 = vpop.eup %14066 }
 0xd14   :  { %v3235_v1 = vadd.f32 1.0, %v14067_v39 }
 0xd15   :  { %v14069_v27 = vpop.eup %14068 }
 0xd16   :  { %14078 = vrcp.f32 %v3235_v1  ;;  %v3234_v59 = vadd.f32 1.0, %v14069_v27 }
 0xd17   :  { %v14071_v57 = vpop.eup %14070 }
 0xd18   :  { %14080 = vrcp.f32 %v3234_v59  ;;  %v3237_v2 = vadd.f32 1.0, %v14071_v57 }
 0xd19   :  { %v14073_v10 = vpop.eup %14072 }
 0xd1a   :  { %v3236_v13 = vadd.f32 1.0, %v14073_v10  ;;  %14082 = vrcp.f32 %v3237_v2 }
 0xd1c   :  { %v14075_v56 = vpop.eup %14074  ;;  %14084 = vrcp.f32 %v3236_v13 }
 0xd1d   :  { %v3239_v7 = vadd.f32 1.0, %v14075_v56 }
 0xd1e   :  { %v14077_v21 = vpop.eup %14076 }
 0xd1f   :  { %v3238_v49 = vadd.f32 1.0, %v14077_v21  ;;  %14086 = vrcp.f32 %v3239_v7 }
 0xd21   :  { %14088 = vrcp.f32 %v3238_v49 }
 0xd23   :  { %v14079_v35 = vpop.eup %14078 }
 0xd24   :  { %3259 = vperm.xlu1 %13897, %v14079_v35  }
 0xd25   :  { %v14081_v37 = vpop.eup %14080 }
 0xd26   :  { %3254 = vperm.xlu0 %13896, %v14081_v37  }
 0xd27   :  { %v14083_v28 = vpop.eup %14082 }
 0xd29   :  { %v14085_v29 = vpop.eup %14084 }
 0xd2a   :  { %3264 = vperm.xlu1 %13897, %v14085_v29   ;;  %3269 = vperm.xlu0 %13896, %v14083_v28  }
 0xd2c   :  { %v14087_v15 = vpop.eup %14086 }
 0xd2e   :  { %v14089_v60 = vpop.eup %14088  ;;  %3279 = vperm.xlu0 %13896, %v14087_v15  }
 0xd2f   :  { %3274 = vperm.xlu1 %13897, %v14089_v60  }
 0xd9f   :  { %v3260_v42 = vpop.permute.xlu1 %3259 }
 0xda0   :  { %v3283_v22 = vmul.f32 %v3260_v42, %v16184_v43 }
 0xda1   :  { %v3255_v30 = vpop.permute.xlu0 %3254 }
 0xda2   :  { %v3282_v34 = vmul.f32 %v3255_v30, %v16186_v31 }
 0xda4   :  { %12782 = vmatprep.mubr.msk.f32.mxu1 %vm1084_vm4, %v3282_v34 }
 0xda5   :  { %v3265_v44 = vpop.permute.xlu1 %3264  ;;  %12783 = vmatmul.mubr.msk.f32.vlgmr.msra.gmra.mxu1 %vm1084_vm4, %v3283_v22  ;;  %v3270_v63 = vpop.permute.xlu0 %3269 }
 0xda6   :  { %v3284_v40 = vmul.f32 %v3265_v44, %v16193_v36  ;;  %v3285_v58 = vmul.f32 %v3270_v63, %v16189_v19  ;;  %v3667_v19 = vld [vmem:[#allocation16 + $0x38] sm:$0xff] }
 0xda7   :  { %v14597_v36 = vld [vmem:[%s17602_s21] sm:$0xff] }
 0xda8   :  { %12785 = vmatprep.mubr.msk.f32.mxu1 %vm1084_vm4, %v3284_v40 }
 0xda9   :  { %12786 = vmatmul.mubr.msk.f32.gmra.mxu1 %vm1084_vm4, %v3285_v58  ;;  %v3280_v54 = vpop.permute.xlu0 %3279 }
 0xdaa   :  { %v3275_v41 = vpop.permute.xlu1 %3274  ;;  %v3287_v31 = vmul.f32 %v3280_v54, %v16199_v5  ;;  %v3666_v5 = vld [vmem:[#allocation16 + $0x30] sm:$0xff] }
 0xdab   :  { %v3286_v43 = vmul.f32 %v3275_v41, %v16202_v18  ;;  %v3665_v18 = vld [vmem:[#allocation16 + $0x28] sm:$0xff] }
 0xdac   :  { %12813 = vmatpush3.msra.mxu1 %v3287_v31 }
 0xdad   :  { %12788 = vmatprep.mubr.msk.f32.mxu1 %vm1084_vm4, %v3286_v43  ;;  %12814 = vmatprep.subr.mxu1 %v15428_v0 }
 0xdae   :  { %12789 = vmatmul.mubr.msk.f32.gmra.mxu1 %vm1084_vm4, %v3287_v31 }
 0xdaf   :  { %12815 = vmatpush3.msra.mxu1 %v3286_v43  ;;  %12824 = vmatprep.mubr.msk.f32.mxu1 %vm15429_vm0, %v15428_v0 }
 0xdb0   :  { %12816 = vmatprep.subr.mxu1 %v15428_v0 }
 0xdb1   :  { %12817 = vmatpush3.msra.mxu1 %v3285_v58 }
 0xdb2   :  { %12818 = vmatprep.subr.mxu1 %v15428_v0 }
 0xdb3   :  { %12819 = vmatpush3.msra.mxu1 %v3284_v40 }
 0xdb4   :  { %12820 = vmatprep.subr.mxu1 %v15428_v0 }
 0xdb5   :  { %12821 = vmatpush3.msra.mxu1 %v3283_v22 }
 0xdb6   :  { %12822 = vmatprep.subr.mxu1 %v15428_v0 }
 0xdb7   :  { %12823 = vmatpush3.msra.mxu1 %v3282_v34 }
 0xdb8   :  { %12825 = vmatmul.mubr.msk.f32.vlgmr.msra.gmra.mxu1 %vm1876_vm5, %v14597_v36  ;;  %12850 = vmatprep.subr.mxu1 %v15428_v0 }
 0xdb9   :  { %12827 = vmatprep.mubr.msk.f32.mxu1 %vm15429_vm0, %v15428_v0  ;;  %12851 = vmatpush3.msra.mxu1 %v3667_v19 }
 0xdba   :  { %12852 = vmatprep.subr.mxu1 %v15428_v0 }
 0xdbb   :  { %12853 = vmatpush3.msra.mxu1 %v3666_v5 }
 0xdbc   :  { %12828 = vmatmul.mubr.msk.f32.gmra.mxu1 %vm1876_vm5, %v14598_v6  ;;  %12854 = vmatprep.subr.mxu1 %v15428_v0 }
 0xdbd   :  { %12830 = vmatprep.mubr.msk.f32.mxu1 %vm15429_vm0, %v15428_v0  ;;  %12855 = vmatpush3.msra.mxu1 %v3665_v18 }
 0xdbe   :  { %12856 = vmatprep.subr.mxu1 %v15428_v0 }
 0xdbf   :  { %12857 = vmatpush3.msra.mxu1 %v3664_v53 }
 0xdc0   :  { %12831 = vmatmul.mubr.msk.f32.gmra.mxu1 %vm1876_vm5, %v14599_v55  ;;  %12884 = vmatprep.subr.mxu1 %v15428_v0 }
 0xdc1   :  { %12858 = vmatprep.mubr.msk.f32.mxu1 %vm15429_vm0, %v15428_v0 }
 0xdc4   :  { %12859 = vmatmul.mubr.msk.f32.vlgmr.msra.gmra.mxu1 %vm1084_vm4, %v16121_v33 }
 0xdc5   :  { %12861 = vmatprep.mubr.msk.f32.mxu1 %vm15429_vm0, %v15428_v0 }
 0xdc8   :  { %12862 = vmatmul.mubr.msk.f32.gmra.mxu1 %vm1084_vm4, %v16115_v25 }
 0xdc9   :  { %12864 = vmatprep.mubr.msk.f32.mxu1 %vm15429_vm0, %v15428_v0 }
 0xdcc   :  { %12865 = vmatmul.mubr.msk.f32.gmra.mxu1 %vm1084_vm4, %v16113_v24 }
 0xdcd   :  { %12892 = vmatprep.mubr.msk.f32.mxu1 %vm15429_vm0, %v15428_v0 }
 0xe65   :  { %v12784_v9 = vpop.f32.mrf.mxu1 }
 0xe66   :  { %v16258_v50 = vadd.f32 %v12784_v9, %v11427_v47 }
 0xe67   :  { %v3385_v38 = vpop.f32.mrf.mxu1 }
 0xe68   :  { %v16260_v32 = vadd.f32 %v11427_v47, %v3385_v38  ;;  %v3415_v59 = vsub.f32 0.0, %v16258_v50 }
 0xe69   :  { %v12787_v61 = vpop.f32.mrf.mxu1 }
 0xe6a   :  { %v3414_v39 = vsub.f32 0.0, %v16260_v32  ;;  %v3401_v1 = vadd.f32 %v12787_v61, %v11427_v47  ;;  %v3422_v49 = vmul.f32 1.442695, %v3415_v59 }
 0xe6b   :  { %v3395_v27 = vpop.f32.mrf.mxu1 }
 0xe6c   :  { %v3417_v57 = vsub.f32 0.0, %v3401_v1  ;;  %v3396_v2 = vadd.f32 %v11427_v47, %v3395_v27  ;;  %v3420_v10 = vmul.f32 1.442695, %v3414_v39 }
 0xe6e   :  { %v3426_v13 = vmul.f32 1.442695, %v3417_v57  ;;  %v3416_v56 = vsub.f32 0.0, %v3396_v2  ;;  %v12790_v7 = vpop.f32.mrf.mxu1 }
 0xe6f   :  { %v3411_v21 = vadd.f32 %v12790_v7, %v11427_v47  ;;  %v11434_v7 = vld [vmem:[#allocation14 + $0x1] ss:$0 sm:$0xff] }
 0xe70   :  { %14090 = vpow2.f32 %v3426_v13  ;;  %v3424_v12 = vmul.f32 1.442695, %v3416_v56  ;;  %v3405_v45 = vpop.f32.mrf.mxu1 }
 0xe71   :  { %14092 = vpow2.f32 %v3420_v10  ;;  %v3419_v35 = vsub.f32 0.0, %v3411_v21  ;;  %v3406_v37 = vadd.f32 %v11427_v47, %v3405_v45 }
 0xe72   :  { %14094 = vpow2.f32 %v3424_v12 }
 0xe73   :  { %v3430_v28 = vmul.f32 1.442695, %v3419_v35  ;;  %v3418_v29 = vsub.f32 0.0, %v3406_v37  ;;  %14096 = vpow2.f32 %v3422_v49 }
 0xe75   :  { %14098 = vpow2.f32 %v3430_v28  ;;  %v3428_v15 = vmul.f32 1.442695, %v3418_v29 }
 0xe77   :  { %14100 = vpow2.f32 %v3428_v15 }
 0xe78   :  { %v16264_v60 = vpop.f32.mrf.mxu1 }
 0xe7a   :  { %v12826_v42 = vpop.f32.mrf.mxu1 }
 0xe7c   :  { %v16266_v30 = vpop.f32.mrf.mxu1 }
 0xe7d   :  { %v14091_v34 = vpop.eup %14090 }
 0xe7e   :  { %v14093_v22 = vpop.eup %14092  ;;  %v12829_v44 = vpop.f32.mrf.mxu1  ;;  %v3435_v40 = vadd.f32 1.0, %v14091_v34 }
 0xe7f   :  { %v14095_v63 = vpop.eup %14094  ;;  %v3432_v43 = vadd.f32 1.0, %v14093_v22 }
 0xe80   :  { %v3434_v58 = vadd.f32 1.0, %v14095_v63  ;;  %v16268_v54 = vpop.f32.mrf.mxu1  ;;  %v14097_v41 = vpop.eup %14096 }
 0xe81   :  { %v3433_v6 = vadd.f32 1.0, %v14097_v41 }
 0xe82   :  { %v14099_v31 = vpop.eup %14098  ;;  %v12832_v19 = vpop.f32.mrf.mxu1  ;;  %14102 = vrcp.f32 %v3434_v58 }
 0xe83   :  { %v3437_v36 = vadd.f32 1.0, %v14099_v31  ;;  %14104 = vrcp.f32 %v3435_v40 }
 0xe84   :  { %v14101_v5 = vpop.eup %14100  ;;  %v16270_v18 = vpop.f32.mrf.mxu1 }
 0xe85   :  { %14106 = vrcp.f32 %v3437_v36  ;;  %v3436_v53 = vadd.f32 1.0, %v14101_v5 }
 0xe86   :  { %14108 = vrcp.f32 %v3432_v43  ;;  %v12860_v55 = vpop.f32.mrf.mxu1 }
 0xe87   :  { %14110 = vrcp.f32 %v3436_v53 }
 0xe88   :  { %v16272_v9 = vpop.f32.mrf.mxu1  ;;  %14112 = vrcp.f32 %v3433_v6 }
 0xe8a   :  { %v12863_v47 = vpop.f32.mrf.mxu1 }
 0xe8c   :  { %v16274_v38 = vpop.f32.mrf.mxu1 }
 0xe8e   :  { %v12866_v61 = vpop.f32.mrf.mxu1 }
 0xe8f   :  { %v14103_v39 = vpop.eup %14102 }
 0xe90   :  { %v14105_v27 = vpop.eup %14104  ;;  %v3452_v10 = vmul.f32 %v14103_v39, %v3396_v2 }
 0xe91   :  { %v3453_v49 = vmul.f32 %v14105_v27, %v3401_v1 }
 0xe92   :  { %v14107_v59 = vpop.eup %14106  ;;  %v3466_v42 = vmul.f32 %v11434_v7, %v3452_v10  ;;  %v14602_v10 = vld [vmem:[%s17603_s23 + $0x10] sm:$0xff] }
 0xe93   :  { %v14109_v57 = vpop.eup %14108  ;;  %v3455_v13 = vmul.f32 %v14107_v59, %v3411_v21  ;;  %v3467_v44 = vmul.f32 %v11434_v7, %v3453_v49  ;;  %v3672_v59 = vld [vmem:[#allocation17 + $0x38] sm:$0xff]  ;;  %v3885_v49 = vld [vmem:[#allocation20 + $0x28] sm:$0xff] }
 0xe94   :  { %v14111_v56 = vpop.eup %14110  ;;  %v3450_v28 = vmul.f32 %v14109_v57, %v16260_v32  ;;  %v3476_v2 = vsel %vm1084_vm4, %v3466_v42, 0.0  ;;  %v3669_v57 = vld [vmem:[#allocation17 + $0x20] sm:$0xff] }
 0xe95   :  { %v3454_v12 = vmul.f32 %v14111_v56, %v3406_v37  ;;  %v3469_v45 = vmul.f32 %v11434_v7, %v3455_v13  ;;  %v14113_v35 = vpop.eup %14112  ;;  %v3479_v1 = vsel %vm1084_vm4, %v3467_v44, 0.0  ;;  %v3994_v13 = vld [vmem:[%s17604_s26 + $0x18] sm:$0xff]  ;;  %v3992_v56 = vld [vmem:[%s17604_s26 + $0x8] sm:$0xff]  ;;  %v11447_v44 = vld [vmem:[#allocation19 + $0x1] ss:$0 sm:$0xff] }
 0xe96   :  { %v3451_v34 = vmul.f32 %v14113_v35, %v16258_v50  ;;  %v3464_v21 = vmul.f32 %v11434_v7, %v3450_v28  ;;  %12885 = vmatpush3.msra.mxu1 %v3994_v13 }
 0xe97   :  { %v3485_v29 = vsel %vm1084_vm4, %v3469_v45, 0.0  ;;  %v3468_v15 = vmul.f32 %v11434_v7, %v3454_v12  ;;  %12886 = vmatprep.subr.mxu1 %v15428_v0  ;;  %v3884_v12 = vld [vmem:[#allocation20 + $0x20] sm:$0xff] }
 0xe98   :  { %3486 = vadd.xlane.f32.xlu1 %v3485_v29  ;;  %v3465_v37 = vmul.f32 %v11434_v7, %v3451_v34  ;;  %v3470_v32 = vsel %vm1084_vm4, %v3464_v21, 0.0  ;;  %v3887_v7 = vld [vmem:[#allocation20 + $0x38] sm:$0xff] }
 0xe99   :  { %v3482_v22 = vsel %vm1084_vm4, %v3468_v15, 0.0 }
 0xe9a   :  { %3483 = vadd.xlane.f32.xlu0 %v3482_v22  ;;  %v3473_v63 = vsel %vm1084_vm4, %v3465_v37, 0.0 }
 0xe9c   :  { %3477 = vadd.xlane.f32.xlu1 %v3476_v2 }
 0xe9e   :  { %3480 = vadd.xlane.f32.xlu0 %v3479_v1 }
 0xea0   :  { %3471 = vadd.xlane.f32.xlu1 %v3470_v32 }
 0xea2   :  { %3474 = vadd.xlane.f32.xlu0 %v3473_v63 }
 0xf21   :  { %v3487_v40 = vpop.xlane.xlu1 %3486 }
 0xf22   :  { %14114 = vtanh.f32 %v3487_v40 }
 0xf23   :  { %v3484_v50 = vpop.xlane.xlu0 %3483 }
 0xf24   :  { %14116 = vtanh.f32 %v3484_v50 }
 0xf25   :  { %v3478_v58 = vpop.xlane.xlu1 %3477 }
 0xf26   :  { %14118 = vtanh.f32 %v3478_v58 }
 0xf27   :  { %v3481_v41 = vpop.xlane.xlu0 %3480 }
 0xf28   :  { %14120 = vtanh.f32 %v3481_v41 }
 0xf29   :  { %v3472_v31 = vpop.xlane.xlu1 %3471 }
 0xf2a   :  { %14122 = vtanh.f32 %v3472_v31 }
 0xf2b   :  { %v3475_v43 = vpop.xlane.xlu0 %3474 }
 0xf2c   :  { %14124 = vtanh.f32 %v3475_v43 }
 0xf2f   :  { %v14115_v19 = vpop.eup %14114 }
 0xf30   :  { %v3499_v36 = vmul.f32 %v14115_v19, %v16099_v62 }
 0xf31   :  { %v14117_v5 = vpop.eup %14116 }
 0xf32   :  { %12792 = vmatpush3.msra.mxu0 %v3499_v36  ;;  %v3498_v6 = vmul.f32 %v14117_v5, %v16104_v3 }
 0xf33   :  { %12793 = vmatprep.subr.mxu0 %v15428_v0  ;;  %v14119_v53 = vpop.eup %14118 }
 0xf34   :  { %12794 = vmatpush3.msra.mxu0 %v3498_v6  ;;  %v3496_v39 = vmul.f32 %v14119_v53, %v16094_v52  ;;  %v3671_v52 = vld [vmem:[#allocation17 + $0x30] sm:$0xff] }
 0xf35   :  { %v14121_v55 = vpop.eup %14120  ;;  %12795 = vmatprep.subr.mxu0 %v15428_v0 }
 0xf36   :  { %v3497_v47 = vmul.f32 %v14121_v55, %v16089_v51  ;;  %v14600_v51 = vld [vmem:[%s17603_s23] sm:$0xff] }
 0xf37   :  { %v14123_v61 = vpop.eup %14122 }
 0xf38   :  { %12796 = vmatpush3.msra.mxu0 %v3497_v47  ;;  %v3494_v3 = vmul.f32 %v14123_v61, %v16084_v46  ;;  %v14601_v46 = vld [vmem:[%s17603_s23 + $0x8] sm:$0xff] }
 0xf39   :  { %v14125_v27 = vpop.eup %14124  ;;  %12797 = vmatprep.subr.mxu0 %v15428_v0 }
 0xf3a   :  { %12798 = vmatpush3.msra.mxu0 %v3496_v39  ;;  %v3495_v62 = vmul.f32 %v14125_v27, %v16080_v48  ;;  %v3670_v48 = vld [vmem:[#allocation17 + $0x28] sm:$0xff] }
 0xf3b   :  { %12799 = vmatprep.subr.mxu0 %v15428_v0 }
 0xf3c   :  { %12800 = vmatpush3.msra.mxu0 %v3495_v62 }
 0xf3d   :  { %12801 = vmatprep.subr.mxu0 %v15428_v0 }
 0xf3e   :  { %12802 = vmatpush3.msra.mxu0 %v3494_v3 }
 0xf3f   :  { %12804 = vmatmul.mubr.msk.f32.vlgmr.msra.gmra.mxu0 %vm1876_vm5, %v14600_v51  ;;  %12833 = vmatprep.subr.mxu0 %v15428_v0  ;;  %v4092_v51 = vld [vmem:[#allocation28 + $0x8] sm:$0xff] }
 0xf40   :  { %12806 = vmatprep.mubr.msk.f32.mxu0 %vm15429_vm0, %v15428_v0  ;;  %12834 = vmatpush3.msra.mxu0 %v3672_v59 }
 0xf41   :  { %12835 = vmatprep.subr.mxu0 %v15428_v0 }
 0xf42   :  { %12836 = vmatpush3.msra.mxu0 %v3671_v52 }
 0xf43   :  { %12807 = vmatmul.mubr.msk.f32.gmra.mxu0 %vm1876_vm5, %v14601_v46  ;;  %12837 = vmatprep.subr.mxu0 %v15428_v0 }
 0xf44   :  { %12809 = vmatprep.mubr.msk.f32.mxu0 %vm15429_vm0, %v15428_v0  ;;  %12838 = vmatpush3.msra.mxu0 %v3670_v48  ;;  %v11451_v48 = vld [vmem:[#allocation22 + $0x1] ss:$0 sm:$0xff] }
 0xf45   :  { %12839 = vmatprep.subr.mxu0 %v15428_v0 }
 0xf46   :  { %12840 = vmatpush3.msra.mxu0 %v3669_v57 }
 0xf47   :  { %12810 = vmatmul.mubr.msk.f32.gmra.mxu0 %vm1876_vm5, %v14602_v10  ;;  %12867 = vmatprep.subr.mxu0 %v15428_v0 }
 0xf48   :  { %12841 = vmatprep.mubr.msk.f32.mxu0 %vm15429_vm0, %v15428_v0 }
 0xf4b   :  { %12842 = vmatmul.mubr.msk.f32.vlgmr.msra.gmra.mxu0 %vm1084_vm4, %v16264_v60  ;;  %v3993_v60 = vld [vmem:[%s17604_s26 + $0x10] sm:$0xff] }
 0xf4c   :  { %12844 = vmatprep.mubr.msk.f32.mxu0 %vm15429_vm0, %v15428_v0  ;;  %12887 = vmatpush3.msra.mxu1 %v3993_v60 }
 0xf4d   :  { %12888 = vmatprep.subr.mxu1 %v15428_v0  ;;  %12868 = vmatpush3.msra.mxu0 %v3887_v7 }
 0xf4e   :  { %12889 = vmatpush3.msra.mxu1 %v3992_v56  ;;  %12869 = vmatprep.subr.mxu0 %v15428_v0 }
 0xf4f   :  { %12845 = vmatmul.mubr.msk.f32.gmra.mxu0 %vm1084_vm4, %v16266_v30  ;;  %12890 = vmatprep.subr.mxu1 %v15428_v0  ;;  %v3991_v30 = vld [vmem:[%s17604_s26] sm:$0xff] }
 0xf50   :  { %12847 = vmatprep.mubr.msk.f32.mxu0 %vm15429_vm0, %v15428_v0  ;;  %12891 = vmatpush3.msra.mxu1 %v3991_v30 }
 0xf53   :  { %12848 = vmatmul.mubr.msk.f32.gmra.mxu0 %vm1084_vm4, %v16268_v54  ;;  %v3886_v54 = vld [vmem:[#allocation20 + $0x30] sm:$0xff] }
 0xf54   :  { %12875 = vmatprep.mubr.msk.f32.mxu0 %vm15429_vm0, %v15428_v0  ;;  %12870 = vmatpush3.msra.mxu0 %v3886_v54 }
 0xf55   :  { %12871 = vmatprep.subr.mxu0 %v15428_v0 }
 0xf56   :  { %12872 = vmatpush3.msra.mxu0 %v3885_v49  ;;  %v4091_v49 = vld [vmem:[#allocation28] sm:$0xff] }
 0xf57   :  { %12873 = vmatprep.subr.mxu0 %v15428_v0 }
 0xf58   :  { %12874 = vmatpush3.msra.mxu0 %v3884_v12  ;;  %v11452_v12 = vld [vmem:[#allocation26] ss:$0 sm:$0xff] }
 0xf59   :  { %12901 = vmatprep.subr.mxu0 %v15428_v0 }
 0xfff   :  { %v16335_v45 = vpop.f32.mrf.mxu0 }
0x1000   :  { %v16365_v7 = vadd.f32 %v16335_v45, %v16050_v16 }
0x1001   :  { %v12805_v35 = vpop.f32.mrf.mxu0 }
0x1003   :  { %v3571_v28 = vpop.f32.mrf.mxu0 }
0x1004   :  { %v16356_v60 = vadd.f32 %v3571_v28, %v16045_v8 }
0x1005   :  { %v12808_v29 = vpop.f32.mrf.mxu0 }
0x1007   :  { %v3576_v15 = vpop.f32.mrf.mxu0 }
0x1008   :  { %v16338_v42 = vadd.f32 %v3576_v15, %v16042_v4 }
0x1009   :  { %v12811_v34 = vpop.f32.mrf.mxu0 }
0x100a   :  { %12914 = vmatprep.subr.mxu1 %v16338_v42 }
0x100b   :  { %v3748_v22 = vpop.f32.mrf.mxu0 }
0x100c   :  { %v3838_v2 = vadd.f32 %v16270_v18, %v3748_v22 }
0x100d   :  { %v12843_v21 = vpop.f32.mrf.mxu0 }
0x100e   :  { %v3859_v1 = vadd.f32 %v11447_v44, %v3838_v2  ;;  %v14604_v21 = vld [vmem:[%s17597_s30] sm:$0xff] }
0x100f   :  { %v3753_v37 = vpop.f32.mrf.mxu0 }
0x1010   :  { %v3862_v32 = vsub.f32 0.0, %v3859_v1  ;;  %v3843_v63 = vadd.f32 %v16272_v9, %v3753_v37 }
0x1011   :  { %v12846_v40 = vpop.f32.mrf.mxu0 }
0x1012   :  { %v3865_v50 = vmul.f32 1.442695, %v3862_v32  ;;  %v3860_v58 = vadd.f32 %v11447_v44, %v3843_v63 }
0x1013   :  { %v3758_v41 = vpop.f32.mrf.mxu0 }
0x1014   :  { %14126 = vpow2.f32 %v3865_v50  ;;  %v3863_v4 = vsub.f32 0.0, %v3860_v58  ;;  %v3848_v31 = vadd.f32 %v16274_v38, %v3758_v41 }
0x1015   :  { %v12849_v43 = vpop.f32.mrf.mxu0 }
0x1016   :  { %v3867_v19 = vmul.f32 1.442695, %v3863_v4  ;;  %v3861_v36 = vadd.f32 %v11447_v44, %v3848_v31 }
0x1018   :  { %14128 = vpow2.f32 %v3867_v19  ;;  %v3864_v5 = vsub.f32 0.0, %v3861_v36 }
0x101a   :  { %v3869_v18 = vmul.f32 1.442695, %v3864_v5 }
0x101c   :  { %14130 = vpow2.f32 %v3869_v18 }
0x1021   :  { %v14127_v6 = vpop.eup %14126 }
0x1022   :  { %v3871_v53 = vadd.f32 1.0, %v14127_v6 }
0x1024   :  { %14132 = vrcp.f32 %v3871_v53 }
0x1025   :  { %v14129_v55 = vpop.eup %14128 }
0x1026   :  { %v3872_v9 = vadd.f32 1.0, %v14129_v55 }
0x1028   :  { %14134 = vrcp.f32 %v3872_v9 }
0x1029   :  { %v14131_v47 = vpop.eup %14130 }
0x102a   :  { %v3873_v61 = vadd.f32 1.0, %v14131_v47 }
0x102c   :  { %14136 = vrcp.f32 %v3873_v61 }
0x1031   :  { %v14133_v39 = vpop.eup %14132 }
0x1032   :  { %v3880_v27 = vmul.f32 %v14133_v39, %v3859_v1 }
0x1034   :  { %12876 = vmatmul.mubr.msk.f32.vlgmr.msra.gmra.mxu0 %vm1084_vm4, %v3880_v27  ;;  %v11456_v27 = vld [vmem:[#allocation29] ss:$0 sm:$0xff] }
0x1035   :  { %v14135_v38 = vpop.eup %14134  ;;  %12878 = vmatprep.mubr.msk.f32.mxu0 %vm15429_vm0, %v15428_v0  ;;  %12902 = vmatpush3.msra.mxu0 %v4092_v51 }
0x1036   :  { %v3881_v62 = vmul.f32 %v14135_v38, %v3860_v58  ;;  %12903 = vmatprep.subr.mxu0 %v15428_v0 }
0x1037   :  { %12904 = vmatpush3.msra.mxu0 %v4091_v49  ;;  %v11483_v49 = vld [vmem:[%s17599_s0 + $0x48] sm:$0xff] }
0x1038   :  { %12879 = vmatmul.mubr.msk.f32.gmra.mxu0 %vm1084_vm4, %v3881_v62 }
0x1039   :  { %v14137_v3 = vpop.eup %14136  ;;  %12881 = vmatprep.mubr.msk.f32.mxu0 %vm15429_vm0, %v15428_v0 }
0x103a   :  { %v3882_v59 = vmul.f32 %v14137_v3, %v3861_v36 }
0x103c   :  { %12882 = vmatmul.mubr.msk.f32.gmra.mxu0 %vm1084_vm4, %v3882_v59 }
0x103d   :  { %12905 = vmatprep.mubr.msk.f32.mxu0 %vm15429_vm0, %v15428_v0 }
0x10f4   :  { %v3963_v52 = vpop.f32.mrf.mxu0 }
0x10f5   :  { %v3977_v46 = vadd.f32 %v3963_v52, %v16121_v33  ;;  %v11485_v52 = vld [vmem:[%s17599_s0 + $0x58] sm:$0xff] }
0x10f6   :  { %v12877_v57 = vpop.f32.mrf.mxu0 }
0x10f7   :  { %v3988_v10 = vadd.f32 %v11451_v48, %v3977_v46  ;;  %v14605_v46 = vld [vmem:[%s17597_s30 + $0x8] sm:$0xff] }
0x10f8   :  { %v3968_v13 = vpop.f32.mrf.mxu0  ;;  %v14606_v57 = vld [vmem:[%s17598_s3 + $0x8] sm:$0xff] }
0x10f9   :  { %v3978_v56 = vadd.f32 %v3968_v13, %v16115_v25  ;;  %12893 = vmatmul.mubr.msk.f32.vlgmr.msra.gmra.mxu1 %vm1084_vm4, %v3988_v10  ;;  %v14607_v10 = vld [vmem:[%s17597_s30 + $0x10] sm:$0xff] }
0x10fa   :  { %12915 = vmatpush3.msra.mxu1 %v16338_v42  ;;  %v12880_v30 = vpop.f32.mrf.mxu0  ;;  %12895 = vmatprep.mubr.msk.f32.mxu1 %vm15429_vm0, %v15428_v0  ;;  %v14608_v13 = vld [vmem:[%s17598_s3 + $0x10] sm:$0xff] }
0x10fb   :  { %v3989_v33 = vadd.f32 %v11451_v48, %v3978_v56  ;;  %12916 = vmatprep.subr.mxu1 %v16356_v60  ;;  %v11484_v56 = vld [vmem:[%s17599_s0 + $0x50] sm:$0xff] }
0x10fc   :  { %12917 = vmatpush3.msra.mxu1 %v16356_v60  ;;  %v3973_v8 = vpop.f32.mrf.mxu0  ;;  %v11480_v30 = vld [vmem:[%s17600_s19 + $0x50] sm:$0xff] }
0x10fd   :  { %v3979_v25 = vadd.f32 %v3973_v8, %v16113_v24  ;;  %12918 = vmatprep.subr.mxu1 %v16365_v7  ;;  %12896 = vmatmul.mubr.msk.f32.gmra.mxu1 %vm1084_vm4, %v3989_v33  ;;  %v14603_v24 = vld [vmem:[%s17598_s3] sm:$0xff]  ;;  %v14609_v33 = vld [vmem:[%s17597_s30 + $0x18] sm:$0xff] }
0x10fe   :  { %12919 = vmatpush3.msra.mxu1 %v16365_v7  ;;  %v12883_v54 = vpop.f32.mrf.mxu0  ;;  %12898 = vmatprep.mubr.msk.f32.mxu1 %vm15429_vm0, %v15428_v0  ;;  %v14610_v8 = vld [vmem:[%s17598_s3 + $0x18] sm:$0xff] }
0x10ff   :  { %v3990_v16 = vadd.f32 %v11451_v48, %v3979_v25  ;;  %v11481_v48 = vld [vmem:[%s17600_s19 + $0x58] sm:$0xff]  ;;  %v14611_v25 = vld [vmem:[%s17597_s30 + $0x20] sm:$0xff] }
0x1100   :  { %v14612_v54 = vld [vmem:[%s17598_s3 + $0x20] sm:$0xff] }
0x1101   :  { %12899 = vmatmul.mubr.msk.f32.gmra.mxu1 %vm1084_vm4, %v3990_v16  ;;  %v14613_v16 = vld [vmem:[%s17597_s30 + $0x28] sm:$0xff] }
0x1102   :  { %12920 = vmatprep.mubr.msk.f32.mxu1 %vm711_vm2, %v15772_v11 }
0x1105   :  { %12921 = vmatmul.mubr.msk.f32.vlgmr.msra.gmra.mxu1 %vm711_vm2, %v15777_v14 }
0x1106   :  { %12923 = vmatprep.mubr.msk.f32.mxu1 %vm711_vm2, %v15785_v17 }
0x1109   :  { %12924 = vmatmul.mubr.msk.f32.gmra.mxu1 %vm711_vm2, %v15789_v20 }
0x110a   :  { %12926 = vmatprep.mubr.msk.f32.mxu1 %vm711_vm2, %v15797_v23 }
0x110d   :  { %12927 = vmatmul.mubr.msk.f32.gmra.mxu1 %vm711_vm2, %v15801_v26 }
0x110e   :  { %12950 = vmatprep.mubr.msk.f32.mxu1 %vm711_vm2, %v14603_v24  ;;  %v14614_v24 = vld [vmem:[%s17598_s3 + $0x28] sm:$0xff] }
0x11b9   :  { %v4077_v45 = vpop.f32.mrf.mxu1 }
0x11ba   :  { %v16390_v35 = vadd.f32 %v11452_v12, %v4077_v45  ;;  %v11482_v45 = vld [vmem:[%s17599_s0 + $0x40] sm:$0xff] }
0x11bb   :  { %v12894_v28 = vpop.f32.mrf.mxu1 }
0x11bc   :  { %12906 = vmatmul.mubr.msk.f32.vlgmr.msra.gmra.mxu0 %vm621_vm1, %v16390_v35  ;;  %v11478_v28 = vld [vmem:[%s17600_s19 + $0x40] sm:$0xff] }
0x11bd   :  { %v4082_v29 = vpop.f32.mrf.mxu1  ;;  %12908 = vmatprep.mubr.msk.f32.mxu0 %vm15429_vm0, %v15428_v0 }
0x11be   :  { %v16396_v15 = vadd.f32 %v11452_v12, %v4082_v29 }
0x11bf   :  { %v12897_v34 = vpop.f32.mrf.mxu1 }
0x11c0   :  { %12909 = vmatmul.mubr.msk.f32.gmra.mxu0 %vm621_vm1, %v16396_v15 }
0x11c1   :  { %v4087_v22 = vpop.f32.mrf.mxu1  ;;  %12911 = vmatprep.mubr.msk.f32.mxu0 %vm15429_vm0, %v15428_v0 }
0x11c2   :  { %v16402_v44 = vadd.f32 %v11452_v12, %v4087_v22  ;;  %v11479_v12 = vld [vmem:[%s17600_s19 + $0x48] sm:$0xff] }
0x11c3   :  { %v12900_v2 = vpop.f32.mrf.mxu1 }
0x11c4   :  { %12912 = vmatmul.mubr.msk.f32.gmra.mxu0 %vm621_vm1, %v16402_v44 }
0x11c5   :  { %12935 = vmatprep.mubr.msk.f32.mxu0 %vm711_vm2, %v14604_v21  ;;  %v16408_v1 = vpop.f32.mrf.mxu1 }
0x11c6   :  { %v4285_v37 = vmul.f32 %v16408_v1, %v16408_v1 }
0x11c7   :  { %v16412_v32 = vpop.f32.mrf.mxu1 }
0x11c8   :  { %v4293_v63 = vsel %vm831_vm3, %v4285_v37, 0.0  ;;  %v4284_v40 = vmul.f32 %v16412_v32, %v16412_v32 }
0x11c9   :  { %v16417_v50 = vpop.f32.mrf.mxu1  ;;  %4294 = vadd.xlane.f32.xlu1 %v4293_v63 }
0x11ca   :  { %v4287_v58 = vmul.f32 %v16417_v50, %v16417_v50  ;;  %v4290_v41 = vsel %vm831_vm3, %v4284_v40, 0.0 }
0x11cb   :  { %4291 = vadd.xlane.f32.xlu0 %v4290_v41  ;;  %v16422_v4 = vpop.f32.mrf.mxu1 }
0x11cc   :  { %v4299_v31 = vsel %vm831_vm3, %v4287_v58, 0.0  ;;  %v4286_v43 = vmul.f32 %v16422_v4, %v16422_v4 }
0x11cd   :  { %v16427_v19 = vpop.f32.mrf.mxu1  ;;  %4300 = vadd.xlane.f32.xlu1 %v4299_v31 }
0x11ce   :  { %v4289_v36 = vmul.f32 %v16427_v19, %v16427_v19  ;;  %v4296_v5 = vsel %vm831_vm3, %v4286_v43, 0.0 }
0x11cf   :  { %4297 = vadd.xlane.f32.xlu0 %v4296_v5  ;;  %v16432_v18 = vpop.f32.mrf.mxu1  ;;  %v4813_v5 = vld [vmem:[#allocation7 + $0x50] sm:$0xff] }
0x11d0   :  { %v4305_v6 = vsel %vm831_vm3, %v4289_v36, 0.0  ;;  %v4288_v53 = vmul.f32 %v16432_v18, %v16432_v18  ;;  %v4814_v36 = vld [vmem:[#allocation7 + $0x58] sm:$0xff] }
0x11d1   :  { %4306 = vadd.xlane.f32.xlu1 %v4305_v6  ;;  %v4812_v6 = vld [vmem:[#allocation7 + $0x48] sm:$0xff] }
0x11d2   :  { %v4302_v55 = vsel %vm831_vm3, %v4288_v53, 0.0  ;;  %v4811_v53 = vld [vmem:[#allocation7 + $0x40] sm:$0xff] }
0x11d3   :  { %4303 = vadd.xlane.f32.xlu0 %v4302_v55 }
0x1252   :  { %v4295_v55 = vpop.xlane.xlu1 %4294 }
0x127c   :  { %v4175_v9 = vpop.f32.mrf.mxu0 }
0x127d   :  { %v16446_v51 = vadd.f32 %v11456_v27, %v4175_v9  ;;  %v4292_v9 = vpop.xlane.xlu0 %4291 }
0x127e   :  { %v12907_v47 = vpop.f32.mrf.mxu0 }
0x127f   :  { %v11498_v47 = vld [vmem:[#allocation2 + $0x2] ss:$0 sm:$0xff] }
0x1280   :  { %v4180_v61 = vpop.f32.mrf.mxu0 }
0x1281   :  { %v16440_v59 = vadd.f32 %v11456_v27, %v4180_v61 }
0x1282   :  { %v12910_v39 = vpop.f32.mrf.mxu0 }
0x1284   :  { %v4185_v38 = vpop.f32.mrf.mxu0 }
0x1285   :  { %v16438_v62 = vadd.f32 %v11456_v27, %v4185_v38  ;;  %v4743_v27 = vmul.f32 %v11498_v47, %v4295_v55  ;;  %v4301_v38 = vpop.xlane.xlu1 %4300 }
0x1286   :  { %v12913_v3 = vpop.f32.mrf.mxu0 }
0x1287   :  { %12929 = vmatprep.subr.mxu0 %v16438_v62  ;;  %12944 = vmatprep.subr.mxu1 %v16438_v62 }
0x1288   :  { %12930 = vmatpush3.msra.mxu0 %v16438_v62  ;;  %12945 = vmatpush3.msra.mxu1 %v16438_v62 }
0x1289   :  { %12931 = vmatprep.subr.mxu0 %v16440_v59  ;;  %12946 = vmatprep.subr.mxu1 %v16440_v59 }
0x128a   :  { %12932 = vmatpush3.msra.mxu0 %v16440_v59  ;;  %12947 = vmatpush3.msra.mxu1 %v16440_v59 }
0x128b   :  { %12933 = vmatprep.subr.mxu0 %v16446_v51  ;;  %12948 = vmatprep.subr.mxu1 %v16446_v51 }
0x128c   :  { %12934 = vmatpush3.msra.mxu0 %v16446_v51  ;;  %12949 = vmatpush3.msra.mxu1 %v16446_v51 }
0x128d   :  { %12936 = vmatmul.mubr.msk.f32.vlgmr.msra.gmra.mxu0 %vm711_vm2, %v14605_v46  ;;  %12951 = vmatmul.mubr.msk.f32.vlgmr.msra.gmra.mxu1 %vm711_vm2, %v14606_v57  ;;  %v4742_v57 = vmul.f32 %v11498_v47, %v4292_v9 }
0x128e   :  { %12938 = vmatprep.mubr.msk.f32.mxu0 %vm711_vm2, %v14607_v10  ;;  %12953 = vmatprep.mubr.msk.f32.mxu1 %vm711_vm2, %v14608_v13  ;;  %v4298_v10 = vpop.xlane.xlu0 %4297 }
0x128f   :  { %12959 = vmatprep.subr.mxu0 %v11485_v52  ;;  %12976 = vmatprep.subr.mxu1 %v11481_v48 }
0x1290   :  { %12960 = vmatpush3.msra.mxu0 %v11485_v52  ;;  %12977 = vmatpush3.msra.mxu1 %v11481_v48  ;;  %v11499_v52 = vld [vmem:[#allocation5 + $0x2] ss:$0 sm:$0xff] }
0x1291   :  { %12939 = vmatmul.mubr.msk.f32.gmra.mxu0 %vm711_vm2, %v14609_v33  ;;  %12954 = vmatmul.mubr.msk.f32.gmra.mxu1 %vm711_vm2, %v14610_v8  ;;  %v4745_v8 = vmul.f32 %v11498_v47, %v4301_v38 }
0x1292   :  { %12941 = vmatprep.mubr.msk.f32.mxu0 %vm711_vm2, %v14611_v25  ;;  %12956 = vmatprep.mubr.msk.f32.mxu1 %vm711_vm2, %v14612_v54 }
0x1293   :  { %12961 = vmatprep.subr.mxu0 %v11484_v56  ;;  %12978 = vmatprep.subr.mxu1 %v11480_v30 }
0x1294   :  { %12962 = vmatpush3.msra.mxu0 %v11484_v56  ;;  %12979 = vmatpush3.msra.mxu1 %v11480_v30 }
0x1295   :  { %12942 = vmatmul.mubr.msk.f32.gmra.mxu0 %vm711_vm2, %v14613_v16  ;;  %12957 = vmatmul.mubr.msk.f32.gmra.mxu1 %vm711_vm2, %v14614_v24  ;;  %v4744_v24 = vmul.f32 %v11498_v47, %v4298_v10 }
0x1296   :  { %12963 = vmatprep.subr.mxu0 %v11483_v49  ;;  %12980 = vmatprep.subr.mxu1 %v11479_v12 }
0x1297   :  { %12964 = vmatpush3.msra.mxu0 %v11483_v49  ;;  %12981 = vmatpush3.msra.mxu1 %v11479_v12 }
0x1298   :  { %12965 = vmatprep.subr.mxu0 %v11482_v45  ;;  %12982 = vmatprep.subr.mxu1 %v11478_v28 }
0x1299   :  { %12966 = vmatpush3.msra.mxu0 %v11482_v45  ;;  %12983 = vmatpush3.msra.mxu1 %v11478_v28  ;;  %v4307_v45 = vpop.xlane.xlu1 %4306 }
0x129a   :  { %12993 = vmatprep.subr.mxu0 %v4814_v36 }
0x134d   :  { %v12937_v29 = vpop.f32.mrf.mxu0  ;;  %v12952_v34 = vpop.f32.mrf.mxu1 }
0x134f   :  { %v4374_v22 = vpop.f32.mrf.mxu0  ;;  %v4469_v2 = vpop.f32.mrf.mxu1 }
0x1350   :  { %12967 = vmatprep.mubr.msk.f32.mxu0 %vm1084_vm4, %v4469_v2  ;;  %12984 = vmatprep.mubr.msk.f32.mxu1 %vm1084_vm4, %v4374_v22 }
0x1351   :  { %v12940_v21 = vpop.f32.mrf.mxu0  ;;  %v12955_v37 = vpop.f32.mrf.mxu1  ;;  %12968 = vmatmul.mubr.msk.f32.vlgmr.msra.gmra.mxu0 %vm1084_vm4, %v12952_v34  ;;  %12985 = vmatmul.mubr.msk.f32.vlgmr.msra.gmra.mxu1 %vm1084_vm4, %v12937_v29 }
0x1352   :  { %12994 = vmatpush3.msra.mxu0 %v4814_v36 }
0x1353   :  { %v4384_v63 = vpop.f32.mrf.mxu0  ;;  %v4479_v40 = vpop.f32.mrf.mxu1  ;;  %12995 = vmatprep.subr.mxu0 %v4813_v5 }
0x1354   :  { %12970 = vmatprep.mubr.msk.f32.mxu0 %vm1084_vm4, %v4479_v40  ;;  %12987 = vmatprep.mubr.msk.f32.mxu1 %vm1084_vm4, %v4384_v63 }
0x1355   :  { %v12943_v58 = vpop.f32.mrf.mxu0  ;;  %v12958_v41 = vpop.f32.mrf.mxu1  ;;  %12971 = vmatmul.mubr.msk.f32.gmra.mxu0 %vm1084_vm4, %v12955_v37  ;;  %12988 = vmatmul.mubr.msk.f32.gmra.mxu1 %vm1084_vm4, %v12940_v21 }
0x1356   :  { %12996 = vmatpush3.msra.mxu0 %v4813_v5  ;;  %v4304_v37 = vpop.xlane.xlu0 %4303 }
0x1357   :  { %v4394_v31 = vpop.f32.mrf.mxu0  ;;  %v4489_v43 = vpop.f32.mrf.mxu1  ;;  %12997 = vmatprep.subr.mxu0 %v4812_v6  ;;  %v4746_v9 = vmul.f32 %v11498_v47, %v4304_v37 }
0x1358   :  { %12973 = vmatprep.mubr.msk.f32.mxu0 %vm1084_vm4, %v4489_v43  ;;  %12990 = vmatprep.mubr.msk.f32.mxu1 %vm1084_vm4, %v4394_v31  ;;  %v4747_v31 = vmul.f32 %v11498_v47, %v4307_v45 }
0x1359   :  { %12974 = vmatmul.mubr.msk.f32.gmra.mxu0 %vm1084_vm4, %v12958_v41  ;;  %12991 = vmatmul.mubr.msk.f32.gmra.mxu1 %vm1084_vm4, %v12943_v58 }
0x135a   :  { %12998 = vmatpush3.msra.mxu0 %v4812_v6 }
0x135b   :  { %12999 = vmatprep.subr.mxu0 %v4811_v53 }
0x135c   :  { %13000 = vmatpush3.msra.mxu0 %v4811_v53 }
0x135d   :  { %13027 = vmatprep.subr.mxu0 %v15428_v0 }
0x1411   :  { %v12969_v61 = vpop.f32.mrf.mxu0  ;;  %v12986_v39 = vpop.f32.mrf.mxu1 }
0x1412   :  { %v4711_v3 = vadd.f32 %v12986_v39, %v12969_v61 }
0x1413   :  { %v4592_v48 = vpop.f32.mrf.mxu0  ;;  %v4705_v46 = vpop.f32.mrf.mxu1 }
0x1414   :  { %v4749_v13 = vadd.f32 %v4743_v27, %v4711_v3  ;;  %v4706_v56 = vadd.f32 %v4705_v46, %v4592_v48 }
0x1415   :  { %v12972_v30 = vpop.f32.mrf.mxu0  ;;  %v12989_v33 = vpop.f32.mrf.mxu1 }
0x1416   :  { %v16497_v25 = vadd.f32 %v11499_v52, %v4749_v13  ;;  %v4748_v54 = vadd.f32 %v4742_v57, %v4706_v56  ;;  %v4721_v16 = vadd.f32 %v12989_v33, %v12972_v30 }
0x1417   :  { %v4602_v49 = vpop.f32.mrf.mxu0  ;;  %v4715_v12 = vpop.f32.mrf.mxu1 }
0x1418   :  { %v4769_v28 = vsub.f32 0.0, %v16497_v25  ;;  %v4762_v29 = vadd.f32 %v11499_v52, %v4748_v54  ;;  %v4751_v34 = vadd.f32 %v4745_v8, %v4721_v16  ;;  %v4716_v22 = vadd.f32 %v4715_v12, %v4602_v49 }
0x1419   :  { %v12975_v2 = vpop.f32.mrf.mxu0  ;;  %v12992_v21 = vpop.f32.mrf.mxu1 }
0x141a   :  { %v4776_v63 = vmul.f32 1.442695, %v4769_v28  ;;  %v4768_v40 = vsub.f32 0.0, %v4762_v29  ;;  %v4765_v58 = vadd.f32 %v11499_v52, %v4751_v34  ;;  %v4750_v41 = vadd.f32 %v4744_v24, %v4716_v22 }
0x141b   :  { %v4731_v43 = vadd.f32 %v12992_v21, %v12975_v2  ;;  %v4612_v36 = vpop.f32.mrf.mxu0  ;;  %v4725_v5 = vpop.f32.mrf.mxu1 }
0x141c   :  { %14138 = vpow2.f32 %v4776_v63  ;;  %v4774_v6 = vmul.f32 1.442695, %v4768_v40  ;;  %v4771_v53 = vsub.f32 0.0, %v4765_v58  ;;  %v4764_v55 = vadd.f32 %v11499_v52, %v4750_v41 }
0x141d   :  { %v4753_v61 = vadd.f32 %v4747_v31, %v4731_v43  ;;  %v4726_v39 = vadd.f32 %v4725_v5, %v4612_v36 }
0x141e   :  { %14140 = vpow2.f32 %v4774_v6  ;;  %v4780_v27 = vmul.f32 1.442695, %v4771_v53  ;;  %v4770_v38 = vsub.f32 0.0, %v4764_v55 }
0x141f   :  { %v4767_v3 = vadd.f32 %v11499_v52, %v4753_v61  ;;  %v4752_v48 = vadd.f32 %v4746_v9, %v4726_v39 }
0x1420   :  { %14142 = vpow2.f32 %v4780_v27  ;;  %v4778_v46 = vmul.f32 1.442695, %v4770_v38 }
0x1421   :  { %v4773_v57 = vsub.f32 0.0, %v4767_v3  ;;  %v4766_v10 = vadd.f32 %v11499_v52, %v4752_v48 }
0x1422   :  { %14144 = vpow2.f32 %v4778_v46 }
0x1423   :  { %v4784_v13 = vmul.f32 1.442695, %v4773_v57  ;;  %v4772_v56 = vsub.f32 0.0, %v4766_v10 }
0x1425   :  { %14146 = vpow2.f32 %v4784_v13  ;;  %v4782_v30 = vmul.f32 1.442695, %v4772_v56 }
0x1427   :  { %14148 = vpow2.f32 %v4782_v30 }
0x1429   :  { %v14139_v33 = vpop.eup %14138 }
0x142a   :  { %v4787_v8 = vadd.f32 1.0, %v14139_v33 }
0x142b   :  { %v14141_v47 = vpop.eup %14140 }
0x142c   :  { %v4786_v54 = vadd.f32 1.0, %v14141_v47  ;;  %14150 = vrcp.f32 %v4787_v8 }
0x142d   :  { %v14143_v16 = vpop.eup %14142 }
0x142e   :  { %14152 = vrcp.f32 %v4786_v54  ;;  %v4789_v24 = vadd.f32 1.0, %v14143_v16 }
0x142f   :  { %v14145_v49 = vpop.eup %14144 }
0x1430   :  { %v4788_v12 = vadd.f32 1.0, %v14145_v49  ;;  %14154 = vrcp.f32 %v4789_v24 }
0x1432   :  { %v14147_v45 = vpop.eup %14146  ;;  %14156 = vrcp.f32 %v4788_v12 }
0x1433   :  { %v4791_v52 = vadd.f32 1.0, %v14147_v45 }
0x1434   :  { %v14149_v28 = vpop.eup %14148 }
0x1435   :  { %v4790_v34 = vadd.f32 1.0, %v14149_v28  ;;  %14158 = vrcp.f32 %v4791_v52 }
0x1437   :  { %14160 = vrcp.f32 %v4790_v34 }
0x1439   :  { %v14151_v22 = vpop.eup %14150 }
0x143a   :  { %v4805_v37 = vmul.f32 %v14151_v22, %v16497_v25  ;;  %v11500_v25 = vld [vmem:[#allocation8 + $0x2] ss:$0 sm:$0xff] }
0x143b   :  { %v14153_v2 = vpop.eup %14152 }
0x143c   :  { %v4804_v21 = vmul.f32 %v14153_v2, %v4762_v29 }
0x143d   :  { %v14155_v63 = vpop.eup %14154 }
0x143e   :  { %13001 = vmatprep.mubr.msk.f32.mxu0 %vm1084_vm4, %v4804_v21  ;;  %v4807_v31 = vmul.f32 %v14155_v63, %v4765_v58 }
0x143f   :  { %v14157_v40 = vpop.eup %14156  ;;  %13002 = vmatmul.mubr.msk.f32.vlgmr.msra.gmra.mxu0 %vm1084_vm4, %v4805_v37 }
0x1440   :  { %v4806_v41 = vmul.f32 %v14157_v40, %v4764_v55 }
0x1442   :  { %13004 = vmatprep.mubr.msk.f32.mxu0 %vm1084_vm4, %v4806_v41  ;;  %v14159_v43 = vpop.eup %14158 }
0x1443   :  { %13005 = vmatmul.mubr.msk.f32.gmra.mxu0 %vm1084_vm4, %v4807_v31  ;;  %v4809_v6 = vmul.f32 %v14159_v43, %v4767_v3  ;;  %v11507_v43 = vld [vmem:[#allocation10 + $0x2] ss:$0 sm:$0xff] }
0x1444   :  { %v14161_v36 = vpop.eup %14160 }
0x1445   :  { %v4808_v5 = vmul.f32 %v14161_v36, %v4766_v10 }
0x1447   :  { %13007 = vmatprep.mubr.msk.f32.mxu0 %vm1084_vm4, %v4808_v5 }
0x1448   :  { %13008 = vmatmul.mubr.msk.f32.gmra.mxu0 %vm1084_vm4, %v4809_v6 }
0x1449   :  { %13039 = vmatprep.mubr.msk.f32.mxu0 %vm15429_vm0, %v15428_v0 }
0x14ff   :  { %v13003_v29 = vpop.f32.mrf.mxu0 }
0x1500   :  { %v4913_v53 = vadd.f32 %v13003_v29, %v11500_v25 }
0x1501   :  { %v4907_v55 = vpop.f32.mrf.mxu0 }
0x1502   :  { %v4937_v58 = vsub.f32 0.0, %v4913_v53  ;;  %v4908_v9 = vadd.f32 %v11500_v25, %v4907_v55 }
0x1503   :  { %v13006_v61 = vpop.f32.mrf.mxu0 }
0x1504   :  { %v4944_v39 = vmul.f32 1.442695, %v4937_v58  ;;  %v4936_v27 = vsub.f32 0.0, %v4908_v9  ;;  %v4923_v38 = vadd.f32 %v13006_v61, %v11500_v25 }
0x1505   :  { %v4917_v48 = vpop.f32.mrf.mxu0 }
0x1506   :  { %14162 = vpow2.f32 %v4944_v39  ;;  %v4942_v3 = vmul.f32 1.442695, %v4936_v27  ;;  %v4939_v46 = vsub.f32 0.0, %v4923_v38  ;;  %v4918_v57 = vadd.f32 %v11500_v25, %v4917_v48 }
0x1508   :  { %14164 = vpow2.f32 %v4942_v3  ;;  %v4948_v10 = vmul.f32 1.442695, %v4939_v46  ;;  %v4938_v13 = vsub.f32 0.0, %v4918_v57  ;;  %v13009_v56 = vpop.f32.mrf.mxu0 }
0x1509   :  { %v4933_v30 = vadd.f32 %v13009_v56, %v11500_v25 }
0x150a   :  { %14166 = vpow2.f32 %v4948_v10  ;;  %v4946_v33 = vmul.f32 1.442695, %v4938_v13  ;;  %v4927_v8 = vpop.f32.mrf.mxu0 }
0x150b   :  { %v4941_v47 = vsub.f32 0.0, %v4933_v30  ;;  %v4928_v54 = vadd.f32 %v11500_v25, %v4927_v8 }
0x150c   :  { %14168 = vpow2.f32 %v4946_v33 }
0x150d   :  { %v4952_v16 = vmul.f32 1.442695, %v4941_v47  ;;  %v4940_v24 = vsub.f32 0.0, %v4928_v54 }
0x150f   :  { %14170 = vpow2.f32 %v4952_v16  ;;  %v4950_v49 = vmul.f32 1.442695, %v4940_v24  ;;  %v5099_v16 = vld [vmem:[#allocation11 + $0x50] sm:$0xff]  ;;  %v11509_v24 = vld [vmem:[%s17601_s22 + $0x2] ss:$0 sm:$0xff] }
0x1511   :  { %14172 = vpow2.f32 %v4950_v49 }
0x1513   :  { %v14163_v12 = vpop.eup %14162 }
0x1514   :  { %v4955_v45 = vadd.f32 1.0, %v14163_v12 }
0x1515   :  { %v14165_v52 = vpop.eup %14164 }
0x1516   :  { %14174 = vrcp.f32 %v4955_v45  ;;  %v4954_v28 = vadd.f32 1.0, %v14165_v52 }
0x1517   :  { %v14167_v34 = vpop.eup %14166 }
0x1518   :  { %14176 = vrcp.f32 %v4954_v28  ;;  %v4957_v22 = vadd.f32 1.0, %v14167_v34 }
0x1519   :  { %v14169_v2 = vpop.eup %14168 }
0x151a   :  { %14178 = vrcp.f32 %v4957_v22  ;;  %v4956_v21 = vadd.f32 1.0, %v14169_v2 }
0x151c   :  { %v14171_v37 = vpop.eup %14170  ;;  %14180 = vrcp.f32 %v4956_v21 }
0x151d   :  { %v4959_v63 = vadd.f32 1.0, %v14171_v37 }
0x151e   :  { %v14173_v40 = vpop.eup %14172 }
0x151f   :  { %14182 = vrcp.f32 %v4959_v63  ;;  %v4958_v41 = vadd.f32 1.0, %v14173_v40 }
0x1521   :  { %14184 = vrcp.f32 %v4958_v41 }
0x1523   :  { %v14175_v31 = vpop.eup %14174 }
0x1524   :  { %v16509_v36 = vmul.f32 %v14175_v31, %v4913_v53 }
0x1525   :  { %v14177_v5 = vpop.eup %14176 }
0x1526   :  { %v16511_v6 = vmul.f32 %v14177_v5, %v4908_v9  ;;  %v4987_v25 = vmul.f32 %v11507_v43, %v16509_v36 }
0x1527   :  { %v14179_v29 = vpop.eup %14178 }
0x1528   :  { %v16514_v55 = vmul.f32 %v14179_v29, %v4923_v38  ;;  %v4995_v58 = vsel %vm1084_vm4, %v4987_v25, 0.0  ;;  %v4986_v61 = vmul.f32 %v11507_v43, %v16511_v6 }
0x1529   :  { %v14181_v39 = vpop.eup %14180  ;;  %4996 = vadd.xlane.f32.xlu1 %v4995_v58 }
0x152a   :  { %v16518_v27 = vmul.f32 %v14181_v39, %v4918_v57  ;;  %v4992_v48 = vsel %vm1084_vm4, %v4986_v61, 0.0  ;;  %v4989_v53 = vmul.f32 %v11507_v43, %v16514_v55 }
0x152b   :  { %4993 = vadd.xlane.f32.xlu0 %v4992_v48 }
0x152c   :  { %v14183_v9 = vpop.eup %14182  ;;  %v5001_v3 = vsel %vm1084_vm4, %v4989_v53, 0.0  ;;  %v4988_v46 = vmul.f32 %v11507_v43, %v16518_v27 }
0x152d   :  { %v16524_v38 = vmul.f32 %v14183_v9, %v4933_v30  ;;  %5002 = vadd.xlane.f32.xlu1 %v5001_v3  ;;  %v5100_v30 = vld [vmem:[#allocation11 + $0x58] sm:$0xff] }
0x152e   :  { %v14185_v10 = vpop.eup %14184  ;;  %v4998_v13 = vsel %vm1084_vm4, %v4988_v46, 0.0  ;;  %13010 = vmatprep.subr.mxu1 %v5100_v30 }
0x152f   :  { %v16527_v56 = vmul.f32 %v14185_v10, %v4928_v54  ;;  %4999 = vadd.xlane.f32.xlu0 %v4998_v13  ;;  %v4991_v57 = vmul.f32 %v11507_v43, %v16524_v38  ;;  %13011 = vmatpush3.msra.mxu1 %v5100_v30 }
0x1530   :  { %13012 = vmatprep.subr.mxu1 %v5099_v16 }
0x1531   :  { %v5007_v33 = vsel %vm1084_vm4, %v4991_v57, 0.0  ;;  %v4990_v8 = vmul.f32 %v11507_v43, %v16527_v56  ;;  %13013 = vmatpush3.msra.mxu1 %v5099_v16 }
0x1532   :  { %5008 = vadd.xlane.f32.xlu1 %v5007_v33 }
0x1533   :  { %v5004_v47 = vsel %vm1084_vm4, %v4990_v8, 0.0 }
0x1534   :  { %5005 = vadd.xlane.f32.xlu0 %v5004_v47 }
0x15b2   :  { %v4997_v54 = vpop.xlane.xlu1 %4996 }
0x15b3   :  { %v5019_v49 = vadd.f32 %v11509_v24, %v4997_v54  ;;  %v5098_v54 = vld [vmem:[#allocation11 + $0x48] sm:$0xff] }
0x15b4   :  { %v4994_v12 = vpop.xlane.xlu0 %4993  ;;  %13014 = vmatprep.subr.mxu1 %v5098_v54 }
0x15b5   :  { %v5025_v45 = vsub.f32 0.0, %v5019_v49  ;;  %v5018_v52 = vadd.f32 %v11509_v24, %v4994_v12  ;;  %13015 = vmatpush3.msra.mxu1 %v5098_v54  ;;  %v5097_v49 = vld [vmem:[#allocation11 + $0x40] sm:$0xff] }
0x15b6   :  { %v5003_v28 = vpop.xlane.xlu1 %5002  ;;  %13016 = vmatprep.subr.mxu1 %v5097_v49 }
0x15b7   :  { %v5032_v34 = vmul.f32 1.442695, %v5025_v45  ;;  %v5024_v22 = vsub.f32 0.0, %v5018_v52  ;;  %v5021_v2 = vadd.f32 %v11509_v24, %v5003_v28  ;;  %13017 = vmatpush3.msra.mxu1 %v5097_v49 }
0x15b8   :  { %v5000_v21 = vpop.xlane.xlu0 %4999  ;;  %13048 = vmatprep.subr.mxu1 %v15428_v0 }
0x15b9   :  { %14186 = vpow2.f32 %v5032_v34  ;;  %v5030_v37 = vmul.f32 1.442695, %v5024_v22  ;;  %v5027_v63 = vsub.f32 0.0, %v5021_v2  ;;  %v5020_v40 = vadd.f32 %v11509_v24, %v5000_v21 }
0x15bb   :  { %14188 = vpow2.f32 %v5030_v37  ;;  %v5036_v41 = vmul.f32 1.442695, %v5027_v63  ;;  %v5026_v31 = vsub.f32 0.0, %v5020_v40  ;;  %v5009_v43 = vpop.xlane.xlu1 %5008 }
0x15bc   :  { %v5023_v5 = vadd.f32 %v11509_v24, %v5009_v43 }
0x15bd   :  { %14190 = vpow2.f32 %v5036_v41  ;;  %v5034_v25 = vmul.f32 1.442695, %v5026_v31  ;;  %v5006_v29 = vpop.xlane.xlu0 %5005 }
0x15be   :  { %v5029_v58 = vsub.f32 0.0, %v5023_v5  ;;  %v5022_v61 = vadd.f32 %v11509_v24, %v5006_v29  ;;  %v14616_v29 = vld [vmem:[%s17602_s21 + $0x8] sm:$0xff] }
0x15bf   :  { %14192 = vpow2.f32 %v5034_v25 }
0x15c0   :  { %v5040_v39 = vmul.f32 1.442695, %v5029_v58  ;;  %v5028_v48 = vsub.f32 0.0, %v5022_v61  ;;  %v5472_v58 = vld [vmem:[#allocation16 + $0x40] sm:$0xff]  ;;  %v14617_v61 = vld [vmem:[%s17602_s21 + $0x10] sm:$0xff] }
0x15c2   :  { %14194 = vpow2.f32 %v5040_v39  ;;  %v5038_v53 = vmul.f32 1.442695, %v5028_v48  ;;  %v11510_v48 = vld [vmem:[#allocation13 + $0x2] ss:$0 sm:$0xff] }
0x15c4   :  { %14196 = vpow2.f32 %v5038_v53 }
0x15c6   :  { %v14187_v9 = vpop.eup %14186 }
0x15c7   :  { %v5043_v3 = vadd.f32 1.0, %v14187_v9 }
0x15c8   :  { %v14189_v46 = vpop.eup %14188 }
0x15c9   :  { %14198 = vrcp.f32 %v5043_v3  ;;  %v5042_v10 = vadd.f32 1.0, %v14189_v46 }
0x15ca   :  { %v14191_v13 = vpop.eup %14190 }
0x15cb   :  { %14200 = vrcp.f32 %v5042_v10  ;;  %v5045_v57 = vadd.f32 1.0, %v14191_v13 }
0x15cc   :  { %v14193_v33 = vpop.eup %14192 }
0x15cd   :  { %v5044_v8 = vadd.f32 1.0, %v14193_v33  ;;  %14202 = vrcp.f32 %v5045_v57 }
0x15cf   :  { %v14195_v47 = vpop.eup %14194  ;;  %14204 = vrcp.f32 %v5044_v8 }
0x15d0   :  { %v5047_v30 = vadd.f32 1.0, %v14195_v47 }
0x15d1   :  { %v14197_v16 = vpop.eup %14196 }
0x15d2   :  { %v5046_v24 = vadd.f32 1.0, %v14197_v16  ;;  %14206 = vrcp.f32 %v5047_v30 }
0x15d4   :  { %14208 = vrcp.f32 %v5046_v24 }
0x15d6   :  { %v14199_v12 = vpop.eup %14198 }
0x15d7   :  { %5067 = vperm.xlu1 %13897, %v14199_v12  }
0x15d8   :  { %v14201_v45 = vpop.eup %14200 }
0x15d9   :  { %5062 = vperm.xlu0 %13896, %v14201_v45  }
0x15da   :  { %v14203_v52 = vpop.eup %14202 }
0x15dc   :  { %v14205_v28 = vpop.eup %14204 }
0x15dd   :  { %5072 = vperm.xlu1 %13897, %v14205_v28   ;;  %5077 = vperm.xlu0 %13896, %v14203_v52  }
0x15df   :  { %v14207_v34 = vpop.eup %14206 }
0x15e1   :  { %v14209_v22 = vpop.eup %14208  ;;  %5087 = vperm.xlu0 %13896, %v14207_v34  }
0x15e2   :  { %5082 = vperm.xlu1 %13897, %v14209_v22  }
0x1652   :  { %v5068_v2 = vpop.permute.xlu1 %5067 }
0x1653   :  { %v5091_v63 = vmul.f32 %v5068_v2, %v16509_v36 }
0x1654   :  { %v5063_v21 = vpop.permute.xlu0 %5062 }
0x1655   :  { %v5090_v37 = vmul.f32 %v5063_v21, %v16511_v6 }
0x1657   :  { %13018 = vmatprep.mubr.msk.f32.mxu1 %vm1084_vm4, %v5090_v37 }
0x1658   :  { %v5073_v40 = vpop.permute.xlu1 %5072  ;;  %13019 = vmatmul.mubr.msk.f32.vlgmr.msra.gmra.mxu1 %vm1084_vm4, %v5091_v63  ;;  %v5078_v41 = vpop.permute.xlu0 %5077 }
0x1659   :  { %v5092_v31 = vmul.f32 %v5073_v40, %v16518_v27  ;;  %v5093_v43 = vmul.f32 %v5078_v41, %v16514_v55  ;;  %v5475_v55 = vld [vmem:[#allocation16 + $0x58] sm:$0xff] }
0x165a   :  { %v14615_v27 = vld [vmem:[%s17602_s21] sm:$0xff] }
0x165b   :  { %13021 = vmatprep.mubr.msk.f32.mxu1 %vm1084_vm4, %v5092_v31 }
0x165c   :  { %13022 = vmatmul.mubr.msk.f32.gmra.mxu1 %vm1084_vm4, %v5093_v43  ;;  %v5088_v5 = vpop.permute.xlu0 %5087 }
0x165d   :  { %v5083_v25 = vpop.permute.xlu1 %5082  ;;  %v5095_v6 = vmul.f32 %v5088_v5, %v16524_v38  ;;  %v5474_v38 = vld [vmem:[#allocation16 + $0x50] sm:$0xff] }
0x165e   :  { %v5094_v36 = vmul.f32 %v5083_v25, %v16527_v56  ;;  %v5473_v56 = vld [vmem:[#allocation16 + $0x48] sm:$0xff] }
0x165f   :  { %13049 = vmatpush3.msra.mxu1 %v5095_v6 }
0x1660   :  { %13024 = vmatprep.mubr.msk.f32.mxu1 %vm1084_vm4, %v5094_v36  ;;  %13050 = vmatprep.subr.mxu1 %v15428_v0 }
0x1661   :  { %13025 = vmatmul.mubr.msk.f32.gmra.mxu1 %vm1084_vm4, %v5095_v6 }
0x1662   :  { %13051 = vmatpush3.msra.mxu1 %v5094_v36  ;;  %13060 = vmatprep.mubr.msk.f32.mxu1 %vm15429_vm0, %v15428_v0 }
0x1663   :  { %13052 = vmatprep.subr.mxu1 %v15428_v0 }
0x1664   :  { %13053 = vmatpush3.msra.mxu1 %v5093_v43 }
0x1665   :  { %13054 = vmatprep.subr.mxu1 %v15428_v0 }
0x1666   :  { %13055 = vmatpush3.msra.mxu1 %v5092_v31 }
0x1667   :  { %13056 = vmatprep.subr.mxu1 %v15428_v0 }
0x1668   :  { %13057 = vmatpush3.msra.mxu1 %v5091_v63 }
0x1669   :  { %13058 = vmatprep.subr.mxu1 %v15428_v0 }
0x166a   :  { %13059 = vmatpush3.msra.mxu1 %v5090_v37 }
0x166b   :  { %13061 = vmatmul.mubr.msk.f32.vlgmr.msra.gmra.mxu1 %vm1876_vm5, %v14615_v27  ;;  %13086 = vmatprep.subr.mxu1 %v15428_v0 }
0x166c   :  { %13063 = vmatprep.mubr.msk.f32.mxu1 %vm15429_vm0, %v15428_v0  ;;  %13087 = vmatpush3.msra.mxu1 %v5475_v55 }
0x166d   :  { %13088 = vmatprep.subr.mxu1 %v15428_v0 }
0x166e   :  { %13089 = vmatpush3.msra.mxu1 %v5474_v38 }
0x166f   :  { %13064 = vmatmul.mubr.msk.f32.gmra.mxu1 %vm1876_vm5, %v14616_v29  ;;  %13090 = vmatprep.subr.mxu1 %v15428_v0 }
0x1670   :  { %13066 = vmatprep.mubr.msk.f32.mxu1 %vm15429_vm0, %v15428_v0  ;;  %13091 = vmatpush3.msra.mxu1 %v5473_v56 }
0x1671   :  { %13092 = vmatprep.subr.mxu1 %v15428_v0 }
0x1672   :  { %13093 = vmatpush3.msra.mxu1 %v5472_v58 }
0x1673   :  { %13067 = vmatmul.mubr.msk.f32.gmra.mxu1 %vm1876_vm5, %v14617_v61 }
0x1674   :  { %13094 = vmatprep.mubr.msk.f32.mxu1 %vm15429_vm0, %v15428_v0 }
0x1677   :  { %13095 = vmatmul.mubr.msk.f32.vlgmr.msra.gmra.mxu1 %vm1084_vm4, %v16446_v51 }
0x1678   :  { %13097 = vmatprep.mubr.msk.f32.mxu1 %vm15429_vm0, %v15428_v0 }
0x167b   :  { %13098 = vmatmul.mubr.msk.f32.gmra.mxu1 %vm1084_vm4, %v16440_v59 }
0x167c   :  { %13100 = vmatprep.mubr.msk.f32.mxu1 %vm15429_vm0, %v15428_v0 }
0x167f   :  { %13101 = vmatmul.mubr.msk.f32.gmra.mxu1 %vm1084_vm4, %v16438_v62 }
0x1680   :  { %13126 = vmatprep.mubr.msk.f32.mxu1 %vm711_vm2, %v15772_v11 }
0x1718   :  { %v13020_v39 = vpop.f32.mrf.mxu1 }
0x1719   :  { %v16582_v9 = vadd.f32 %v13020_v39, %v11510_v48 }
0x171a   :  { %v5193_v53 = vpop.f32.mrf.mxu1 }
0x171b   :  { %v16584_v3 = vadd.f32 %v11510_v48, %v5193_v53  ;;  %v5223_v33 = vsub.f32 0.0, %v16582_v9 }
0x171c   :  { %v13023_v46 = vpop.f32.mrf.mxu1 }
0x171d   :  { %v5222_v10 = vsub.f32 0.0, %v16584_v3  ;;  %v5209_v13 = vadd.f32 %v13023_v46, %v11510_v48  ;;  %v5230_v12 = vmul.f32 1.442695, %v5223_v33 }
0x171e   :  { %v5203_v57 = vpop.f32.mrf.mxu1 }
0x171f   :  { %v5225_v8 = vsub.f32 0.0, %v5209_v13  ;;  %v5204_v47 = vadd.f32 %v11510_v48, %v5203_v57  ;;  %v5228_v30 = vmul.f32 1.442695, %v5222_v10 }
0x1721   :  { %v5234_v16 = vmul.f32 1.442695, %v5225_v8  ;;  %v5224_v24 = vsub.f32 0.0, %v5204_v47  ;;  %v13026_v54 = vpop.f32.mrf.mxu1 }
0x1722   :  { %v5219_v49 = vadd.f32 %v13026_v54, %v11510_v48 }
0x1723   :  { %14210 = vpow2.f32 %v5234_v16  ;;  %v5232_v45 = vmul.f32 1.442695, %v5224_v24  ;;  %v5213_v52 = vpop.f32.mrf.mxu1 }
0x1724   :  { %14212 = vpow2.f32 %v5228_v30  ;;  %v5227_v28 = vsub.f32 0.0, %v5219_v49  ;;  %v5214_v34 = vadd.f32 %v11510_v48, %v5213_v52  ;;  %v11517_v52 = vld [vmem:[#allocation14 + $0x2] ss:$0 sm:$0xff] }
0x1725   :  { %14214 = vpow2.f32 %v5232_v45 }
0x1726   :  { %v5238_v22 = vmul.f32 1.442695, %v5227_v28  ;;  %v5226_v2 = vsub.f32 0.0, %v5214_v34  ;;  %14216 = vpow2.f32 %v5230_v12 }
0x1728   :  { %14218 = vpow2.f32 %v5238_v22  ;;  %v5236_v21 = vmul.f32 1.442695, %v5226_v2 }
0x172a   :  { %14220 = vpow2.f32 %v5236_v21 }
0x172b   :  { %v16588_v37 = vpop.f32.mrf.mxu1 }
0x172d   :  { %v13062_v63 = vpop.f32.mrf.mxu1 }
0x172f   :  { %v16590_v40 = vpop.f32.mrf.mxu1 }
0x1730   :  { %v14211_v41 = vpop.eup %14210 }
0x1731   :  { %v14213_v31 = vpop.eup %14212  ;;  %v13065_v43 = vpop.f32.mrf.mxu1  ;;  %v5243_v25 = vadd.f32 1.0, %v14211_v41 }
0x1732   :  { %v14215_v5 = vpop.eup %14214  ;;  %v5240_v38 = vadd.f32 1.0, %v14213_v31 }
0x1733   :  { %v5242_v6 = vadd.f32 1.0, %v14215_v5  ;;  %v16592_v36 = vpop.f32.mrf.mxu1  ;;  %v14217_v55 = vpop.eup %14216 }
0x1734   :  { %v5241_v39 = vadd.f32 1.0, %v14217_v55 }
0x1735   :  { %v14219_v27 = vpop.eup %14218  ;;  %v13068_v56 = vpop.f32.mrf.mxu1  ;;  %14222 = vrcp.f32 %v5242_v6 }
0x1736   :  { %v5245_v29 = vadd.f32 1.0, %v14219_v27  ;;  %14224 = vrcp.f32 %v5243_v25 }
0x1737   :  { %v14221_v58 = vpop.eup %14220  ;;  %v16594_v61 = vpop.f32.mrf.mxu1 }
0x1738   :  { %14226 = vrcp.f32 %v5245_v29  ;;  %v5244_v48 = vadd.f32 1.0, %v14221_v58 }
0x1739   :  { %14228 = vrcp.f32 %v5240_v38  ;;  %v13096_v53 = vpop.f32.mrf.mxu1 }
0x173a   :  { %14230 = vrcp.f32 %v5244_v48 }
0x173b   :  { %v16596_v46 = vpop.f32.mrf.mxu1  ;;  %14232 = vrcp.f32 %v5241_v39 }
0x173d   :  { %v13099_v10 = vpop.f32.mrf.mxu1 }
0x173f   :  { %v16598_v57 = vpop.f32.mrf.mxu1 }
0x1741   :  { %v13102_v33 = vpop.f32.mrf.mxu1 }
0x1742   :  { %v14223_v8 = vpop.eup %14222 }
0x1743   :  { %v14225_v30 = vpop.eup %14224  ;;  %v5260_v54 = vmul.f32 %v14223_v8, %v5204_v47 }
0x1744   :  { %v5261_v28 = vmul.f32 %v14225_v30, %v5209_v13 }
0x1745   :  { %v14227_v16 = vpop.eup %14226  ;;  %v5274_v43 = vmul.f32 %v11517_v52, %v5260_v54 }
0x1746   :  { %v14229_v24 = vpop.eup %14228  ;;  %v5263_v12 = vmul.f32 %v14227_v16, %v5219_v49  ;;  %v5275_v6 = vmul.f32 %v11517_v52, %v5261_v28  ;;  %v5695_v28 = vld [vmem:[#allocation20 + $0x58] sm:$0xff] }
0x1747   :  { %v14231_v45 = vpop.eup %14230  ;;  %v5258_v63 = vmul.f32 %v14229_v24, %v16584_v3  ;;  %v5284_v47 = vsel %vm1084_vm4, %v5274_v43, 0.0 }
0x1748   :  { %v5262_v22 = vmul.f32 %v14231_v45, %v5214_v34  ;;  %v5277_v2 = vmul.f32 %v11517_v52, %v5263_v12  ;;  %v14233_v21 = vpop.eup %14232  ;;  %v5287_v13 = vsel %vm1084_vm4, %v5275_v6, 0.0  ;;  %v5480_v12 = vld [vmem:[#allocation17 + $0x58] sm:$0xff]  ;;  %v5477_v45 = vld [vmem:[#allocation17 + $0x40] sm:$0xff] }
0x1749   :  { %v5259_v5 = vmul.f32 %v14233_v21, %v16582_v9  ;;  %v5272_v49 = vmul.f32 %v11517_v52, %v5258_v63  ;;  %v11530_v6 = vld [vmem:[#allocation19 + $0x2] ss:$0 sm:$0xff] }
0x174a   :  { %v5293_v41 = vsel %vm1084_vm4, %v5277_v2, 0.0  ;;  %v5276_v31 = vmul.f32 %v11517_v52, %v5262_v22  ;;  %v5693_v22 = vld [vmem:[#allocation20 + $0x48] sm:$0xff] }
0x174b   :  { %5294 = vadd.xlane.f32.xlu1 %v5293_v41  ;;  %v5273_v34 = vmul.f32 %v11517_v52, %v5259_v5  ;;  %v5278_v3 = vsel %vm1084_vm4, %v5272_v49, 0.0  ;;  %v14620_v52 = vld [vmem:[%s17603_s23 + $0x10] sm:$0xff] }
0x174c   :  { %v5290_v25 = vsel %vm1084_vm4, %v5276_v31, 0.0 }
0x174d   :  { %5291 = vadd.xlane.f32.xlu0 %v5290_v25  ;;  %v5281_v55 = vsel %vm1084_vm4, %v5273_v34, 0.0 }
0x174f   :  { %5285 = vadd.xlane.f32.xlu1 %v5284_v47 }
0x1751   :  { %5288 = vadd.xlane.f32.xlu0 %v5287_v13 }
0x1753   :  { %5279 = vadd.xlane.f32.xlu1 %v5278_v3 }
0x1755   :  { %5282 = vadd.xlane.f32.xlu0 %v5281_v55 }
0x17d4   :  { %v5295_v27 = vpop.xlane.xlu1 %5294 }
0x17d5   :  { %14234 = vtanh.f32 %v5295_v27 }
0x17d6   :  { %v5292_v9 = vpop.xlane.xlu0 %5291 }
0x17d7   :  { %14236 = vtanh.f32 %v5292_v9 }
0x17d8   :  { %v5286_v38 = vpop.xlane.xlu1 %5285 }
0x17d9   :  { %14238 = vtanh.f32 %v5286_v38 }
0x17da   :  { %v5289_v56 = vpop.xlane.xlu0 %5288 }
0x17db   :  { %14240 = vtanh.f32 %v5289_v56 }
0x17dc   :  { %v5280_v29 = vpop.xlane.xlu1 %5279 }
0x17dd   :  { %14242 = vtanh.f32 %v5280_v29 }
0x17de   :  { %v5283_v58 = vpop.xlane.xlu0 %5282 }
0x17df   :  { %14244 = vtanh.f32 %v5283_v58 }
0x17e2   :  { %v14235_v39 = vpop.eup %14234 }
0x17e3   :  { %v5307_v48 = vmul.f32 %v14235_v39, %v16427_v19  ;;  %v14621_v39 = vld [vmem:[%s17598_s3] sm:$0xff] }
0x17e4   :  { %v14237_v53 = vpop.eup %14236 }
0x17e5   :  { %13028 = vmatpush3.msra.mxu0 %v5307_v48  ;;  %v5306_v10 = vmul.f32 %v14237_v53, %v16432_v18 }
0x17e6   :  { %13029 = vmatprep.subr.mxu0 %v15428_v0  ;;  %v14239_v33 = vpop.eup %14238 }
0x17e7   :  { %13030 = vmatpush3.msra.mxu0 %v5306_v10  ;;  %v5304_v24 = vmul.f32 %v14239_v33, %v16422_v4  ;;  %v5479_v4 = vld [vmem:[#allocation17 + $0x50] sm:$0xff] }
0x17e8   :  { %v14241_v8 = vpop.eup %14240  ;;  %13031 = vmatprep.subr.mxu0 %v15428_v0 }
0x17e9   :  { %v5305_v30 = vmul.f32 %v14241_v8, %v16417_v50  ;;  %v14618_v50 = vld [vmem:[%s17603_s23] sm:$0xff] }
0x17ea   :  { %v14243_v16 = vpop.eup %14242 }
0x17eb   :  { %13032 = vmatpush3.msra.mxu0 %v5305_v30  ;;  %v5302_v18 = vmul.f32 %v14243_v16, %v16412_v32  ;;  %v14619_v32 = vld [vmem:[%s17603_s23 + $0x8] sm:$0xff] }
0x17ec   :  { %v14245_v54 = vpop.eup %14244  ;;  %13033 = vmatprep.subr.mxu0 %v15428_v0 }
0x17ed   :  { %13034 = vmatpush3.msra.mxu0 %v5304_v24  ;;  %v5303_v19 = vmul.f32 %v14245_v54, %v16408_v1  ;;  %v5478_v1 = vld [vmem:[#allocation17 + $0x48] sm:$0xff] }
0x17ee   :  { %13035 = vmatprep.subr.mxu0 %v15428_v0 }
0x17ef   :  { %13036 = vmatpush3.msra.mxu0 %v5303_v19 }
0x17f0   :  { %13037 = vmatprep.subr.mxu0 %v15428_v0 }
0x17f1   :  { %13038 = vmatpush3.msra.mxu0 %v5302_v18 }
0x17f2   :  { %13040 = vmatmul.mubr.msk.f32.vlgmr.msra.gmra.mxu0 %vm1876_vm5, %v14618_v50  ;;  %13069 = vmatprep.subr.mxu0 %v15428_v0  ;;  %v14622_v50 = vld [vmem:[%s17597_s30] sm:$0xff] }
0x17f3   :  { %13042 = vmatprep.mubr.msk.f32.mxu0 %vm15429_vm0, %v15428_v0  ;;  %13070 = vmatpush3.msra.mxu0 %v5480_v12 }
0x17f4   :  { %13071 = vmatprep.subr.mxu0 %v15428_v0 }
0x17f5   :  { %13072 = vmatpush3.msra.mxu0 %v5479_v4 }
0x17f6   :  { %13043 = vmatmul.mubr.msk.f32.gmra.mxu0 %vm1876_vm5, %v14619_v32  ;;  %13073 = vmatprep.subr.mxu0 %v15428_v0 }
0x17f7   :  { %13045 = vmatprep.mubr.msk.f32.mxu0 %vm15429_vm0, %v15428_v0  ;;  %13074 = vmatpush3.msra.mxu0 %v5478_v1 }
0x17f8   :  { %13075 = vmatprep.subr.mxu0 %v15428_v0 }
0x17f9   :  { %13076 = vmatpush3.msra.mxu0 %v5477_v45 }
0x17fa   :  { %13046 = vmatmul.mubr.msk.f32.gmra.mxu0 %vm1876_vm5, %v14620_v52  ;;  %13103 = vmatprep.subr.mxu0 %v15428_v0 }
0x17fb   :  { %13077 = vmatprep.mubr.msk.f32.mxu0 %vm15429_vm0, %v15428_v0 }
0x17fe   :  { %13078 = vmatmul.mubr.msk.f32.vlgmr.msra.gmra.mxu0 %vm1084_vm4, %v16588_v37  ;;  %v5694_v37 = vld [vmem:[#allocation20 + $0x50] sm:$0xff] }
0x17ff   :  { %13080 = vmatprep.mubr.msk.f32.mxu0 %vm15429_vm0, %v15428_v0  ;;  %13104 = vmatpush3.msra.mxu0 %v5695_v28 }
0x1800   :  { %13105 = vmatprep.subr.mxu0 %v15428_v0 }
0x1801   :  { %13106 = vmatpush3.msra.mxu0 %v5694_v37 }
0x1802   :  { %13081 = vmatmul.mubr.msk.f32.gmra.mxu0 %vm1084_vm4, %v16590_v40  ;;  %13107 = vmatprep.subr.mxu0 %v15428_v0  ;;  %v5692_v40 = vld [vmem:[#allocation20 + $0x40] sm:$0xff] }
0x1803   :  { %13083 = vmatprep.mubr.msk.f32.mxu0 %vm15429_vm0, %v15428_v0  ;;  %13108 = vmatpush3.msra.mxu0 %v5693_v22 }
0x1804   :  { %13109 = vmatprep.subr.mxu0 %v15428_v0 }
0x1805   :  { %13110 = vmatpush3.msra.mxu0 %v5692_v40 }
0x1806   :  { %13084 = vmatmul.mubr.msk.f32.gmra.mxu0 %vm1084_vm4, %v16592_v36 }
0x1807   :  { %13111 = vmatprep.mubr.msk.f32.mxu0 %vm15429_vm0, %v15428_v0 }
0x18b2   :  { %v5374_v2 = vpop.f32.mrf.mxu0 }
0x18b3   :  { %v16660_v47 = vadd.f32 %v5374_v2, %v16365_v7 }
0x18b4   :  { %v13041_v21 = vpop.f32.mrf.mxu0 }
0x18b6   :  { %v5379_v36 = vpop.f32.mrf.mxu0 }
0x18b7   :  { %v16655_v5 = vadd.f32 %v5379_v36, %v16356_v60 }
0x18b8   :  { %v13044_v63 = vpop.f32.mrf.mxu0 }
0x18ba   :  { %v5384_v41 = vpop.f32.mrf.mxu0 }
0x18bb   :  { %v16652_v31 = vadd.f32 %v5384_v41, %v16338_v42 }
0x18bc   :  { %v13047_v43 = vpop.f32.mrf.mxu0 }
0x18bd   :  { %13120 = vmatprep.subr.mxu1 %v16652_v31 }
0x18be   :  { %v5556_v25 = vpop.f32.mrf.mxu0  ;;  %13121 = vmatpush3.msra.mxu1 %v16652_v31 }
0x18bf   :  { %v5646_v49 = vadd.f32 %v16594_v61, %v5556_v25  ;;  %13122 = vmatprep.subr.mxu1 %v16655_v5 }
0x18c0   :  { %v13079_v13 = vpop.f32.mrf.mxu0  ;;  %13123 = vmatpush3.msra.mxu1 %v16655_v5 }
0x18c1   :  { %v5667_v42 = vadd.f32 %v11530_v6, %v5646_v49  ;;  %13124 = vmatprep.subr.mxu1 %v16660_v47 }
0x18c2   :  { %v5561_v60 = vpop.f32.mrf.mxu0  ;;  %13125 = vmatpush3.msra.mxu1 %v16660_v47 }
0x18c3   :  { %v5670_v34 = vsub.f32 0.0, %v5667_v42  ;;  %v5651_v3 = vadd.f32 %v16596_v46, %v5561_v60  ;;  %13127 = vmatmul.mubr.msk.f32.vlgmr.msra.gmra.mxu1 %vm711_vm2, %v15777_v14 }
0x18c4   :  { %v13082_v7 = vpop.f32.mrf.mxu0  ;;  %13129 = vmatprep.mubr.msk.f32.mxu1 %vm711_vm2, %v15785_v17 }
0x18c5   :  { %v5673_v61 = vmul.f32 1.442695, %v5670_v34  ;;  %v5668_v55 = vadd.f32 %v11530_v6, %v5651_v3 }
0x18c6   :  { %v5566_v27 = vpop.f32.mrf.mxu0 }
0x18c7   :  { %14246 = vpow2.f32 %v5673_v61  ;;  %v5671_v9 = vsub.f32 0.0, %v5668_v55  ;;  %v5656_v38 = vadd.f32 %v16598_v57, %v5566_v27  ;;  %13130 = vmatmul.mubr.msk.f32.gmra.mxu1 %vm711_vm2, %v15789_v20 }
0x18c8   :  { %v13085_v56 = vpop.f32.mrf.mxu0  ;;  %13132 = vmatprep.mubr.msk.f32.mxu1 %vm711_vm2, %v15797_v23 }
0x18c9   :  { %v5675_v46 = vmul.f32 1.442695, %v5671_v9  ;;  %v5669_v29 = vadd.f32 %v11530_v6, %v5656_v38 }
0x18cb   :  { %14248 = vpow2.f32 %v5675_v46  ;;  %v5672_v58 = vsub.f32 0.0, %v5669_v29  ;;  %13133 = vmatmul.mubr.msk.f32.gmra.mxu1 %vm711_vm2, %v15801_v26  ;;  %v14623_v46 = vld [vmem:[%s17597_s30 + $0x8] sm:$0xff] }
0x18cc   :  { %13156 = vmatprep.mubr.msk.f32.mxu1 %vm711_vm2, %v14621_v39  ;;  %v14626_v39 = vld [vmem:[%s17598_s3 + $0x10] sm:$0xff] }
0x18cd   :  { %v5677_v48 = vmul.f32 1.442695, %v5672_v58  ;;  %v14625_v58 = vld [vmem:[%s17597_s30 + $0x10] sm:$0xff] }
0x18cf   :  { %14250 = vpow2.f32 %v5677_v48  ;;  %v11559_v48 = vld [vmem:[%s17599_s0 + $0x70] sm:$0xff] }
0x18d4   :  { %v14247_v57 = vpop.eup %14246 }
0x18d5   :  { %v5679_v53 = vadd.f32 1.0, %v14247_v57  ;;  %v11555_v57 = vld [vmem:[%s17600_s19 + $0x70] sm:$0xff] }
0x18d7   :  { %14252 = vrcp.f32 %v5679_v53  ;;  %v14627_v53 = vld [vmem:[%s17597_s30 + $0x18] sm:$0xff] }
0x18d8   :  { %v14249_v10 = vpop.eup %14248 }
0x18d9   :  { %v5680_v33 = vadd.f32 1.0, %v14249_v10  ;;  %v14628_v10 = vld [vmem:[%s17598_s3 + $0x18] sm:$0xff] }
0x18db   :  { %14254 = vrcp.f32 %v5680_v33  ;;  %v14629_v33 = vld [vmem:[%s17597_s30 + $0x20] sm:$0xff] }
0x18dc   :  { %v14251_v8 = vpop.eup %14250 }
0x18dd   :  { %v5681_v30 = vadd.f32 1.0, %v14251_v8  ;;  %v14630_v8 = vld [vmem:[%s17598_s3 + $0x20] sm:$0xff] }
0x18df   :  { %14256 = vrcp.f32 %v5681_v30  ;;  %v14631_v30 = vld [vmem:[%s17597_s30 + $0x28] sm:$0xff] }
0x18e4   :  { %v14253_v16 = vpop.eup %14252 }
0x18e5   :  { %v5688_v24 = vmul.f32 %v14253_v16, %v5667_v42  ;;  %v14632_v16 = vld [vmem:[%s17598_s3 + $0x28] sm:$0xff] }
0x18e7   :  { %13112 = vmatmul.mubr.msk.f32.vlgmr.msra.gmra.mxu0 %vm1084_vm4, %v5688_v24  ;;  %v11558_v24 = vld [vmem:[%s17599_s0 + $0x68] sm:$0xff] }
0x18e8   :  { %v14255_v54 = vpop.eup %14254  ;;  %13114 = vmatprep.mubr.msk.f32.mxu0 %vm15429_vm0, %v15428_v0 }
0x18e9   :  { %v5689_v19 = vmul.f32 %v14255_v54, %v5668_v55  ;;  %v11534_v55 = vld [vmem:[#allocation22 + $0x2] ss:$0 sm:$0xff] }
0x18ea   :  { %v11554_v54 = vld [vmem:[%s17600_s19 + $0x68] sm:$0xff] }
0x18eb   :  { %13115 = vmatmul.mubr.msk.f32.gmra.mxu0 %vm1084_vm4, %v5689_v19  ;;  %v11557_v19 = vld [vmem:[%s17599_s0 + $0x60] sm:$0xff] }
0x18ec   :  { %v14257_v18 = vpop.eup %14256  ;;  %13117 = vmatprep.mubr.msk.f32.mxu0 %vm15429_vm0, %v15428_v0 }
0x18ed   :  { %v5690_v12 = vmul.f32 %v14257_v18, %v5669_v29  ;;  %v14624_v29 = vld [vmem:[%s17598_s3 + $0x8] sm:$0xff]  ;;  %v11553_v18 = vld [vmem:[%s17600_s19 + $0x60] sm:$0xff] }
0x18ef   :  { %13118 = vmatmul.mubr.msk.f32.gmra.mxu0 %vm1084_vm4, %v5690_v12 }
0x18f0   :  { %13141 = vmatprep.mubr.msk.f32.mxu0 %vm711_vm2, %v14622_v50 }
0x1983   :  { %v16690_v4 = vpop.f32.mrf.mxu1 }
0x1984   :  { %v5895_v1 = vmul.f32 %v16690_v4, %v16690_v4 }
0x1985   :  { %v16694_v32 = vpop.f32.mrf.mxu1 }
0x1986   :  { %v5903_v45 = vsel %vm831_vm3, %v5895_v1, 0.0  ;;  %v5894_v52 = vmul.f32 %v16694_v32, %v16694_v32 }
0x1987   :  { %v16699_v28 = vpop.f32.mrf.mxu1  ;;  %5904 = vadd.xlane.f32.xlu1 %v5903_v45 }
0x1988   :  { %v5897_v37 = vmul.f32 %v16699_v28, %v16699_v28  ;;  %v5900_v22 = vsel %vm831_vm3, %v5894_v52, 0.0 }
0x1989   :  { %5901 = vadd.xlane.f32.xlu0 %v5900_v22  ;;  %v16704_v40 = vpop.f32.mrf.mxu1 }
0x198a   :  { %v5909_v2 = vsel %vm831_vm3, %v5897_v37, 0.0  ;;  %v5896_v21 = vmul.f32 %v16704_v40, %v16704_v40 }
0x198b   :  { %v16709_v36 = vpop.f32.mrf.mxu1  ;;  %5910 = vadd.xlane.f32.xlu1 %v5909_v2 }
0x198c   :  { %v5899_v63 = vmul.f32 %v16709_v36, %v16709_v36  ;;  %v5906_v41 = vsel %vm831_vm3, %v5896_v21, 0.0 }
0x198d   :  { %5907 = vadd.xlane.f32.xlu0 %v5906_v41  ;;  %v16714_v43 = vpop.f32.mrf.mxu1 }
0x198e   :  { %v5915_v25 = vsel %vm831_vm3, %v5899_v63, 0.0  ;;  %v5898_v6 = vmul.f32 %v16714_v43, %v16714_v43 }
0x198f   :  { %5916 = vadd.xlane.f32.xlu1 %v5915_v25 }
0x1990   :  { %v5912_v49 = vsel %vm831_vm3, %v5898_v6, 0.0  ;;  %v6424_v6 = vld [vmem:[#allocation7 + $0x78] sm:$0xff] }
0x1991   :  { %5913 = vadd.xlane.f32.xlu0 %v5912_v49  ;;  %v6423_v49 = vld [vmem:[#allocation7 + $0x70] sm:$0xff] }
0x19a7   :  { %v5771_v13 = vpop.f32.mrf.mxu0 }
0x19a8   :  { %v5785_v9 = vadd.f32 %v5771_v13, %v16446_v51  ;;  %v11556_v51 = vld [vmem:[%s17600_s19 + $0x78] sm:$0xff] }
0x19a9   :  { %v13113_v42 = vpop.f32.mrf.mxu0  ;;  %v6422_v13 = vld [vmem:[#allocation7 + $0x68] sm:$0xff] }
0x19aa   :  { %v6421_v42 = vld [vmem:[#allocation7 + $0x60] sm:$0xff] }
0x19ab   :  { %v5776_v60 = vpop.f32.mrf.mxu0 }
0x19ac   :  { %v5786_v7 = vadd.f32 %v5776_v60, %v16440_v59  ;;  %v11560_v59 = vld [vmem:[%s17599_s0 + $0x78] sm:$0xff] }
0x19ad   :  { %v13116_v34 = vpop.f32.mrf.mxu0 }
0x19ae   :  { %v16725_v56 = vadd.f32 %v11534_v55, %v5786_v7 }
0x19af   :  { %v5781_v3 = vpop.f32.mrf.mxu0 }
0x19b0   :  { %v5787_v61 = vadd.f32 %v5781_v3, %v16438_v62  ;;  %v16731_v62 = vadd.f32 %v11534_v55, %v5785_v9  ;;  %v11573_v3 = vld [vmem:[#allocation2 + $0x3] ss:$0 sm:$0xff] }
0x19b1   :  { %v13119_v27 = vpop.f32.mrf.mxu0 }
0x19b2   :  { %v16723_v38 = vadd.f32 %v11534_v55, %v5787_v61 }
0x19b4   :  { %13135 = vmatprep.subr.mxu0 %v16723_v38  ;;  %13150 = vmatprep.subr.mxu1 %v16723_v38 }
0x19b5   :  { %13136 = vmatpush3.msra.mxu0 %v16723_v38  ;;  %13151 = vmatpush3.msra.mxu1 %v16723_v38 }
0x19b6   :  { %13137 = vmatprep.subr.mxu0 %v16725_v56  ;;  %13152 = vmatprep.subr.mxu1 %v16725_v56 }
0x19b7   :  { %13138 = vmatpush3.msra.mxu0 %v16725_v56  ;;  %13153 = vmatpush3.msra.mxu1 %v16725_v56 }
0x19b8   :  { %13139 = vmatprep.subr.mxu0 %v16731_v62  ;;  %13154 = vmatprep.subr.mxu1 %v16731_v62 }
0x19b9   :  { %13140 = vmatpush3.msra.mxu0 %v16731_v62  ;;  %13155 = vmatpush3.msra.mxu1 %v16731_v62 }
0x19ba   :  { %13142 = vmatmul.mubr.msk.f32.vlgmr.msra.gmra.mxu0 %vm711_vm2, %v14623_v46  ;;  %13157 = vmatmul.mubr.msk.f32.vlgmr.msra.gmra.mxu1 %vm711_vm2, %v14624_v29 }
0x19bb   :  { %13144 = vmatprep.mubr.msk.f32.mxu0 %vm711_vm2, %v14625_v58  ;;  %13159 = vmatprep.mubr.msk.f32.mxu1 %vm711_vm2, %v14626_v39 }
0x19bc   :  { %13165 = vmatprep.subr.mxu0 %v11560_v59  ;;  %13182 = vmatprep.subr.mxu1 %v11556_v51 }
0x19bd   :  { %13166 = vmatpush3.msra.mxu0 %v11560_v59  ;;  %13183 = vmatpush3.msra.mxu1 %v11556_v51  ;;  %v11574_v59 = vld [vmem:[#allocation5 + $0x3] ss:$0 sm:$0xff] }
0x19be   :  { %13145 = vmatmul.mubr.msk.f32.gmra.mxu0 %vm711_vm2, %v14627_v53  ;;  %13160 = vmatmul.mubr.msk.f32.gmra.mxu1 %vm711_vm2, %v14628_v10 }
0x19bf   :  { %13147 = vmatprep.mubr.msk.f32.mxu0 %vm711_vm2, %v14629_v33  ;;  %13162 = vmatprep.mubr.msk.f32.mxu1 %vm711_vm2, %v14630_v8 }
0x19c0   :  { %13167 = vmatprep.subr.mxu0 %v11559_v48  ;;  %13184 = vmatprep.subr.mxu1 %v11555_v57 }
0x19c1   :  { %13168 = vmatpush3.msra.mxu0 %v11559_v48  ;;  %13185 = vmatpush3.msra.mxu1 %v11555_v57 }
0x19c2   :  { %13148 = vmatmul.mubr.msk.f32.gmra.mxu0 %vm711_vm2, %v14631_v30  ;;  %13163 = vmatmul.mubr.msk.f32.gmra.mxu1 %vm711_vm2, %v14632_v16 }
0x19c3   :  { %13169 = vmatprep.subr.mxu0 %v11558_v24  ;;  %13186 = vmatprep.subr.mxu1 %v11554_v54 }
0x19c4   :  { %13170 = vmatpush3.msra.mxu0 %v11558_v24  ;;  %13187 = vmatpush3.msra.mxu1 %v11554_v54 }
0x19c5   :  { %13171 = vmatprep.subr.mxu0 %v11557_v19  ;;  %13188 = vmatprep.subr.mxu1 %v11553_v18 }
0x19c6   :  { %13172 = vmatpush3.msra.mxu0 %v11557_v19  ;;  %13189 = vmatpush3.msra.mxu1 %v11553_v18 }
0x19c7   :  { %13199 = vmatprep.subr.mxu0 %v6424_v6 }
0x1a10   :  { %v5905_v60 = vpop.xlane.xlu1 %5904 }
0x1a11   :  { %v6353_v55 = vmul.f32 %v11573_v3, %v5905_v60 }
0x1a12   :  { %v5902_v34 = vpop.xlane.xlu0 %5901 }
0x1a13   :  { %v6352_v29 = vmul.f32 %v11573_v3, %v5902_v34 }
0x1a14   :  { %v5911_v27 = vpop.xlane.xlu1 %5910 }
0x1a15   :  { %v6355_v10 = vmul.f32 %v11573_v3, %v5911_v27 }
0x1a16   :  { %v5908_v58 = vpop.xlane.xlu0 %5907 }
0x1a17   :  { %v6354_v16 = vmul.f32 %v11573_v3, %v5908_v58 }
0x1a18   :  { %v5917_v19 = vpop.xlane.xlu1 %5916 }
0x1a7a   :  { %v13143_v12 = vpop.f32.mrf.mxu0  ;;  %v13158_v50 = vpop.f32.mrf.mxu1 }
0x1a7c   :  { %v5984_v1 = vpop.f32.mrf.mxu0  ;;  %v6079_v45 = vpop.f32.mrf.mxu1 }
0x1a7d   :  { %13173 = vmatprep.mubr.msk.f32.mxu0 %vm1084_vm4, %v6079_v45  ;;  %13190 = vmatprep.mubr.msk.f32.mxu1 %vm1084_vm4, %v5984_v1 }
0x1a7e   :  { %v13146_v52 = vpop.f32.mrf.mxu0  ;;  %v13161_v37 = vpop.f32.mrf.mxu1  ;;  %13174 = vmatmul.mubr.msk.f32.vlgmr.msra.gmra.mxu0 %vm1084_vm4, %v13158_v50  ;;  %13191 = vmatmul.mubr.msk.f32.vlgmr.msra.gmra.mxu1 %vm1084_vm4, %v13143_v12 }
0x1a7f   :  { %13200 = vmatpush3.msra.mxu0 %v6424_v6 }
0x1a80   :  { %v5994_v22 = vpop.f32.mrf.mxu0  ;;  %v6089_v2 = vpop.f32.mrf.mxu1  ;;  %13201 = vmatprep.subr.mxu0 %v6423_v49 }
0x1a81   :  { %13176 = vmatprep.mubr.msk.f32.mxu0 %vm1084_vm4, %v6089_v2  ;;  %13193 = vmatprep.mubr.msk.f32.mxu1 %vm1084_vm4, %v5994_v22 }
0x1a82   :  { %v13149_v21 = vpop.f32.mrf.mxu0  ;;  %v13164_v63 = vpop.f32.mrf.mxu1  ;;  %13177 = vmatmul.mubr.msk.f32.gmra.mxu0 %vm1084_vm4, %v13161_v37  ;;  %13194 = vmatmul.mubr.msk.f32.gmra.mxu1 %vm1084_vm4, %v13146_v52 }
0x1a83   :  { %13202 = vmatpush3.msra.mxu0 %v6423_v49  ;;  %v5914_v37 = vpop.xlane.xlu0 %5913 }
0x1a84   :  { %v6004_v41 = vpop.f32.mrf.mxu0  ;;  %v6099_v25 = vpop.f32.mrf.mxu1  ;;  %13203 = vmatprep.subr.mxu0 %v6422_v13  ;;  %v6356_v34 = vmul.f32 %v11573_v3, %v5914_v37 }
0x1a85   :  { %13179 = vmatprep.mubr.msk.f32.mxu0 %vm1084_vm4, %v6099_v25  ;;  %13196 = vmatprep.mubr.msk.f32.mxu1 %vm1084_vm4, %v6004_v41  ;;  %v6357_v41 = vmul.f32 %v11573_v3, %v5917_v19 }
0x1a86   :  { %13180 = vmatmul.mubr.msk.f32.gmra.mxu0 %vm1084_vm4, %v13164_v63  ;;  %13197 = vmatmul.mubr.msk.f32.gmra.mxu1 %vm1084_vm4, %v13149_v21 }
0x1a87   :  { %13204 = vmatpush3.msra.mxu0 %v6422_v13 }
0x1a88   :  { %13205 = vmatprep.subr.mxu0 %v6421_v42 }
0x1a89   :  { %13206 = vmatpush3.msra.mxu0 %v6421_v42 }
0x1a8a   :  { %13233 = vmatprep.subr.mxu0 %v15428_v0 }
0x1b3e   :  { %v13175_v7 = vpop.f32.mrf.mxu0  ;;  %v13192_v61 = vpop.f32.mrf.mxu1 }
0x1b3f   :  { %v6321_v9 = vadd.f32 %v13192_v61, %v13175_v7 }
0x1b40   :  { %v6202_v51 = vpop.f32.mrf.mxu0  ;;  %v6315_v46 = vpop.f32.mrf.mxu1 }
0x1b41   :  { %v6359_v39 = vadd.f32 %v6353_v55, %v6321_v9  ;;  %v6316_v48 = vadd.f32 %v6315_v46, %v6202_v51 }
0x1b42   :  { %v13178_v57 = vpop.f32.mrf.mxu0  ;;  %v13195_v53 = vpop.f32.mrf.mxu1 }
0x1b43   :  { %v16782_v33 = vadd.f32 %v11574_v59, %v6359_v39  ;;  %v6358_v8 = vadd.f32 %v6352_v29, %v6316_v48  ;;  %v6331_v30 = vadd.f32 %v13195_v53, %v13178_v57 }
0x1b44   :  { %v6212_v24 = vpop.f32.mrf.mxu0  ;;  %v6325_v54 = vpop.f32.mrf.mxu1 }
0x1b45   :  { %v6379_v18 = vsub.f32 0.0, %v16782_v33  ;;  %v6372_v12 = vadd.f32 %v11574_v59, %v6358_v8  ;;  %v6361_v50 = vadd.f32 %v6355_v10, %v6331_v30  ;;  %v6326_v1 = vadd.f32 %v6325_v54, %v6212_v24 }
0x1b46   :  { %v13181_v45 = vpop.f32.mrf.mxu0  ;;  %v13198_v52 = vpop.f32.mrf.mxu1 }
0x1b47   :  { %v6386_v22 = vmul.f32 1.442695, %v6379_v18  ;;  %v6378_v2 = vsub.f32 0.0, %v6372_v12  ;;  %v6375_v21 = vadd.f32 %v11574_v59, %v6361_v50  ;;  %v6360_v63 = vadd.f32 %v6354_v16, %v6326_v1 }
0x1b48   :  { %v6341_v25 = vadd.f32 %v13198_v52, %v13181_v45  ;;  %v6222_v6 = vpop.f32.mrf.mxu0  ;;  %v6335_v49 = vpop.f32.mrf.mxu1 }
0x1b49   :  { %14258 = vpow2.f32 %v6386_v22  ;;  %v6384_v13 = vmul.f32 1.442695, %v6378_v2  ;;  %v6381_v42 = vsub.f32 0.0, %v6375_v21  ;;  %v6374_v60 = vadd.f32 %v11574_v59, %v6360_v63 }
0x1b4a   :  { %v6363_v7 = vadd.f32 %v6357_v41, %v6341_v25  ;;  %v6336_v61 = vadd.f32 %v6335_v49, %v6222_v6 }
0x1b4b   :  { %14260 = vpow2.f32 %v6384_v13  ;;  %v6390_v55 = vmul.f32 1.442695, %v6381_v42  ;;  %v6380_v27 = vsub.f32 0.0, %v6374_v60 }
0x1b4c   :  { %v6377_v9 = vadd.f32 %v11574_v59, %v6363_v7  ;;  %v6362_v51 = vadd.f32 %v6356_v34, %v6336_v61 }
0x1b4d   :  { %14262 = vpow2.f32 %v6390_v55  ;;  %v6388_v46 = vmul.f32 1.442695, %v6380_v27 }
0x1b4e   :  { %v6383_v29 = vsub.f32 0.0, %v6377_v9  ;;  %v6376_v58 = vadd.f32 %v11574_v59, %v6362_v51 }
0x1b4f   :  { %14264 = vpow2.f32 %v6388_v46 }
0x1b50   :  { %v6394_v39 = vmul.f32 1.442695, %v6383_v29  ;;  %v6382_v48 = vsub.f32 0.0, %v6376_v58 }
0x1b52   :  { %14266 = vpow2.f32 %v6394_v39  ;;  %v6392_v57 = vmul.f32 1.442695, %v6382_v48 }
0x1b54   :  { %14268 = vpow2.f32 %v6392_v57 }
0x1b56   :  { %v14259_v53 = vpop.eup %14258 }
0x1b57   :  { %v6397_v10 = vadd.f32 1.0, %v14259_v53 }
0x1b58   :  { %v14261_v3 = vpop.eup %14260 }
0x1b59   :  { %v6396_v8 = vadd.f32 1.0, %v14261_v3  ;;  %14270 = vrcp.f32 %v6397_v10 }
0x1b5a   :  { %v14263_v30 = vpop.eup %14262 }
0x1b5b   :  { %14272 = vrcp.f32 %v6396_v8  ;;  %v6399_v16 = vadd.f32 1.0, %v14263_v30 }
0x1b5c   :  { %v14265_v24 = vpop.eup %14264 }
0x1b5d   :  { %v6398_v54 = vadd.f32 1.0, %v14265_v24  ;;  %14274 = vrcp.f32 %v6399_v16 }
0x1b5f   :  { %v14267_v19 = vpop.eup %14266  ;;  %14276 = vrcp.f32 %v6398_v54 }
0x1b60   :  { %v6401_v59 = vadd.f32 1.0, %v14267_v19 }
0x1b61   :  { %v14269_v18 = vpop.eup %14268 }
0x1b62   :  { %v6400_v50 = vadd.f32 1.0, %v14269_v18  ;;  %14278 = vrcp.f32 %v6401_v59 }
0x1b64   :  { %14280 = vrcp.f32 %v6400_v50 }
0x1b66   :  { %v14271_v1 = vpop.eup %14270 }
0x1b67   :  { %v6415_v37 = vmul.f32 %v14271_v1, %v16782_v33  ;;  %v11575_v33 = vld [vmem:[#allocation8 + $0x3] ss:$0 sm:$0xff] }
0x1b68   :  { %v14273_v45 = vpop.eup %14272 }
0x1b69   :  { %v6414_v52 = vmul.f32 %v14273_v45, %v6372_v12 }
0x1b6a   :  { %v14275_v22 = vpop.eup %14274 }
0x1b6b   :  { %13207 = vmatprep.mubr.msk.f32.mxu0 %vm1084_vm4, %v6414_v52  ;;  %v6417_v41 = vmul.f32 %v14275_v22, %v6375_v21 }
0x1b6c   :  { %v14277_v2 = vpop.eup %14276  ;;  %13208 = vmatmul.mubr.msk.f32.vlgmr.msra.gmra.mxu0 %vm1084_vm4, %v6415_v37 }
0x1b6d   :  { %v6416_v63 = vmul.f32 %v14277_v2, %v6374_v60 }
0x1b6f   :  { %13210 = vmatprep.mubr.msk.f32.mxu0 %vm1084_vm4, %v6416_v63  ;;  %v14279_v25 = vpop.eup %14278 }
0x1b70   :  { %13211 = vmatmul.mubr.msk.f32.gmra.mxu0 %vm1084_vm4, %v6417_v41  ;;  %v6419_v13 = vmul.f32 %v14279_v25, %v6377_v9  ;;  %v11582_v25 = vld [vmem:[#allocation10 + $0x3] ss:$0 sm:$0xff] }
0x1b71   :  { %v14281_v6 = vpop.eup %14280 }
0x1b72   :  { %v6418_v49 = vmul.f32 %v14281_v6, %v6376_v58 }
0x1b74   :  { %13213 = vmatprep.mubr.msk.f32.mxu0 %vm1084_vm4, %v6418_v49 }
0x1b75   :  { %13214 = vmatmul.mubr.msk.f32.gmra.mxu0 %vm1084_vm4, %v6419_v13 }
0x1b76   :  { %13245 = vmatprep.mubr.msk.f32.mxu0 %vm15429_vm0, %v15428_v0 }
0x1c2c   :  { %v13209_v12 = vpop.f32.mrf.mxu0 }
0x1c2d   :  { %v6523_v42 = vadd.f32 %v13209_v12, %v11575_v33 }
0x1c2e   :  { %v6517_v60 = vpop.f32.mrf.mxu0 }
0x1c2f   :  { %v6547_v21 = vsub.f32 0.0, %v6523_v42  ;;  %v6518_v34 = vadd.f32 %v11575_v33, %v6517_v60 }
0x1c30   :  { %v13212_v7 = vpop.f32.mrf.mxu0 }
0x1c31   :  { %v6554_v61 = vmul.f32 1.442695, %v6547_v21  ;;  %v6546_v55 = vsub.f32 0.0, %v6518_v34  ;;  %v6533_v27 = vadd.f32 %v13212_v7, %v11575_v33 }
0x1c32   :  { %v6527_v51 = vpop.f32.mrf.mxu0 }
0x1c33   :  { %14282 = vpow2.f32 %v6554_v61  ;;  %v6552_v9 = vmul.f32 1.442695, %v6546_v55  ;;  %v6549_v46 = vsub.f32 0.0, %v6533_v27  ;;  %v6528_v29 = vadd.f32 %v11575_v33, %v6527_v51 }
0x1c35   :  { %14284 = vpow2.f32 %v6552_v9  ;;  %v6558_v58 = vmul.f32 1.442695, %v6549_v46  ;;  %v6548_v39 = vsub.f32 0.0, %v6528_v29  ;;  %v13215_v48 = vpop.f32.mrf.mxu0 }
0x1c36   :  { %v6543_v57 = vadd.f32 %v13215_v48, %v11575_v33 }
0x1c37   :  { %14286 = vpow2.f32 %v6558_v58  ;;  %v6556_v53 = vmul.f32 1.442695, %v6548_v39  ;;  %v6537_v10 = vpop.f32.mrf.mxu0 }
0x1c38   :  { %v6551_v3 = vsub.f32 0.0, %v6543_v57  ;;  %v6538_v8 = vadd.f32 %v11575_v33, %v6537_v10 }
0x1c39   :  { %14288 = vpow2.f32 %v6556_v53 }
0x1c3a   :  { %v6562_v30 = vmul.f32 1.442695, %v6551_v3  ;;  %v6550_v16 = vsub.f32 0.0, %v6538_v8 }
0x1c3c   :  { %14290 = vpow2.f32 %v6562_v30  ;;  %v6560_v24 = vmul.f32 1.442695, %v6550_v16  ;;  %v6709_v30 = vld [vmem:[#allocation11 + $0x70] sm:$0xff]  ;;  %v11584_v16 = vld [vmem:[%s17601_s22 + $0x3] ss:$0 sm:$0xff] }
0x1c3e   :  { %14292 = vpow2.f32 %v6560_v24 }
0x1c40   :  { %v14283_v54 = vpop.eup %14282 }
0x1c41   :  { %v6565_v19 = vadd.f32 1.0, %v14283_v54 }
0x1c42   :  { %v14285_v59 = vpop.eup %14284 }
0x1c43   :  { %14294 = vrcp.f32 %v6565_v19  ;;  %v6564_v18 = vadd.f32 1.0, %v14285_v59 }
0x1c44   :  { %v14287_v50 = vpop.eup %14286 }
0x1c45   :  { %14296 = vrcp.f32 %v6564_v18  ;;  %v6567_v1 = vadd.f32 1.0, %v14287_v50 }
0x1c46   :  { %v14289_v45 = vpop.eup %14288 }
0x1c47   :  { %14298 = vrcp.f32 %v6567_v1  ;;  %v6566_v52 = vadd.f32 1.0, %v14289_v45 }
0x1c49   :  { %v14291_v37 = vpop.eup %14290  ;;  %14300 = vrcp.f32 %v6566_v52 }
0x1c4a   :  { %v6569_v22 = vadd.f32 1.0, %v14291_v37 }
0x1c4b   :  { %v14293_v2 = vpop.eup %14292 }
0x1c4c   :  { %14302 = vrcp.f32 %v6569_v22  ;;  %v6568_v63 = vadd.f32 1.0, %v14293_v2 }
0x1c4e   :  { %14304 = vrcp.f32 %v6568_v63 }
0x1c50   :  { %v14295_v41 = vpop.eup %14294 }
0x1c51   :  { %v16794_v6 = vmul.f32 %v14295_v41, %v6523_v42 }
0x1c52   :  { %v14297_v49 = vpop.eup %14296 }
0x1c53   :  { %v16796_v13 = vmul.f32 %v14297_v49, %v6518_v34  ;;  %v6597_v33 = vmul.f32 %v11582_v25, %v16794_v6 }
0x1c54   :  { %v14299_v12 = vpop.eup %14298 }
0x1c55   :  { %v16799_v60 = vmul.f32 %v14299_v12, %v6533_v27  ;;  %v6605_v21 = vsel %vm1084_vm4, %v6597_v33, 0.0  ;;  %v6596_v7 = vmul.f32 %v11582_v25, %v16796_v13 }
0x1c56   :  { %v14301_v61 = vpop.eup %14300  ;;  %6606 = vadd.xlane.f32.xlu1 %v6605_v21 }
0x1c57   :  { %v16803_v55 = vmul.f32 %v14301_v61, %v6528_v29  ;;  %v6602_v51 = vsel %vm1084_vm4, %v6596_v7, 0.0  ;;  %v6599_v42 = vmul.f32 %v11582_v25, %v16799_v60 }
0x1c58   :  { %6603 = vadd.xlane.f32.xlu0 %v6602_v51 }
0x1c59   :  { %v14303_v34 = vpop.eup %14302  ;;  %v6611_v9 = vsel %vm1084_vm4, %v6599_v42, 0.0  ;;  %v6598_v46 = vmul.f32 %v11582_v25, %v16803_v55 }
0x1c5a   :  { %v16809_v27 = vmul.f32 %v14303_v34, %v6543_v57  ;;  %6612 = vadd.xlane.f32.xlu1 %v6611_v9  ;;  %v6710_v57 = vld [vmem:[#allocation11 + $0x78] sm:$0xff] }
0x1c5b   :  { %v14305_v58 = vpop.eup %14304  ;;  %v6608_v39 = vsel %vm1084_vm4, %v6598_v46, 0.0  ;;  %13216 = vmatprep.subr.mxu1 %v6710_v57 }
0x1c5c   :  { %v16812_v48 = vmul.f32 %v14305_v58, %v6538_v8  ;;  %6609 = vadd.xlane.f32.xlu0 %v6608_v39  ;;  %v6601_v29 = vmul.f32 %v11582_v25, %v16809_v27  ;;  %13217 = vmatpush3.msra.mxu1 %v6710_v57 }
0x1c5d   :  { %13218 = vmatprep.subr.mxu1 %v6709_v30 }
0x1c5e   :  { %v6617_v53 = vsel %vm1084_vm4, %v6601_v29, 0.0  ;;  %v6600_v10 = vmul.f32 %v11582_v25, %v16812_v48  ;;  %13219 = vmatpush3.msra.mxu1 %v6709_v30 }
0x1c5f   :  { %6618 = vadd.xlane.f32.xlu1 %v6617_v53 }
0x1c60   :  { %v6614_v3 = vsel %vm1084_vm4, %v6600_v10, 0.0 }
0x1c61   :  { %6615 = vadd.xlane.f32.xlu0 %v6614_v3 }
0x1cdf   :  { %v6607_v8 = vpop.xlane.xlu1 %6606 }
0x1ce0   :  { %v6629_v24 = vadd.f32 %v11584_v16, %v6607_v8  ;;  %v6708_v8 = vld [vmem:[#allocation11 + $0x68] sm:$0xff] }
0x1ce1   :  { %v6604_v54 = vpop.xlane.xlu0 %6603  ;;  %13220 = vmatprep.subr.mxu1 %v6708_v8 }
0x1ce2   :  { %v6635_v19 = vsub.f32 0.0, %v6629_v24  ;;  %v6628_v59 = vadd.f32 %v11584_v16, %v6604_v54  ;;  %13221 = vmatpush3.msra.mxu1 %v6708_v8  ;;  %v6707_v24 = vld [vmem:[#allocation11 + $0x60] sm:$0xff] }
0x1ce3   :  { %v6613_v18 = vpop.xlane.xlu1 %6612  ;;  %13222 = vmatprep.subr.mxu1 %v6707_v24 }
0x1ce4   :  { %v6642_v50 = vmul.f32 1.442695, %v6635_v19  ;;  %v6634_v1 = vsub.f32 0.0, %v6628_v59  ;;  %v6631_v45 = vadd.f32 %v11584_v16, %v6613_v18  ;;  %13223 = vmatpush3.msra.mxu1 %v6707_v24 }
0x1ce5   :  { %v6610_v52 = vpop.xlane.xlu0 %6609  ;;  %13254 = vmatprep.subr.mxu1 %v15428_v0 }
0x1ce6   :  { %14306 = vpow2.f32 %v6642_v50  ;;  %v6640_v37 = vmul.f32 1.442695, %v6634_v1  ;;  %v6637_v22 = vsub.f32 0.0, %v6631_v45  ;;  %v6630_v2 = vadd.f32 %v11584_v16, %v6610_v52 }
0x1ce8   :  { %14308 = vpow2.f32 %v6640_v37  ;;  %v6646_v63 = vmul.f32 1.442695, %v6637_v22  ;;  %v6636_v41 = vsub.f32 0.0, %v6630_v2  ;;  %v6619_v25 = vpop.xlane.xlu1 %6618 }
0x1ce9   :  { %v6633_v49 = vadd.f32 %v11584_v16, %v6619_v25 }
0x1cea   :  { %14310 = vpow2.f32 %v6646_v63  ;;  %v6644_v33 = vmul.f32 1.442695, %v6636_v41  ;;  %v6616_v12 = vpop.xlane.xlu0 %6615 }
0x1ceb   :  { %v6639_v21 = vsub.f32 0.0, %v6633_v49  ;;  %v6632_v7 = vadd.f32 %v11584_v16, %v6616_v12  ;;  %v14634_v12 = vld [vmem:[%s17602_s21 + $0x8] sm:$0xff] }
0x1cec   :  { %14312 = vpow2.f32 %v6644_v33 }
0x1ced   :  { %v6650_v61 = vmul.f32 1.442695, %v6639_v21  ;;  %v6638_v51 = vsub.f32 0.0, %v6632_v7  ;;  %v7082_v21 = vld [vmem:[#allocation16 + $0x60] sm:$0xff]  ;;  %v14635_v7 = vld [vmem:[%s17602_s21 + $0x10] sm:$0xff] }
0x1cef   :  { %14314 = vpow2.f32 %v6650_v61  ;;  %v6648_v42 = vmul.f32 1.442695, %v6638_v51  ;;  %v11585_v51 = vld [vmem:[#allocation13 + $0x3] ss:$0 sm:$0xff] }
0x1cf1   :  { %14316 = vpow2.f32 %v6648_v42 }
0x1cf3   :  { %v14307_v34 = vpop.eup %14306 }
0x1cf4   :  { %v6653_v9 = vadd.f32 1.0, %v14307_v34 }
0x1cf5   :  { %v14309_v46 = vpop.eup %14308 }
0x1cf6   :  { %14318 = vrcp.f32 %v6653_v9  ;;  %v6652_v58 = vadd.f32 1.0, %v14309_v46 }
0x1cf7   :  { %v14311_v39 = vpop.eup %14310 }
0x1cf8   :  { %14320 = vrcp.f32 %v6652_v58  ;;  %v6655_v29 = vadd.f32 1.0, %v14311_v39 }
0x1cf9   :  { %v14313_v53 = vpop.eup %14312 }
0x1cfa   :  { %v6654_v10 = vadd.f32 1.0, %v14313_v53  ;;  %14322 = vrcp.f32 %v6655_v29 }
0x1cfc   :  { %v14315_v3 = vpop.eup %14314  ;;  %14324 = vrcp.f32 %v6654_v10 }
0x1cfd   :  { %v6657_v57 = vadd.f32 1.0, %v14315_v3 }
0x1cfe   :  { %v14317_v30 = vpop.eup %14316 }
0x1cff   :  { %v6656_v16 = vadd.f32 1.0, %v14317_v30  ;;  %14326 = vrcp.f32 %v6657_v57 }
0x1d01   :  { %14328 = vrcp.f32 %v6656_v16 }
0x1d03   :  { %v14319_v54 = vpop.eup %14318 }
0x1d04   :  { %6677 = vperm.xlu1 %13897, %v14319_v54  }
0x1d05   :  { %v14321_v19 = vpop.eup %14320 }
0x1d06   :  { %6672 = vperm.xlu0 %13896, %v14321_v19  }
0x1d07   :  { %v14323_v59 = vpop.eup %14322 }
0x1d09   :  { %v14325_v18 = vpop.eup %14324 }
0x1d0a   :  { %6682 = vperm.xlu1 %13897, %v14325_v18   ;;  %6687 = vperm.xlu0 %13896, %v14323_v59  }
0x1d0c   :  { %v14327_v50 = vpop.eup %14326 }
0x1d0e   :  { %v14329_v1 = vpop.eup %14328  ;;  %6697 = vperm.xlu0 %13896, %v14327_v50  }
0x1d0f   :  { %6692 = vperm.xlu1 %13897, %v14329_v1  }
0x1d7f   :  { %v6678_v45 = vpop.permute.xlu1 %6677 }
0x1d80   :  { %v6701_v22 = vmul.f32 %v6678_v45, %v16794_v6 }
0x1d81   :  { %v6673_v52 = vpop.permute.xlu0 %6672 }
0x1d82   :  { %v6700_v37 = vmul.f32 %v6673_v52, %v16796_v13 }
0x1d84   :  { %13224 = vmatprep.mubr.msk.f32.mxu1 %vm1084_vm4, %v6700_v37 }
0x1d85   :  { %v6683_v2 = vpop.permute.xlu1 %6682  ;;  %13225 = vmatmul.mubr.msk.f32.vlgmr.msra.gmra.mxu1 %vm1084_vm4, %v6701_v22  ;;  %v6688_v63 = vpop.permute.xlu0 %6687 }
0x1d86   :  { %v6702_v41 = vmul.f32 %v6683_v2, %v16803_v55  ;;  %v6703_v25 = vmul.f32 %v6688_v63, %v16799_v60  ;;  %v7085_v60 = vld [vmem:[#allocation16 + $0x78] sm:$0xff] }
0x1d87   :  { %v14633_v55 = vld [vmem:[%s17602_s21] sm:$0xff] }
0x1d88   :  { %13227 = vmatprep.mubr.msk.f32.mxu1 %vm1084_vm4, %v6702_v41 }
0x1d89   :  { %13228 = vmatmul.mubr.msk.f32.gmra.mxu1 %vm1084_vm4, %v6703_v25  ;;  %v6698_v49 = vpop.permute.xlu0 %6697 }
0x1d8a   :  { %v6693_v33 = vpop.permute.xlu1 %6692  ;;  %v6705_v13 = vmul.f32 %v6698_v49, %v16809_v27  ;;  %v7084_v27 = vld [vmem:[#allocation16 + $0x70] sm:$0xff] }
0x1d8b   :  { %v6704_v6 = vmul.f32 %v6693_v33, %v16812_v48  ;;  %v7083_v48 = vld [vmem:[#allocation16 + $0x68] sm:$0xff] }
0x1d8c   :  { %13255 = vmatpush3.msra.mxu1 %v6705_v13 }
0x1d8d   :  { %13230 = vmatprep.mubr.msk.f32.mxu1 %vm1084_vm4, %v6704_v6  ;;  %13256 = vmatprep.subr.mxu1 %v15428_v0 }
0x1d8e   :  { %13231 = vmatmul.mubr.msk.f32.gmra.mxu1 %vm1084_vm4, %v6705_v13 }
0x1d8f   :  { %13257 = vmatpush3.msra.mxu1 %v6704_v6  ;;  %13266 = vmatprep.mubr.msk.f32.mxu1 %vm15429_vm0, %v15428_v0 }
0x1d90   :  { %13258 = vmatprep.subr.mxu1 %v15428_v0 }
0x1d91   :  { %13259 = vmatpush3.msra.mxu1 %v6703_v25 }
0x1d92   :  { %13260 = vmatprep.subr.mxu1 %v15428_v0 }
0x1d93   :  { %13261 = vmatpush3.msra.mxu1 %v6702_v41 }
0x1d94   :  { %13262 = vmatprep.subr.mxu1 %v15428_v0 }
0x1d95   :  { %13263 = vmatpush3.msra.mxu1 %v6701_v22 }
0x1d96   :  { %13264 = vmatprep.subr.mxu1 %v15428_v0 }
0x1d97   :  { %13265 = vmatpush3.msra.mxu1 %v6700_v37 }
0x1d98   :  { %13267 = vmatmul.mubr.msk.f32.vlgmr.msra.gmra.mxu1 %vm1876_vm5, %v14633_v55  ;;  %13292 = vmatprep.subr.mxu1 %v15428_v0 }
0x1d99   :  { %13269 = vmatprep.mubr.msk.f32.mxu1 %vm15429_vm0, %v15428_v0  ;;  %13293 = vmatpush3.msra.mxu1 %v7085_v60 }
0x1d9a   :  { %13294 = vmatprep.subr.mxu1 %v15428_v0 }
0x1d9b   :  { %13295 = vmatpush3.msra.mxu1 %v7084_v27 }
0x1d9c   :  { %13270 = vmatmul.mubr.msk.f32.gmra.mxu1 %vm1876_vm5, %v14634_v12  ;;  %13296 = vmatprep.subr.mxu1 %v15428_v0 }
0x1d9d   :  { %13272 = vmatprep.mubr.msk.f32.mxu1 %vm15429_vm0, %v15428_v0  ;;  %13297 = vmatpush3.msra.mxu1 %v7083_v48 }
0x1d9e   :  { %13298 = vmatprep.subr.mxu1 %v15428_v0 }
0x1d9f   :  { %13299 = vmatpush3.msra.mxu1 %v7082_v21 }
0x1da0   :  { %13273 = vmatmul.mubr.msk.f32.gmra.mxu1 %vm1876_vm5, %v14635_v7  ;;  %13326 = vmatprep.subr.mxu1 %v15428_v0 }
0x1da1   :  { %13300 = vmatprep.mubr.msk.f32.mxu1 %vm15429_vm0, %v15428_v0 }
0x1da4   :  { %13301 = vmatmul.mubr.msk.f32.vlgmr.msra.gmra.mxu1 %vm1084_vm4, %v16731_v62 }
0x1da5   :  { %13303 = vmatprep.mubr.msk.f32.mxu1 %vm15429_vm0, %v15428_v0 }
0x1da8   :  { %13304 = vmatmul.mubr.msk.f32.gmra.mxu1 %vm1084_vm4, %v16725_v56 }
0x1da9   :  { %13306 = vmatprep.mubr.msk.f32.mxu1 %vm15429_vm0, %v15428_v0 }
0x1dac   :  { %13307 = vmatmul.mubr.msk.f32.gmra.mxu1 %vm1084_vm4, %v16723_v38 }
0x1dad   :  { %13334 = vmatprep.mubr.msk.f32.mxu1 %vm15429_vm0, %v15428_v0 }
0x1e45   :  { %v13226_v61 = vpop.f32.mrf.mxu1 }
0x1e46   :  { %v16868_v34 = vadd.f32 %v13226_v61, %v11585_v51 }
0x1e47   :  { %v6803_v42 = vpop.f32.mrf.mxu1 }
0x1e48   :  { %v16870_v9 = vadd.f32 %v11585_v51, %v6803_v42  ;;  %v6833_v53 = vsub.f32 0.0, %v16868_v34 }
0x1e49   :  { %v13229_v46 = vpop.f32.mrf.mxu1 }
0x1e4a   :  { %v6832_v58 = vsub.f32 0.0, %v16870_v9  ;;  %v6819_v39 = vadd.f32 %v13229_v46, %v11585_v51  ;;  %v6840_v54 = vmul.f32 1.442695, %v6833_v53 }
0x1e4b   :  { %v6813_v29 = vpop.f32.mrf.mxu1 }
0x1e4c   :  { %v6835_v10 = vsub.f32 0.0, %v6819_v39  ;;  %v6814_v3 = vadd.f32 %v11585_v51, %v6813_v29  ;;  %v6838_v57 = vmul.f32 1.442695, %v6832_v58 }
0x1e4e   :  { %v6844_v30 = vmul.f32 1.442695, %v6835_v10  ;;  %v6834_v16 = vsub.f32 0.0, %v6814_v3  ;;  %v13232_v8 = vpop.f32.mrf.mxu1 }
0x1e4f   :  { %v6829_v24 = vadd.f32 %v13232_v8, %v11585_v51 }
0x1e50   :  { %14330 = vpow2.f32 %v6844_v30  ;;  %v6842_v19 = vmul.f32 1.442695, %v6834_v16  ;;  %v6823_v59 = vpop.f32.mrf.mxu1 }
0x1e51   :  { %14332 = vpow2.f32 %v6838_v57  ;;  %v6837_v18 = vsub.f32 0.0, %v6829_v24  ;;  %v6824_v50 = vadd.f32 %v11585_v51, %v6823_v59  ;;  %v11592_v59 = vld [vmem:[#allocation14 + $0x3] ss:$0 sm:$0xff] }
0x1e52   :  { %14334 = vpow2.f32 %v6842_v19 }
0x1e53   :  { %v6848_v1 = vmul.f32 1.442695, %v6837_v18  ;;  %v6836_v45 = vsub.f32 0.0, %v6824_v50  ;;  %14336 = vpow2.f32 %v6840_v54 }
0x1e55   :  { %14338 = vpow2.f32 %v6848_v1  ;;  %v6846_v52 = vmul.f32 1.442695, %v6836_v45 }
0x1e57   :  { %14340 = vpow2.f32 %v6846_v52 }
0x1e58   :  { %v16874_v37 = vpop.f32.mrf.mxu1 }
0x1e5a   :  { %v13268_v22 = vpop.f32.mrf.mxu1 }
0x1e5c   :  { %v16876_v2 = vpop.f32.mrf.mxu1 }
0x1e5d   :  { %v14331_v63 = vpop.eup %14330 }
0x1e5e   :  { %v14333_v41 = vpop.eup %14332  ;;  %v13271_v25 = vpop.f32.mrf.mxu1  ;;  %v6853_v33 = vadd.f32 1.0, %v14331_v63 }
0x1e5f   :  { %v14335_v49 = vpop.eup %14334  ;;  %v6850_v27 = vadd.f32 1.0, %v14333_v41 }
0x1e60   :  { %v6852_v13 = vadd.f32 1.0, %v14335_v49  ;;  %v16878_v6 = vpop.f32.mrf.mxu1  ;;  %v14337_v60 = vpop.eup %14336 }
0x1e61   :  { %v6851_v61 = vadd.f32 1.0, %v14337_v60 }
0x1e62   :  { %v14339_v55 = vpop.eup %14338  ;;  %v13274_v48 = vpop.f32.mrf.mxu1  ;;  %14342 = vrcp.f32 %v6852_v13 }
0x1e63   :  { %v6855_v12 = vadd.f32 1.0, %v14339_v55  ;;  %14344 = vrcp.f32 %v6853_v33 }
0x1e64   :  { %v14341_v21 = vpop.eup %14340  ;;  %v16880_v7 = vpop.f32.mrf.mxu1 }
0x1e65   :  { %14346 = vrcp.f32 %v6855_v12  ;;  %v6854_v51 = vadd.f32 1.0, %v14341_v21 }
0x1e66   :  { %14348 = vrcp.f32 %v6850_v27  ;;  %v13302_v42 = vpop.f32.mrf.mxu1 }
0x1e67   :  { %14350 = vrcp.f32 %v6854_v51 }
0x1e68   :  { %v16882_v46 = vpop.f32.mrf.mxu1  ;;  %14352 = vrcp.f32 %v6851_v61 }
0x1e6a   :  { %v13305_v58 = vpop.f32.mrf.mxu1 }
0x1e6c   :  { %v16884_v29 = vpop.f32.mrf.mxu1 }
0x1e6e   :  { %v13308_v53 = vpop.f32.mrf.mxu1 }
0x1e6f   :  { %v14343_v10 = vpop.eup %14342 }
0x1e70   :  { %v14345_v57 = vpop.eup %14344  ;;  %v6870_v8 = vmul.f32 %v14343_v10, %v6814_v3 }
0x1e71   :  { %v6871_v18 = vmul.f32 %v14345_v57, %v6819_v39 }
0x1e72   :  { %v14347_v30 = vpop.eup %14346  ;;  %v6884_v25 = vmul.f32 %v11592_v59, %v6870_v8 }
0x1e73   :  { %v14349_v16 = vpop.eup %14348  ;;  %v6873_v54 = vmul.f32 %v14347_v30, %v6829_v24  ;;  %v6885_v13 = vmul.f32 %v11592_v59, %v6871_v18  ;;  %v7412_v18 = vld [vmem:[%s17605_s28 + $0x18] sm:$0xff] }
0x1e74   :  { %v14351_v19 = vpop.eup %14350  ;;  %v6868_v22 = vmul.f32 %v14349_v16, %v16870_v9  ;;  %v6894_v3 = vsel %vm1084_vm4, %v6884_v25, 0.0  ;;  %13327 = vmatpush3.msra.mxu1 %v7412_v18 }
0x1e75   :  { %v6872_v1 = vmul.f32 %v14351_v19, %v6824_v50  ;;  %v6887_v45 = vmul.f32 %v11592_v59, %v6873_v54  ;;  %v14353_v52 = vpop.eup %14352  ;;  %v6897_v39 = vsel %vm1084_vm4, %v6885_v13, 0.0  ;;  %v7090_v54 = vld [vmem:[#allocation17 + $0x78] sm:$0xff]  ;;  %v7087_v19 = vld [vmem:[#allocation17 + $0x60] sm:$0xff]  ;;  %13328 = vmatprep.subr.mxu1 %v15428_v0 }
0x1e76   :  { %v6869_v49 = vmul.f32 %v14353_v52, %v16868_v34  ;;  %v6882_v24 = vmul.f32 %v11592_v59, %v6868_v22  ;;  %v7303_v52 = vld [vmem:[#allocation20 + $0x68] sm:$0xff]  ;;  %v7302_v22 = vld [vmem:[#allocation20 + $0x60] sm:$0xff] }
0x1e77   :  { %v6903_v63 = vsel %vm1084_vm4, %v6887_v45, 0.0  ;;  %v6886_v41 = vmul.f32 %v11592_v59, %v6872_v1  ;;  %v7410_v1 = vld [vmem:[%s17605_s28 + $0x8] sm:$0xff] }
0x1e78   :  { %6904 = vadd.xlane.f32.xlu1 %v6903_v63  ;;  %v6883_v50 = vmul.f32 %v11592_v59, %v6869_v49  ;;  %v6888_v9 = vsel %vm1084_vm4, %v6882_v24, 0.0  ;;  %v14638_v59 = vld [vmem:[%s17603_s23 + $0x10] sm:$0xff]  ;;  %v7305_v45 = vld [vmem:[#allocation20 + $0x78] sm:$0xff] }
0x1e79   :  { %v6900_v33 = vsel %vm1084_vm4, %v6886_v41, 0.0 }
0x1e7a   :  { %6901 = vadd.xlane.f32.xlu0 %v6900_v33  ;;  %v6891_v60 = vsel %vm1084_vm4, %v6883_v50, 0.0 }
0x1e7c   :  { %6895 = vadd.xlane.f32.xlu1 %v6894_v3 }
0x1e7e   :  { %6898 = vadd.xlane.f32.xlu0 %v6897_v39  ;;  %v11605_v39 = vld [vmem:[#allocation19 + $0x3] ss:$0 sm:$0xff] }
0x1e80   :  { %6889 = vadd.xlane.f32.xlu1 %v6888_v9 }
0x1e82   :  { %6892 = vadd.xlane.f32.xlu0 %v6891_v60 }
0x1f01   :  { %v6905_v55 = vpop.xlane.xlu1 %6904 }
0x1f02   :  { %14354 = vtanh.f32 %v6905_v55 }
0x1f03   :  { %v6902_v34 = vpop.xlane.xlu0 %6901 }
0x1f04   :  { %14356 = vtanh.f32 %v6902_v34 }
0x1f05   :  { %v6896_v27 = vpop.xlane.xlu1 %6895 }
0x1f06   :  { %14358 = vtanh.f32 %v6896_v27 }
0x1f07   :  { %v6899_v48 = vpop.xlane.xlu0 %6898 }
0x1f08   :  { %14360 = vtanh.f32 %v6899_v48 }
0x1f09   :  { %v6890_v12 = vpop.xlane.xlu1 %6889 }
0x1f0a   :  { %14362 = vtanh.f32 %v6890_v12 }
0x1f0b   :  { %v6893_v21 = vpop.xlane.xlu0 %6892 }
0x1f0c   :  { %14364 = vtanh.f32 %v6893_v21 }
0x1f0f   :  { %v14355_v61 = vpop.eup %14354 }
0x1f10   :  { %v6917_v51 = vmul.f32 %v14355_v61, %v16709_v36 }
0x1f11   :  { %v14357_v42 = vpop.eup %14356 }
0x1f12   :  { %13234 = vmatpush3.msra.mxu0 %v6917_v51  ;;  %v6916_v58 = vmul.f32 %v14357_v42, %v16714_v43 }
0x1f13   :  { %13235 = vmatprep.subr.mxu0 %v15428_v0  ;;  %v14359_v53 = vpop.eup %14358 }
0x1f14   :  { %13236 = vmatpush3.msra.mxu0 %v6916_v58  ;;  %v6914_v16 = vmul.f32 %v14359_v53, %v16704_v40  ;;  %v7089_v40 = vld [vmem:[#allocation17 + $0x70] sm:$0xff] }
0x1f15   :  { %v14361_v10 = vpop.eup %14360  ;;  %13237 = vmatprep.subr.mxu0 %v15428_v0 }
0x1f16   :  { %v6915_v57 = vmul.f32 %v14361_v10, %v16699_v28  ;;  %v14636_v28 = vld [vmem:[%s17603_s23] sm:$0xff] }
0x1f17   :  { %v14363_v30 = vpop.eup %14362 }
0x1f18   :  { %13238 = vmatpush3.msra.mxu0 %v6915_v57  ;;  %v6912_v43 = vmul.f32 %v14363_v30, %v16694_v32  ;;  %v14637_v32 = vld [vmem:[%s17603_s23 + $0x8] sm:$0xff] }
0x1f19   :  { %v14365_v8 = vpop.eup %14364  ;;  %13239 = vmatprep.subr.mxu0 %v15428_v0 }
0x1f1a   :  { %13240 = vmatpush3.msra.mxu0 %v6914_v16  ;;  %v6913_v36 = vmul.f32 %v14365_v8, %v16690_v4  ;;  %v7088_v4 = vld [vmem:[#allocation17 + $0x68] sm:$0xff] }
0x1f1b   :  { %13241 = vmatprep.subr.mxu0 %v15428_v0 }
0x1f1c   :  { %13242 = vmatpush3.msra.mxu0 %v6913_v36 }
0x1f1d   :  { %13243 = vmatprep.subr.mxu0 %v15428_v0 }
0x1f1e   :  { %13244 = vmatpush3.msra.mxu0 %v6912_v43 }
0x1f1f   :  { %13246 = vmatmul.mubr.msk.f32.vlgmr.msra.gmra.mxu0 %vm1876_vm5, %v14636_v28  ;;  %13275 = vmatprep.subr.mxu0 %v15428_v0 }
0x1f20   :  { %13248 = vmatprep.mubr.msk.f32.mxu0 %vm15429_vm0, %v15428_v0  ;;  %13276 = vmatpush3.msra.mxu0 %v7090_v54 }
0x1f21   :  { %13277 = vmatprep.subr.mxu0 %v15428_v0 }
0x1f22   :  { %13278 = vmatpush3.msra.mxu0 %v7089_v40 }
0x1f23   :  { %13249 = vmatmul.mubr.msk.f32.gmra.mxu0 %vm1876_vm5, %v14637_v32  ;;  %13279 = vmatprep.subr.mxu0 %v15428_v0  ;;  %v7509_v32 = vld [vmem:[#allocation32] sm:$0xff] }
0x1f24   :  { %13251 = vmatprep.mubr.msk.f32.mxu0 %vm15429_vm0, %v15428_v0  ;;  %13280 = vmatpush3.msra.mxu0 %v7088_v4 }
0x1f25   :  { %13281 = vmatprep.subr.mxu0 %v15428_v0 }
0x1f26   :  { %13282 = vmatpush3.msra.mxu0 %v7087_v19 }
0x1f27   :  { %13252 = vmatmul.mubr.msk.f32.gmra.mxu0 %vm1876_vm5, %v14638_v59  ;;  %13309 = vmatprep.subr.mxu0 %v15428_v0  ;;  %v11609_v59 = vld [vmem:[#allocation22 + $0x3] ss:$0 sm:$0xff] }
0x1f28   :  { %13283 = vmatprep.mubr.msk.f32.mxu0 %vm15429_vm0, %v15428_v0 }
0x1f2b   :  { %13284 = vmatmul.mubr.msk.f32.vlgmr.msra.gmra.mxu0 %vm1084_vm4, %v16874_v37  ;;  %v7411_v37 = vld [vmem:[%s17605_s28 + $0x10] sm:$0xff] }
0x1f2c   :  { %13286 = vmatprep.mubr.msk.f32.mxu0 %vm15429_vm0, %v15428_v0  ;;  %13329 = vmatpush3.msra.mxu1 %v7411_v37 }
0x1f2d   :  { %13330 = vmatprep.subr.mxu1 %v15428_v0  ;;  %13310 = vmatpush3.msra.mxu0 %v7305_v45 }
0x1f2e   :  { %13331 = vmatpush3.msra.mxu1 %v7410_v1  ;;  %13311 = vmatprep.subr.mxu0 %v15428_v0 }
0x1f2f   :  { %13287 = vmatmul.mubr.msk.f32.gmra.mxu0 %vm1084_vm4, %v16876_v2  ;;  %13332 = vmatprep.subr.mxu1 %v15428_v0  ;;  %v7409_v2 = vld [vmem:[%s17605_s28] sm:$0xff] }
0x1f30   :  { %13289 = vmatprep.mubr.msk.f32.mxu0 %vm15429_vm0, %v15428_v0  ;;  %13333 = vmatpush3.msra.mxu1 %v7409_v2 }
0x1f33   :  { %13290 = vmatmul.mubr.msk.f32.gmra.mxu0 %vm1084_vm4, %v16878_v6  ;;  %v7304_v6 = vld [vmem:[#allocation20 + $0x70] sm:$0xff] }
0x1f34   :  { %13317 = vmatprep.mubr.msk.f32.mxu0 %vm15429_vm0, %v15428_v0  ;;  %13312 = vmatpush3.msra.mxu0 %v7304_v6 }
0x1f35   :  { %13313 = vmatprep.subr.mxu0 %v15428_v0 }
0x1f36   :  { %13314 = vmatpush3.msra.mxu0 %v7303_v52 }
0x1f37   :  { %13315 = vmatprep.subr.mxu0 %v15428_v0 }
0x1f38   :  { %13316 = vmatpush3.msra.mxu0 %v7302_v22 }
0x1f39   :  { %13343 = vmatprep.subr.mxu0 %v15428_v0 }
0x1fdf   :  { %v16945_v63 = vpop.f32.mrf.mxu0 }
0x1fe0   :  { %v16974_v22 = vadd.f32 %v16945_v63, %v16660_v47  ;;  %v11610_v63 = vld [vmem:[#allocation31] ss:$0 sm:$0xff] }
0x1fe1   :  { %v13247_v41 = vpop.f32.mrf.mxu0 }
0x1fe3   :  { %v6989_v25 = vpop.f32.mrf.mxu0 }
0x1fe4   :  { %v16965_v45 = vadd.f32 %v6989_v25, %v16655_v5 }
0x1fe5   :  { %v13250_v49 = vpop.f32.mrf.mxu0 }
0x1fe7   :  { %v6994_v33 = vpop.f32.mrf.mxu0 }
0x1fe8   :  { %v16948_v13 = vadd.f32 %v6994_v33, %v16652_v31 }
0x1fe9   :  { %v13253_v3 = vpop.f32.mrf.mxu0 }
0x1fea   :  { %13354 = vmatprep.subr.mxu1 %v16948_v13 }
0x1feb   :  { %v7166_v24 = vpop.f32.mrf.mxu0 }
0x1fec   :  { %v7256_v50 = vadd.f32 %v16880_v7, %v7166_v24 }
0x1fed   :  { %v13285_v9 = vpop.f32.mrf.mxu0 }
0x1fee   :  { %v7277_v60 = vadd.f32 %v11605_v39, %v7256_v50 }
0x1fef   :  { %v7171_v55 = vpop.f32.mrf.mxu0 }
0x1ff0   :  { %v7280_v34 = vsub.f32 0.0, %v7277_v60  ;;  %v7261_v27 = vadd.f32 %v16882_v46, %v7171_v55  ;;  %v14640_v55 = vld [vmem:[%s17597_s30] sm:$0xff] }
0x1ff1   :  { %v13288_v48 = vpop.f32.mrf.mxu0 }
0x1ff2   :  { %v7283_v12 = vmul.f32 1.442695, %v7280_v34  ;;  %v7278_v21 = vadd.f32 %v11605_v39, %v7261_v27 }
0x1ff3   :  { %v7176_v61 = vpop.f32.mrf.mxu0 }
0x1ff4   :  { %14366 = vpow2.f32 %v7283_v12  ;;  %v7281_v31 = vsub.f32 0.0, %v7278_v21  ;;  %v7266_v51 = vadd.f32 %v16884_v29, %v7176_v61 }
0x1ff5   :  { %v13291_v42 = vpop.f32.mrf.mxu0 }
0x1ff6   :  { %v7285_v58 = vmul.f32 1.442695, %v7281_v31  ;;  %v7279_v53 = vadd.f32 %v11605_v39, %v7266_v51 }
0x1ff8   :  { %14368 = vpow2.f32 %v7285_v58  ;;  %v7282_v10 = vsub.f32 0.0, %v7279_v53 }
0x1ffa   :  { %v7287_v7 = vmul.f32 1.442695, %v7282_v10 }
0x1ffc   :  { %14370 = vpow2.f32 %v7287_v7 }
0x2001   :  { %v14367_v57 = vpop.eup %14366 }
0x2002   :  { %v7289_v30 = vadd.f32 1.0, %v14367_v57 }
0x2004   :  { %14372 = vrcp.f32 %v7289_v30 }
0x2005   :  { %v14369_v16 = vpop.eup %14368 }
0x2006   :  { %v7290_v46 = vadd.f32 1.0, %v14369_v16 }
0x2008   :  { %14374 = vrcp.f32 %v7290_v46 }
0x2009   :  { %v14371_v8 = vpop.eup %14370 }
0x200a   :  { %v7291_v36 = vadd.f32 1.0, %v14371_v8 }
0x200c   :  { %14376 = vrcp.f32 %v7291_v36 }
0x2011   :  { %v14373_v43 = vpop.eup %14372 }
0x2012   :  { %v7298_v54 = vmul.f32 %v14373_v43, %v7277_v60 }
0x2014   :  { %13318 = vmatmul.mubr.msk.f32.vlgmr.msra.gmra.mxu0 %vm1084_vm4, %v7298_v54 }
0x2015   :  { %v14375_v29 = vpop.eup %14374  ;;  %13320 = vmatprep.mubr.msk.f32.mxu0 %vm15429_vm0, %v15428_v0  ;;  %13344 = vmatpush3.msra.mxu0 %v7509_v32 }
0x2016   :  { %v7299_v28 = vmul.f32 %v14375_v29, %v7278_v21 }
0x2018   :  { %13321 = vmatmul.mubr.msk.f32.gmra.mxu0 %vm1084_vm4, %v7299_v28  ;;  %v11614_v28 = vld [vmem:[#allocation34] ss:$0 sm:$0xff] }
0x2019   :  { %v14377_v40 = vpop.eup %14376  ;;  %13323 = vmatprep.mubr.msk.f32.mxu0 %vm15429_vm0, %v15428_v0 }
0x201a   :  { %v7300_v4 = vmul.f32 %v14377_v40, %v7279_v53 }
0x201c   :  { %13324 = vmatmul.mubr.msk.f32.gmra.mxu0 %vm1084_vm4, %v7300_v4 }
0x201d   :  { %13345 = vmatprep.mubr.msk.f32.mxu0 %vm15429_vm0, %v15428_v0 }
0x20d4   :  { %v7381_v19 = vpop.f32.mrf.mxu0 }
0x20d5   :  { %v7395_v18 = vadd.f32 %v7381_v19, %v16731_v62 }
0x20d6   :  { %v13319_v37 = vpop.f32.mrf.mxu0 }
0x20d7   :  { %v7406_v1 = vadd.f32 %v11609_v59, %v7395_v18  ;;  %v11643_v18 = vld [vmem:[%s17599_s0 + $0x98] sm:$0xff] }
0x20d8   :  { %v7386_v2 = vpop.f32.mrf.mxu0  ;;  %v11639_v37 = vld [vmem:[%s17600_s19 + $0x98] sm:$0xff] }
0x20d9   :  { %v7396_v6 = vadd.f32 %v7386_v2, %v16725_v56  ;;  %13335 = vmatmul.mubr.msk.f32.vlgmr.msra.gmra.mxu1 %vm1084_vm4, %v7406_v1  ;;  %v14641_v1 = vld [vmem:[%s17597_s30 + $0x8] sm:$0xff] }
0x20da   :  { %13355 = vmatpush3.msra.mxu1 %v16948_v13  ;;  %v13322_v52 = vpop.f32.mrf.mxu0  ;;  %13337 = vmatprep.mubr.msk.f32.mxu1 %vm15429_vm0, %v15428_v0  ;;  %v14642_v2 = vld [vmem:[%s17598_s3 + $0x8] sm:$0xff] }
0x20db   :  { %v7407_v62 = vadd.f32 %v11609_v59, %v7396_v6  ;;  %13356 = vmatprep.subr.mxu1 %v16965_v45  ;;  %v14643_v6 = vld [vmem:[%s17597_s30 + $0x10] sm:$0xff] }
0x20dc   :  { %13357 = vmatpush3.msra.mxu1 %v16965_v45  ;;  %v7391_v5 = vpop.f32.mrf.mxu0  ;;  %v14644_v52 = vld [vmem:[%s17598_s3 + $0x10] sm:$0xff] }
0x20dd   :  { %v7397_v56 = vadd.f32 %v7391_v5, %v16723_v38  ;;  %13358 = vmatprep.subr.mxu1 %v16974_v22  ;;  %13338 = vmatmul.mubr.msk.f32.gmra.mxu1 %vm1084_vm4, %v7407_v62  ;;  %v14639_v38 = vld [vmem:[%s17598_s3] sm:$0xff]  ;;  %v11642_v62 = vld [vmem:[%s17599_s0 + $0x90] sm:$0xff] }
0x20de   :  { %13359 = vmatpush3.msra.mxu1 %v16974_v22  ;;  %v13325_v41 = vpop.f32.mrf.mxu0  ;;  %13340 = vmatprep.mubr.msk.f32.mxu1 %vm15429_vm0, %v15428_v0  ;;  %v11638_v5 = vld [vmem:[%s17600_s19 + $0x90] sm:$0xff] }
0x20df   :  { %v7408_v47 = vadd.f32 %v11609_v59, %v7397_v56  ;;  %v14645_v56 = vld [vmem:[%s17597_s30 + $0x18] sm:$0xff] }
0x20e0   :  { %v14646_v41 = vld [vmem:[%s17598_s3 + $0x18] sm:$0xff] }
0x20e1   :  { %13341 = vmatmul.mubr.msk.f32.gmra.mxu1 %vm1084_vm4, %v7408_v47  ;;  %v14647_v47 = vld [vmem:[%s17597_s30 + $0x20] sm:$0xff] }
0x20e2   :  { %13360 = vmatprep.mubr.msk.f32.mxu1 %vm711_vm2, %v15772_v11 }
0x20e5   :  { %13361 = vmatmul.mubr.msk.f32.vlgmr.msra.gmra.mxu1 %vm711_vm2, %v15777_v14 }
0x20e6   :  { %13363 = vmatprep.mubr.msk.f32.mxu1 %vm711_vm2, %v15785_v17 }
0x20e9   :  { %13364 = vmatmul.mubr.msk.f32.gmra.mxu1 %vm711_vm2, %v15789_v20 }
0x20ea   :  { %13366 = vmatprep.mubr.msk.f32.mxu1 %vm711_vm2, %v15797_v23 }
0x20ed   :  { %13367 = vmatmul.mubr.msk.f32.gmra.mxu1 %vm711_vm2, %v15801_v26 }
0x20ee   :  { %13390 = vmatprep.mubr.msk.f32.mxu1 %vm711_vm2, %v14639_v38  ;;  %v14648_v38 = vld [vmem:[%s17598_s3 + $0x20] sm:$0xff] }
0x2199   :  { %v7495_v25 = vpop.f32.mrf.mxu1 }
0x219a   :  { %v16999_v49 = vadd.f32 %v11610_v63, %v7495_v25  ;;  %v14650_v25 = vld [vmem:[%s17598_s3 + $0x28] sm:$0xff] }
0x219b   :  { %v13336_v33 = vpop.f32.mrf.mxu1 }
0x219c   :  { %13346 = vmatmul.mubr.msk.f32.vlgmr.msra.gmra.mxu0 %vm7517_vm6, %v16999_v49  ;;  %v11641_v33 = vld [vmem:[%s17599_s0 + $0x88] sm:$0xff] }
0x219d   :  { %v7500_v3 = vpop.f32.mrf.mxu1  ;;  %13348 = vmatprep.mubr.msk.f32.mxu0 %vm15429_vm0, %v15428_v0 }
0x219e   :  { %v17005_v24 = vadd.f32 %v11610_v63, %v7500_v3  ;;  %v11637_v3 = vld [vmem:[%s17600_s19 + $0x88] sm:$0xff] }
0x219f   :  { %v13339_v39 = vpop.f32.mrf.mxu1 }
0x21a0   :  { %13349 = vmatmul.mubr.msk.f32.gmra.mxu0 %vm7517_vm6, %v17005_v24  ;;  %v11640_v39 = vld [vmem:[%s17599_s0 + $0x80] sm:$0xff] }
0x21a1   :  { %v7505_v50 = vpop.f32.mrf.mxu1  ;;  %13351 = vmatprep.mubr.msk.f32.mxu0 %vm15429_vm0, %v15428_v0 }
0x21a2   :  { %v17011_v9 = vadd.f32 %v11610_v63, %v7505_v50  ;;  %v14649_v63 = vld [vmem:[%s17597_s30 + $0x28] sm:$0xff]  ;;  %v11636_v50 = vld [vmem:[%s17600_s19 + $0x80] sm:$0xff] }
0x21a3   :  { %v13342_v60 = vpop.f32.mrf.mxu1 }
0x21a4   :  { %13352 = vmatmul.mubr.msk.f32.gmra.mxu0 %vm7517_vm6, %v17011_v9 }
0x21a5   :  { %13375 = vmatprep.mubr.msk.f32.mxu0 %vm711_vm2, %v14640_v55  ;;  %v17017_v34 = vpop.f32.mrf.mxu1 }
0x21a6   :  { %v7703_v27 = vmul.f32 %v17017_v34, %v17017_v34 }
0x21a7   :  { %v17021_v48 = vpop.f32.mrf.mxu1 }
0x21a8   :  { %v7702_v12 = vmul.f32 %v17021_v48, %v17021_v48  ;;  %v7711_v21 = vsel %vm831_vm3, %v7703_v27, 0.0 }
0x21a9   :  { %v17026_v61 = vpop.f32.mrf.mxu1  ;;  %7712 = vadd.xlane.f32.xlu1 %v7711_v21 }
0x21aa   :  { %v7705_v31 = vmul.f32 %v17026_v61, %v17026_v61  ;;  %v7708_v51 = vsel %vm831_vm3, %v7702_v12, 0.0 }
0x21ab   :  { %7709 = vadd.xlane.f32.xlu0 %v7708_v51  ;;  %v17031_v42 = vpop.f32.mrf.mxu1 }
0x21ac   :  { %v7704_v58 = vmul.f32 %v17031_v42, %v17031_v42  ;;  %v7717_v53 = vsel %vm831_vm3, %v7705_v31, 0.0 }
0x21ad   :  { %v17036_v10 = vpop.f32.mrf.mxu1  ;;  %7718 = vadd.xlane.f32.xlu1 %v7717_v53 }
0x21ae   :  { %v7707_v7 = vmul.f32 %v17036_v10, %v17036_v10  ;;  %v7714_v57 = vsel %vm831_vm3, %v7704_v58, 0.0 }
0x21af   :  { %7715 = vadd.xlane.f32.xlu0 %v7714_v57  ;;  %v17041_v30 = vpop.f32.mrf.mxu1 }
0x21b0   :  { %v7706_v16 = vmul.f32 %v17041_v30, %v17041_v30  ;;  %v7723_v46 = vsel %vm831_vm3, %v7707_v7, 0.0 }
0x21b1   :  { %7724 = vadd.xlane.f32.xlu1 %v7723_v46  ;;  %v8232_v46 = vld [vmem:[#allocation7 + $0x98] sm:$0xff] }
0x21b2   :  { %v7720_v8 = vsel %vm831_vm3, %v7706_v16, 0.0 }
0x21b3   :  { %7721 = vadd.xlane.f32.xlu0 %v7720_v8  ;;  %v8231_v8 = vld [vmem:[#allocation7 + $0x90] sm:$0xff] }
0x225c   :  { %v7593_v36 = vpop.f32.mrf.mxu0 }
0x225d   :  { %v17055_v59 = vadd.f32 %v11614_v28, %v7593_v36  ;;  %v8230_v36 = vld [vmem:[#allocation7 + $0x88] sm:$0xff] }
0x225e   :  { %v13347_v43 = vpop.f32.mrf.mxu0 }
0x225f   :  { %v8229_v43 = vld [vmem:[#allocation7 + $0x80] sm:$0xff] }
0x2260   :  { %v7598_v54 = vpop.f32.mrf.mxu0 }
0x2261   :  { %v17049_v19 = vadd.f32 %v11614_v28, %v7598_v54  ;;  %v7713_v54 = vpop.xlane.xlu1 %7712 }
0x2262   :  { %v13350_v29 = vpop.f32.mrf.mxu0 }
0x2263   :  { %v7710_v29 = vpop.xlane.xlu0 %7709 }
0x2264   :  { %v7603_v40 = vpop.f32.mrf.mxu0 }
0x2265   :  { %v17047_v4 = vadd.f32 %v11614_v28, %v7603_v40  ;;  %v11656_v28 = vld [vmem:[#allocation2 + $0x4] ss:$0 sm:$0xff] }
0x2266   :  { %v13353_v32 = vpop.f32.mrf.mxu0 }
0x2267   :  { %13369 = vmatprep.subr.mxu0 %v17047_v4  ;;  %13384 = vmatprep.subr.mxu1 %v17047_v4 }
0x2268   :  { %13370 = vmatpush3.msra.mxu0 %v17047_v4  ;;  %13385 = vmatpush3.msra.mxu1 %v17047_v4 }
0x2269   :  { %13371 = vmatprep.subr.mxu0 %v17049_v19  ;;  %13386 = vmatprep.subr.mxu1 %v17049_v19 }
0x226a   :  { %13372 = vmatpush3.msra.mxu0 %v17049_v19  ;;  %13387 = vmatpush3.msra.mxu1 %v17049_v19 }
0x226b   :  { %13373 = vmatprep.subr.mxu0 %v17055_v59  ;;  %13388 = vmatprep.subr.mxu1 %v17055_v59 }
0x226c   :  { %13374 = vmatpush3.msra.mxu0 %v17055_v59  ;;  %13389 = vmatpush3.msra.mxu1 %v17055_v59 }
0x226d   :  { %13376 = vmatmul.mubr.msk.f32.vlgmr.msra.gmra.mxu0 %vm711_vm2, %v14641_v1  ;;  %13391 = vmatmul.mubr.msk.f32.vlgmr.msra.gmra.mxu1 %vm711_vm2, %v14642_v2  ;;  %v11657_v2 = vld [vmem:[#allocation5 + $0x4] ss:$0 sm:$0xff] }
0x226e   :  { %13378 = vmatprep.mubr.msk.f32.mxu0 %vm711_vm2, %v14643_v6  ;;  %13393 = vmatprep.mubr.msk.f32.mxu1 %vm711_vm2, %v14644_v52 }
0x226f   :  { %13399 = vmatprep.subr.mxu0 %v11643_v18  ;;  %13416 = vmatprep.subr.mxu1 %v11639_v37 }
0x2270   :  { %13400 = vmatpush3.msra.mxu0 %v11643_v18  ;;  %13417 = vmatpush3.msra.mxu1 %v11639_v37  ;;  %v8161_v18 = vmul.f32 %v11656_v28, %v7713_v54  ;;  %v7719_v37 = vpop.xlane.xlu1 %7718 }
0x2271   :  { %13379 = vmatmul.mubr.msk.f32.gmra.mxu0 %vm711_vm2, %v14645_v56  ;;  %13394 = vmatmul.mubr.msk.f32.gmra.mxu1 %vm711_vm2, %v14646_v41 }
0x2272   :  { %13381 = vmatprep.mubr.msk.f32.mxu0 %vm711_vm2, %v14647_v47  ;;  %13396 = vmatprep.mubr.msk.f32.mxu1 %vm711_vm2, %v14648_v38 }
0x2273   :  { %13401 = vmatprep.subr.mxu0 %v11642_v62  ;;  %13418 = vmatprep.subr.mxu1 %v11638_v5 }
0x2274   :  { %13402 = vmatpush3.msra.mxu0 %v11642_v62  ;;  %13419 = vmatpush3.msra.mxu1 %v11638_v5  ;;  %v8160_v62 = vmul.f32 %v11656_v28, %v7710_v29  ;;  %v7716_v5 = vpop.xlane.xlu0 %7715 }
0x2275   :  { %13382 = vmatmul.mubr.msk.f32.gmra.mxu0 %vm711_vm2, %v14649_v63  ;;  %13397 = vmatmul.mubr.msk.f32.gmra.mxu1 %vm711_vm2, %v14650_v25  ;;  %v8163_v63 = vmul.f32 %v11656_v28, %v7719_v37 }
0x2276   :  { %13403 = vmatprep.subr.mxu0 %v11641_v33  ;;  %13420 = vmatprep.subr.mxu1 %v11637_v3 }
0x2277   :  { %13404 = vmatpush3.msra.mxu0 %v11641_v33  ;;  %13421 = vmatpush3.msra.mxu1 %v11637_v3 }
0x2278   :  { %13405 = vmatprep.subr.mxu0 %v11640_v39  ;;  %13422 = vmatprep.subr.mxu1 %v11636_v50 }
0x2279   :  { %13406 = vmatpush3.msra.mxu0 %v11640_v39  ;;  %13423 = vmatpush3.msra.mxu1 %v11636_v50  ;;  %v8162_v39 = vmul.f32 %v11656_v28, %v7716_v5 }
0x227a   :  { %13433 = vmatprep.subr.mxu0 %v8232_v46 }
0x232d   :  { %v13377_v60 = vpop.f32.mrf.mxu0  ;;  %v13392_v55 = vpop.f32.mrf.mxu1 }
0x232f   :  { %v7792_v27 = vpop.f32.mrf.mxu0  ;;  %v7887_v12 = vpop.f32.mrf.mxu1 }
0x2330   :  { %13407 = vmatprep.mubr.msk.f32.mxu0 %vm1084_vm4, %v7887_v12  ;;  %13424 = vmatprep.mubr.msk.f32.mxu1 %vm1084_vm4, %v7792_v27 }
0x2331   :  { %v13380_v21 = vpop.f32.mrf.mxu0  ;;  %v13395_v31 = vpop.f32.mrf.mxu1  ;;  %13408 = vmatmul.mubr.msk.f32.vlgmr.msra.gmra.mxu0 %vm1084_vm4, %v13392_v55  ;;  %13425 = vmatmul.mubr.msk.f32.vlgmr.msra.gmra.mxu1 %vm1084_vm4, %v13377_v60 }
0x2332   :  { %13434 = vmatpush3.msra.mxu0 %v8232_v46  ;;  %v7725_v55 = vpop.xlane.xlu1 %7724 }
0x2333   :  { %v7802_v51 = vpop.f32.mrf.mxu0  ;;  %v7897_v58 = vpop.f32.mrf.mxu1  ;;  %13435 = vmatprep.subr.mxu0 %v8231_v8 }
0x2334   :  { %13410 = vmatprep.mubr.msk.f32.mxu0 %vm1084_vm4, %v7897_v58  ;;  %13427 = vmatprep.mubr.msk.f32.mxu1 %vm1084_vm4, %v7802_v51 }
0x2335   :  { %v13383_v53 = vpop.f32.mrf.mxu0  ;;  %v13398_v7 = vpop.f32.mrf.mxu1  ;;  %13411 = vmatmul.mubr.msk.f32.gmra.mxu0 %vm1084_vm4, %v13395_v31  ;;  %13428 = vmatmul.mubr.msk.f32.gmra.mxu1 %vm1084_vm4, %v13380_v21 }
0x2336   :  { %13436 = vmatpush3.msra.mxu0 %v8231_v8  ;;  %v8165_v8 = vmul.f32 %v11656_v28, %v7725_v55 }
0x2337   :  { %v7812_v57 = vpop.f32.mrf.mxu0  ;;  %v7907_v16 = vpop.f32.mrf.mxu1  ;;  %13437 = vmatprep.subr.mxu0 %v8230_v36 }
0x2338   :  { %13413 = vmatprep.mubr.msk.f32.mxu0 %vm1084_vm4, %v7907_v16  ;;  %13430 = vmatprep.mubr.msk.f32.mxu1 %vm1084_vm4, %v7812_v57 }
0x2339   :  { %13414 = vmatmul.mubr.msk.f32.gmra.mxu0 %vm1084_vm4, %v13398_v7  ;;  %13431 = vmatmul.mubr.msk.f32.gmra.mxu1 %vm1084_vm4, %v13383_v53  ;;  %v7722_v53 = vpop.xlane.xlu0 %7721 }
0x233a   :  { %13438 = vmatpush3.msra.mxu0 %v8230_v36 }
0x233b   :  { %13439 = vmatprep.subr.mxu0 %v8229_v43 }
0x233c   :  { %13440 = vmatpush3.msra.mxu0 %v8229_v43 }
0x233d   :  { %13467 = vmatprep.subr.mxu0 %v15428_v0 }
0x23f1   :  { %v13409_v40 = vpop.f32.mrf.mxu0  ;;  %v13426_v32 = vpop.f32.mrf.mxu1 }
0x23f2   :  { %v8129_v1 = vadd.f32 %v13426_v32, %v13409_v40 }
0x23f3   :  { %v8010_v6 = vpop.f32.mrf.mxu0  ;;  %v8123_v52 = vpop.f32.mrf.mxu1 }
0x23f4   :  { %v8167_v56 = vadd.f32 %v8161_v18, %v8129_v1  ;;  %v8124_v41 = vadd.f32 %v8123_v52, %v8010_v6  ;;  %v8164_v18 = vmul.f32 %v11656_v28, %v7722_v53 }
0x23f5   :  { %v13412_v47 = vpop.f32.mrf.mxu0  ;;  %v13429_v38 = vpop.f32.mrf.mxu1 }
0x23f6   :  { %v17106_v25 = vadd.f32 %v11657_v2, %v8167_v56  ;;  %v8166_v33 = vadd.f32 %v8160_v62, %v8124_v41  ;;  %v8139_v3 = vadd.f32 %v13429_v38, %v13412_v47 }
0x23f7   :  { %v8020_v50 = vpop.f32.mrf.mxu0  ;;  %v8133_v60 = vpop.f32.mrf.mxu1 }
0x23f8   :  { %v8187_v27 = vsub.f32 0.0, %v17106_v25  ;;  %v8180_v12 = vadd.f32 %v11657_v2, %v8166_v33  ;;  %v8169_v21 = vadd.f32 %v8163_v63, %v8139_v3  ;;  %v8134_v31 = vadd.f32 %v8133_v60, %v8020_v50 }
0x23f9   :  { %v13415_v51 = vpop.f32.mrf.mxu0  ;;  %v13432_v58 = vpop.f32.mrf.mxu1 }
0x23fa   :  { %v8194_v7 = vmul.f32 1.442695, %v8187_v27  ;;  %v8186_v57 = vsub.f32 0.0, %v8180_v12  ;;  %v8183_v16 = vadd.f32 %v11657_v2, %v8169_v21  ;;  %v8168_v46 = vadd.f32 %v8162_v39, %v8134_v31 }
0x23fb   :  { %v8149_v36 = vadd.f32 %v13432_v58, %v13415_v51  ;;  %v8030_v43 = vpop.f32.mrf.mxu0  ;;  %v8143_v54 = vpop.f32.mrf.mxu1 }
0x23fc   :  { %14378 = vpow2.f32 %v8194_v7  ;;  %v8192_v29 = vmul.f32 1.442695, %v8186_v57  ;;  %v8189_v40 = vsub.f32 0.0, %v8183_v16  ;;  %v8182_v32 = vadd.f32 %v11657_v2, %v8168_v46 }
0x23fd   :  { %v8171_v37 = vadd.f32 %v8165_v8, %v8149_v36  ;;  %v8144_v1 = vadd.f32 %v8143_v54, %v8030_v43 }
0x23fe   :  { %14380 = vpow2.f32 %v8192_v29  ;;  %v8198_v6 = vmul.f32 1.442695, %v8189_v40  ;;  %v8188_v52 = vsub.f32 0.0, %v8182_v32 }
0x23ff   :  { %v8185_v62 = vadd.f32 %v11657_v2, %v8171_v37  ;;  %v8170_v5 = vadd.f32 %v8164_v18, %v8144_v1 }
0x2400   :  { %14382 = vpow2.f32 %v8198_v6  ;;  %v8196_v56 = vmul.f32 1.442695, %v8188_v52 }
0x2401   :  { %v8191_v41 = vsub.f32 0.0, %v8185_v62  ;;  %v8184_v47 = vadd.f32 %v11657_v2, %v8170_v5 }
0x2402   :  { %14384 = vpow2.f32 %v8196_v56 }
0x2403   :  { %v8202_v38 = vmul.f32 1.442695, %v8191_v41  ;;  %v8190_v63 = vsub.f32 0.0, %v8184_v47 }
0x2405   :  { %14386 = vpow2.f32 %v8202_v38  ;;  %v8200_v33 = vmul.f32 1.442695, %v8190_v63 }
0x2407   :  { %14388 = vpow2.f32 %v8200_v33 }
0x2409   :  { %v14379_v3 = vpop.eup %14378 }
0x240a   :  { %v8205_v39 = vadd.f32 1.0, %v14379_v3 }
0x240b   :  { %v14381_v28 = vpop.eup %14380 }
0x240c   :  { %v8204_v50 = vadd.f32 1.0, %v14381_v28  ;;  %14390 = vrcp.f32 %v8205_v39 }
0x240d   :  { %v14383_v60 = vpop.eup %14382 }
0x240e   :  { %14392 = vrcp.f32 %v8204_v50  ;;  %v8207_v55 = vadd.f32 1.0, %v14383_v60 }
0x240f   :  { %v14385_v27 = vpop.eup %14384 }
0x2410   :  { %v8206_v21 = vadd.f32 1.0, %v14385_v27  ;;  %14394 = vrcp.f32 %v8207_v55 }
0x2412   :  { %v14387_v31 = vpop.eup %14386  ;;  %14396 = vrcp.f32 %v8206_v21 }
0x2413   :  { %v8209_v2 = vadd.f32 1.0, %v14387_v31 }
0x2414   :  { %v14389_v51 = vpop.eup %14388 }
0x2415   :  { %v8208_v58 = vadd.f32 1.0, %v14389_v51  ;;  %14398 = vrcp.f32 %v8209_v2 }
0x2417   :  { %14400 = vrcp.f32 %v8208_v58 }
0x2419   :  { %v14391_v53 = vpop.eup %14390 }
0x241a   :  { %v8223_v46 = vmul.f32 %v14391_v53, %v17106_v25  ;;  %v11658_v25 = vld [vmem:[#allocation8 + $0x4] ss:$0 sm:$0xff] }
0x241b   :  { %v14393_v7 = vpop.eup %14392 }
0x241c   :  { %v8222_v57 = vmul.f32 %v14393_v7, %v8180_v12 }
0x241d   :  { %v14395_v8 = vpop.eup %14394 }
0x241e   :  { %13441 = vmatprep.mubr.msk.f32.mxu0 %vm1084_vm4, %v8222_v57  ;;  %v8225_v54 = vmul.f32 %v14395_v8, %v8183_v16 }
0x241f   :  { %v14397_v36 = vpop.eup %14396  ;;  %13442 = vmatmul.mubr.msk.f32.vlgmr.msra.gmra.mxu0 %vm1084_vm4, %v8223_v46 }
0x2420   :  { %v8224_v43 = vmul.f32 %v14397_v36, %v8182_v32 }
0x2422   :  { %13444 = vmatprep.mubr.msk.f32.mxu0 %vm1084_vm4, %v8224_v43  ;;  %v14399_v29 = vpop.eup %14398 }
0x2423   :  { %13445 = vmatmul.mubr.msk.f32.gmra.mxu0 %vm1084_vm4, %v8225_v54  ;;  %v8227_v37 = vmul.f32 %v14399_v29, %v8185_v62 }
0x2424   :  { %v14401_v40 = vpop.eup %14400 }
0x2425   :  { %v8226_v18 = vmul.f32 %v14401_v40, %v8184_v47 }
0x2427   :  { %13447 = vmatprep.mubr.msk.f32.mxu0 %vm1084_vm4, %v8226_v18 }
0x2428   :  { %13448 = vmatmul.mubr.msk.f32.gmra.mxu0 %vm1084_vm4, %v8227_v37  ;;  %v11665_v37 = vld [vmem:[#allocation10 + $0x4] ss:$0 sm:$0xff] }
0x2429   :  { %13479 = vmatprep.mubr.msk.f32.mxu0 %vm15429_vm0, %v15428_v0 }
0x24df   :  { %v13443_v12 = vpop.f32.mrf.mxu0 }
0x24e0   :  { %v8331_v1 = vadd.f32 %v13443_v12, %v11658_v25 }
0x24e1   :  { %v8325_v32 = vpop.f32.mrf.mxu0 }
0x24e2   :  { %v8355_v16 = vsub.f32 0.0, %v8331_v1  ;;  %v8326_v6 = vadd.f32 %v11658_v25, %v8325_v32 }
0x24e3   :  { %v13446_v52 = vpop.f32.mrf.mxu0 }
0x24e4   :  { %v8362_v5 = vmul.f32 1.442695, %v8355_v16  ;;  %v8354_v56 = vsub.f32 0.0, %v8326_v6  ;;  %v8341_v41 = vadd.f32 %v13446_v52, %v11658_v25 }
0x24e5   :  { %v8335_v38 = vpop.f32.mrf.mxu0 }
0x24e6   :  { %14402 = vpow2.f32 %v8362_v5  ;;  %v8360_v62 = vmul.f32 1.442695, %v8354_v56  ;;  %v8357_v47 = vsub.f32 0.0, %v8341_v41  ;;  %v8336_v63 = vadd.f32 %v11658_v25, %v8335_v38 }
0x24e8   :  { %14404 = vpow2.f32 %v8360_v62  ;;  %v8366_v33 = vmul.f32 1.442695, %v8357_v47  ;;  %v8356_v3 = vsub.f32 0.0, %v8336_v63  ;;  %v13449_v39 = vpop.f32.mrf.mxu0 }
0x24e9   :  { %v8351_v28 = vadd.f32 %v13449_v39, %v11658_v25 }
0x24ea   :  { %14406 = vpow2.f32 %v8366_v33  ;;  %v8364_v50 = vmul.f32 1.442695, %v8356_v3  ;;  %v8345_v60 = vpop.f32.mrf.mxu0 }
0x24eb   :  { %v8359_v55 = vsub.f32 0.0, %v8351_v28  ;;  %v8346_v27 = vadd.f32 %v11658_v25, %v8345_v60 }
0x24ec   :  { %14408 = vpow2.f32 %v8364_v50 }
0x24ed   :  { %v8370_v21 = vmul.f32 1.442695, %v8359_v55  ;;  %v8358_v31 = vsub.f32 0.0, %v8346_v27 }
0x24ef   :  { %14410 = vpow2.f32 %v8370_v21  ;;  %v8368_v2 = vmul.f32 1.442695, %v8358_v31 }
0x24f1   :  { %14412 = vpow2.f32 %v8368_v2 }
0x24f3   :  { %v14403_v51 = vpop.eup %14402 }
0x24f4   :  { %v8373_v58 = vadd.f32 1.0, %v14403_v51  ;;  %v8517_v51 = vld [vmem:[#allocation11 + $0x90] sm:$0xff] }
0x24f5   :  { %v14405_v53 = vpop.eup %14404 }
0x24f6   :  { %14414 = vrcp.f32 %v8373_v58  ;;  %v8372_v7 = vadd.f32 1.0, %v14405_v53  ;;  %v11667_v58 = vld [vmem:[%s17601_s22 + $0x4] ss:$0 sm:$0xff] }
0x24f7   :  { %v14407_v57 = vpop.eup %14406 }
0x24f8   :  { %14416 = vrcp.f32 %v8372_v7  ;;  %v8375_v46 = vadd.f32 1.0, %v14407_v57 }
0x24f9   :  { %v14409_v8 = vpop.eup %14408 }
0x24fa   :  { %14418 = vrcp.f32 %v8375_v46  ;;  %v8374_v36 = vadd.f32 1.0, %v14409_v8 }
0x24fc   :  { %v14411_v43 = vpop.eup %14410  ;;  %14420 = vrcp.f32 %v8374_v36 }
0x24fd   :  { %v8377_v54 = vadd.f32 1.0, %v14411_v43 }
0x24fe   :  { %v14413_v29 = vpop.eup %14412 }
0x24ff   :  { %14422 = vrcp.f32 %v8377_v54  ;;  %v8376_v40 = vadd.f32 1.0, %v14413_v29 }
0x2501   :  { %14424 = vrcp.f32 %v8376_v40 }
0x2503   :  { %v14415_v18 = vpop.eup %14414 }
0x2504   :  { %v17118_v25 = vmul.f32 %v14415_v18, %v8331_v1 }
0x2505   :  { %v14417_v12 = vpop.eup %14416 }
0x2506   :  { %v17120_v32 = vmul.f32 %v14417_v12, %v8326_v6  ;;  %v8405_v16 = vmul.f32 %v11665_v37, %v17118_v25 }
0x2507   :  { %v14419_v52 = vpop.eup %14418 }
0x2508   :  { %v17123_v5 = vmul.f32 %v14419_v52, %v8341_v41  ;;  %v8413_v56 = vsel %vm1084_vm4, %v8405_v16, 0.0  ;;  %v8404_v38 = vmul.f32 %v11665_v37, %v17120_v32 }
0x2509   :  { %v14421_v62 = vpop.eup %14420  ;;  %8414 = vadd.xlane.f32.xlu1 %v8413_v56 }
0x250a   :  { %v17127_v47 = vmul.f32 %v14421_v62, %v8336_v63  ;;  %v8410_v33 = vsel %vm1084_vm4, %v8404_v38, 0.0  ;;  %v8407_v1 = vmul.f32 %v11665_v37, %v17123_v5 }
0x250b   :  { %8411 = vadd.xlane.f32.xlu0 %v8410_v33 }
0x250c   :  { %v14423_v6 = vpop.eup %14422  ;;  %v8419_v3 = vsel %vm1084_vm4, %v8407_v1, 0.0  ;;  %v8406_v39 = vmul.f32 %v11665_v37, %v17127_v47 }
0x250d   :  { %v17133_v41 = vmul.f32 %v14423_v6, %v8351_v28  ;;  %8420 = vadd.xlane.f32.xlu1 %v8419_v3  ;;  %v8518_v28 = vld [vmem:[#allocation11 + $0x98] sm:$0xff] }
0x250e   :  { %v14425_v50 = vpop.eup %14424  ;;  %v8416_v60 = vsel %vm1084_vm4, %v8406_v39, 0.0  ;;  %13450 = vmatprep.subr.mxu1 %v8518_v28 }
0x250f   :  { %v17136_v55 = vmul.f32 %v14425_v50, %v8346_v27  ;;  %8417 = vadd.xlane.f32.xlu0 %v8416_v60  ;;  %v8409_v63 = vmul.f32 %v11665_v37, %v17133_v41  ;;  %13451 = vmatpush3.msra.mxu1 %v8518_v28 }
0x2510   :  { %13452 = vmatprep.subr.mxu1 %v8517_v51 }
0x2511   :  { %v8425_v21 = vsel %vm1084_vm4, %v8409_v63, 0.0  ;;  %v8408_v31 = vmul.f32 %v11665_v37, %v17136_v55  ;;  %13453 = vmatpush3.msra.mxu1 %v8517_v51 }
0x2512   :  { %8426 = vadd.xlane.f32.xlu1 %v8425_v21 }
0x2513   :  { %v8422_v2 = vsel %vm1084_vm4, %v8408_v31, 0.0 }
0x2514   :  { %8423 = vadd.xlane.f32.xlu0 %v8422_v2 }
0x2592   :  { %v8415_v27 = vpop.xlane.xlu1 %8414 }
0x2593   :  { %v8437_v53 = vadd.f32 %v11667_v58, %v8415_v27 }
0x2594   :  { %v8412_v7 = vpop.xlane.xlu0 %8411 }
0x2595   :  { %v8443_v57 = vsub.f32 0.0, %v8437_v53  ;;  %v8436_v46 = vadd.f32 %v11667_v58, %v8412_v7 }
0x2596   :  { %v8421_v8 = vpop.xlane.xlu1 %8420 }
0x2597   :  { %v8450_v36 = vmul.f32 1.442695, %v8443_v57  ;;  %v8442_v43 = vsub.f32 0.0, %v8436_v46  ;;  %v8439_v54 = vadd.f32 %v11667_v58, %v8421_v8  ;;  %v8516_v57 = vld [vmem:[#allocation11 + $0x88] sm:$0xff]  ;;  %v8515_v46 = vld [vmem:[#allocation11 + $0x80] sm:$0xff] }
0x2598   :  { %v8418_v29 = vpop.xlane.xlu0 %8417  ;;  %13454 = vmatprep.subr.mxu1 %v8516_v57 }
0x2599   :  { %14426 = vpow2.f32 %v8450_v36  ;;  %v8448_v40 = vmul.f32 1.442695, %v8442_v43  ;;  %v8445_v18 = vsub.f32 0.0, %v8439_v54  ;;  %v8438_v37 = vadd.f32 %v11667_v58, %v8418_v29  ;;  %13455 = vmatpush3.msra.mxu1 %v8516_v57 }
0x259a   :  { %13456 = vmatprep.subr.mxu1 %v8515_v46 }
0x259b   :  { %14428 = vpow2.f32 %v8448_v40  ;;  %v8454_v12 = vmul.f32 1.442695, %v8445_v18  ;;  %v8444_v16 = vsub.f32 0.0, %v8438_v37  ;;  %v8427_v52 = vpop.xlane.xlu1 %8426  ;;  %13457 = vmatpush3.msra.mxu1 %v8515_v46 }
0x259c   :  { %v8441_v56 = vadd.f32 %v11667_v58, %v8427_v52  ;;  %13488 = vmatprep.subr.mxu1 %v15428_v0 }
0x259d   :  { %14430 = vpow2.f32 %v8454_v12  ;;  %v8452_v38 = vmul.f32 1.442695, %v8444_v16  ;;  %v8424_v62 = vpop.xlane.xlu0 %8423 }
0x259e   :  { %v8447_v33 = vsub.f32 0.0, %v8441_v56  ;;  %v8440_v1 = vadd.f32 %v11667_v58, %v8424_v62 }
0x259f   :  { %14432 = vpow2.f32 %v8452_v38 }
0x25a0   :  { %v8458_v6 = vmul.f32 1.442695, %v8447_v33  ;;  %v8446_v3 = vsub.f32 0.0, %v8440_v1 }
0x25a2   :  { %14434 = vpow2.f32 %v8458_v6  ;;  %v8456_v39 = vmul.f32 1.442695, %v8446_v3  ;;  %v14652_v6 = vld [vmem:[%s17602_s21 + $0x8] sm:$0xff] }
0x25a3   :  { %v8890_v3 = vld [vmem:[#allocation16 + $0x80] sm:$0xff] }
0x25a4   :  { %14436 = vpow2.f32 %v8456_v39  ;;  %v14653_v39 = vld [vmem:[%s17602_s21 + $0x10] sm:$0xff] }
0x25a6   :  { %v14427_v50 = vpop.eup %14426 }
0x25a7   :  { %v8461_v60 = vadd.f32 1.0, %v14427_v50 }
0x25a8   :  { %v14429_v63 = vpop.eup %14428 }
0x25a9   :  { %14438 = vrcp.f32 %v8461_v60  ;;  %v8460_v21 = vadd.f32 1.0, %v14429_v63  ;;  %v11668_v60 = vld [vmem:[#allocation13 + $0x4] ss:$0 sm:$0xff] }
0x25aa   :  { %v14431_v31 = vpop.eup %14430 }
0x25ab   :  { %14440 = vrcp.f32 %v8460_v21  ;;  %v8463_v2 = vadd.f32 1.0, %v14431_v31 }
0x25ac   :  { %v14433_v28 = vpop.eup %14432 }
0x25ad   :  { %v8462_v51 = vadd.f32 1.0, %v14433_v28  ;;  %14442 = vrcp.f32 %v8463_v2 }
0x25af   :  { %v14435_v27 = vpop.eup %14434  ;;  %14444 = vrcp.f32 %v8462_v51 }
0x25b0   :  { %v8465_v58 = vadd.f32 1.0, %v14435_v27 }
0x25b1   :  { %v14437_v53 = vpop.eup %14436 }
0x25b2   :  { %v8464_v7 = vadd.f32 1.0, %v14437_v53  ;;  %14446 = vrcp.f32 %v8465_v58 }
0x25b4   :  { %14448 = vrcp.f32 %v8464_v7 }
0x25b6   :  { %v14439_v8 = vpop.eup %14438 }
0x25b7   :  { %8485 = vperm.xlu1 %13897, %v14439_v8  }
0x25b8   :  { %v14441_v36 = vpop.eup %14440 }
0x25b9   :  { %8480 = vperm.xlu0 %13896, %v14441_v36  }
0x25ba   :  { %v14443_v43 = vpop.eup %14442 }
0x25bc   :  { %v14445_v54 = vpop.eup %14444 }
0x25bd   :  { %8490 = vperm.xlu1 %13897, %v14445_v54   ;;  %8495 = vperm.xlu0 %13896, %v14443_v43  }
0x25bf   :  { %v14447_v29 = vpop.eup %14446 }
0x25c1   :  { %v14449_v40 = vpop.eup %14448  ;;  %8505 = vperm.xlu0 %13896, %v14447_v29  }
0x25c2   :  { %8500 = vperm.xlu1 %13897, %v14449_v40  }
0x2632   :  { %v8486_v18 = vpop.permute.xlu1 %8485 }
0x2633   :  { %v8509_v16 = vmul.f32 %v8486_v18, %v17118_v25 }
0x2634   :  { %v8481_v37 = vpop.permute.xlu0 %8480 }
0x2635   :  { %v8508_v12 = vmul.f32 %v8481_v37, %v17120_v32 }
0x2637   :  { %13458 = vmatprep.mubr.msk.f32.mxu1 %vm1084_vm4, %v8508_v12 }
0x2638   :  { %v8491_v52 = vpop.permute.xlu1 %8490  ;;  %13459 = vmatmul.mubr.msk.f32.vlgmr.msra.gmra.mxu1 %vm1084_vm4, %v8509_v16  ;;  %v8496_v56 = vpop.permute.xlu0 %8495 }
0x2639   :  { %v8510_v38 = vmul.f32 %v8491_v52, %v17127_v47  ;;  %v8511_v62 = vmul.f32 %v8496_v56, %v17123_v5  ;;  %v8893_v5 = vld [vmem:[#allocation16 + $0x98] sm:$0xff] }
0x263a   :  { %v14651_v47 = vld [vmem:[%s17602_s21] sm:$0xff] }
0x263b   :  { %13461 = vmatprep.mubr.msk.f32.mxu1 %vm1084_vm4, %v8510_v38 }
0x263c   :  { %13462 = vmatmul.mubr.msk.f32.gmra.mxu1 %vm1084_vm4, %v8511_v62  ;;  %v8506_v33 = vpop.permute.xlu0 %8505 }
0x263d   :  { %v8501_v1 = vpop.permute.xlu1 %8500  ;;  %v8513_v32 = vmul.f32 %v8506_v33, %v17133_v41  ;;  %v8892_v41 = vld [vmem:[#allocation16 + $0x90] sm:$0xff] }
0x263e   :  { %v8512_v25 = vmul.f32 %v8501_v1, %v17136_v55  ;;  %v8891_v55 = vld [vmem:[#allocation16 + $0x88] sm:$0xff] }
0x263f   :  { %13489 = vmatpush3.msra.mxu1 %v8513_v32 }
0x2640   :  { %13464 = vmatprep.mubr.msk.f32.mxu1 %vm1084_vm4, %v8512_v25  ;;  %13490 = vmatprep.subr.mxu1 %v15428_v0 }
0x2641   :  { %13465 = vmatmul.mubr.msk.f32.gmra.mxu1 %vm1084_vm4, %v8513_v32 }
0x2642   :  { %13491 = vmatpush3.msra.mxu1 %v8512_v25  ;;  %13500 = vmatprep.mubr.msk.f32.mxu1 %vm15429_vm0, %v15428_v0 }
0x2643   :  { %13492 = vmatprep.subr.mxu1 %v15428_v0 }
0x2644   :  { %13493 = vmatpush3.msra.mxu1 %v8511_v62 }
0x2645   :  { %13494 = vmatprep.subr.mxu1 %v15428_v0 }
0x2646   :  { %13495 = vmatpush3.msra.mxu1 %v8510_v38 }
0x2647   :  { %13496 = vmatprep.subr.mxu1 %v15428_v0 }
0x2648   :  { %13497 = vmatpush3.msra.mxu1 %v8509_v16 }
0x2649   :  { %13498 = vmatprep.subr.mxu1 %v15428_v0 }
0x264a   :  { %13499 = vmatpush3.msra.mxu1 %v8508_v12 }
0x264b   :  { %13501 = vmatmul.mubr.msk.f32.vlgmr.msra.gmra.mxu1 %vm1876_vm5, %v14651_v47  ;;  %13526 = vmatprep.subr.mxu1 %v15428_v0 }
0x264c   :  { %13503 = vmatprep.mubr.msk.f32.mxu1 %vm15429_vm0, %v15428_v0  ;;  %13527 = vmatpush3.msra.mxu1 %v8893_v5 }
0x264d   :  { %13528 = vmatprep.subr.mxu1 %v15428_v0 }
0x264e   :  { %13529 = vmatpush3.msra.mxu1 %v8892_v41 }
0x264f   :  { %13504 = vmatmul.mubr.msk.f32.gmra.mxu1 %vm1876_vm5, %v14652_v6  ;;  %13530 = vmatprep.subr.mxu1 %v15428_v0 }
0x2650   :  { %13506 = vmatprep.mubr.msk.f32.mxu1 %vm15429_vm0, %v15428_v0  ;;  %13531 = vmatpush3.msra.mxu1 %v8891_v55 }
0x2651   :  { %13532 = vmatprep.subr.mxu1 %v15428_v0 }
0x2652   :  { %13533 = vmatpush3.msra.mxu1 %v8890_v3 }
0x2653   :  { %13507 = vmatmul.mubr.msk.f32.gmra.mxu1 %vm1876_vm5, %v14653_v39 }
0x2654   :  { %13534 = vmatprep.mubr.msk.f32.mxu1 %vm15429_vm0, %v15428_v0 }
0x2657   :  { %13535 = vmatmul.mubr.msk.f32.vlgmr.msra.gmra.mxu1 %vm1084_vm4, %v17055_v59 }
0x2658   :  { %13537 = vmatprep.mubr.msk.f32.mxu1 %vm15429_vm0, %v15428_v0 }
0x265b   :  { %13538 = vmatmul.mubr.msk.f32.gmra.mxu1 %vm1084_vm4, %v17049_v19 }
0x265c   :  { %13540 = vmatprep.mubr.msk.f32.mxu1 %vm15429_vm0, %v15428_v0 }
0x265f   :  { %13541 = vmatmul.mubr.msk.f32.gmra.mxu1 %vm1084_vm4, %v17047_v4 }
0x2660   :  { %13566 = vmatprep.mubr.msk.f32.mxu1 %vm711_vm2, %v15772_v11 }
0x26f8   :  { %v13460_v50 = vpop.f32.mrf.mxu1 }
0x26f9   :  { %v17191_v21 = vadd.f32 %v13460_v50, %v11668_v60 }
0x26fa   :  { %v8611_v63 = vpop.f32.mrf.mxu1 }
0x26fb   :  { %v17193_v31 = vadd.f32 %v11668_v60, %v8611_v63  ;;  %v8641_v58 = vsub.f32 0.0, %v17191_v21 }
0x26fc   :  { %v13463_v2 = vpop.f32.mrf.mxu1 }
0x26fd   :  { %v8640_v28 = vsub.f32 0.0, %v17193_v31  ;;  %v8627_v51 = vadd.f32 %v13463_v2, %v11668_v60  ;;  %v8648_v43 = vmul.f32 1.442695, %v8641_v58 }
0x26fe   :  { %v8621_v27 = vpop.f32.mrf.mxu1 }
0x26ff   :  { %v8643_v53 = vsub.f32 0.0, %v8627_v51  ;;  %v8622_v7 = vadd.f32 %v11668_v60, %v8621_v27  ;;  %v8646_v57 = vmul.f32 1.442695, %v8640_v28 }
0x2701   :  { %v8652_v46 = vmul.f32 1.442695, %v8643_v53  ;;  %v8642_v8 = vsub.f32 0.0, %v8622_v7  ;;  %v13466_v11 = vpop.f32.mrf.mxu1 }
0x2702   :  { %v8637_v36 = vadd.f32 %v13466_v11, %v11668_v60 }
0x2703   :  { %14450 = vpow2.f32 %v8652_v46  ;;  %v8650_v54 = vmul.f32 1.442695, %v8642_v8  ;;  %v8631_v29 = vpop.f32.mrf.mxu1 }
0x2704   :  { %14452 = vpow2.f32 %v8646_v57  ;;  %v8645_v40 = vsub.f32 0.0, %v8637_v36  ;;  %v8632_v18 = vadd.f32 %v11668_v60, %v8631_v29 }
0x2705   :  { %14454 = vpow2.f32 %v8650_v54 }
0x2706   :  { %v8656_v37 = vmul.f32 1.442695, %v8645_v40  ;;  %v8644_v12 = vsub.f32 0.0, %v8632_v18  ;;  %14456 = vpow2.f32 %v8648_v43 }
0x2708   :  { %14458 = vpow2.f32 %v8656_v37  ;;  %v8654_v16 = vmul.f32 1.442695, %v8644_v12  ;;  %v11675_v37 = vld [vmem:[#allocation14 + $0x4] ss:$0 sm:$0xff] }
0x270a   :  { %14460 = vpow2.f32 %v8654_v16 }
0x270b   :  { %v17197_v52 = vpop.f32.mrf.mxu1 }
0x270d   :  { %v13502_v56 = vpop.f32.mrf.mxu1 }
0x270f   :  { %v17199_v38 = vpop.f32.mrf.mxu1 }
0x2710   :  { %v14451_v62 = vpop.eup %14450 }
0x2711   :  { %v14453_v33 = vpop.eup %14452  ;;  %v13505_v1 = vpop.f32.mrf.mxu1  ;;  %v8661_v25 = vadd.f32 1.0, %v14451_v62 }
0x2712   :  { %v14455_v32 = vpop.eup %14454  ;;  %v8658_v6 = vadd.f32 1.0, %v14453_v33 }
0x2713   :  { %v8660_v5 = vadd.f32 1.0, %v14455_v32  ;;  %v17201_v47 = vpop.f32.mrf.mxu1  ;;  %v14457_v41 = vpop.eup %14456 }
0x2714   :  { %v8659_v63 = vadd.f32 1.0, %v14457_v41 }
0x2715   :  { %v14459_v55 = vpop.eup %14458  ;;  %v13508_v3 = vpop.f32.mrf.mxu1  ;;  %14462 = vrcp.f32 %v8660_v5 }
0x2716   :  { %v8663_v39 = vadd.f32 1.0, %v14459_v55  ;;  %14464 = vrcp.f32 %v8661_v25 }
0x2717   :  { %v14461_v50 = vpop.eup %14460  ;;  %v17203_v60 = vpop.f32.mrf.mxu1 }
0x2718   :  { %14466 = vrcp.f32 %v8663_v39  ;;  %v8662_v2 = vadd.f32 1.0, %v14461_v50 }
0x2719   :  { %14468 = vrcp.f32 %v8658_v6  ;;  %v13536_v28 = vpop.f32.mrf.mxu1 }
0x271a   :  { %14470 = vrcp.f32 %v8662_v2 }
0x271b   :  { %v17205_v27 = vpop.f32.mrf.mxu1  ;;  %14472 = vrcp.f32 %v8659_v63 }
0x271d   :  { %v13539_v58 = vpop.f32.mrf.mxu1 }
0x271f   :  { %v17207_v53 = vpop.f32.mrf.mxu1 }
0x2721   :  { %v13542_v57 = vpop.f32.mrf.mxu1 }
0x2722   :  { %v14463_v46 = vpop.eup %14462 }
0x2723   :  { %v14465_v8 = vpop.eup %14464  ;;  %v8678_v54 = vmul.f32 %v14463_v46, %v8622_v7 }
0x2724   :  { %v8679_v12 = vmul.f32 %v14465_v8, %v8627_v51 }
0x2725   :  { %v14467_v11 = vpop.eup %14466  ;;  %v8692_v25 = vmul.f32 %v11675_v37, %v8678_v54 }
0x2726   :  { %v14469_v43 = vpop.eup %14468  ;;  %v8681_v29 = vmul.f32 %v14467_v11, %v8637_v36  ;;  %v8693_v55 = vmul.f32 %v11675_v37, %v8679_v12  ;;  %v8895_v12 = vld [vmem:[#allocation17 + $0x80] sm:$0xff] }
0x2727   :  { %v14471_v40 = vpop.eup %14470  ;;  %v8676_v33 = vmul.f32 %v14469_v43, %v17193_v31  ;;  %v8702_v7 = vsel %vm1084_vm4, %v8692_v25, 0.0 }
0x2728   :  { %v8680_v16 = vmul.f32 %v14471_v40, %v8632_v18  ;;  %v8695_v56 = vmul.f32 %v11675_v37, %v8681_v29  ;;  %v14473_v62 = vpop.eup %14472  ;;  %v8705_v51 = vsel %vm1084_vm4, %v8693_v55, 0.0 }
0x2729   :  { %v8677_v5 = vmul.f32 %v14473_v62, %v17191_v21  ;;  %v8690_v36 = vmul.f32 %v11675_v37, %v8676_v33  ;;  %v9111_v62 = vld [vmem:[#allocation20 + $0x88] sm:$0xff] }
0x272a   :  { %v8711_v1 = vsel %vm1084_vm4, %v8695_v56, 0.0  ;;  %v8694_v32 = vmul.f32 %v11675_v37, %v8680_v16  ;;  %v14656_v16 = vld [vmem:[%s17603_s23 + $0x10] sm:$0xff]  ;;  %v9113_v56 = vld [vmem:[#allocation20 + $0x98] sm:$0xff] }
0x272b   :  { %8712 = vadd.xlane.f32.xlu1 %v8711_v1  ;;  %v8691_v18 = vmul.f32 %v11675_v37, %v8677_v5  ;;  %v8696_v31 = vsel %vm1084_vm4, %v8690_v36, 0.0  ;;  %v8898_v37 = vld [vmem:[#allocation17 + $0x98] sm:$0xff]  ;;  %v11688_v36 = vld [vmem:[#allocation19 + $0x4] ss:$0 sm:$0xff] }
0x272c   :  { %v8708_v41 = vsel %vm1084_vm4, %v8694_v32, 0.0 }
0x272d   :  { %8709 = vadd.xlane.f32.xlu0 %v8708_v41  ;;  %v8699_v6 = vsel %vm1084_vm4, %v8691_v18, 0.0 }
0x272f   :  { %8703 = vadd.xlane.f32.xlu1 %v8702_v7 }
0x2731   :  { %8706 = vadd.xlane.f32.xlu0 %v8705_v51 }
0x2733   :  { %8697 = vadd.xlane.f32.xlu1 %v8696_v31 }
0x2735   :  { %8700 = vadd.xlane.f32.xlu0 %v8699_v6 }
0x27b4   :  { %v8713_v3 = vpop.xlane.xlu1 %8712 }
0x27b5   :  { %14474 = vtanh.f32 %v8713_v3 }
0x27b6   :  { %v8710_v21 = vpop.xlane.xlu0 %8709 }
0x27b7   :  { %14476 = vtanh.f32 %v8710_v21 }
0x27b8   :  { %v8704_v39 = vpop.xlane.xlu1 %8703 }
0x27b9   :  { %14478 = vtanh.f32 %v8704_v39 }
0x27ba   :  { %v8707_v50 = vpop.xlane.xlu0 %8706 }
0x27bb   :  { %14480 = vtanh.f32 %v8707_v50 }
0x27bc   :  { %v8698_v63 = vpop.xlane.xlu1 %8697 }
0x27bd   :  { %14482 = vtanh.f32 %v8698_v63 }
0x27be   :  { %v8701_v2 = vpop.xlane.xlu0 %8700 }
0x27bf   :  { %14484 = vtanh.f32 %v8701_v2 }
0x27c2   :  { %v14475_v28 = vpop.eup %14474 }
0x27c3   :  { %v8725_v58 = vmul.f32 %v14475_v28, %v17036_v10 }
0x27c4   :  { %v14477_v57 = vpop.eup %14476 }
0x27c5   :  { %13468 = vmatpush3.msra.mxu0 %v8725_v58  ;;  %v8724_v46 = vmul.f32 %v14477_v57, %v17041_v30 }
0x27c6   :  { %13469 = vmatprep.subr.mxu0 %v15428_v0  ;;  %v14479_v8 = vpop.eup %14478 }
0x27c7   :  { %13470 = vmatpush3.msra.mxu0 %v8724_v46  ;;  %v8722_v29 = vmul.f32 %v14479_v8, %v17031_v42  ;;  %v8897_v42 = vld [vmem:[#allocation17 + $0x90] sm:$0xff] }
0x27c8   :  { %v14481_v11 = vpop.eup %14480  ;;  %13471 = vmatprep.subr.mxu0 %v15428_v0 }
0x27c9   :  { %v8723_v43 = vmul.f32 %v14481_v11, %v17026_v61  ;;  %v14654_v61 = vld [vmem:[%s17603_s23] sm:$0xff] }
0x27ca   :  { %v14483_v54 = vpop.eup %14482 }
0x27cb   :  { %13472 = vmatpush3.msra.mxu0 %v8723_v43  ;;  %v8720_v30 = vmul.f32 %v14483_v54, %v17021_v48  ;;  %v14655_v48 = vld [vmem:[%s17603_s23 + $0x8] sm:$0xff] }
0x27cc   :  { %v14485_v40 = vpop.eup %14484  ;;  %13473 = vmatprep.subr.mxu0 %v15428_v0 }
0x27cd   :  { %13474 = vmatpush3.msra.mxu0 %v8722_v29  ;;  %v8721_v10 = vmul.f32 %v14485_v40, %v17017_v34  ;;  %v8896_v34 = vld [vmem:[#allocation17 + $0x88] sm:$0xff] }
0x27ce   :  { %13475 = vmatprep.subr.mxu0 %v15428_v0 }
0x27cf   :  { %13476 = vmatpush3.msra.mxu0 %v8721_v10  ;;  %v14658_v10 = vld [vmem:[%s17597_s30] sm:$0xff] }
0x27d0   :  { %13477 = vmatprep.subr.mxu0 %v15428_v0 }
0x27d1   :  { %13478 = vmatpush3.msra.mxu0 %v8720_v30 }
0x27d2   :  { %13480 = vmatmul.mubr.msk.f32.vlgmr.msra.gmra.mxu0 %vm1876_vm5, %v14654_v61  ;;  %13509 = vmatprep.subr.mxu0 %v15428_v0 }
0x27d3   :  { %13482 = vmatprep.mubr.msk.f32.mxu0 %vm15429_vm0, %v15428_v0  ;;  %13510 = vmatpush3.msra.mxu0 %v8898_v37 }
0x27d4   :  { %13511 = vmatprep.subr.mxu0 %v15428_v0 }
0x27d5   :  { %13512 = vmatpush3.msra.mxu0 %v8897_v42 }
0x27d6   :  { %13483 = vmatmul.mubr.msk.f32.gmra.mxu0 %vm1876_vm5, %v14655_v48  ;;  %13513 = vmatprep.subr.mxu0 %v15428_v0 }
0x27d7   :  { %13485 = vmatprep.mubr.msk.f32.mxu0 %vm15429_vm0, %v15428_v0  ;;  %13514 = vmatpush3.msra.mxu0 %v8896_v34 }
0x27d8   :  { %13515 = vmatprep.subr.mxu0 %v15428_v0 }
0x27d9   :  { %13516 = vmatpush3.msra.mxu0 %v8895_v12 }
0x27da   :  { %13486 = vmatmul.mubr.msk.f32.gmra.mxu0 %vm1876_vm5, %v14656_v16  ;;  %13543 = vmatprep.subr.mxu0 %v15428_v0 }
0x27db   :  { %13517 = vmatprep.mubr.msk.f32.mxu0 %vm15429_vm0, %v15428_v0 }
0x27de   :  { %13518 = vmatmul.mubr.msk.f32.vlgmr.msra.gmra.mxu0 %vm1084_vm4, %v17197_v52  ;;  %v9112_v52 = vld [vmem:[#allocation20 + $0x90] sm:$0xff] }
0x27df   :  { %13520 = vmatprep.mubr.msk.f32.mxu0 %vm15429_vm0, %v15428_v0  ;;  %13544 = vmatpush3.msra.mxu0 %v9113_v56 }
0x27e0   :  { %13545 = vmatprep.subr.mxu0 %v15428_v0 }
0x27e1   :  { %13546 = vmatpush3.msra.mxu0 %v9112_v52 }
0x27e2   :  { %13521 = vmatmul.mubr.msk.f32.gmra.mxu0 %vm1084_vm4, %v17199_v38  ;;  %13547 = vmatprep.subr.mxu0 %v15428_v0  ;;  %v9110_v38 = vld [vmem:[#allocation20 + $0x80] sm:$0xff] }
0x27e3   :  { %13523 = vmatprep.mubr.msk.f32.mxu0 %vm15429_vm0, %v15428_v0  ;;  %13548 = vmatpush3.msra.mxu0 %v9111_v62 }
0x27e4   :  { %13549 = vmatprep.subr.mxu0 %v15428_v0 }
0x27e5   :  { %13550 = vmatpush3.msra.mxu0 %v9110_v38 }
0x27e6   :  { %13524 = vmatmul.mubr.msk.f32.gmra.mxu0 %vm1084_vm4, %v17201_v47 }
0x27e7   :  { %13551 = vmatprep.mubr.msk.f32.mxu0 %vm15429_vm0, %v15428_v0 }
0x2892   :  { %v8792_v33 = vpop.f32.mrf.mxu0 }
0x2893   :  { %v8806_v51 = vadd.f32 %v8792_v33, %v16974_v22 }
0x2894   :  { %v13481_v1 = vpop.f32.mrf.mxu0 }
0x2895   :  { %v11692_v1 = vld [vmem:[#allocation22 + $0x4] ss:$0 sm:$0xff] }
0x2896   :  { %v8797_v47 = vpop.f32.mrf.mxu0 }
0x2897   :  { %v8807_v55 = vadd.f32 %v8797_v47, %v16965_v45 }
0x2898   :  { %v13484_v32 = vpop.f32.mrf.mxu0 }
0x289a   :  { %v8802_v25 = vpop.f32.mrf.mxu0 }
0x289b   :  { %v8808_v5 = vadd.f32 %v8802_v25, %v16948_v13 }
0x289c   :  { %v13487_v41 = vpop.f32.mrf.mxu0 }
0x289d   :  { %13560 = vmatprep.subr.mxu1 %v8808_v5  ;;  %v14659_v41 = vld [vmem:[%s17597_s30 + $0x8] sm:$0xff] }
0x289e   :  { %v8974_v7 = vpop.f32.mrf.mxu0  ;;  %13561 = vmatpush3.msra.mxu1 %v8808_v5 }
0x289f   :  { %v9064_v18 = vadd.f32 %v17203_v60, %v8974_v7  ;;  %13562 = vmatprep.subr.mxu1 %v8807_v55  ;;  %v14661_v7 = vld [vmem:[%s17597_s30 + $0x10] sm:$0xff] }
0x28a0   :  { %v13519_v31 = vpop.f32.mrf.mxu0  ;;  %13563 = vmatpush3.msra.mxu1 %v8807_v55  ;;  %v14660_v55 = vld [vmem:[%s17598_s3 + $0x8] sm:$0xff] }
0x28a1   :  { %v9085_v6 = vadd.f32 %v11688_v36, %v9064_v18  ;;  %13564 = vmatprep.subr.mxu1 %v8806_v51  ;;  %v11713_v18 = vld [vmem:[%s17600_s19 + $0xb0] sm:$0xff]  ;;  %v14663_v31 = vld [vmem:[%s17597_s30 + $0x18] sm:$0xff] }
0x28a2   :  { %v8979_v3 = vpop.f32.mrf.mxu0  ;;  %13565 = vmatpush3.msra.mxu1 %v8806_v51  ;;  %v11717_v51 = vld [vmem:[%s17599_s0 + $0xb0] sm:$0xff] }
0x28a3   :  { %v9088_v21 = vsub.f32 0.0, %v9085_v6  ;;  %v9069_v13 = vadd.f32 %v17205_v27, %v8979_v3  ;;  %13567 = vmatmul.mubr.msk.f32.vlgmr.msra.gmra.mxu1 %vm711_vm2, %v15777_v14  ;;  %v14665_v3 = vld [vmem:[%s17597_s30 + $0x20] sm:$0xff] }
0x28a4   :  { %v13522_v45 = vpop.f32.mrf.mxu0  ;;  %13569 = vmatprep.mubr.msk.f32.mxu1 %vm711_vm2, %v15785_v17  ;;  %v14657_v17 = vld [vmem:[%s17598_s3] sm:$0xff] }
0x28a5   :  { %v9091_v22 = vmul.f32 1.442695, %v9088_v21  ;;  %v9086_v60 = vadd.f32 %v11688_v36, %v9069_v13  ;;  %v14666_v21 = vld [vmem:[%s17598_s3 + $0x20] sm:$0xff]  ;;  %v14667_v13 = vld [vmem:[%s17597_s30 + $0x28] sm:$0xff] }
0x28a6   :  { %v8984_v39 = vpop.f32.mrf.mxu0  ;;  %v14668_v45 = vld [vmem:[%s17598_s3 + $0x28] sm:$0xff] }
0x28a7   :  { %14486 = vpow2.f32 %v9091_v22  ;;  %v9089_v50 = vsub.f32 0.0, %v9086_v60  ;;  %v9074_v63 = vadd.f32 %v17207_v53, %v8984_v39  ;;  %13570 = vmatmul.mubr.msk.f32.gmra.mxu1 %vm711_vm2, %v15789_v20 }
0x28a8   :  { %v13525_v2 = vpop.f32.mrf.mxu0  ;;  %13572 = vmatprep.mubr.msk.f32.mxu1 %vm711_vm2, %v15797_v23 }
0x28a9   :  { %v9093_v14 = vmul.f32 1.442695, %v9089_v50  ;;  %v9087_v27 = vadd.f32 %v11688_v36, %v9074_v63  ;;  %v14662_v36 = vld [vmem:[%s17598_s3 + $0x10] sm:$0xff] }
0x28ab   :  { %14488 = vpow2.f32 %v9093_v14  ;;  %v9090_v28 = vsub.f32 0.0, %v9087_v27  ;;  %13573 = vmatmul.mubr.msk.f32.gmra.mxu1 %vm711_vm2, %v15801_v26 }
0x28ac   :  { %13596 = vmatprep.mubr.msk.f32.mxu1 %vm711_vm2, %v14657_v17 }
0x28ad   :  { %v9095_v58 = vmul.f32 1.442695, %v9090_v28 }
0x28af   :  { %14490 = vpow2.f32 %v9095_v58  ;;  %v11716_v58 = vld [vmem:[%s17599_s0 + $0xa8] sm:$0xff] }
0x28b4   :  { %v14487_v53 = vpop.eup %14486 }
0x28b5   :  { %v9097_v57 = vadd.f32 1.0, %v14487_v53  ;;  %v11712_v53 = vld [vmem:[%s17600_s19 + $0xa8] sm:$0xff] }
0x28b7   :  { %14492 = vrcp.f32 %v9097_v57  ;;  %v11715_v57 = vld [vmem:[%s17599_s0 + $0xa0] sm:$0xff] }
0x28b8   :  { %v14489_v20 = vpop.eup %14488 }
0x28b9   :  { %v9098_v46 = vadd.f32 1.0, %v14489_v20  ;;  %v11711_v20 = vld [vmem:[%s17600_s19 + $0xa0] sm:$0xff] }
0x28bb   :  { %14494 = vrcp.f32 %v9098_v46 }
0x28bc   :  { %v14491_v23 = vpop.eup %14490 }
0x28bd   :  { %v9099_v8 = vadd.f32 1.0, %v14491_v23 }
0x28bf   :  { %14496 = vrcp.f32 %v9099_v8 }
0x28c4   :  { %v14493_v11 = vpop.eup %14492 }
0x28c5   :  { %v9106_v43 = vmul.f32 %v14493_v11, %v9085_v6  ;;  %v14664_v6 = vld [vmem:[%s17598_s3 + $0x18] sm:$0xff] }
0x28c7   :  { %13552 = vmatmul.mubr.msk.f32.vlgmr.msra.gmra.mxu0 %vm1084_vm4, %v9106_v43 }
0x28c8   :  { %v14495_v26 = vpop.eup %14494  ;;  %13554 = vmatprep.mubr.msk.f32.mxu0 %vm15429_vm0, %v15428_v0 }
0x28c9   :  { %v9107_v54 = vmul.f32 %v14495_v26, %v9086_v60 }
0x28cb   :  { %13555 = vmatmul.mubr.msk.f32.gmra.mxu0 %vm1084_vm4, %v9107_v54 }
0x28cc   :  { %v14497_v29 = vpop.eup %14496  ;;  %13557 = vmatprep.mubr.msk.f32.mxu0 %vm15429_vm0, %v15428_v0 }
0x28cd   :  { %v9108_v40 = vmul.f32 %v14497_v29, %v9087_v27 }
0x28cf   :  { %13558 = vmatmul.mubr.msk.f32.gmra.mxu0 %vm1084_vm4, %v9108_v40 }
0x28d0   :  { %13581 = vmatprep.mubr.msk.f32.mxu0 %vm711_vm2, %v14658_v10 }
0x2963   :  { %v13568_v30 = vpop.f32.mrf.mxu1 }
0x2964   :  { %v9313_v37 = vmul.f32 %v13568_v30, %v13568_v30 }
0x2965   :  { %v9283_v61 = vpop.f32.mrf.mxu1 }
0x2966   :  { %v9312_v42 = vmul.f32 %v9283_v61, %v9283_v61  ;;  %v9321_v34 = vsel %vm831_vm3, %v9313_v37, 0.0 }
0x2967   :  { %9322 = vadd.xlane.f32.xlu1 %v9321_v34  ;;  %v13571_v22 = vpop.f32.mrf.mxu1  ;;  %v9842_v34 = vld [vmem:[#allocation7 + $0xb8] sm:$0xff] }
0x2968   :  { %v9318_v48 = vsel %vm831_vm3, %v9312_v42, 0.0  ;;  %v9315_v50 = vmul.f32 %v13571_v22, %v13571_v22 }
0x2969   :  { %9319 = vadd.xlane.f32.xlu0 %v9318_v48  ;;  %v9293_v60 = vpop.f32.mrf.mxu1  ;;  %v9841_v48 = vld [vmem:[#allocation7 + $0xb0] sm:$0xff] }
0x296a   :  { %v9314_v63 = vmul.f32 %v9293_v60, %v9293_v60  ;;  %v9327_v14 = vsel %vm831_vm3, %v9315_v50, 0.0 }
0x296b   :  { %v13574_v39 = vpop.f32.mrf.mxu1  ;;  %9328 = vadd.xlane.f32.xlu1 %v9327_v14 }
0x296c   :  { %v9324_v27 = vsel %vm831_vm3, %v9314_v63, 0.0  ;;  %v9317_v28 = vmul.f32 %v13574_v39, %v13574_v39 }
0x296d   :  { %v9303_v2 = vpop.f32.mrf.mxu1  ;;  %9325 = vadd.xlane.f32.xlu0 %v9324_v27 }
0x296e   :  { %v9316_v17 = vmul.f32 %v9303_v2, %v9303_v2  ;;  %v9333_v46 = vsel %vm831_vm3, %v9317_v28, 0.0 }
0x296f   :  { %9334 = vadd.xlane.f32.xlu1 %v9333_v46 }
0x2970   :  { %v9330_v23 = vsel %vm831_vm3, %v9316_v17, 0.0 }
0x2971   :  { %9331 = vadd.xlane.f32.xlu0 %v9330_v23 }
0x2987   :  { %v9189_v12 = vpop.f32.mrf.mxu0 }
0x2988   :  { %v9203_v32 = vadd.f32 %v9189_v12, %v17055_v59  ;;  %v11714_v59 = vld [vmem:[%s17600_s19 + $0xb8] sm:$0xff] }
0x2989   :  { %v13553_v16 = vpop.f32.mrf.mxu0  ;;  %v9840_v12 = vld [vmem:[#allocation7 + $0xa8] sm:$0xff] }
0x298a   :  { %v9839_v16 = vld [vmem:[#allocation7 + $0xa0] sm:$0xff] }
0x298b   :  { %v9194_v56 = vpop.f32.mrf.mxu0 }
0x298c   :  { %v9204_v38 = vadd.f32 %v9194_v56, %v17049_v19  ;;  %v11718_v19 = vld [vmem:[%s17599_s0 + $0xb8] sm:$0xff] }
0x298d   :  { %v13556_v52 = vpop.f32.mrf.mxu0 }
0x298e   :  { %v17294_v5 = vadd.f32 %v11692_v1, %v9204_v38 }
0x298f   :  { %v9199_v62 = vpop.f32.mrf.mxu0 }
0x2990   :  { %v9205_v33 = vadd.f32 %v9199_v62, %v17047_v4  ;;  %v17300_v4 = vadd.f32 %v11692_v1, %v9203_v32  ;;  %v11731_v62 = vld [vmem:[#allocation2 + $0x5] ss:$0 sm:$0xff] }
0x2991   :  { %v13559_v47 = vpop.f32.mrf.mxu0 }
0x2992   :  { %v17292_v25 = vadd.f32 %v11692_v1, %v9205_v33 }
0x2994   :  { %13575 = vmatprep.subr.mxu0 %v17292_v25  ;;  %13590 = vmatprep.subr.mxu1 %v17292_v25 }
0x2995   :  { %13576 = vmatpush3.msra.mxu0 %v17292_v25  ;;  %13591 = vmatpush3.msra.mxu1 %v17292_v25 }
0x2996   :  { %13577 = vmatprep.subr.mxu0 %v17294_v5  ;;  %13592 = vmatprep.subr.mxu1 %v17294_v5 }
0x2997   :  { %13578 = vmatpush3.msra.mxu0 %v17294_v5  ;;  %13593 = vmatpush3.msra.mxu1 %v17294_v5 }
0x2998   :  { %13579 = vmatprep.subr.mxu0 %v17300_v4  ;;  %13594 = vmatprep.subr.mxu1 %v17300_v4 }
0x2999   :  { %13580 = vmatpush3.msra.mxu0 %v17300_v4  ;;  %13595 = vmatpush3.msra.mxu1 %v17300_v4 }
0x299a   :  { %13582 = vmatmul.mubr.msk.f32.vlgmr.msra.gmra.mxu0 %vm711_vm2, %v14659_v41  ;;  %13597 = vmatmul.mubr.msk.f32.vlgmr.msra.gmra.mxu1 %vm711_vm2, %v14660_v55 }
0x299b   :  { %13584 = vmatprep.mubr.msk.f32.mxu0 %vm711_vm2, %v14661_v7  ;;  %13599 = vmatprep.mubr.msk.f32.mxu1 %vm711_vm2, %v14662_v36 }
0x299c   :  { %13605 = vmatprep.subr.mxu0 %v11718_v19  ;;  %13622 = vmatprep.subr.mxu1 %v11714_v59 }
0x299d   :  { %13606 = vmatpush3.msra.mxu0 %v11718_v19  ;;  %13623 = vmatpush3.msra.mxu1 %v11714_v59  ;;  %v11732_v19 = vld [vmem:[#allocation5 + $0x5] ss:$0 sm:$0xff] }
0x299e   :  { %13585 = vmatmul.mubr.msk.f32.gmra.mxu0 %vm711_vm2, %v14663_v31  ;;  %13600 = vmatmul.mubr.msk.f32.gmra.mxu1 %vm711_vm2, %v14664_v6 }
0x299f   :  { %13587 = vmatprep.mubr.msk.f32.mxu0 %vm711_vm2, %v14665_v3  ;;  %13602 = vmatprep.mubr.msk.f32.mxu1 %vm711_vm2, %v14666_v21 }
0x29a0   :  { %13607 = vmatprep.subr.mxu0 %v11717_v51  ;;  %13624 = vmatprep.subr.mxu1 %v11713_v18 }
0x29a1   :  { %13608 = vmatpush3.msra.mxu0 %v11717_v51  ;;  %13625 = vmatpush3.msra.mxu1 %v11713_v18 }
0x29a2   :  { %13588 = vmatmul.mubr.msk.f32.gmra.mxu0 %vm711_vm2, %v14667_v13  ;;  %13603 = vmatmul.mubr.msk.f32.gmra.mxu1 %vm711_vm2, %v14668_v45 }
0x29a3   :  { %13609 = vmatprep.subr.mxu0 %v11716_v58  ;;  %13626 = vmatprep.subr.mxu1 %v11712_v53 }
0x29a4   :  { %13610 = vmatpush3.msra.mxu0 %v11716_v58  ;;  %13627 = vmatpush3.msra.mxu1 %v11712_v53 }
0x29a5   :  { %13611 = vmatprep.subr.mxu0 %v11715_v57  ;;  %13628 = vmatprep.subr.mxu1 %v11711_v20 }
0x29a6   :  { %13612 = vmatpush3.msra.mxu0 %v11715_v57  ;;  %13629 = vmatpush3.msra.mxu1 %v11711_v20 }
0x29a7   :  { %13656 = vmatprep.subr.mxu1 %v15428_v0  ;;  %13639 = vmatprep.subr.mxu0 %v9842_v34 }
0x29f0   :  { %v9323_v56 = vpop.xlane.xlu1 %9322 }
0x29f1   :  { %v9771_v1 = vmul.f32 %v11731_v62, %v9323_v56 }
0x29f2   :  { %v9320_v52 = vpop.xlane.xlu0 %9319 }
0x29f3   :  { %v9770_v55 = vmul.f32 %v11731_v62, %v9320_v52 }
0x29f4   :  { %v9329_v47 = vpop.xlane.xlu1 %9328 }
0x29f5   :  { %v9773_v6 = vmul.f32 %v11731_v62, %v9329_v47 }
0x29f6   :  { %v9326_v7 = vpop.xlane.xlu0 %9325 }
0x29f7   :  { %v9772_v45 = vmul.f32 %v11731_v62, %v9326_v7 }
0x29f8   :  { %v9335_v39 = vpop.xlane.xlu1 %9334 }
0x29f9   :  { %v9775_v46 = vmul.f32 %v11731_v62, %v9335_v39 }
0x29fa   :  { %v9332_v17 = vpop.xlane.xlu0 %9331 }
0x2a5a   :  { %v13583_v8 = vpop.f32.mrf.mxu0  ;;  %v13598_v11 = vpop.f32.mrf.mxu1 }
0x2a5c   :  { %v9402_v43 = vpop.f32.mrf.mxu0  ;;  %v9497_v26 = vpop.f32.mrf.mxu1 }
0x2a5d   :  { %13613 = vmatprep.mubr.msk.f32.mxu0 %vm1084_vm4, %v9497_v26  ;;  %13630 = vmatprep.mubr.msk.f32.mxu1 %vm1084_vm4, %v9402_v43 }
0x2a5e   :  { %v13586_v54 = vpop.f32.mrf.mxu0  ;;  %v13601_v29 = vpop.f32.mrf.mxu1  ;;  %13614 = vmatmul.mubr.msk.f32.vlgmr.msra.gmra.mxu0 %vm1084_vm4, %v13598_v11  ;;  %13631 = vmatmul.mubr.msk.f32.vlgmr.msra.gmra.mxu1 %vm1084_vm4, %v13583_v8 }
0x2a5f   :  { %13640 = vmatpush3.msra.mxu0 %v9842_v34 }
0x2a60   :  { %v9412_v40 = vpop.f32.mrf.mxu0  ;;  %v9507_v10 = vpop.f32.mrf.mxu1  ;;  %13641 = vmatprep.subr.mxu0 %v9841_v48 }
0x2a61   :  { %13616 = vmatprep.mubr.msk.f32.mxu0 %vm1084_vm4, %v9507_v10  ;;  %13633 = vmatprep.mubr.msk.f32.mxu1 %vm1084_vm4, %v9412_v40 }
0x2a62   :  { %v13589_v30 = vpop.f32.mrf.mxu0  ;;  %v13604_v37 = vpop.f32.mrf.mxu1  ;;  %13617 = vmatmul.mubr.msk.f32.gmra.mxu0 %vm1084_vm4, %v13601_v29  ;;  %13634 = vmatmul.mubr.msk.f32.gmra.mxu1 %vm1084_vm4, %v13586_v54  ;;  %v9774_v29 = vmul.f32 %v11731_v62, %v9332_v17 }
0x2a63   :  { %13642 = vmatpush3.msra.mxu0 %v9841_v48 }
0x2a64   :  { %v9422_v61 = vpop.f32.mrf.mxu0  ;;  %v9517_v42 = vpop.f32.mrf.mxu1  ;;  %13643 = vmatprep.subr.mxu0 %v9840_v12 }
0x2a65   :  { %13619 = vmatprep.mubr.msk.f32.mxu0 %vm1084_vm4, %v9517_v42  ;;  %13636 = vmatprep.mubr.msk.f32.mxu1 %vm1084_vm4, %v9422_v61 }
0x2a66   :  { %13620 = vmatmul.mubr.msk.f32.gmra.mxu0 %vm1084_vm4, %v13604_v37  ;;  %13637 = vmatmul.mubr.msk.f32.gmra.mxu1 %vm1084_vm4, %v13589_v30 }
0x2a67   :  { %13668 = vmatprep.mubr.msk.f32.mxu1 %vm15429_vm0, %v15428_v0  ;;  %13644 = vmatpush3.msra.mxu0 %v9840_v12 }
0x2a68   :  { %13645 = vmatprep.subr.mxu0 %v9839_v16 }
0x2a69   :  { %13646 = vmatpush3.msra.mxu0 %v9839_v16 }
0x2a6a   :  { %13677 = vmatprep.subr.mxu0 %v15428_v0 }
0x2b1e   :  { %v13615_v38 = vpop.f32.mrf.mxu0  ;;  %v13632_v33 = vpop.f32.mrf.mxu1 }
0x2b1f   :  { %v9739_v32 = vadd.f32 %v13632_v33, %v13615_v38 }
0x2b20   :  { %v9620_v59 = vpop.f32.mrf.mxu0  ;;  %v9733_v41 = vpop.f32.mrf.mxu1 }
0x2b21   :  { %v9777_v36 = vadd.f32 %v9771_v1, %v9739_v32  ;;  %v9734_v51 = vadd.f32 %v9733_v41, %v9620_v59 }
0x2b22   :  { %v13618_v18 = vpop.f32.mrf.mxu0  ;;  %v13635_v31 = vpop.f32.mrf.mxu1 }
0x2b23   :  { %v17358_v3 = vadd.f32 %v11732_v19, %v9777_v36  ;;  %v9776_v21 = vadd.f32 %v9770_v55, %v9734_v51  ;;  %v9749_v13 = vadd.f32 %v13635_v31, %v13618_v18 }
0x2b24   :  { %v9630_v22 = vpop.f32.mrf.mxu0  ;;  %v9743_v60 = vpop.f32.mrf.mxu1 }
0x2b25   :  { %v9797_v50 = vsub.f32 0.0, %v17358_v3  ;;  %v9790_v63 = vadd.f32 %v11732_v19, %v9776_v21  ;;  %v9779_v2 = vadd.f32 %v9773_v6, %v9749_v13  ;;  %v9744_v14 = vadd.f32 %v9743_v60, %v9630_v22 }
0x2b26   :  { %v13621_v27 = vpop.f32.mrf.mxu0  ;;  %v13638_v28 = vpop.f32.mrf.mxu1 }
0x2b27   :  { %v9804_v58 = vmul.f32 1.442695, %v9797_v50  ;;  %v9796_v53 = vsub.f32 0.0, %v9790_v63  ;;  %v9793_v57 = vadd.f32 %v11732_v19, %v9779_v2  ;;  %v9778_v20 = vadd.f32 %v9772_v45, %v9744_v14 }
0x2b28   :  { %v9759_v23 = vadd.f32 %v13638_v28, %v13621_v27  ;;  %v9640_v8 = vpop.f32.mrf.mxu0  ;;  %v9753_v11 = vpop.f32.mrf.mxu1 }
0x2b29   :  { %14498 = vpow2.f32 %v9804_v58  ;;  %v9802_v43 = vmul.f32 1.442695, %v9796_v53  ;;  %v9799_v26 = vsub.f32 0.0, %v9793_v57  ;;  %v9792_v54 = vadd.f32 %v11732_v19, %v9778_v20 }
0x2b2a   :  { %v9781_v40 = vadd.f32 %v9775_v46, %v9759_v23  ;;  %v9754_v10 = vadd.f32 %v9753_v11, %v9640_v8 }
0x2b2b   :  { %14500 = vpow2.f32 %v9802_v43  ;;  %v9808_v30 = vmul.f32 1.442695, %v9799_v26  ;;  %v9798_v37 = vsub.f32 0.0, %v9792_v54 }
0x2b2c   :  { %v9795_v61 = vadd.f32 %v11732_v19, %v9781_v40  ;;  %v9780_v42 = vadd.f32 %v9774_v29, %v9754_v10 }
0x2b2d   :  { %14502 = vpow2.f32 %v9808_v30  ;;  %v9806_v34 = vmul.f32 1.442695, %v9798_v37 }
0x2b2e   :  { %v9801_v48 = vsub.f32 0.0, %v9795_v61  ;;  %v9794_v12 = vadd.f32 %v11732_v19, %v9780_v42 }
0x2b2f   :  { %14504 = vpow2.f32 %v9806_v34 }
0x2b30   :  { %v9812_v16 = vmul.f32 1.442695, %v9801_v48  ;;  %v9800_v56 = vsub.f32 0.0, %v9794_v12 }
0x2b32   :  { %14506 = vpow2.f32 %v9812_v16  ;;  %v9810_v52 = vmul.f32 1.442695, %v9800_v56 }
0x2b34   :  { %14508 = vpow2.f32 %v9810_v52 }
0x2b36   :  { %v14499_v38 = vpop.eup %14498 }
0x2b37   :  { %v9815_v33 = vadd.f32 1.0, %v14499_v38 }
0x2b38   :  { %v14501_v62 = vpop.eup %14500 }
0x2b39   :  { %v9814_v1 = vadd.f32 1.0, %v14501_v62  ;;  %14510 = vrcp.f32 %v9815_v33 }
0x2b3a   :  { %v14503_v47 = vpop.eup %14502 }
0x2b3b   :  { %14512 = vrcp.f32 %v9814_v1  ;;  %v9817_v32 = vadd.f32 1.0, %v14503_v47 }
0x2b3c   :  { %v14505_v59 = vpop.eup %14504 }
0x2b3d   :  { %v9816_v41 = vadd.f32 1.0, %v14505_v59  ;;  %14514 = vrcp.f32 %v9817_v32 }
0x2b3f   :  { %v14507_v55 = vpop.eup %14506  ;;  %14516 = vrcp.f32 %v9816_v41 }
0x2b40   :  { %v9819_v19 = vadd.f32 1.0, %v14507_v55 }
0x2b41   :  { %v14509_v7 = vpop.eup %14508 }
0x2b42   :  { %v9818_v36 = vadd.f32 1.0, %v14509_v7  ;;  %14518 = vrcp.f32 %v9819_v19 }
0x2b44   :  { %14520 = vrcp.f32 %v9818_v36 }
0x2b46   :  { %v14511_v51 = vpop.eup %14510 }
0x2b47   :  { %v9833_v6 = vmul.f32 %v14511_v51, %v17358_v3  ;;  %v11733_v3 = vld [vmem:[#allocation8 + $0x5] ss:$0 sm:$0xff] }
0x2b48   :  { %v14513_v18 = vpop.eup %14512 }
0x2b49   :  { %v9832_v31 = vmul.f32 %v14513_v18, %v9790_v63 }
0x2b4a   :  { %v14515_v21 = vpop.eup %14514 }
0x2b4b   :  { %13647 = vmatprep.mubr.msk.f32.mxu0 %vm1084_vm4, %v9832_v31  ;;  %v9835_v22 = vmul.f32 %v14515_v21, %v9793_v57  ;;  %v11740_v31 = vld [vmem:[#allocation10 + $0x5] ss:$0 sm:$0xff] }
0x2b4c   :  { %v14517_v13 = vpop.eup %14516  ;;  %13648 = vmatmul.mubr.msk.f32.vlgmr.msra.gmra.mxu0 %vm1084_vm4, %v9833_v6 }
0x2b4d   :  { %v9834_v45 = vmul.f32 %v14517_v13, %v9792_v54 }
0x2b4f   :  { %13650 = vmatprep.mubr.msk.f32.mxu0 %vm1084_vm4, %v9834_v45  ;;  %v14519_v60 = vpop.eup %14518 }
0x2b50   :  { %13651 = vmatmul.mubr.msk.f32.gmra.mxu0 %vm1084_vm4, %v9835_v22  ;;  %v9837_v2 = vmul.f32 %v14519_v60, %v9795_v61 }
0x2b51   :  { %v14521_v39 = vpop.eup %14520 }
0x2b52   :  { %v9836_v50 = vmul.f32 %v14521_v39, %v9794_v12 }
0x2b54   :  { %13653 = vmatprep.mubr.msk.f32.mxu0 %vm1084_vm4, %v9836_v50 }
0x2b55   :  { %13654 = vmatmul.mubr.msk.f32.gmra.mxu0 %vm1084_vm4, %v9837_v2 }
0x2b56   :  { %13685 = vmatprep.mubr.msk.f32.mxu0 %vm15429_vm0, %v15428_v0 }
0x2c0c   :  { %v13649_v63 = vpop.f32.mrf.mxu0 }
0x2c0d   :  { %v9941_v14 = vadd.f32 %v13649_v63, %v11733_v3 }
0x2c0e   :  { %v9935_v27 = vpop.f32.mrf.mxu0 }
0x2c0f   :  { %v9936_v28 = vadd.f32 %v11733_v3, %v9935_v27  ;;  %v9965_v17 = vsub.f32 0.0, %v9941_v14 }
0x2c10   :  { %v13652_v58 = vpop.f32.mrf.mxu0 }
0x2c11   :  { %v9951_v53 = vadd.f32 %v13652_v58, %v11733_v3  ;;  %v9964_v20 = vsub.f32 0.0, %v9936_v28  ;;  %v9972_v8 = vmul.f32 1.442695, %v9965_v17 }
0x2c12   :  { %v9945_v57 = vpop.f32.mrf.mxu0 }
0x2c13   :  { %v9967_v46 = vsub.f32 0.0, %v9951_v53  ;;  %v9946_v23 = vadd.f32 %v11733_v3, %v9945_v57  ;;  %v9970_v29 = vmul.f32 1.442695, %v9964_v20  ;;  %v11742_v57 = vld [vmem:[%s17601_s22 + $0x5] ss:$0 sm:$0xff] }
0x2c15   :  { %v9976_v11 = vmul.f32 1.442695, %v9967_v46  ;;  %v9966_v43 = vsub.f32 0.0, %v9946_v23  ;;  %v13655_v26 = vpop.f32.mrf.mxu0 }
0x2c16   :  { %v9961_v54 = vadd.f32 %v13655_v26, %v11733_v3 }
0x2c17   :  { %14522 = vpow2.f32 %v9976_v11  ;;  %v9974_v40 = vmul.f32 1.442695, %v9966_v43  ;;  %v9955_v10 = vpop.f32.mrf.mxu0 }
0x2c18   :  { %14524 = vpow2.f32 %v9972_v8  ;;  %v9969_v30 = vsub.f32 0.0, %v9961_v54  ;;  %v9956_v37 = vadd.f32 %v11733_v3, %v9955_v10 }
0x2c19   :  { %14526 = vpow2.f32 %v9974_v40 }
0x2c1a   :  { %v9980_v61 = vmul.f32 1.442695, %v9969_v30  ;;  %v9968_v42 = vsub.f32 0.0, %v9956_v37  ;;  %14528 = vpow2.f32 %v9970_v29 }
0x2c1c   :  { %14530 = vpow2.f32 %v9980_v61  ;;  %v9978_v34 = vmul.f32 1.442695, %v9968_v42 }
0x2c1e   :  { %14532 = vpow2.f32 %v9978_v34 }
0x2c24   :  { %v14523_v48 = vpop.eup %14522 }
0x2c25   :  { %v14525_v12 = vpop.eup %14524  ;;  %v9985_v56 = vadd.f32 1.0, %v14523_v48 }
0x2c26   :  { %v14527_v16 = vpop.eup %14526  ;;  %v9983_v62 = vadd.f32 1.0, %v14525_v12 }
0x2c27   :  { %v9984_v52 = vadd.f32 1.0, %v14527_v16  ;;  %v14529_v38 = vpop.eup %14528  ;;  %14534 = vrcp.f32 %v9985_v56 }
0x2c28   :  { %v9982_v32 = vadd.f32 1.0, %v14529_v38 }
0x2c29   :  { %v14531_v33 = vpop.eup %14530  ;;  %14536 = vrcp.f32 %v9984_v52 }
0x2c2a   :  { %v9987_v1 = vadd.f32 1.0, %v14531_v33 }
0x2c2b   :  { %v14533_v47 = vpop.eup %14532 }
0x2c2c   :  { %14538 = vrcp.f32 %v9987_v1  ;;  %v9986_v59 = vadd.f32 1.0, %v14533_v47 }
0x2c2d   :  { %14540 = vrcp.f32 %v9983_v62 }
0x2c2e   :  { %14542 = vrcp.f32 %v9986_v59 }
0x2c2f   :  { %14544 = vrcp.f32 %v9982_v32 }
0x2c34   :  { %v14535_v41 = vpop.eup %14534 }
0x2c35   :  { %v17370_v36 = vmul.f32 %v14535_v41, %v9951_v53 }
0x2c36   :  { %v14537_v55 = vpop.eup %14536 }
0x2c37   :  { %v17374_v6 = vmul.f32 %v14537_v55, %v9946_v23  ;;  %v10017_v50 = vmul.f32 %v11740_v31, %v17370_v36 }
0x2c39   :  { %v14539_v19 = vpop.eup %14538  ;;  %v10016_v63 = vmul.f32 %v11740_v31, %v17374_v6  ;;  %v10029_v27 = vsel %vm1084_vm4, %v10017_v50, 0.0 }
0x2c3a   :  { %v14541_v7 = vpop.eup %14540  ;;  %v17372_v51 = vmul.f32 %v14539_v19, %v9961_v54 }
0x2c3b   :  { %v14543_v18 = vpop.eup %14542  ;;  %v17379_v22 = vmul.f32 %v14541_v7, %v9941_v14  ;;  %v10026_v17 = vsel %vm1084_vm4, %v10016_v63, 0.0 }
0x2c3c   :  { %v17376_v21 = vmul.f32 %v14543_v18, %v9956_v37  ;;  %v10019_v13 = vmul.f32 %v11740_v31, %v17372_v51  ;;  %v14545_v45 = vpop.eup %14544 }
0x2c3d   :  { %v17384_v2 = vmul.f32 %v14545_v45, %v9936_v28  ;;  %v10015_v14 = vmul.f32 %v11740_v31, %v17379_v22 }
0x2c3e   :  { %v10035_v60 = vsel %vm1084_vm4, %v10019_v13, 0.0  ;;  %v10018_v39 = vmul.f32 %v11740_v31, %v17376_v21 }
0x2c3f   :  { %10036 = vadd.xlane.f32.xlu0 %v10035_v60  ;;  %v10014_v58 = vmul.f32 %v11740_v31, %v17384_v2  ;;  %v10023_v53 = vsel %vm1084_vm4, %v10015_v14, 0.0  ;;  %v10213_v14 = vld [vmem:[#allocation17 + $0xb8] sm:$0xff] }
0x2c40   :  { %v10032_v3 = vsel %vm1084_vm4, %v10018_v39, 0.0  ;;  %13678 = vmatpush3.msra.mxu0 %v10213_v14 }
0x2c41   :  { %10033 = vadd.xlane.f32.xlu1 %v10032_v3  ;;  %v10020_v28 = vsel %vm1084_vm4, %v10014_v58, 0.0  ;;  %13679 = vmatprep.subr.mxu0 %v15428_v0  ;;  %v10211_v58 = vld [vmem:[#allocation17 + $0xa8] sm:$0xff] }
0x2c43   :  { %10030 = vadd.xlane.f32.xlu0 %v10029_v27 }
0x2c45   :  { %10027 = vadd.xlane.f32.xlu1 %v10026_v17  ;;  %v10212_v17 = vld [vmem:[#allocation17 + $0xb0] sm:$0xff] }
0x2c46   :  { %13680 = vmatpush3.msra.mxu0 %v10212_v17 }
0x2c47   :  { %10024 = vadd.xlane.f32.xlu0 %v10023_v53  ;;  %13681 = vmatprep.subr.mxu0 %v15428_v0 }
0x2c48   :  { %13682 = vmatpush3.msra.mxu0 %v10211_v58 }
0x2c49   :  { %10021 = vadd.xlane.f32.xlu1 %v10020_v28  ;;  %13683 = vmatprep.subr.mxu0 %v15428_v0 }
0x2cc8   :  { %v10037_v20 = vpop.xlane.xlu0 %10036 }
0x2cc9   :  { %v10051_v46 = vadd.f32 %v11742_v57, %v10037_v20 }
0x2cca   :  { %v10034_v23 = vpop.xlane.xlu1 %10033 }
0x2ccb   :  { %v10057_v8 = vsub.f32 0.0, %v10051_v46  ;;  %v10050_v11 = vadd.f32 %v11742_v57, %v10034_v23 }
0x2ccc   :  { %v10031_v43 = vpop.xlane.xlu0 %10030 }
0x2ccd   :  { %v10068_v26 = vmul.f32 1.442695, %v10057_v8  ;;  %v10056_v54 = vsub.f32 0.0, %v10050_v11  ;;  %v10049_v29 = vadd.f32 %v11742_v57, %v10031_v43 }
0x2cce   :  { %v10028_v40 = vpop.xlane.xlu1 %10027 }
0x2ccf   :  { %14546 = vpow2.f32 %v10068_v26  ;;  %v10066_v10 = vmul.f32 1.442695, %v10056_v54  ;;  %v10055_v30 = vsub.f32 0.0, %v10049_v29  ;;  %v10048_v37 = vadd.f32 %v11742_v57, %v10028_v40  ;;  %v10208_v54 = vld [vmem:[#allocation16 + $0xb8] sm:$0xff]  ;;  %v10205_v29 = vld [vmem:[#allocation16 + $0xa0] sm:$0xff]  ;;  %v14671_v40 = vld [vmem:[%s17602_s21 + $0x10] sm:$0xff] }
0x2cd0   :  { %v10025_v61 = vpop.xlane.xlu0 %10024 }
0x2cd1   :  { %14548 = vpow2.f32 %v10066_v10  ;;  %v10064_v42 = vmul.f32 1.442695, %v10055_v30  ;;  %v10054_v34 = vsub.f32 0.0, %v10048_v37  ;;  %v10047_v48 = vadd.f32 %v11742_v57, %v10025_v61  ;;  %v10210_v10 = vld [vmem:[#allocation17 + $0xa0] sm:$0xff] }
0x2cd2   :  { %v10022_v12 = vpop.xlane.xlu1 %10021  ;;  %13684 = vmatpush3.msra.mxu0 %v10210_v10 }
0x2cd3   :  { %14550 = vpow2.f32 %v10064_v42  ;;  %v10062_v16 = vmul.f32 1.442695, %v10054_v34  ;;  %v10053_v56 = vsub.f32 0.0, %v10047_v48  ;;  %v10046_v52 = vadd.f32 %v11742_v57, %v10022_v12  ;;  %13711 = vmatprep.subr.mxu0 %v15428_v0 }
0x2cd5   :  { %14552 = vpow2.f32 %v10062_v16  ;;  %v10060_v38 = vmul.f32 1.442695, %v10053_v56  ;;  %v10052_v33 = vsub.f32 0.0, %v10046_v52 }
0x2cd7   :  { %14554 = vpow2.f32 %v10060_v38  ;;  %v10058_v62 = vmul.f32 1.442695, %v10052_v33 }
0x2cd9   :  { %14556 = vpow2.f32 %v10058_v62  ;;  %v10428_v62 = vld [vmem:[#allocation20 + $0xb8] sm:$0xff] }
0x2cdc   :  { %v14547_v1 = vpop.eup %14546 }
0x2cdd   :  { %v10075_v47 = vadd.f32 1.0, %v14547_v1  ;;  %v10427_v1 = vld [vmem:[#allocation20 + $0xb0] sm:$0xff] }
0x2cde   :  { %v14549_v32 = vpop.eup %14548 }
0x2cdf   :  { %14558 = vrcp.f32 %v10075_v47  ;;  %v10074_v59 = vadd.f32 1.0, %v14549_v32  ;;  %v10426_v47 = vld [vmem:[#allocation20 + $0xa8] sm:$0xff]  ;;  %v10425_v32 = vld [vmem:[#allocation20 + $0xa0] sm:$0xff] }
0x2ce0   :  { %v14551_v41 = vpop.eup %14550 }
0x2ce1   :  { %14560 = vrcp.f32 %v10074_v59  ;;  %v10073_v55 = vadd.f32 1.0, %v14551_v41  ;;  %v10535_v59 = vld [vmem:[%s17606_s8 + $0x18] sm:$0xff]  ;;  %v10534_v41 = vld [vmem:[%s17606_s8 + $0x10] sm:$0xff] }
0x2ce2   :  { %v14553_v19 = vpop.eup %14552 }
0x2ce3   :  { %v10072_v7 = vadd.f32 1.0, %v14553_v19  ;;  %14562 = vrcp.f32 %v10073_v55  ;;  %v11752_v19 = vld [vmem:[#allocation19 + $0x5] ss:$0 sm:$0xff] }
0x2ce4   :  { %v14555_v18 = vpop.eup %14554 }
0x2ce5   :  { %14564 = vrcp.f32 %v10072_v7  ;;  %v10071_v31 = vadd.f32 1.0, %v14555_v18 }
0x2ce6   :  { %v14557_v13 = vpop.eup %14556 }
0x2ce7   :  { %v10070_v45 = vadd.f32 1.0, %v14557_v13  ;;  %14566 = vrcp.f32 %v10071_v31 }
0x2ce9   :  { %14568 = vrcp.f32 %v10070_v45 }
0x2cec   :  { %v14559_v60 = vpop.eup %14558 }
0x2ced   :  { %10115 = vperm.xlu0 %13896, %v14559_v60  }
0x2cee   :  { %v14561_v39 = vpop.eup %14560 }
0x2cef   :  { %10110 = vperm.xlu1 %13897, %v14561_v39  }
0x2cf0   :  { %v14563_v50 = vpop.eup %14562 }
0x2cf2   :  { %v14565_v3 = vpop.eup %14564 }
0x2cf3   :  { %10105 = vperm.xlu1 %13897, %v14563_v50   ;;  %10100 = vperm.xlu0 %13896, %v14565_v3  }
0x2cf4   :  { %v14567_v63 = vpop.eup %14566 }
0x2cf6   :  { %v14569_v27 = vpop.eup %14568 }
0x2cf7   :  { %10095 = vperm.xlu1 %13897, %v14567_v63   ;;  %10090 = vperm.xlu0 %13896, %v14569_v27  }
0x2d68   :  { %v10116_v53 = vpop.permute.xlu0 %10115 }
0x2d69   :  { %v10123_v28 = vmul.f32 %v10116_v53, %v17372_v51 }
0x2d6a   :  { %v10111_v57 = vpop.permute.xlu1 %10110 }
0x2d6b   :  { %v10122_v20 = vmul.f32 %v10111_v57, %v17376_v21  ;;  %13657 = vmatpush3.msra.mxu1 %v10123_v28 }
0x2d6c   :  { %13658 = vmatprep.subr.mxu1 %v15428_v0 }
0x2d6d   :  { %13659 = vmatpush3.msra.mxu1 %v10122_v20 }
0x2d6e   :  { %v10101_v46 = vpop.permute.xlu0 %10100  ;;  %v10106_v23 = vpop.permute.xlu1 %10105  ;;  %13660 = vmatprep.subr.mxu1 %v15428_v0 }
0x2d6f   :  { %v10121_v8 = vmul.f32 %v10106_v23, %v17370_v36  ;;  %v10120_v11 = vmul.f32 %v10101_v46, %v17374_v6  ;;  %v14669_v36 = vld [vmem:[%s17602_s21] sm:$0xff]  ;;  %v10207_v6 = vld [vmem:[#allocation16 + $0xb0] sm:$0xff] }
0x2d71   :  { %13661 = vmatpush3.msra.mxu1 %v10121_v8 }
0x2d72   :  { %v10091_v43 = vpop.permute.xlu0 %10090  ;;  %13662 = vmatprep.subr.mxu1 %v15428_v0  ;;  %v10096_v51 = vpop.permute.xlu1 %10095 }
0x2d73   :  { %v10119_v21 = vmul.f32 %v10096_v51, %v17379_v22  ;;  %13663 = vmatpush3.msra.mxu1 %v10120_v11  ;;  %v10118_v26 = vmul.f32 %v10091_v43, %v17384_v2  ;;  %v10206_v22 = vld [vmem:[#allocation16 + $0xa8] sm:$0xff] }
0x2d74   :  { %13664 = vmatprep.subr.mxu1 %v15428_v0  ;;  %v14670_v2 = vld [vmem:[%s17602_s21 + $0x8] sm:$0xff] }
0x2d75   :  { %13665 = vmatpush3.msra.mxu1 %v10119_v21 }
0x2d76   :  { %13666 = vmatprep.subr.mxu1 %v15428_v0 }
0x2d77   :  { %13667 = vmatpush3.msra.mxu1 %v10118_v26 }
0x2d78   :  { %13669 = vmatmul.mubr.msk.f32.vlgmr.msra.gmra.mxu1 %vm1876_vm5, %v14669_v36  ;;  %13694 = vmatprep.subr.mxu1 %v15428_v0 }
0x2d79   :  { %13671 = vmatprep.mubr.msk.f32.mxu1 %vm15429_vm0, %v15428_v0  ;;  %13695 = vmatpush3.msra.mxu1 %v10208_v54 }
0x2d7a   :  { %13696 = vmatprep.subr.mxu1 %v15428_v0 }
0x2d7b   :  { %13697 = vmatpush3.msra.mxu1 %v10207_v6  ;;  %v10533_v6 = vld [vmem:[%s17606_s8 + $0x8] sm:$0xff] }
0x2d7c   :  { %13672 = vmatmul.mubr.msk.f32.gmra.mxu1 %vm1876_vm5, %v14670_v2  ;;  %13698 = vmatprep.subr.mxu1 %v15428_v0 }
0x2d7d   :  { %13674 = vmatprep.mubr.msk.f32.mxu1 %vm15429_vm0, %v15428_v0  ;;  %13699 = vmatpush3.msra.mxu1 %v10206_v22  ;;  %v11756_v22 = vld [vmem:[#allocation22 + $0x5] ss:$0 sm:$0xff] }
0x2d7e   :  { %13700 = vmatprep.subr.mxu1 %v15428_v0 }
0x2d7f   :  { %13701 = vmatpush3.msra.mxu1 %v10205_v29 }
0x2d80   :  { %13675 = vmatmul.mubr.msk.f32.gmra.mxu1 %vm1876_vm5, %v14671_v40  ;;  %13728 = vmatprep.subr.mxu1 %v15428_v0 }
0x2d81   :  { %13702 = vmatprep.mubr.msk.f32.mxu1 %vm15429_vm0, %v15428_v0 }
0x2d84   :  { %13703 = vmatmul.mubr.msk.f32.vlgmr.msra.gmra.mxu1 %vm1084_vm4, %v17300_v4 }
0x2d85   :  { %13705 = vmatprep.mubr.msk.f32.mxu1 %vm15429_vm0, %v15428_v0  ;;  %13729 = vmatpush3.msra.mxu1 %v10535_v59 }
0x2d86   :  { %13730 = vmatprep.subr.mxu1 %v15428_v0 }
0x2d87   :  { %13731 = vmatpush3.msra.mxu1 %v10534_v41  ;;  %v11766_v41 = vld [vmem:[#allocation41] ss:$0 sm:$0xff] }
0x2d88   :  { %13706 = vmatmul.mubr.msk.f32.gmra.mxu1 %vm1084_vm4, %v17294_v5  ;;  %13732 = vmatprep.subr.mxu1 %v15428_v0 }
0x2d89   :  { %13708 = vmatprep.mubr.msk.f32.mxu1 %vm15429_vm0, %v15428_v0  ;;  %13733 = vmatpush3.msra.mxu1 %v10533_v6  ;;  %v11135_v6 = vld [vmem:[%s15665_s13 + $0x8] sm:$0xff] }
0x2d8a   :  { %13734 = vmatprep.subr.mxu1 %v15428_v0 }
0x2d8c   :  { %13709 = vmatmul.mubr.msk.f32.gmra.mxu1 %vm1084_vm4, %v17292_v25 }
0x2d8d   :  { %13736 = vmatprep.mubr.msk.f32.mxu1 %vm15429_vm0, %v15428_v0 }
0x2e38   :  { %v10190_v30 = vpop.f32.mrf.mxu1 }
0x2e39   :  { %13686 = vmatmul.mubr.msk.f32.vlgmr.msra.gmra.mxu0 %vm1084_vm4, %v10190_v30 }
0x2e3a   :  { %v13670_v37 = vpop.f32.mrf.mxu1  ;;  %13688 = vmatprep.mubr.msk.f32.mxu0 %vm15429_vm0, %v15428_v0  ;;  %13712 = vmatpush3.msra.mxu0 %v10428_v62  ;;  %v11762_v62 = vld [vmem:[#allocation37] ss:$0 sm:$0xff] }
0x2e3b   :  { %13713 = vmatprep.subr.mxu0 %v15428_v0 }
0x2e3c   :  { %v10195_v61 = vpop.f32.mrf.mxu1  ;;  %13714 = vmatpush3.msra.mxu0 %v10427_v1  ;;  %v11765_v1 = vld [vmem:[#allocation40] ss:$0 sm:$0xff] }
0x2e3d   :  { %13689 = vmatmul.mubr.msk.f32.gmra.mxu0 %vm1084_vm4, %v10195_v61  ;;  %13715 = vmatprep.subr.mxu0 %v15428_v0 }
0x2e3e   :  { %v13673_v42 = vpop.f32.mrf.mxu1  ;;  %13691 = vmatprep.mubr.msk.f32.mxu0 %vm15429_vm0, %v15428_v0  ;;  %13716 = vmatpush3.msra.mxu0 %v10426_v47 }
0x2e3f   :  { %13717 = vmatprep.subr.mxu0 %v15428_v0 }
0x2e40   :  { %v10200_v34 = vpop.f32.mrf.mxu1  ;;  %13718 = vmatpush3.msra.mxu0 %v10425_v32  ;;  %v11763_v32 = vld [vmem:[#allocation38] ss:$0 sm:$0xff] }
0x2e41   :  { %13692 = vmatmul.mubr.msk.f32.gmra.mxu0 %vm1084_vm4, %v10200_v34  ;;  %13745 = vmatprep.subr.mxu0 %v15428_v0 }
0x2e42   :  { %v13676_v48 = vpop.f32.mrf.mxu1  ;;  %13719 = vmatprep.mubr.msk.f32.mxu0 %vm15429_vm0, %v15428_v0 }
0x2e44   :  { %v10378_v12 = vpop.f32.mrf.mxu1 }
0x2e46   :  { %v13704_v16 = vpop.f32.mrf.mxu1 }
0x2e48   :  { %v10383_v56 = vpop.f32.mrf.mxu1 }
0x2e4a   :  { %v13707_v52 = vpop.f32.mrf.mxu1 }
0x2e4c   :  { %v10388_v38 = vpop.f32.mrf.mxu1 }
0x2e4e   :  { %v13710_v33 = vpop.f32.mrf.mxu1 }
0x2ef9   :  { %v10289_v55 = vpop.f32.mrf.mxu0 }
0x2efa   :  { %v10379_v7 = vadd.f32 %v10378_v12, %v10289_v55  ;;  %v11757_v12 = vld [vmem:[#allocation35] ss:$0 sm:$0xff] }
0x2efb   :  { %v13687_v18 = vpop.f32.mrf.mxu0 }
0x2efc   :  { %v10400_v31 = vadd.f32 %v11752_v19, %v10379_v7 }
0x2efd   :  { %v10294_v13 = vpop.f32.mrf.mxu0 }
0x2efe   :  { %v10403_v45 = vsub.f32 0.0, %v10400_v31  ;;  %v10384_v60 = vadd.f32 %v10383_v56, %v10294_v13 }
0x2eff   :  { %v13690_v39 = vpop.f32.mrf.mxu0 }
0x2f00   :  { %v10406_v50 = vmul.f32 1.442695, %v10403_v45  ;;  %v10401_v3 = vadd.f32 %v11752_v19, %v10384_v60  ;;  %v10898_v45 = vld [vmem:[%s17608_s27 + $0x8] sm:$0xff] }
0x2f01   :  { %v10299_v63 = vpop.f32.mrf.mxu0 }
0x2f02   :  { %14570 = vpow2.f32 %v10406_v50  ;;  %v10404_v27 = vsub.f32 0.0, %v10401_v3  ;;  %v10389_v14 = vadd.f32 %v10388_v38, %v10299_v63  ;;  %v10897_v50 = vld [vmem:[%s17608_s27] sm:$0xff] }
0x2f03   :  { %v13693_v17 = vpop.f32.mrf.mxu0  ;;  %v11046_v63 = vld [vmem:[%s17609_s6] sm:$0xf] }
0x2f04   :  { %v10408_v58 = vmul.f32 1.442695, %v10404_v27  ;;  %v10402_v53 = vadd.f32 %v11752_v19, %v10389_v14  ;;  %v11142_v27 = vld [vmem:[%s15665_s13 + $0x40] sm:$0x3]  ;;  %v11141_v14 = vld [vmem:[%s15665_s13 + $0x38] sm:$0xff]  ;;  %v11140_v17 = vld [vmem:[%s15665_s13 + $0x30] sm:$0xff] }
0x2f06   :  { %14572 = vpow2.f32 %v10408_v58  ;;  %v10405_v28 = vsub.f32 0.0, %v10402_v53  ;;  %v11139_v58 = vld [vmem:[%s15665_s13 + $0x28] sm:$0xff] }
0x2f08   :  { %v10410_v57 = vmul.f32 1.442695, %v10405_v28  ;;  %v11137_v28 = vld [vmem:[%s15665_s13 + $0x18] sm:$0xff] }
0x2f0a   :  { %14574 = vpow2.f32 %v10410_v57  ;;  %v11768_v57 = vld [vmem:[#allocation43] ss:$0 sm:$0xff] }
0x2f0f   :  { %v14571_v20 = vpop.eup %14570 }
0x2f10   :  { %v10412_v46 = vadd.f32 1.0, %v14571_v20 }
0x2f12   :  { %14576 = vrcp.f32 %v10412_v46  ;;  %v11769_v46 = vld [vmem:[#allocation44] ss:$0 sm:$0xff] }
0x2f13   :  { %v14573_v23 = vpop.eup %14572 }
0x2f14   :  { %v10413_v8 = vadd.f32 1.0, %v14573_v23 }
0x2f16   :  { %14578 = vrcp.f32 %v10413_v8 }
0x2f17   :  { %v14575_v11 = vpop.eup %14574 }
0x2f18   :  { %v10414_v43 = vadd.f32 1.0, %v14575_v11 }
0x2f1a   :  { %14580 = vrcp.f32 %v10414_v43 }
0x2f1f   :  { %v14577_v51 = vpop.eup %14576 }
0x2f20   :  { %v10421_v21 = vmul.f32 %v14577_v51, %v10400_v31 }
0x2f22   :  { %13720 = vmatmul.mubr.msk.f32.vlgmr.msra.gmra.mxu0 %vm1084_vm4, %v10421_v21 }
0x2f23   :  { %v14579_v26 = vpop.eup %14578  ;;  %13746 = vmatpush3.msra.mxu0 %v16402_v44  ;;  %13722 = vmatprep.mubr.msk.f32.mxu0 %vm15429_vm0, %v15428_v0 }
0x2f24   :  { %v10422_v54 = vmul.f32 %v14579_v26, %v10401_v3  ;;  %13747 = vmatprep.subr.mxu0 %v15428_v0  ;;  %v10899_v3 = vld [vmem:[#allocation46] sm:$0xff] }
0x2f25   :  { %13748 = vmatpush3.msra.mxu0 %v16396_v15  ;;  %v10532_v15 = vld [vmem:[%s17606_s8] sm:$0xff] }
0x2f26   :  { %13749 = vmatprep.subr.mxu0 %v15428_v0  ;;  %13723 = vmatmul.mubr.msk.f32.gmra.mxu0 %vm1084_vm4, %v10422_v54 }
0x2f27   :  { %v14581_v36 = vpop.eup %14580  ;;  %13750 = vmatpush3.msra.mxu0 %v16390_v35  ;;  %13725 = vmatprep.mubr.msk.f32.mxu0 %vm15429_vm0, %v15428_v0 }
0x2f28   :  { %v10423_v44 = vmul.f32 %v14581_v36, %v10402_v53  ;;  %13763 = vmatprep.subr.mxu0 %v15428_v0  ;;  %13735 = vmatpush3.msra.mxu1 %v10532_v15  ;;  %v11138_v53 = vld [vmem:[%s15665_s13 + $0x20] sm:$0xff] }
0x2f29   :  { %13754 = vmatprep.subr.mxu1 %v15428_v0  ;;  %v11134_v15 = vld [vmem:[%s15665_s13] sm:$0xff] }
0x2f2a   :  { %13726 = vmatmul.mubr.msk.f32.gmra.mxu0 %vm1084_vm4, %v10423_v44  ;;  %v11136_v44 = vld [vmem:[%s15665_s13 + $0x10] sm:$0xff]  ;;  %s15292_s13 = scalar_lea.vmem %s11237_s20, 32 }
0x2f2b   :  { %13751 = vmatprep.mubr.msk.f32.mxu0 %vm15429_vm0, %v15428_v0  ;;  %p15293_p1 = scmp.ne.s32.totalorder %s11237_s20, %s15292_s13  ;;  %p15298_p3 = scmp.lt.s32.totalorder %s15292_s13, %s15292_s13 }
0x2f2d   :  { %p15299_p4 = por %p15298_p3, %p15297_p2 }
0x2f2f   :  { %p15300_p5 = pnand %p15299_p4, %p15293_p1 }
0x2fe2   :  { %v10504_v35 = vpop.f32.mrf.mxu0 }
0x2fe3   :  { %v10518_v2 = vadd.f32 %v10504_v35, %v17300_v4 }
0x2fe4   :  { %v13721_v29 = vpop.f32.mrf.mxu0 }
0x2fe5   :  { %v10529_v40 = vadd.f32 %v11756_v22, %v10518_v2 }
0x2fe6   :  { %v10509_v10 = vpop.f32.mrf.mxu0 }
0x2fe7   :  { %v10519_v30 = vadd.f32 %v10509_v10, %v17294_v5  ;;  %13737 = vmatmul.mubr.msk.f32.vlgmr.msra.gmra.mxu1 %vm1084_vm4, %v10529_v40  ;;  %v11775_v10 = vld [vmem:[#allocation49] ss:$0 sm:$0xff] }
0x2fe8   :  { %13755 = vmatpush3.msra.mxu1 %v17011_v9  ;;  %v13724_v37 = vpop.f32.mrf.mxu0  ;;  %13739 = vmatprep.mubr.msk.f32.mxu1 %vm15429_vm0, %v15428_v0 }
0x2fe9   :  { %v10530_v61 = vadd.f32 %v11756_v22, %v10519_v30  ;;  %13756 = vmatprep.subr.mxu1 %v15428_v0 }
0x2fea   :  { %13757 = vmatpush3.msra.mxu1 %v17005_v24  ;;  %v10514_v4 = vpop.f32.mrf.mxu0  ;;  %v10632_v24 = vld [vmem:[%s17607_s9] sm:$0x3] }
0x2feb   :  { %v10520_v42 = vadd.f32 %v10514_v4, %v17292_v25  ;;  %13758 = vmatprep.subr.mxu1 %v15428_v0  ;;  %13740 = vmatmul.mubr.msk.f32.gmra.mxu1 %vm1084_vm4, %v10530_v61 }
0x2fec   :  { %13759 = vmatpush3.msra.mxu1 %v16999_v49  ;;  %v13727_v9 = vpop.f32.mrf.mxu0  ;;  %13742 = vmatprep.mubr.msk.f32.mxu1 %vm15429_vm0, %v15428_v0 }
0x2fed   :  { %v10531_v5 = vadd.f32 %v11756_v22, %v10520_v42  ;;  %13772 = vmatprep.subr.mxu1 %v15428_v0  ;;  %13752 = vmatmul.mubr.msk.f32.vlgmr.msra.gmra.mxu0 %vm711_vm2, %v10632_v24  ;;  %v11774_v22 = vld [vmem:[#allocation47] ss:$0 sm:$0xff] }
0x2fee   :  { %13769 = vmatprep.mubr.msk.f32.mxu0 %vm15429_vm0, %v15428_v0 }
0x2fef   :  { %13743 = vmatmul.mubr.msk.f32.gmra.mxu1 %vm1084_vm4, %v10531_v5 }
0x2ff0   :  { %13760 = vmatprep.mubr.msk.f32.mxu1 %vm15429_vm0, %v15428_v0 }
0x2ff3   :  { %13761 = vmatmul.mubr.msk.f32.vlgmr.msra.gmra.mxu1 %vm711_vm2, %v10632_v24 }
0x2ff4   :  { %13774 = vmatprep.mubr.msk.f32.mxu1 %vm15429_vm0, %v15428_v0  ;;  %13773 = vmatpush3.msra.mxu1 %v10899_v3 }
0x2ff5   :  { %13784 = vmatprep.subr.mxu1 %v15428_v0 }
0x30a7   :  { %v10618_v49 = vpop.f32.mrf.mxu1 }
0x30a8   :  { %v10619_v33 = vadd.f32 %v11757_v12, %v10618_v49 }
0x30a9   :  { %v13738_v25 = vpop.f32.mrf.mxu1 }
0x30ab   :  { %v10623_v34 = vpop.f32.mrf.mxu1 }
0x30ac   :  { %v10624_v38 = vadd.f32 %v11757_v12, %v10623_v34 }
0x30ad   :  { %v13741_v48 = vpop.f32.mrf.mxu1  ;;  %v10702_v47 = vpop.f32.mrf.mxu0 }
0x30ae   :  { %v10713_v55 = vmul.f32 %v11762_v62, %v10702_v47 }
0x30af   :  { %v10628_v16 = vpop.f32.mrf.mxu1  ;;  %v13753_v7 = vpop.f32.mrf.mxu0 }
0x30b0   :  { %v10629_v56 = vadd.f32 %v11757_v12, %v10628_v16  ;;  %v10721_v31 = vadd.f32 %v11763_v32, %v10713_v55 }
0x30b1   :  { %v13744_v52 = vpop.f32.mrf.mxu1 }
0x30b2   :  { %13764 = vmatpush3.msra.mxu0 %v10629_v56  ;;  %v10722_v60 = vmax.f32 %v10721_v31, 0.0 }
0x30b3   :  { %13765 = vmatprep.subr.mxu0 %v15428_v0  ;;  %v10789_v59 = vpop.f32.mrf.mxu1 }
0x30b4   :  { %13766 = vmatpush3.msra.mxu0 %v10624_v38  ;;  %v10800_v19 = vmul.f32 %v11765_v1, %v10789_v59 }
0x30b5   :  { %13767 = vmatprep.subr.mxu0 %v15428_v0  ;;  %v13762_v18 = vpop.f32.mrf.mxu1 }
0x30b6   :  { %13768 = vmatpush3.msra.mxu0 %v10619_v33  ;;  %v10808_v13 = vadd.f32 %v11766_v41, %v10800_v19 }
0x30b7   :  { %13770 = vmatmul.mubr.msk.f32.vlgmr.msra.gmra.mxu0 %vm711_vm2, %v10632_v24  ;;  %13777 = vmatprep.subr.mxu0 %v15428_v0 }
0x30b8   :  { %13781 = vmatprep.mubr.msk.f32.mxu0 %vm15429_vm0, %v15428_v0  ;;  %13778 = vmatpush3.msra.mxu0 %v10898_v45  ;;  %v10809_v39 = vmax.f32 %v10808_v13, 0.0 }
0x30b9   :  { %13779 = vmatprep.subr.mxu0 %v15428_v0 }
0x30ba   :  { %13780 = vmatpush3.msra.mxu0 %v10897_v50  ;;  %13775 = vmatmul.mubr.msk.f32.vlgmr.msra.gmra.mxu1 %vm7517_vm6, %v10809_v39 }
0x30bb   :  { %13782 = vmatmul.mubr.msk.f32.vlgmr.msra.gmra.mxu0 %vm621_vm1, %v10722_v60  ;;  %13786 = vmatprep.mubr.msk.f32.mxu1 %vm15429_vm0, %v15428_v0 }
0x30bc   :  { %13789 = vmatprep.subr.mxu0 %v15428_v0  ;;  %13807 = vmatprep.mubr.msk.f32.mxu0 %vm15429_vm0, %v15428_v0 }
0x30bd   :  { %13785 = vmatpush3.msk.msra.mxu1 %vm11051_vm7, %v11046_v63  ;;  %13790 = vmatpush3.msk.msra.mxu0 %vm11154_vm8, %v11142_v27 }
0x30be   :  { %13791 = vmatprep.subr.mxu0 %v15428_v0 }
0x30bf   :  { %13792 = vmatpush3.msra.mxu0 %v11141_v14 }
0x30c0   :  { %13793 = vmatprep.subr.mxu0 %v15428_v0 }
0x30c1   :  { %13794 = vmatpush3.msra.mxu0 %v11140_v17 }
0x30c2   :  { %13795 = vmatprep.subr.mxu0 %v15428_v0 }
0x30c3   :  { %13796 = vmatpush3.msra.mxu0 %v11139_v58 }
0x30c4   :  { %13797 = vmatprep.subr.mxu0 %v15428_v0 }
0x30c5   :  { %13798 = vmatpush3.msra.mxu0 %v11138_v53 }
0x30c6   :  { %13799 = vmatprep.subr.mxu0 %v15428_v0 }
0x30c7   :  { %13800 = vmatpush3.msra.mxu0 %v11137_v28 }
0x30c8   :  { %13801 = vmatprep.subr.mxu0 %v15428_v0 }
0x30c9   :  { %13802 = vmatpush3.msra.mxu0 %v11136_v44 }
0x30ca   :  { %13803 = vmatprep.subr.mxu0 %v15428_v0 }
0x30cb   :  { %13804 = vmatpush3.msra.mxu0 %v11135_v6 }
0x30cc   :  { %13805 = vmatprep.subr.mxu0 %v15428_v0 }
0x30cd   :  { %13806 = vmatpush3.msra.mxu0 %v11134_v15 }
0x3177   :  { %v10876_v20 = vpop.f32.mrf.mxu0 }
0x3178   :  { %v10887_v23 = vmul.f32 %v11768_v57, %v10876_v20 }
0x3179   :  { %v13771_v8 = vpop.f32.mrf.mxu0 }
0x317a   :  { %v10895_v11 = vadd.f32 %v11769_v46, %v10887_v23  ;;  %v10969_v21 = vpop.f32.mrf.mxu1 }
0x317b   :  { %v11042_v51 = vpop.f32.mrf.mxu0 }
0x317c   :  { %v10896_v43 = vmax.f32 %v10895_v11, 0.0  ;;  %v11043_v26 = vadd.f32 %v11042_v51, %v10969_v21  ;;  %v13776_v36 = vpop.f32.mrf.mxu1 }
0x317d   :  { %v13783_v54 = vpop.f32.mrf.mxu0 }
0x317e   :  { %13787 = vmatmul.mubr.msk.f32.vlgmr.msra.gmra.mxu1 %vm11047_vm9, %v10896_v43 }
0x323e   :  { %v11121_v35 = vpop.f32.mrf.mxu1 }
0x323f   :  { %v11125_v2 = vadd.f32 %v11121_v35, %v11043_v26 }
0x3240   :  { %v13788_v29 = vpop.f32.mrf.mxu1 }
0x3241   :  { %v11133_v40 = vadd.f32 %v11774_v22, %v11125_v2 }
0x3243   :  { %13808 = vmatmul.mubr.msk.f32.vlgmr.msra.gmra.mxu0 %vm11150_vm10, %v11133_v40 }
0x3303   :  { %v11224_v30 = vpop.f32.mrf.mxu0 }
0x3304   :  { %v11225_v37 = vadd.f32 %v11775_v10, %v11224_v30 }
0x3305   :  { %v13809_v61 = vpop.f32.mrf.mxu0 }
0x3306   :  { %11229 = vst.msk [vmem:[#allocation50] sm:$0x3] %vm11228_vm11, %v11225_v37 }
0x3307   :  { %15303 = shalt.err (!%p15300_p5)
}
0x3308   :  { %11239 = dma.vmem_to_hbm [thread:$0]  %s11237_s20, 32, %s15675_s29, [#allocation4]  }
0x3309   :  { %15344 = dma.done.wait [#allocation4], 32  }
0x330a   :  { %15345 = vsyncadd [#allocation4], 4294967264 }
0x330b   :  { %11243 = vsyncpa [#allocation3], 1 }
0x330c   :  { %11244 = vsyncpa [#allocation6], 1 }
0x330d   :  { %11245 = vsyncpa [#allocation9], 1 }
0x330e   :  { %11246 = vsyncpa [#allocation12], 1 }
0x330f   :  { %11247 = vsyncpa [#allocation15], 1 }
0x3310   :  { %11248 = vsyncpa [#allocation18], 1 }
0x3311   :  { %11249 = vsyncpa [#allocation21], 1 }
0x3312   :  { %11250 = vsyncpa [#allocation24], 1 }
0x3313   :  { %11251 = vsyncpa [#allocation27], 1 }
0x3314   :  { %11252 = vsyncpa [#allocation30], 1 }
0x3315   :  { %11253 = vsyncpa [#allocation33], 1 }
0x3316   :  { %11254 = vsyncpa [#allocation36], 1 }
0x3317   :  { %11255 = vsyncpa [#allocation39], 1 }
0x3318   :  { %11256 = vsyncpa [#allocation42], 1 }
0x3319   :  { %11257 = vsyncpa [#allocation45], 1 }
0x331a   :  { %11258 = vsyncpa [#allocation48], 1 }
0x331b   :  { %11259 = vsyncpa [#allocation4], 1 }

</bundles_post_ra>
